<compile_context>
chip_gen: v5e
topology: v5e:2x2
jax: 0.10.0
libtpu: 0.0.40
codegen_flags: <defaults>
</compile_context>

<pallas_src>
import numpy as np
import jax
import jax.numpy as jnp
from jax import lax
from jax.experimental import pallas as pl
from jax.experimental.pallas import tpu as pltpu

# --- model dimensions (from the PyTorch module) ---
C_IN = 3
SEQ_LEN = 500
KSIZE = 7
C_MID = 6
L1 = SEQ_LEN - KSIZE + 1          # 494
L2 = L1 - KSIZE + 1               # 488
H2_FLAT = C_MID * L2              # 2928  (== fc1 in_features)
FC1 = 16
FC2 = 64
OUT_DIM = 1

SCALE_M = 1.547
SCALE_S = 156.82
SCALE_EPS = 1e-07

# padded, position-major (t*C + c) feature widths -> all 128-lane aligned
TILE_N = 128
IN_PAD = 1536                      # 500*3 = 1500 -> 12 lane tiles
H1_PAD = 3072                      # 494*6 = 2964 -> 24 lane tiles
H2_PAD = 3072                      # 488*6 = 2928 -> 24 lane tiles

MAX_TM = 256                       # batch-tile rows; ~15 MiB peak VMEM -> fits v5e/v6e/v7x


# ----------------------------- static band plans -------------------------------

def _band_plan(l_out, c_out, c_in, k, n_cols_pad, n_rows_pad):
    """Per 128-wide output column tile (position-major col = l*c_out + co) return
    (k_lo, n_kt): the contiguous range of 128-row input K-tiles (position-major
    row = t*c_in + ci) that overlap the conv band.  n_kt == 0 -> tile is all padding."""
    plan = []
    n_real_cols = l_out * c_out
    for j in range(n_cols_pad // TILE_N):
        c0 = j * TILE_N
        if c0 >= n_real_cols:
            plan.append((0, 0))
            continue
        l_min = c0 // c_out
        l_max = min((c0 + TILE_N - 1) // c_out, l_out - 1)
        r_min = l_min * c_in
        r_max = (l_max + k - 1) * c_in + (c_in - 1)
        k_lo = r_min // TILE_N
        k_hi = min(r_max // TILE_N, n_rows_pad // TILE_N - 1)
        plan.append((k_lo, k_hi - k_lo + 1))
    return tuple(plan)


CONV1_PLAN = _band_plan(L1, C_MID, C_IN, KSIZE, H1_PAD, IN_PAD)    # n_kt in {1, 2}
CONV2_PLAN = _band_plan(L2, C_MID, C_MID, KSIZE, H2_PAD, H1_PAD)   # n_kt in {0, 2, 3}


# ----------------------------------- kernel ------------------------------------

def cann_kernel(x_ref, w1_ref, b1_ref, w2_ref, b2_ref,
                wf1_ref, bf1_ref, wf2_ref, bf2_ref, wf3_ref, bf3_ref,
                o_ref, h1_ref, h2_ref):
    tm = x_ref.shape[0]
    # x tile; cast to bf16 in-kernel (HBM traffic stays one f32 read of x).
    x = x_ref[...].astype(jnp.bfloat16)                                   # (tm, 1536)

    # conv1 (+ input scale() folded into weights/bias): static band-tile skipping.
    for j, (k_lo, n_kt) in enumerate(CONV1_PLAN):
        c0 = j * TILE_N
        if n_kt == 0:
            h1_ref[:, c0:c0 + TILE_N] = jnp.zeros((tm, TILE_N), jnp.bfloat16)
            continue
        acc = jnp.dot(x[:, k_lo * TILE_N:(k_lo + n_kt) * TILE_N],
                      w1_ref[0:n_kt * TILE_N, c0:c0 + TILE_N],
                      preferred_element_type=jnp.float32)
        acc = acc + b1_ref[:, c0:c0 + TILE_N]
        h1_ref[:, c0:c0 + TILE_N] = jnp.maximum(acc, 0.0).astype(jnp.bfloat16)

    # conv2: same band-tile skipping, reading conv1's VMEM scratch output.
    for j, (k_lo, n_kt) in enumerate(CONV2_PLAN):
        c0 = j * TILE_N
        if n_kt == 0:
            h2_ref[:, c0:c0 + TILE_N] = jnp.zeros((tm, TILE_N), jnp.bfloat16)
            continue
        acc = jnp.dot(h1_ref[:, k_lo * TILE_N:(k_lo + n_kt) * TILE_N],
                      w2_ref[0:n_kt * TILE_N, c0:c0 + TILE_N],
                      preferred_element_type=jnp.float32)
        acc = acc + b2_ref[:, c0:c0 + TILE_N]
        h2_ref[:, c0:c0 + TILE_N] = jnp.maximum(acc, 0.0).astype(jnp.bfloat16)

    # fc1 + ReLU (wf1 rows permuted host-side to the position-major h2 layout)
    h = jnp.dot(h2_ref[...], wf1_ref[...], preferred_element_type=jnp.float32) + bf1_ref[...]
    h = jnp.maximum(h, 0.0).astype(jnp.bfloat16)                          # (tm, 16)

    # fc2 + ReLU (keep f32 for the VPU tail)
    h = jnp.dot(h, wf2_ref[...], preferred_element_type=jnp.float32) + bf2_ref[...]
    h = jnp.maximum(h, 0.0)                                               # (tm, 64)

    # fc3 (N=1): VPU multiply + lane reduction instead of a lane-sparse MXU matmul.
    o_ref[...] = jnp.sum(h * wf3_ref[...], axis=-1, keepdims=True) + bf3_ref[...]


# ----------------------------------- wrapper ------------------------------------

def _pick_tm(batch):
    """Batch-tile rows: big tiles for throughput, but for small batches keep >=2
    grid steps so the 'parallel' axis feeds both v7x TensorCores."""
    if batch >= 2 * MAX_TM:
        return MAX_TM
    half = (batch + 1) // 2
    return max(8, min(MAX_TM, ((half + 7) // 8) * 8))


def cann_forward(x, params):
    """x: (B, 3, 500) float32. params from prepare_params(). Returns (B, 1) float32."""
    B = x.shape[0]
    # position-major (channel-interleaved) flatten: col = t*3 + ci; pad to 1536 lanes.
    x_pm = jnp.transpose(x, (0, 2, 1)).reshape(B, C_IN * SEQ_LEN)

    tm = _pick_tm(B)
    bp = ((B + tm - 1) // tm) * tm
    x_pm = jnp.pad(x_pm, ((0, bp - B), (0, IN_PAD - C_IN * SEQ_LEN)))

    vmem = pltpu.MemorySpace.VMEM
    weight_spec = pl.BlockSpec(memory_space=vmem)   # whole array, resident, single copy

    out = pl.pallas_call(
        cann_kernel,
        out_shape=jax.ShapeDtypeStruct((bp, OUT_DIM), jnp.float32),
        grid_spec=pltpu.PrefetchScalarGridSpec(
            num_scalar_prefetch=0,
            grid=(bp // tm,),
            in_specs=[pl.BlockSpec((tm, IN_PAD), lambda i: (i, 0))] + [weight_spec] * 10,
            out_specs=pl.BlockSpec((tm, OUT_DIM), lambda i: (i, 0)),
            scratch_shapes=[pltpu.VMEM((tm, H1_PAD), jnp.bfloat16),   # conv1 output
                            pltpu.VMEM((tm, H2_PAD), jnp.bfloat16)],  # conv2 output
        ),
        compiler_params=pltpu.CompilerParams(
            dimension_semantics=("parallel",),       # shard batch tiles across TCs (v7x)
            vmem_limit_bytes=48 * 1024 * 1024,       # ~4 MiB weights + tiles + temps
        ),
    )(x_pm, *params)
    return out[:B]


# ----------------------------- parameter handling -----------------------------

def _uniform(key, shape, bound):
    return jax.random.uniform(key, shape, jnp.float32, -bound, bound)


def init_params(key):
    """Raw params in PyTorch layout (Conv1d: (C_out, C_in, K); Linear: (out, in));
    default torch init U(-1/sqrt(fan_in), 1/sqrt(fan_in)). conv3 is unused -> omitted."""
    ks = jax.random.split(key, 10)
    bc1 = 1.0 / np.sqrt(C_IN * KSIZE)
    bc2 = 1.0 / np.sqrt(C_MID * KSIZE)
    bl1 = 1.0 / np.sqrt(H2_FLAT)
    bl2 = 1.0 / np.sqrt(FC1)
    bl3 = 1.0 / np.sqrt(FC2)
    return (
        _uniform(ks[0], (C_MID, C_IN, KSIZE), bc1), _uniform(ks[1], (C_MID,), bc1),
        _uniform(ks[2], (C_MID, C_MID, KSIZE), bc2), _uniform(ks[3], (C_MID,), bc2),
        _uniform(ks[4], (FC1, H2_FLAT), bl1), _uniform(ks[5], (FC1,), bl1),
        _uniform(ks[6], (FC2, FC1), bl2), _uniform(ks[7], (FC2,), bl2),
        _uniform(ks[8], (OUT_DIM, FC2), bl3), _uniform(ks[9], (OUT_DIM,), bl3),
    )


def conv_band_compact(w, b, l_in, plan):
    """Valid 1-D conv -> compacted banded matrix in position-major layout.
    Output column c = l*C_out + co; for column tile j only the K rows
    [k_lo*128, (k_lo+n_kt)*128) are stored (at row offset r - k_lo*128)."""
    c_out, c_in, k = w.shape
    l_out = l_in - k + 1
    n_cols = len(plan) * TILE_N
    max_kt = max(n for _, n in plan)
    wc = np.zeros((max_kt * TILE_N, n_cols), np.float32)
    bc = np.zeros((n_cols,), np.float32)
    w_np = np.asarray(w, np.float32)
    b_np = np.asarray(b, np.float32)
    for j, (k_lo, n_kt) in enumerate(plan):
        if n_kt == 0:
            continue
        r_base = k_lo * TILE_N
        for c in range(j * TILE_N, (j + 1) * TILE_N):
            l, co = divmod(c, c_out)
            if l >= l_out:
                continue                      # zero-padded output column
            bc[c] = b_np[co]
            for kk in range(k):
                row = (l + kk) * c_in - r_base
                for ci in range(c_in):
                    wc[row + ci, c] = w_np[co, ci, kk]
    return wc, bc


def prepare_params(raw):
    """Fold scale() into conv1, build compacted position-major bands, permute fc1
    rows to the position-major layout, cast matmul operands to bf16 (biases f32)."""
    (w1, b1, w2, b2, wf1, bf1, wf2, bf2, wf3, bf3) = raw
    inv_s = np.float32(1.0 / (SCALE_S + SCALE_EPS))

    w1_np = np.asarray(w1, np.float32)
    b1_np = np.asarray(b1, np.float32)
    w1_fold = w1_np * inv_s
    b1_fold = b1_np - np.float32(SCALE_M) * inv_s * w1_np.sum(axis=(1, 2))

    w1c, b1c = conv_band_compact(w1_fold, b1_fold, SEQ_LEN, CONV1_PLAN)   # (256, 3072)
    w2c, b2c = conv_band_compact(np.asarray(w2, np.float32),
                                 np.asarray(b2, np.float32), L1, CONV2_PLAN)  # (384, 3072)

    # fc1: torch flattening order is channel-major co*488 + l; our h2 is l*6 + co.
    wf1_np = np.asarray(wf1, np.float32).reshape(FC1, C_MID, L2)          # (out, co, l)
    wf1_pm = np.zeros((H2_PAD, FC1), np.float32)
    wf1_pm[:C_MID * L2] = np.transpose(wf1_np, (2, 1, 0)).reshape(C_MID * L2, FC1)

    return (
        jnp.asarray(w1c).astype(jnp.bfloat16), jnp.asarray(b1c).reshape(1, -1),
        jnp.asarray(w2c).astype(jnp.bfloat16), jnp.asarray(b2c).reshape(1, -1),
        jnp.asarray(wf1_pm).astype(jnp.bfloat16), jnp.asarray(bf1).reshape(1, -1),
        jnp.asarray(wf2).T.astype(jnp.bfloat16), jnp.asarray(bf2).reshape(1, -1),
        jnp.asarray(wf3).reshape(1, FC2).astype(jnp.float32),   # fc3 row, f32 VPU tail
        jnp.asarray(bf3).reshape(1, 1).astype(jnp.float32),
    )


# --------------------------------- reference ----------------------------------

def cann_reference(x, raw):
    """Pure-JAX f32 reference (independent formulation: real convs, no folding)."""
    w1, b1, w2, b2, wf1, bf1, wf2, bf2, wf3, bf3 = raw
    dn = ("NCH", "OIH", "NCH")
    xs = (x - SCALE_M) / (SCALE_S + SCALE_EPS)
    h = lax.conv_general_dilated(xs, w1, window_strides=(1,), padding="VALID",
                                 dimension_numbers=dn) + b1[None, :, None]
    h = jnp.maximum(h, 0.0)
    h = lax.conv_general_dilated(h, w2, window_strides=(1,), padding="VALID",
                                 dimension_numbers=dn) + b2[None, :, None]
    h = jnp.maximum(h, 0.0)
    h = h.reshape(h.shape[0], -1)                 # (B, 2928) channel-major, like torch
    h = jnp.maximum(h @ wf1.T + bf1, 0.0)
    h = jnp.maximum(h @ wf2.T + bf2, 0.0)
    return h @ wf3.T + bf3


if __name__ == "__main__":
    key = jax.random.PRNGKey(0)
    kx, kp = jax.random.split(key)

    B = 2
    x = jax.random.normal(kx, (B, C_IN, SEQ_LEN), jnp.float32) * 50.0 + 1.5

    raw = init_params(kp)
    params = prepare_params(raw)

    out = cann_forward(x, params)
    out = jax.block_until_ready(out)

    ref = cann_reference(x, raw)
    assert out.shape == (B, OUT_DIM), out.shape
    # bf16 MXU operands with f32 accumulation: expected |err| ~1e-3; 3e-2 is a safe bound.
    assert jnp.allclose(out, ref, atol=3e-2, rtol=3e-2), (out, ref)

    print("KERNEL_OK")
</pallas_src>

<mosaic_0001>
module attributes {stable_mosaic.version = 11 : i64} {
  func.func @cann_kernel(%arg0: i32, %arg1: memref<8x1536xf32, #tpu.memory_space<vmem>>, %arg2: memref<256x3072xbf16, #tpu.memory_space<vmem>>, %arg3: memref<1x3072xf32, #tpu.memory_space<vmem>>, %arg4: memref<384x3072xbf16, #tpu.memory_space<vmem>>, %arg5: memref<1x3072xf32, #tpu.memory_space<vmem>>, %arg6: memref<3072x16xbf16, #tpu.memory_space<vmem>>, %arg7: memref<1x16xf32, #tpu.memory_space<vmem>>, %arg8: memref<16x64xbf16, #tpu.memory_space<vmem>>, %arg9: memref<1x64xf32, #tpu.memory_space<vmem>>, %arg10: memref<1x64xf32, #tpu.memory_space<vmem>>, %arg11: memref<1x1xf32, #tpu.memory_space<vmem>>, %arg12: memref<8x1xf32, #tpu.memory_space<vmem>>, %arg13: memref<8x3072xbf16, #tpu.memory_space<vmem>>, %arg14: memref<8x3072xbf16, #tpu.memory_space<vmem>>) attributes {dimension_semantics = [#tpu.dimension_semantics<parallel>], iteration_bounds = array<i64: 1>, scalar_prefetch = 0 : i64, scratch_operands = 2 : i64, tpu.core_type = #tpu.core_type<tc>, window_params = [{transform_indices = @transform_0, window_bounds = array<i64: 8, 1536>}, {pipeline_mode = #tpu.pipeline_mode<synchronous>, transform_indices = @transform_1, window_bounds = array<i64: 256, 3072>}, {pipeline_mode = #tpu.pipeline_mode<synchronous>, transform_indices = @transform_2, window_bounds = array<i64: 1, 3072>}, {pipeline_mode = #tpu.pipeline_mode<synchronous>, transform_indices = @transform_3, window_bounds = array<i64: 384, 3072>}, {pipeline_mode = #tpu.pipeline_mode<synchronous>, transform_indices = @transform_4, window_bounds = array<i64: 1, 3072>}, {pipeline_mode = #tpu.pipeline_mode<synchronous>, transform_indices = @transform_5, window_bounds = array<i64: 3072, 16>}, {pipeline_mode = #tpu.pipeline_mode<synchronous>, transform_indices = @transform_6, window_bounds = array<i64: 1, 16>}, {pipeline_mode = #tpu.pipeline_mode<synchronous>, transform_indices = @transform_7, window_bounds = array<i64: 16, 64>}, {pipeline_mode = #tpu.pipeline_mode<synchronous>, transform_indices = @transform_8, window_bounds = array<i64: 1, 64>}, {pipeline_mode = #tpu.pipeline_mode<synchronous>, transform_indices = @transform_9, window_bounds = array<i64: 1, 64>}, {pipeline_mode = #tpu.pipeline_mode<synchronous>, transform_indices = @transform_10, window_bounds = array<i64: 1, 1>}, {transform_indices = @transform_11, window_bounds = array<i64: 8, 1>}]} {
    %c0 = arith.constant 0 : index
    %c0_0 = arith.constant 0 : index
    %0 = vector.load %arg1[%c0, %c0_0] : memref<8x1536xf32, #tpu.memory_space<vmem>>, vector<8x1536xf32>
    %1 = arith.truncf %0 : vector<8x1536xf32> to vector<8x1536xbf16>
    %2 = vector.extract_strided_slice %1 {offsets = [0, 0], sizes = [8, 128], strides = [1, 1]} : vector<8x1536xbf16> to vector<8x128xbf16>
    %c0_1 = arith.constant 0 : index
    %c0_2 = arith.constant 0 : index
    %3 = vector.load %arg2[%c0_1, %c0_2] : memref<256x3072xbf16, #tpu.memory_space<vmem>>, vector<128x128xbf16>
    %cst = arith.constant dense<0.000000e+00> : vector<8x128xf32>
    %4 = tpu.matmul %2, %3, %cst {dimension_numbers = #tpu.dot_dimension_numbers<[1], [0], [0], [1], [0, 0, 1, 1], [], []>} : vector<8x128xbf16>, vector<128x128xbf16>, vector<8x128xf32> -> vector<8x128xf32>
    %c0_3 = arith.constant 0 : index
    %c0_4 = arith.constant 0 : index
    %5 = vector.load %arg3[%c0_3, %c0_4] : memref<1x3072xf32, #tpu.memory_space<vmem>>, vector<1x128xf32>
    %6 = vector.broadcast %5 : vector<1x128xf32> to vector<8x128xf32>
    %7 = arith.addf %4, %6 : vector<8x128xf32>
    %cst_5 = arith.constant 0.000000e+00 : f32
    %8 = vector.broadcast %cst_5 : f32 to vector<8x128xf32>
    %9 = arith.maximumf %7, %8 : vector<8x128xf32>
    %10 = arith.truncf %9 : vector<8x128xf32> to vector<8x128xbf16>
    %c0_6 = arith.constant 0 : index
    %c0_7 = arith.constant 0 : index
    %11 = vector.load %arg13[%c0_6, %c0_7] : memref<8x3072xbf16, #tpu.memory_space<vmem>>, vector<8x128xbf16>
    tpu.vector_store %arg13[%c0_6, %c0_7], %10 {strides = array<i32>} : memref<8x3072xbf16, #tpu.memory_space<vmem>>, vector<8x128xbf16>,
    %12 = vector.extract_strided_slice %1 {offsets = [0, 0], sizes = [8, 256], strides = [1, 1]} : vector<8x1536xbf16> to vector<8x256xbf16>
    %c0_8 = arith.constant 0 : index
    %c128 = arith.constant 128 : index
    %13 = vector.load %arg2[%c0_8, %c128] : memref<256x3072xbf16, #tpu.memory_space<vmem>>, vector<256x128xbf16>
    %cst_9 = arith.constant dense<0.000000e+00> : vector<8x128xf32>
    %14 = tpu.matmul %12, %13, %cst_9 {dimension_numbers = #tpu.dot_dimension_numbers<[1], [0], [0], [1], [0, 0, 1, 1], [], []>} : vector<8x256xbf16>, vector<256x128xbf16>, vector<8x128xf32> -> vector<8x128xf32>
    %c0_10 = arith.constant 0 : index
    %c128_11 = arith.constant 128 : index
    %15 = vector.load %arg3[%c0_10, %c128_11] : memref<1x3072xf32, #tpu.memory_space<vmem>>, vector<1x128xf32>
    %16 = vector.broadcast %15 : vector<1x128xf32> to vector<8x128xf32>
    %17 = arith.addf %14, %16 : vector<8x128xf32>
    %cst_12 = arith.constant 0.000000e+00 : f32
    %18 = vector.broadcast %cst_12 : f32 to vector<8x128xf32>
    %19 = arith.maximumf %17, %18 : vector<8x128xf32>
    %20 = arith.truncf %19 : vector<8x128xf32> to vector<8x128xbf16>
    %c0_13 = arith.constant 0 : index
    %c128_14 = arith.constant 128 : index
    %21 = vector.load %arg13[%c0_13, %c128_14] : memref<8x3072xbf16, #tpu.memory_space<vmem>>, vector<8x128xbf16>
    tpu.vector_store %arg13[%c0_13, %c128_14], %20 {strides = array<i32>} : memref<8x3072xbf16, #tpu.memory_space<vmem>>, vector<8x128xbf16>,
    %22 = vector.extract_strided_slice %1 {offsets = [0, 0], sizes = [8, 256], strides = [1, 1]} : vector<8x1536xbf16> to vector<8x256xbf16>
    %c0_15 = arith.constant 0 : index
    %c256 = arith.constant 256 : index
    %23 = vector.load %arg2[%c0_15, %c256] : memref<256x3072xbf16, #tpu.memory_space<vmem>>, vector<256x128xbf16>
    %cst_16 = arith.constant dense<0.000000e+00> : vector<8x128xf32>
    %24 = tpu.matmul %22, %23, %cst_16 {dimension_numbers = #tpu.dot_dimension_numbers<[1], [0], [0], [1], [0, 0, 1, 1], [], []>} : vector<8x256xbf16>, vector<256x128xbf16>, vector<8x128xf32> -> vector<8x128xf32>
    %c0_17 = arith.constant 0 : index
    %c256_18 = arith.constant 256 : index
    %25 = vector.load %arg3[%c0_17, %c256_18] : memref<1x3072xf32, #tpu.memory_space<vmem>>, vector<1x128xf32>
    %26 = vector.broadcast %25 : vector<1x128xf32> to vector<8x128xf32>
    %27 = arith.addf %24, %26 : vector<8x128xf32>
    %cst_19 = arith.constant 0.000000e+00 : f32
    %28 = vector.broadcast %cst_19 : f32 to vector<8x128xf32>
    %29 = arith.maximumf %27, %28 : vector<8x128xf32>
    %30 = arith.truncf %29 : vector<8x128xf32> to vector<8x128xbf16>
    %c0_20 = arith.constant 0 : index
    %c256_21 = arith.constant 256 : index
    %31 = vector.load %arg13[%c0_20, %c256_21] : memref<8x3072xbf16, #tpu.memory_space<vmem>>, vector<8x128xbf16>
    tpu.vector_store %arg13[%c0_20, %c256_21], %30 {strides = array<i32>} : memref<8x3072xbf16, #tpu.memory_space<vmem>>, vector<8x128xbf16>,
    %32 = vector.extract_strided_slice %1 {offsets = [0, 128], sizes = [8, 256], strides = [1, 1]} : vector<8x1536xbf16> to vector<8x256xbf16>
    %c0_22 = arith.constant 0 : index
    %c384 = arith.constant 384 : index
    %33 = vector.load %arg2[%c0_22, %c384] : memref<256x3072xbf16, #tpu.memory_space<vmem>>, vector<256x128xbf16>
    %cst_23 = arith.constant dense<0.000000e+00> : vector<8x128xf32>
    %34 = tpu.matmul %32, %33, %cst_23 {dimension_numbers = #tpu.dot_dimension_numbers<[1], [0], [0], [1], [0, 0, 1, 1], [], []>} : vector<8x256xbf16>, vector<256x128xbf16>, vector<8x128xf32> -> vector<8x128xf32>
    %c0_24 = arith.constant 0 : index
    %c384_25 = arith.constant 384 : index
    %35 = vector.load %arg3[%c0_24, %c384_25] : memref<1x3072xf32, #tpu.memory_space<vmem>>, vector<1x128xf32>
    %36 = vector.broadcast %35 : vector<1x128xf32> to vector<8x128xf32>
    %37 = arith.addf %34, %36 : vector<8x128xf32>
    %cst_26 = arith.constant 0.000000e+00 : f32
    %38 = vector.broadcast %cst_26 : f32 to vector<8x128xf32>
    %39 = arith.maximumf %37, %38 : vector<8x128xf32>
    %40 = arith.truncf %39 : vector<8x128xf32> to vector<8x128xbf16>
    %c0_27 = arith.constant 0 : index
    %c384_28 = arith.constant 384 : index
    %41 = vector.load %arg13[%c0_27, %c384_28] : memref<8x3072xbf16, #tpu.memory_space<vmem>>, vector<8x128xbf16>
    tpu.vector_store %arg13[%c0_27, %c384_28], %40 {strides = array<i32>} : memref<8x3072xbf16, #tpu.memory_space<vmem>>, vector<8x128xbf16>,
    %42 = vector.extract_strided_slice %1 {offsets = [0, 128], sizes = [8, 256], strides = [1, 1]} : vector<8x1536xbf16> to vector<8x256xbf16>
    %c0_29 = arith.constant 0 : index
    %c512 = arith.constant 512 : index
    %43 = vector.load %arg2[%c0_29, %c512] : memref<256x3072xbf16, #tpu.memory_space<vmem>>, vector<256x128xbf16>
    %cst_30 = arith.constant dense<0.000000e+00> : vector<8x128xf32>
    %44 = tpu.matmul %42, %43, %cst_30 {dimension_numbers = #tpu.dot_dimension_numbers<[1], [0], [0], [1], [0, 0, 1, 1], [], []>} : vector<8x256xbf16>, vector<256x128xbf16>, vector<8x128xf32> -> vector<8x128xf32>
    %c0_31 = arith.constant 0 : index
    %c512_32 = arith.constant 512 : index
    %45 = vector.load %arg3[%c0_31, %c512_32] : memref<1x3072xf32, #tpu.memory_space<vmem>>, vector<1x128xf32>
    %46 = vector.broadcast %45 : vector<1x128xf32> to vector<8x128xf32>
    %47 = arith.addf %44, %46 : vector<8x128xf32>
    %cst_33 = arith.constant 0.000000e+00 : f32
    %48 = vector.broadcast %cst_33 : f32 to vector<8x128xf32>
    %49 = arith.maximumf %47, %48 : vector<8x128xf32>
    %50 = arith.truncf %49 : vector<8x128xf32> to vector<8x128xbf16>
    %c0_34 = arith.constant 0 : index
    %c512_35 = arith.constant 512 : index
    %51 = vector.load %arg13[%c0_34, %c512_35] : memref<8x3072xbf16, #tpu.memory_space<vmem>>, vector<8x128xbf16>
    tpu.vector_store %arg13[%c0_34, %c512_35], %50 {strides = array<i32>} : memref<8x3072xbf16, #tpu.memory_space<vmem>>, vector<8x128xbf16>,
    %52 = vector.extract_strided_slice %1 {offsets = [0, 256], sizes = [8, 256], strides = [1, 1]} : vector<8x1536xbf16> to vector<8x256xbf16>
    %c0_36 = arith.constant 0 : index
    %c640 = arith.constant 640 : index
    %53 = vector.load %arg2[%c0_36, %c640] : memref<256x3072xbf16, #tpu.memory_space<vmem>>, vector<256x128xbf16>
    %cst_37 = arith.constant dense<0.000000e+00> : vector<8x128xf32>
    %54 = tpu.matmul %52, %53, %cst_37 {dimension_numbers = #tpu.dot_dimension_numbers<[1], [0], [0], [1], [0, 0, 1, 1], [], []>} : vector<8x256xbf16>, vector<256x128xbf16>, vector<8x128xf32> -> vector<8x128xf32>
    %c0_38 = arith.constant 0 : index
    %c640_39 = arith.constant 640 : index
    %55 = vector.load %arg3[%c0_38, %c640_39] : memref<1x3072xf32, #tpu.memory_space<vmem>>, vector<1x128xf32>
    %56 = vector.broadcast %55 : vector<1x128xf32> to vector<8x128xf32>
    %57 = arith.addf %54, %56 : vector<8x128xf32>
    %cst_40 = arith.constant 0.000000e+00 : f32
    %58 = vector.broadcast %cst_40 : f32 to vector<8x128xf32>
    %59 = arith.maximumf %57, %58 : vector<8x128xf32>
    %60 = arith.truncf %59 : vector<8x128xf32> to vector<8x128xbf16>
    %c0_41 = arith.constant 0 : index
    %c640_42 = arith.constant 640 : index
    %61 = vector.load %arg13[%c0_41, %c640_42] : memref<8x3072xbf16, #tpu.memory_space<vmem>>, vector<8x128xbf16>
    tpu.vector_store %arg13[%c0_41, %c640_42], %60 {strides = array<i32>} : memref<8x3072xbf16, #tpu.memory_space<vmem>>, vector<8x128xbf16>,
    %62 = vector.extract_strided_slice %1 {offsets = [0, 384], sizes = [8, 128], strides = [1, 1]} : vector<8x1536xbf16> to vector<8x128xbf16>
    %c0_43 = arith.constant 0 : index
    %c768 = arith.constant 768 : index
    %63 = vector.load %arg2[%c0_43, %c768] : memref<256x3072xbf16, #tpu.memory_space<vmem>>, vector<128x128xbf16>
    %cst_44 = arith.constant dense<0.000000e+00> : vector<8x128xf32>
    %64 = tpu.matmul %62, %63, %cst_44 {dimension_numbers = #tpu.dot_dimension_numbers<[1], [0], [0], [1], [0, 0, 1, 1], [], []>} : vector<8x128xbf16>, vector<128x128xbf16>, vector<8x128xf32> -> vector<8x128xf32>
    %c0_45 = arith.constant 0 : index
    %c768_46 = arith.constant 768 : index
    %65 = vector.load %arg3[%c0_45, %c768_46] : memref<1x3072xf32, #tpu.memory_space<vmem>>, vector<1x128xf32>
    %66 = vector.broadcast %65 : vector<1x128xf32> to vector<8x128xf32>
    %67 = arith.addf %64, %66 : vector<8x128xf32>
    %cst_47 = arith.constant 0.000000e+00 : f32
    %68 = vector.broadcast %cst_47 : f32 to vector<8x128xf32>
    %69 = arith.maximumf %67, %68 : vector<8x128xf32>
    %70 = arith.truncf %69 : vector<8x128xf32> to vector<8x128xbf16>
    %c0_48 = arith.constant 0 : index
    %c768_49 = arith.constant 768 : index
    %71 = vector.load %arg13[%c0_48, %c768_49] : memref<8x3072xbf16, #tpu.memory_space<vmem>>, vector<8x128xbf16>
    tpu.vector_store %arg13[%c0_48, %c768_49], %70 {strides = array<i32>} : memref<8x3072xbf16, #tpu.memory_space<vmem>>, vector<8x128xbf16>,
    %72 = vector.extract_strided_slice %1 {offsets = [0, 384], sizes = [8, 256], strides = [1, 1]} : vector<8x1536xbf16> to vector<8x256xbf16>
    %c0_50 = arith.constant 0 : index
    %c896 = arith.constant 896 : index
    %73 = vector.load %arg2[%c0_50, %c896] : memref<256x3072xbf16, #tpu.memory_space<vmem>>, vector<256x128xbf16>
    %cst_51 = arith.constant dense<0.000000e+00> : vector<8x128xf32>
    %74 = tpu.matmul %72, %73, %cst_51 {dimension_numbers = #tpu.dot_dimension_numbers<[1], [0], [0], [1], [0, 0, 1, 1], [], []>} : vector<8x256xbf16>, vector<256x128xbf16>, vector<8x128xf32> -> vector<8x128xf32>
    %c0_52 = arith.constant 0 : index
    %c896_53 = arith.constant 896 : index
    %75 = vector.load %arg3[%c0_52, %c896_53] : memref<1x3072xf32, #tpu.memory_space<vmem>>, vector<1x128xf32>
    %76 = vector.broadcast %75 : vector<1x128xf32> to vector<8x128xf32>
    %77 = arith.addf %74, %76 : vector<8x128xf32>
    %cst_54 = arith.constant 0.000000e+00 : f32
    %78 = vector.broadcast %cst_54 : f32 to vector<8x128xf32>
    %79 = arith.maximumf %77, %78 : vector<8x128xf32>
    %80 = arith.truncf %79 : vector<8x128xf32> to vector<8x128xbf16>
    %c0_55 = arith.constant 0 : index
    %c896_56 = arith.constant 896 : index
    %81 = vector.load %arg13[%c0_55, %c896_56] : memref<8x3072xbf16, #tpu.memory_space<vmem>>, vector<8x128xbf16>
    tpu.vector_store %arg13[%c0_55, %c896_56], %80 {strides = array<i32>} : memref<8x3072xbf16, #tpu.memory_space<vmem>>, vector<8x128xbf16>,
    %82 = vector.extract_strided_slice %1 {offsets = [0, 384], sizes = [8, 256], strides = [1, 1]} : vector<8x1536xbf16> to vector<8x256xbf16>
    %c0_57 = arith.constant 0 : index
    %c1024 = arith.constant 1024 : index
    %83 = vector.load %arg2[%c0_57, %c1024] : memref<256x3072xbf16, #tpu.memory_space<vmem>>, vector<256x128xbf16>
    %cst_58 = arith.constant dense<0.000000e+00> : vector<8x128xf32>
    %84 = tpu.matmul %82, %83, %cst_58 {dimension_numbers = #tpu.dot_dimension_numbers<[1], [0], [0], [1], [0, 0, 1, 1], [], []>} : vector<8x256xbf16>, vector<256x128xbf16>, vector<8x128xf32> -> vector<8x128xf32>
    %c0_59 = arith.constant 0 : index
    %c1024_60 = arith.constant 1024 : index
    %85 = vector.load %arg3[%c0_59, %c1024_60] : memref<1x3072xf32, #tpu.memory_space<vmem>>, vector<1x128xf32>
    %86 = vector.broadcast %85 : vector<1x128xf32> to vector<8x128xf32>
    %87 = arith.addf %84, %86 : vector<8x128xf32>
    %cst_61 = arith.constant 0.000000e+00 : f32
    %88 = vector.broadcast %cst_61 : f32 to vector<8x128xf32>
    %89 = arith.maximumf %87, %88 : vector<8x128xf32>
    %90 = arith.truncf %89 : vector<8x128xf32> to vector<8x128xbf16>
    %c0_62 = arith.constant 0 : index
    %c1024_63 = arith.constant 1024 : index
    %91 = vector.load %arg13[%c0_62, %c1024_63] : memref<8x3072xbf16, #tpu.memory_space<vmem>>, vector<8x128xbf16>
    tpu.vector_store %arg13[%c0_62, %c1024_63], %90 {strides = array<i32>} : memref<8x3072xbf16, #tpu.memory_space<vmem>>, vector<8x128xbf16>,
    %92 = vector.extract_strided_slice %1 {offsets = [0, 512], sizes = [8, 256], strides = [1, 1]} : vector<8x1536xbf16> to vector<8x256xbf16>
    %c0_64 = arith.constant 0 : index
    %c1152 = arith.constant 1152 : index
    %93 = vector.load %arg2[%c0_64, %c1152] : memref<256x3072xbf16, #tpu.memory_space<vmem>>, vector<256x128xbf16>
    %cst_65 = arith.constant dense<0.000000e+00> : vector<8x128xf32>
    %94 = tpu.matmul %92, %93, %cst_65 {dimension_numbers = #tpu.dot_dimension_numbers<[1], [0], [0], [1], [0, 0, 1, 1], [], []>} : vector<8x256xbf16>, vector<256x128xbf16>, vector<8x128xf32> -> vector<8x128xf32>
    %c0_66 = arith.constant 0 : index
    %c1152_67 = arith.constant 1152 : index
    %95 = vector.load %arg3[%c0_66, %c1152_67] : memref<1x3072xf32, #tpu.memory_space<vmem>>, vector<1x128xf32>
    %96 = vector.broadcast %95 : vector<1x128xf32> to vector<8x128xf32>
    %97 = arith.addf %94, %96 : vector<8x128xf32>
    %cst_68 = arith.constant 0.000000e+00 : f32
    %98 = vector.broadcast %cst_68 : f32 to vector<8x128xf32>
    %99 = arith.maximumf %97, %98 : vector<8x128xf32>
    %100 = arith.truncf %99 : vector<8x128xf32> to vector<8x128xbf16>
    %c0_69 = arith.constant 0 : index
    %c1152_70 = arith.constant 1152 : index
    %101 = vector.load %arg13[%c0_69, %c1152_70] : memref<8x3072xbf16, #tpu.memory_space<vmem>>, vector<8x128xbf16>
    tpu.vector_store %arg13[%c0_69, %c1152_70], %100 {strides = array<i32>} : memref<8x3072xbf16, #tpu.memory_space<vmem>>, vector<8x128xbf16>,
    %102 = vector.extract_strided_slice %1 {offsets = [0, 512], sizes = [8, 256], strides = [1, 1]} : vector<8x1536xbf16> to vector<8x256xbf16>
    %c0_71 = arith.constant 0 : index
    %c1280 = arith.constant 1280 : index
    %103 = vector.load %arg2[%c0_71, %c1280] : memref<256x3072xbf16, #tpu.memory_space<vmem>>, vector<256x128xbf16>
    %cst_72 = arith.constant dense<0.000000e+00> : vector<8x128xf32>
    %104 = tpu.matmul %102, %103, %cst_72 {dimension_numbers = #tpu.dot_dimension_numbers<[1], [0], [0], [1], [0, 0, 1, 1], [], []>} : vector<8x256xbf16>, vector<256x128xbf16>, vector<8x128xf32> -> vector<8x128xf32>
    %c0_73 = arith.constant 0 : index
    %c1280_74 = arith.constant 1280 : index
    %105 = vector.load %arg3[%c0_73, %c1280_74] : memref<1x3072xf32, #tpu.memory_space<vmem>>, vector<1x128xf32>
    %106 = vector.broadcast %105 : vector<1x128xf32> to vector<8x128xf32>
    %107 = arith.addf %104, %106 : vector<8x128xf32>
    %cst_75 = arith.constant 0.000000e+00 : f32
    %108 = vector.broadcast %cst_75 : f32 to vector<8x128xf32>
    %109 = arith.maximumf %107, %108 : vector<8x128xf32>
    %110 = arith.truncf %109 : vector<8x128xf32> to vector<8x128xbf16>
    %c0_76 = arith.constant 0 : index
    %c1280_77 = arith.constant 1280 : index
    %111 = vector.load %arg13[%c0_76, %c1280_77] : memref<8x3072xbf16, #tpu.memory_space<vmem>>, vector<8x128xbf16>
    tpu.vector_store %arg13[%c0_76, %c1280_77], %110 {strides = array<i32>} : memref<8x3072xbf16, #tpu.memory_space<vmem>>, vector<8x128xbf16>,
    %112 = vector.extract_strided_slice %1 {offsets = [0, 640], sizes = [8, 256], strides = [1, 1]} : vector<8x1536xbf16> to vector<8x256xbf16>
    %c0_78 = arith.constant 0 : index
    %c1408 = arith.constant 1408 : index
    %113 = vector.load %arg2[%c0_78, %c1408] : memref<256x3072xbf16, #tpu.memory_space<vmem>>, vector<256x128xbf16>
    %cst_79 = arith.constant dense<0.000000e+00> : vector<8x128xf32>
    %114 = tpu.matmul %112, %113, %cst_79 {dimension_numbers = #tpu.dot_dimension_numbers<[1], [0], [0], [1], [0, 0, 1, 1], [], []>} : vector<8x256xbf16>, vector<256x128xbf16>, vector<8x128xf32> -> vector<8x128xf32>
    %c0_80 = arith.constant 0 : index
    %c1408_81 = arith.constant 1408 : index
    %115 = vector.load %arg3[%c0_80, %c1408_81] : memref<1x3072xf32, #tpu.memory_space<vmem>>, vector<1x128xf32>
    %116 = vector.broadcast %115 : vector<1x128xf32> to vector<8x128xf32>
    %117 = arith.addf %114, %116 : vector<8x128xf32>
    %cst_82 = arith.constant 0.000000e+00 : f32
    %118 = vector.broadcast %cst_82 : f32 to vector<8x128xf32>
    %119 = arith.maximumf %117, %118 : vector<8x128xf32>
    %120 = arith.truncf %119 : vector<8x128xf32> to vector<8x128xbf16>
    %c0_83 = arith.constant 0 : index
    %c1408_84 = arith.constant 1408 : index
    %121 = vector.load %arg13[%c0_83, %c1408_84] : memref<8x3072xbf16, #tpu.memory_space<vmem>>, vector<8x128xbf16>
    tpu.vector_store %arg13[%c0_83, %c1408_84], %120 {strides = array<i32>} : memref<8x3072xbf16, #tpu.memory_space<vmem>>, vector<8x128xbf16>,
    %122 = vector.extract_strided_slice %1 {offsets = [0, 768], sizes = [8, 128], strides = [1, 1]} : vector<8x1536xbf16> to vector<8x128xbf16>
    %c0_85 = arith.constant 0 : index
    %c1536 = arith.constant 1536 : index
    %123 = vector.load %arg2[%c0_85, %c1536] : memref<256x3072xbf16, #tpu.memory_space<vmem>>, vector<128x128xbf16>
    %cst_86 = arith.constant dense<0.000000e+00> : vector<8x128xf32>
    %124 = tpu.matmul %122, %123, %cst_86 {dimension_numbers = #tpu.dot_dimension_numbers<[1], [0], [0], [1], [0, 0, 1, 1], [], []>} : vector<8x128xbf16>, vector<128x128xbf16>, vector<8x128xf32> -> vector<8x128xf32>
    %c0_87 = arith.constant 0 : index
    %c1536_88 = arith.constant 1536 : index
    %125 = vector.load %arg3[%c0_87, %c1536_88] : memref<1x3072xf32, #tpu.memory_space<vmem>>, vector<1x128xf32>
    %126 = vector.broadcast %125 : vector<1x128xf32> to vector<8x128xf32>
    %127 = arith.addf %124, %126 : vector<8x128xf32>
    %cst_89 = arith.constant 0.000000e+00 : f32
    %128 = vector.broadcast %cst_89 : f32 to vector<8x128xf32>
    %129 = arith.maximumf %127, %128 : vector<8x128xf32>
    %130 = arith.truncf %129 : vector<8x128xf32> to vector<8x128xbf16>
    %c0_90 = arith.constant 0 : index
    %c1536_91 = arith.constant 1536 : index
    %131 = vector.load %arg13[%c0_90, %c1536_91] : memref<8x3072xbf16, #tpu.memory_space<vmem>>, vector<8x128xbf16>
    tpu.vector_store %arg13[%c0_90, %c1536_91], %130 {strides = array<i32>} : memref<8x3072xbf16, #tpu.memory_space<vmem>>, vector<8x128xbf16>,
    %132 = vector.extract_strided_slice %1 {offsets = [0, 768], sizes = [8, 256], strides = [1, 1]} : vector<8x1536xbf16> to vector<8x256xbf16>
    %c0_92 = arith.constant 0 : index
    %c1664 = arith.constant 1664 : index
    %133 = vector.load %arg2[%c0_92, %c1664] : memref<256x3072xbf16, #tpu.memory_space<vmem>>, vector<256x128xbf16>
    %cst_93 = arith.constant dense<0.000000e+00> : vector<8x128xf32>
    %134 = tpu.matmul %132, %133, %cst_93 {dimension_numbers = #tpu.dot_dimension_numbers<[1], [0], [0], [1], [0, 0, 1, 1], [], []>} : vector<8x256xbf16>, vector<256x128xbf16>, vector<8x128xf32> -> vector<8x128xf32>
    %c0_94 = arith.constant 0 : index
    %c1664_95 = arith.constant 1664 : index
    %135 = vector.load %arg3[%c0_94, %c1664_95] : memref<1x3072xf32, #tpu.memory_space<vmem>>, vector<1x128xf32>
    %136 = vector.broadcast %135 : vector<1x128xf32> to vector<8x128xf32>
    %137 = arith.addf %134, %136 : vector<8x128xf32>
    %cst_96 = arith.constant 0.000000e+00 : f32
    %138 = vector.broadcast %cst_96 : f32 to vector<8x128xf32>
    %139 = arith.maximumf %137, %138 : vector<8x128xf32>
    %140 = arith.truncf %139 : vector<8x128xf32> to vector<8x128xbf16>
    %c0_97 = arith.constant 0 : index
    %c1664_98 = arith.constant 1664 : index
    %141 = vector.load %arg13[%c0_97, %c1664_98] : memref<8x3072xbf16, #tpu.memory_space<vmem>>, vector<8x128xbf16>
    tpu.vector_store %arg13[%c0_97, %c1664_98], %140 {strides = array<i32>} : memref<8x3072xbf16, #tpu.memory_space<vmem>>, vector<8x128xbf16>,
    %142 = vector.extract_strided_slice %1 {offsets = [0, 768], sizes = [8, 256], strides = [1, 1]} : vector<8x1536xbf16> to vector<8x256xbf16>
    %c0_99 = arith.constant 0 : index
    %c1792 = arith.constant 1792 : index
    %143 = vector.load %arg2[%c0_99, %c1792] : memref<256x3072xbf16, #tpu.memory_space<vmem>>, vector<256x128xbf16>
    %cst_100 = arith.constant dense<0.000000e+00> : vector<8x128xf32>
    %144 = tpu.matmul %142, %143, %cst_100 {dimension_numbers = #tpu.dot_dimension_numbers<[1], [0], [0], [1], [0, 0, 1, 1], [], []>} : vector<8x256xbf16>, vector<256x128xbf16>, vector<8x128xf32> -> vector<8x128xf32>
    %c0_101 = arith.constant 0 : index
    %c1792_102 = arith.constant 1792 : index
    %145 = vector.load %arg3[%c0_101, %c1792_102] : memref<1x3072xf32, #tpu.memory_space<vmem>>, vector<1x128xf32>
    %146 = vector.broadcast %145 : vector<1x128xf32> to vector<8x128xf32>
    %147 = arith.addf %144, %146 : vector<8x128xf32>
    %cst_103 = arith.constant 0.000000e+00 : f32
    %148 = vector.broadcast %cst_103 : f32 to vector<8x128xf32>
    %149 = arith.maximumf %147, %148 : vector<8x128xf32>
    %150 = arith.truncf %149 : vector<8x128xf32> to vector<8x128xbf16>
    %c0_104 = arith.constant 0 : index
    %c1792_105 = arith.constant 1792 : index
    %151 = vector.load %arg13[%c0_104, %c1792_105] : memref<8x3072xbf16, #tpu.memory_space<vmem>>, vector<8x128xbf16>
    tpu.vector_store %arg13[%c0_104, %c1792_105], %150 {strides = array<i32>} : memref<8x3072xbf16, #tpu.memory_space<vmem>>, vector<8x128xbf16>,
    %152 = vector.extract_strided_slice %1 {offsets = [0, 896], sizes = [8, 256], strides = [1, 1]} : vector<8x1536xbf16> to vector<8x256xbf16>
    %c0_106 = arith.constant 0 : index
    %c1920 = arith.constant 1920 : index
    %153 = vector.load %arg2[%c0_106, %c1920] : memref<256x3072xbf16, #tpu.memory_space<vmem>>, vector<256x128xbf16>
    %cst_107 = arith.constant dense<0.000000e+00> : vector<8x128xf32>
    %154 = tpu.matmul %152, %153, %cst_107 {dimension_numbers = #tpu.dot_dimension_numbers<[1], [0], [0], [1], [0, 0, 1, 1], [], []>} : vector<8x256xbf16>, vector<256x128xbf16>, vector<8x128xf32> -> vector<8x128xf32>
    %c0_108 = arith.constant 0 : index
    %c1920_109 = arith.constant 1920 : index
    %155 = vector.load %arg3[%c0_108, %c1920_109] : memref<1x3072xf32, #tpu.memory_space<vmem>>, vector<1x128xf32>
    %156 = vector.broadcast %155 : vector<1x128xf32> to vector<8x128xf32>
    %157 = arith.addf %154, %156 : vector<8x128xf32>
    %cst_110 = arith.constant 0.000000e+00 : f32
    %158 = vector.broadcast %cst_110 : f32 to vector<8x128xf32>
    %159 = arith.maximumf %157, %158 : vector<8x128xf32>
    %160 = arith.truncf %159 : vector<8x128xf32> to vector<8x128xbf16>
    %c0_111 = arith.constant 0 : index
    %c1920_112 = arith.constant 1920 : index
    %161 = vector.load %arg13[%c0_111, %c1920_112] : memref<8x3072xbf16, #tpu.memory_space<vmem>>, vector<8x128xbf16>
    tpu.vector_store %arg13[%c0_111, %c1920_112], %160 {strides = array<i32>} : memref<8x3072xbf16, #tpu.memory_space<vmem>>, vector<8x128xbf16>,
    %162 = vector.extract_strided_slice %1 {offsets = [0, 896], sizes = [8, 256], strides = [1, 1]} : vector<8x1536xbf16> to vector<8x256xbf16>
    %c0_113 = arith.constant 0 : index
    %c2048 = arith.constant 2048 : index
    %163 = vector.load %arg2[%c0_113, %c2048] : memref<256x3072xbf16, #tpu.memory_space<vmem>>, vector<256x128xbf16>
    %cst_114 = arith.constant dense<0.000000e+00> : vector<8x128xf32>
    %164 = tpu.matmul %162, %163, %cst_114 {dimension_numbers = #tpu.dot_dimension_numbers<[1], [0], [0], [1], [0, 0, 1, 1], [], []>} : vector<8x256xbf16>, vector<256x128xbf16>, vector<8x128xf32> -> vector<8x128xf32>
    %c0_115 = arith.constant 0 : index
    %c2048_116 = arith.constant 2048 : index
    %165 = vector.load %arg3[%c0_115, %c2048_116] : memref<1x3072xf32, #tpu.memory_space<vmem>>, vector<1x128xf32>
    %166 = vector.broadcast %165 : vector<1x128xf32> to vector<8x128xf32>
    %167 = arith.addf %164, %166 : vector<8x128xf32>
    %cst_117 = arith.constant 0.000000e+00 : f32
    %168 = vector.broadcast %cst_117 : f32 to vector<8x128xf32>
    %169 = arith.maximumf %167, %168 : vector<8x128xf32>
    %170 = arith.truncf %169 : vector<8x128xf32> to vector<8x128xbf16>
    %c0_118 = arith.constant 0 : index
    %c2048_119 = arith.constant 2048 : index
    %171 = vector.load %arg13[%c0_118, %c2048_119] : memref<8x3072xbf16, #tpu.memory_space<vmem>>, vector<8x128xbf16>
    tpu.vector_store %arg13[%c0_118, %c2048_119], %170 {strides = array<i32>} : memref<8x3072xbf16, #tpu.memory_space<vmem>>, vector<8x128xbf16>,
    %172 = vector.extract_strided_slice %1 {offsets = [0, 1024], sizes = [8, 256], strides = [1, 1]} : vector<8x1536xbf16> to vector<8x256xbf16>
    %c0_120 = arith.constant 0 : index
    %c2176 = arith.constant 2176 : index
    %173 = vector.load %arg2[%c0_120, %c2176] : memref<256x3072xbf16, #tpu.memory_space<vmem>>, vector<256x128xbf16>
    %cst_121 = arith.constant dense<0.000000e+00> : vector<8x128xf32>
    %174 = tpu.matmul %172, %173, %cst_121 {dimension_numbers = #tpu.dot_dimension_numbers<[1], [0], [0], [1], [0, 0, 1, 1], [], []>} : vector<8x256xbf16>, vector<256x128xbf16>, vector<8x128xf32> -> vector<8x128xf32>
    %c0_122 = arith.constant 0 : index
    %c2176_123 = arith.constant 2176 : index
    %175 = vector.load %arg3[%c0_122, %c2176_123] : memref<1x3072xf32, #tpu.memory_space<vmem>>, vector<1x128xf32>
    %176 = vector.broadcast %175 : vector<1x128xf32> to vector<8x128xf32>
    %177 = arith.addf %174, %176 : vector<8x128xf32>
    %cst_124 = arith.constant 0.000000e+00 : f32
    %178 = vector.broadcast %cst_124 : f32 to vector<8x128xf32>
    %179 = arith.maximumf %177, %178 : vector<8x128xf32>
    %180 = arith.truncf %179 : vector<8x128xf32> to vector<8x128xbf16>
    %c0_125 = arith.constant 0 : index
    %c2176_126 = arith.constant 2176 : index
    %181 = vector.load %arg13[%c0_125, %c2176_126] : memref<8x3072xbf16, #tpu.memory_space<vmem>>, vector<8x128xbf16>
    tpu.vector_store %arg13[%c0_125, %c2176_126], %180 {strides = array<i32>} : memref<8x3072xbf16, #tpu.memory_space<vmem>>, vector<8x128xbf16>,
    %182 = vector.extract_strided_slice %1 {offsets = [0, 1152], sizes = [8, 128], strides = [1, 1]} : vector<8x1536xbf16> to vector<8x128xbf16>
    %c0_127 = arith.constant 0 : index
    %c2304 = arith.constant 2304 : index
    %183 = vector.load %arg2[%c0_127, %c2304] : memref<256x3072xbf16, #tpu.memory_space<vmem>>, vector<128x128xbf16>
    %cst_128 = arith.constant dense<0.000000e+00> : vector<8x128xf32>
    %184 = tpu.matmul %182, %183, %cst_128 {dimension_numbers = #tpu.dot_dimension_numbers<[1], [0], [0], [1], [0, 0, 1, 1], [], []>} : vector<8x128xbf16>, vector<128x128xbf16>, vector<8x128xf32> -> vector<8x128xf32>
    %c0_129 = arith.constant 0 : index
    %c2304_130 = arith.constant 2304 : index
    %185 = vector.load %arg3[%c0_129, %c2304_130] : memref<1x3072xf32, #tpu.memory_space<vmem>>, vector<1x128xf32>
    %186 = vector.broadcast %185 : vector<1x128xf32> to vector<8x128xf32>
    %187 = arith.addf %184, %186 : vector<8x128xf32>
    %cst_131 = arith.constant 0.000000e+00 : f32
    %188 = vector.broadcast %cst_131 : f32 to vector<8x128xf32>
    %189 = arith.maximumf %187, %188 : vector<8x128xf32>
    %190 = arith.truncf %189 : vector<8x128xf32> to vector<8x128xbf16>
    %c0_132 = arith.constant 0 : index
    %c2304_133 = arith.constant 2304 : index
    %191 = vector.load %arg13[%c0_132, %c2304_133] : memref<8x3072xbf16, #tpu.memory_space<vmem>>, vector<8x128xbf16>
    tpu.vector_store %arg13[%c0_132, %c2304_133], %190 {strides = array<i32>} : memref<8x3072xbf16, #tpu.memory_space<vmem>>, vector<8x128xbf16>,
    %192 = vector.extract_strided_slice %1 {offsets = [0, 1152], sizes = [8, 256], strides = [1, 1]} : vector<8x1536xbf16> to vector<8x256xbf16>
    %c0_134 = arith.constant 0 : index
    %c2432 = arith.constant 2432 : index
    %193 = vector.load %arg2[%c0_134, %c2432] : memref<256x3072xbf16, #tpu.memory_space<vmem>>, vector<256x128xbf16>
    %cst_135 = arith.constant dense<0.000000e+00> : vector<8x128xf32>
    %194 = tpu.matmul %192, %193, %cst_135 {dimension_numbers = #tpu.dot_dimension_numbers<[1], [0], [0], [1], [0, 0, 1, 1], [], []>} : vector<8x256xbf16>, vector<256x128xbf16>, vector<8x128xf32> -> vector<8x128xf32>
    %c0_136 = arith.constant 0 : index
    %c2432_137 = arith.constant 2432 : index
    %195 = vector.load %arg3[%c0_136, %c2432_137] : memref<1x3072xf32, #tpu.memory_space<vmem>>, vector<1x128xf32>
    %196 = vector.broadcast %195 : vector<1x128xf32> to vector<8x128xf32>
    %197 = arith.addf %194, %196 : vector<8x128xf32>
    %cst_138 = arith.constant 0.000000e+00 : f32
    %198 = vector.broadcast %cst_138 : f32 to vector<8x128xf32>
    %199 = arith.maximumf %197, %198 : vector<8x128xf32>
    %200 = arith.truncf %199 : vector<8x128xf32> to vector<8x128xbf16>
    %c0_139 = arith.constant 0 : index
    %c2432_140 = arith.constant 2432 : index
    %201 = vector.load %arg13[%c0_139, %c2432_140] : memref<8x3072xbf16, #tpu.memory_space<vmem>>, vector<8x128xbf16>
    tpu.vector_store %arg13[%c0_139, %c2432_140], %200 {strides = array<i32>} : memref<8x3072xbf16, #tpu.memory_space<vmem>>, vector<8x128xbf16>,
    %202 = vector.extract_strided_slice %1 {offsets = [0, 1152], sizes = [8, 256], strides = [1, 1]} : vector<8x1536xbf16> to vector<8x256xbf16>
    %c0_141 = arith.constant 0 : index
    %c2560 = arith.constant 2560 : index
    %203 = vector.load %arg2[%c0_141, %c2560] : memref<256x3072xbf16, #tpu.memory_space<vmem>>, vector<256x128xbf16>
    %cst_142 = arith.constant dense<0.000000e+00> : vector<8x128xf32>
    %204 = tpu.matmul %202, %203, %cst_142 {dimension_numbers = #tpu.dot_dimension_numbers<[1], [0], [0], [1], [0, 0, 1, 1], [], []>} : vector<8x256xbf16>, vector<256x128xbf16>, vector<8x128xf32> -> vector<8x128xf32>
    %c0_143 = arith.constant 0 : index
    %c2560_144 = arith.constant 2560 : index
    %205 = vector.load %arg3[%c0_143, %c2560_144] : memref<1x3072xf32, #tpu.memory_space<vmem>>, vector<1x128xf32>
    %206 = vector.broadcast %205 : vector<1x128xf32> to vector<8x128xf32>
    %207 = arith.addf %204, %206 : vector<8x128xf32>
    %cst_145 = arith.constant 0.000000e+00 : f32
    %208 = vector.broadcast %cst_145 : f32 to vector<8x128xf32>
    %209 = arith.maximumf %207, %208 : vector<8x128xf32>
    %210 = arith.truncf %209 : vector<8x128xf32> to vector<8x128xbf16>
    %c0_146 = arith.constant 0 : index
    %c2560_147 = arith.constant 2560 : index
    %211 = vector.load %arg13[%c0_146, %c2560_147] : memref<8x3072xbf16, #tpu.memory_space<vmem>>, vector<8x128xbf16>
    tpu.vector_store %arg13[%c0_146, %c2560_147], %210 {strides = array<i32>} : memref<8x3072xbf16, #tpu.memory_space<vmem>>, vector<8x128xbf16>,
    %212 = vector.extract_strided_slice %1 {offsets = [0, 1280], sizes = [8, 256], strides = [1, 1]} : vector<8x1536xbf16> to vector<8x256xbf16>
    %c0_148 = arith.constant 0 : index
    %c2688 = arith.constant 2688 : index
    %213 = vector.load %arg2[%c0_148, %c2688] : memref<256x3072xbf16, #tpu.memory_space<vmem>>, vector<256x128xbf16>
    %cst_149 = arith.constant dense<0.000000e+00> : vector<8x128xf32>
    %214 = tpu.matmul %212, %213, %cst_149 {dimension_numbers = #tpu.dot_dimension_numbers<[1], [0], [0], [1], [0, 0, 1, 1], [], []>} : vector<8x256xbf16>, vector<256x128xbf16>, vector<8x128xf32> -> vector<8x128xf32>
    %c0_150 = arith.constant 0 : index
    %c2688_151 = arith.constant 2688 : index
    %215 = vector.load %arg3[%c0_150, %c2688_151] : memref<1x3072xf32, #tpu.memory_space<vmem>>, vector<1x128xf32>
    %216 = vector.broadcast %215 : vector<1x128xf32> to vector<8x128xf32>
    %217 = arith.addf %214, %216 : vector<8x128xf32>
    %cst_152 = arith.constant 0.000000e+00 : f32
    %218 = vector.broadcast %cst_152 : f32 to vector<8x128xf32>
    %219 = arith.maximumf %217, %218 : vector<8x128xf32>
    %220 = arith.truncf %219 : vector<8x128xf32> to vector<8x128xbf16>
    %c0_153 = arith.constant 0 : index
    %c2688_154 = arith.constant 2688 : index
    %221 = vector.load %arg13[%c0_153, %c2688_154] : memref<8x3072xbf16, #tpu.memory_space<vmem>>, vector<8x128xbf16>
    tpu.vector_store %arg13[%c0_153, %c2688_154], %220 {strides = array<i32>} : memref<8x3072xbf16, #tpu.memory_space<vmem>>, vector<8x128xbf16>,
    %222 = vector.extract_strided_slice %1 {offsets = [0, 1280], sizes = [8, 256], strides = [1, 1]} : vector<8x1536xbf16> to vector<8x256xbf16>
    %c0_155 = arith.constant 0 : index
    %c2816 = arith.constant 2816 : index
    %223 = vector.load %arg2[%c0_155, %c2816] : memref<256x3072xbf16, #tpu.memory_space<vmem>>, vector<256x128xbf16>
    %cst_156 = arith.constant dense<0.000000e+00> : vector<8x128xf32>
    %224 = tpu.matmul %222, %223, %cst_156 {dimension_numbers = #tpu.dot_dimension_numbers<[1], [0], [0], [1], [0, 0, 1, 1], [], []>} : vector<8x256xbf16>, vector<256x128xbf16>, vector<8x128xf32> -> vector<8x128xf32>
    %c0_157 = arith.constant 0 : index
    %c2816_158 = arith.constant 2816 : index
    %225 = vector.load %arg3[%c0_157, %c2816_158] : memref<1x3072xf32, #tpu.memory_space<vmem>>, vector<1x128xf32>
    %226 = vector.broadcast %225 : vector<1x128xf32> to vector<8x128xf32>
    %227 = arith.addf %224, %226 : vector<8x128xf32>
    %cst_159 = arith.constant 0.000000e+00 : f32
    %228 = vector.broadcast %cst_159 : f32 to vector<8x128xf32>
    %229 = arith.maximumf %227, %228 : vector<8x128xf32>
    %230 = arith.truncf %229 : vector<8x128xf32> to vector<8x128xbf16>
    %c0_160 = arith.constant 0 : index
    %c2816_161 = arith.constant 2816 : index
    %231 = vector.load %arg13[%c0_160, %c2816_161] : memref<8x3072xbf16, #tpu.memory_space<vmem>>, vector<8x128xbf16>
    tpu.vector_store %arg13[%c0_160, %c2816_161], %230 {strides = array<i32>} : memref<8x3072xbf16, #tpu.memory_space<vmem>>, vector<8x128xbf16>,
    %232 = vector.extract_strided_slice %1 {offsets = [0, 1408], sizes = [8, 128], strides = [1, 1]} : vector<8x1536xbf16> to vector<8x128xbf16>
    %c0_162 = arith.constant 0 : index
    %c2944 = arith.constant 2944 : index
    %233 = vector.load %arg2[%c0_162, %c2944] : memref<256x3072xbf16, #tpu.memory_space<vmem>>, vector<128x128xbf16>
    %cst_163 = arith.constant dense<0.000000e+00> : vector<8x128xf32>
    %234 = tpu.matmul %232, %233, %cst_163 {dimension_numbers = #tpu.dot_dimension_numbers<[1], [0], [0], [1], [0, 0, 1, 1], [], []>} : vector<8x128xbf16>, vector<128x128xbf16>, vector<8x128xf32> -> vector<8x128xf32>
    %c0_164 = arith.constant 0 : index
    %c2944_165 = arith.constant 2944 : index
    %235 = vector.load %arg3[%c0_164, %c2944_165] : memref<1x3072xf32, #tpu.memory_space<vmem>>, vector<1x128xf32>
    %236 = vector.broadcast %235 : vector<1x128xf32> to vector<8x128xf32>
    %237 = arith.addf %234, %236 : vector<8x128xf32>
    %cst_166 = arith.constant 0.000000e+00 : f32
    %238 = vector.broadcast %cst_166 : f32 to vector<8x128xf32>
    %239 = arith.maximumf %237, %238 : vector<8x128xf32>
    %240 = arith.truncf %239 : vector<8x128xf32> to vector<8x128xbf16>
    %c0_167 = arith.constant 0 : index
    %c2944_168 = arith.constant 2944 : index
    %241 = vector.load %arg13[%c0_167, %c2944_168] : memref<8x3072xbf16, #tpu.memory_space<vmem>>, vector<8x128xbf16>
    tpu.vector_store %arg13[%c0_167, %c2944_168], %240 {strides = array<i32>} : memref<8x3072xbf16, #tpu.memory_space<vmem>>, vector<8x128xbf16>,
    %c0_169 = arith.constant 0 : index
    %c0_170 = arith.constant 0 : index
    %242 = vector.load %arg13[%c0_169, %c0_170] : memref<8x3072xbf16, #tpu.memory_space<vmem>>, vector<8x256xbf16>
    %c0_171 = arith.constant 0 : index
    %c0_172 = arith.constant 0 : index
    %243 = vector.load %arg4[%c0_171, %c0_172] : memref<384x3072xbf16, #tpu.memory_space<vmem>>, vector<256x128xbf16>
    %cst_173 = arith.constant dense<0.000000e+00> : vector<8x128xf32>
    %244 = tpu.matmul %242, %243, %cst_173 {dimension_numbers = #tpu.dot_dimension_numbers<[1], [0], [0], [1], [0, 0, 1, 1], [], []>} : vector<8x256xbf16>, vector<256x128xbf16>, vector<8x128xf32> -> vector<8x128xf32>
    %c0_174 = arith.constant 0 : index
    %c0_175 = arith.constant 0 : index
    %245 = vector.load %arg5[%c0_174, %c0_175] : memref<1x3072xf32, #tpu.memory_space<vmem>>, vector<1x128xf32>
    %246 = vector.broadcast %245 : vector<1x128xf32> to vector<8x128xf32>
    %247 = arith.addf %244, %246 : vector<8x128xf32>
    %cst_176 = arith.constant 0.000000e+00 : f32
    %248 = vector.broadcast %cst_176 : f32 to vector<8x128xf32>
    %249 = arith.maximumf %247, %248 : vector<8x128xf32>
    %250 = arith.truncf %249 : vector<8x128xf32> to vector<8x128xbf16>
    %c0_177 = arith.constant 0 : index
    %c0_178 = arith.constant 0 : index
    %251 = vector.load %arg14[%c0_177, %c0_178] : memref<8x3072xbf16, #tpu.memory_space<vmem>>, vector<8x128xbf16>
    tpu.vector_store %arg14[%c0_177, %c0_178], %250 {strides = array<i32>} : memref<8x3072xbf16, #tpu.memory_space<vmem>>, vector<8x128xbf16>,
    %c0_179 = arith.constant 0 : index
    %c0_180 = arith.constant 0 : index
    %252 = vector.load %arg13[%c0_179, %c0_180] : memref<8x3072xbf16, #tpu.memory_space<vmem>>, vector<8x384xbf16>
    %c0_181 = arith.constant 0 : index
    %c128_182 = arith.constant 128 : index
    %253 = vector.load %arg4[%c0_181, %c128_182] : memref<384x3072xbf16, #tpu.memory_space<vmem>>, vector<384x128xbf16>
    %cst_183 = arith.constant dense<0.000000e+00> : vector<8x128xf32>
    %254 = tpu.matmul %252, %253, %cst_183 {dimension_numbers = #tpu.dot_dimension_numbers<[1], [0], [0], [1], [0, 0, 1, 1], [], []>} : vector<8x384xbf16>, vector<384x128xbf16>, vector<8x128xf32> -> vector<8x128xf32>
    %c0_184 = arith.constant 0 : index
    %c128_185 = arith.constant 128 : index
    %255 = vector.load %arg5[%c0_184, %c128_185] : memref<1x3072xf32, #tpu.memory_space<vmem>>, vector<1x128xf32>
    %256 = vector.broadcast %255 : vector<1x128xf32> to vector<8x128xf32>
    %257 = arith.addf %254, %256 : vector<8x128xf32>
    %cst_186 = arith.constant 0.000000e+00 : f32
    %258 = vector.broadcast %cst_186 : f32 to vector<8x128xf32>
    %259 = arith.maximumf %257, %258 : vector<8x128xf32>
    %260 = arith.truncf %259 : vector<8x128xf32> to vector<8x128xbf16>
    %c0_187 = arith.constant 0 : index
    %c128_188 = arith.constant 128 : index
    %261 = vector.load %arg14[%c0_187, %c128_188] : memref<8x3072xbf16, #tpu.memory_space<vmem>>, vector<8x128xbf16>
    tpu.vector_store %arg14[%c0_187, %c128_188], %260 {strides = array<i32>} : memref<8x3072xbf16, #tpu.memory_space<vmem>>, vector<8x128xbf16>,
    %c0_189 = arith.constant 0 : index
    %c128_190 = arith.constant 128 : index
    %262 = vector.load %arg13[%c0_189, %c128_190] : memref<8x3072xbf16, #tpu.memory_space<vmem>>, vector<8x384xbf16>
    %c0_191 = arith.constant 0 : index
    %c256_192 = arith.constant 256 : index
    %263 = vector.load %arg4[%c0_191, %c256_192] : memref<384x3072xbf16, #tpu.memory_space<vmem>>, vector<384x128xbf16>
    %cst_193 = arith.constant dense<0.000000e+00> : vector<8x128xf32>
    %264 = tpu.matmul %262, %263, %cst_193 {dimension_numbers = #tpu.dot_dimension_numbers<[1], [0], [0], [1], [0, 0, 1, 1], [], []>} : vector<8x384xbf16>, vector<384x128xbf16>, vector<8x128xf32> -> vector<8x128xf32>
    %c0_194 = arith.constant 0 : index
    %c256_195 = arith.constant 256 : index
    %265 = vector.load %arg5[%c0_194, %c256_195] : memref<1x3072xf32, #tpu.memory_space<vmem>>, vector<1x128xf32>
    %266 = vector.broadcast %265 : vector<1x128xf32> to vector<8x128xf32>
    %267 = arith.addf %264, %266 : vector<8x128xf32>
    %cst_196 = arith.constant 0.000000e+00 : f32
    %268 = vector.broadcast %cst_196 : f32 to vector<8x128xf32>
    %269 = arith.maximumf %267, %268 : vector<8x128xf32>
    %270 = arith.truncf %269 : vector<8x128xf32> to vector<8x128xbf16>
    %c0_197 = arith.constant 0 : index
    %c256_198 = arith.constant 256 : index
    %271 = vector.load %arg14[%c0_197, %c256_198] : memref<8x3072xbf16, #tpu.memory_space<vmem>>, vector<8x128xbf16>
    tpu.vector_store %arg14[%c0_197, %c256_198], %270 {strides = array<i32>} : memref<8x3072xbf16, #tpu.memory_space<vmem>>, vector<8x128xbf16>,
    %c0_199 = arith.constant 0 : index
    %c384_200 = arith.constant 384 : index
    %272 = vector.load %arg13[%c0_199, %c384_200] : memref<8x3072xbf16, #tpu.memory_space<vmem>>, vector<8x256xbf16>
    %c0_201 = arith.constant 0 : index
    %c384_202 = arith.constant 384 : index
    %273 = vector.load %arg4[%c0_201, %c384_202] : memref<384x3072xbf16, #tpu.memory_space<vmem>>, vector<256x128xbf16>
    %cst_203 = arith.constant dense<0.000000e+00> : vector<8x128xf32>
    %274 = tpu.matmul %272, %273, %cst_203 {dimension_numbers = #tpu.dot_dimension_numbers<[1], [0], [0], [1], [0, 0, 1, 1], [], []>} : vector<8x256xbf16>, vector<256x128xbf16>, vector<8x128xf32> -> vector<8x128xf32>
    %c0_204 = arith.constant 0 : index
    %c384_205 = arith.constant 384 : index
    %275 = vector.load %arg5[%c0_204, %c384_205] : memref<1x3072xf32, #tpu.memory_space<vmem>>, vector<1x128xf32>
    %276 = vector.broadcast %275 : vector<1x128xf32> to vector<8x128xf32>
    %277 = arith.addf %274, %276 : vector<8x128xf32>
    %cst_206 = arith.constant 0.000000e+00 : f32
    %278 = vector.broadcast %cst_206 : f32 to vector<8x128xf32>
    %279 = arith.maximumf %277, %278 : vector<8x128xf32>
    %280 = arith.truncf %279 : vector<8x128xf32> to vector<8x128xbf16>
    %c0_207 = arith.constant 0 : index
    %c384_208 = arith.constant 384 : index
    %281 = vector.load %arg14[%c0_207, %c384_208] : memref<8x3072xbf16, #tpu.memory_space<vmem>>, vector<8x128xbf16>
    tpu.vector_store %arg14[%c0_207, %c384_208], %280 {strides = array<i32>} : memref<8x3072xbf16, #tpu.memory_space<vmem>>, vector<8x128xbf16>,
    %c0_209 = arith.constant 0 : index
    %c384_210 = arith.constant 384 : index
    %282 = vector.load %arg13[%c0_209, %c384_210] : memref<8x3072xbf16, #tpu.memory_space<vmem>>, vector<8x384xbf16>
    %c0_211 = arith.constant 0 : index
    %c512_212 = arith.constant 512 : index
    %283 = vector.load %arg4[%c0_211, %c512_212] : memref<384x3072xbf16, #tpu.memory_space<vmem>>, vector<384x128xbf16>
    %cst_213 = arith.constant dense<0.000000e+00> : vector<8x128xf32>
    %284 = tpu.matmul %282, %283, %cst_213 {dimension_numbers = #tpu.dot_dimension_numbers<[1], [0], [0], [1], [0, 0, 1, 1], [], []>} : vector<8x384xbf16>, vector<384x128xbf16>, vector<8x128xf32> -> vector<8x128xf32>
    %c0_214 = arith.constant 0 : index
    %c512_215 = arith.constant 512 : index
    %285 = vector.load %arg5[%c0_214, %c512_215] : memref<1x3072xf32, #tpu.memory_space<vmem>>, vector<1x128xf32>
    %286 = vector.broadcast %285 : vector<1x128xf32> to vector<8x128xf32>
    %287 = arith.addf %284, %286 : vector<8x128xf32>
    %cst_216 = arith.constant 0.000000e+00 : f32
    %288 = vector.broadcast %cst_216 : f32 to vector<8x128xf32>
    %289 = arith.maximumf %287, %288 : vector<8x128xf32>
    %290 = arith.truncf %289 : vector<8x128xf32> to vector<8x128xbf16>
    %c0_217 = arith.constant 0 : index
    %c512_218 = arith.constant 512 : index
    %291 = vector.load %arg14[%c0_217, %c512_218] : memref<8x3072xbf16, #tpu.memory_space<vmem>>, vector<8x128xbf16>
    tpu.vector_store %arg14[%c0_217, %c512_218], %290 {strides = array<i32>} : memref<8x3072xbf16, #tpu.memory_space<vmem>>, vector<8x128xbf16>,
    %c0_219 = arith.constant 0 : index
    %c512_220 = arith.constant 512 : index
    %292 = vector.load %arg13[%c0_219, %c512_220] : memref<8x3072xbf16, #tpu.memory_space<vmem>>, vector<8x384xbf16>
    %c0_221 = arith.constant 0 : index
    %c640_222 = arith.constant 640 : index
    %293 = vector.load %arg4[%c0_221, %c640_222] : memref<384x3072xbf16, #tpu.memory_space<vmem>>, vector<384x128xbf16>
    %cst_223 = arith.constant dense<0.000000e+00> : vector<8x128xf32>
    %294 = tpu.matmul %292, %293, %cst_223 {dimension_numbers = #tpu.dot_dimension_numbers<[1], [0], [0], [1], [0, 0, 1, 1], [], []>} : vector<8x384xbf16>, vector<384x128xbf16>, vector<8x128xf32> -> vector<8x128xf32>
    %c0_224 = arith.constant 0 : index
    %c640_225 = arith.constant 640 : index
    %295 = vector.load %arg5[%c0_224, %c640_225] : memref<1x3072xf32, #tpu.memory_space<vmem>>, vector<1x128xf32>
    %296 = vector.broadcast %295 : vector<1x128xf32> to vector<8x128xf32>
    %297 = arith.addf %294, %296 : vector<8x128xf32>
    %cst_226 = arith.constant 0.000000e+00 : f32
    %298 = vector.broadcast %cst_226 : f32 to vector<8x128xf32>
    %299 = arith.maximumf %297, %298 : vector<8x128xf32>
    %300 = arith.truncf %299 : vector<8x128xf32> to vector<8x128xbf16>
    %c0_227 = arith.constant 0 : index
    %c640_228 = arith.constant 640 : index
    %301 = vector.load %arg14[%c0_227, %c640_228] : memref<8x3072xbf16, #tpu.memory_space<vmem>>, vector<8x128xbf16>
    tpu.vector_store %arg14[%c0_227, %c640_228], %300 {strides = array<i32>} : memref<8x3072xbf16, #tpu.memory_space<vmem>>, vector<8x128xbf16>,
    %c0_229 = arith.constant 0 : index
    %c768_230 = arith.constant 768 : index
    %302 = vector.load %arg13[%c0_229, %c768_230] : memref<8x3072xbf16, #tpu.memory_space<vmem>>, vector<8x256xbf16>
    %c0_231 = arith.constant 0 : index
    %c768_232 = arith.constant 768 : index
    %303 = vector.load %arg4[%c0_231, %c768_232] : memref<384x3072xbf16, #tpu.memory_space<vmem>>, vector<256x128xbf16>
    %cst_233 = arith.constant dense<0.000000e+00> : vector<8x128xf32>
    %304 = tpu.matmul %302, %303, %cst_233 {dimension_numbers = #tpu.dot_dimension_numbers<[1], [0], [0], [1], [0, 0, 1, 1], [], []>} : vector<8x256xbf16>, vector<256x128xbf16>, vector<8x128xf32> -> vector<8x128xf32>
    %c0_234 = arith.constant 0 : index
    %c768_235 = arith.constant 768 : index
    %305 = vector.load %arg5[%c0_234, %c768_235] : memref<1x3072xf32, #tpu.memory_space<vmem>>, vector<1x128xf32>
    %306 = vector.broadcast %305 : vector<1x128xf32> to vector<8x128xf32>
    %307 = arith.addf %304, %306 : vector<8x128xf32>
    %cst_236 = arith.constant 0.000000e+00 : f32
    %308 = vector.broadcast %cst_236 : f32 to vector<8x128xf32>
    %309 = arith.maximumf %307, %308 : vector<8x128xf32>
    %310 = arith.truncf %309 : vector<8x128xf32> to vector<8x128xbf16>
    %c0_237 = arith.constant 0 : index
    %c768_238 = arith.constant 768 : index
    %311 = vector.load %arg14[%c0_237, %c768_238] : memref<8x3072xbf16, #tpu.memory_space<vmem>>, vector<8x128xbf16>
    tpu.vector_store %arg14[%c0_237, %c768_238], %310 {strides = array<i32>} : memref<8x3072xbf16, #tpu.memory_space<vmem>>, vector<8x128xbf16>,
    %c0_239 = arith.constant 0 : index
    %c768_240 = arith.constant 768 : index
    %312 = vector.load %arg13[%c0_239, %c768_240] : memref<8x3072xbf16, #tpu.memory_space<vmem>>, vector<8x384xbf16>
    %c0_241 = arith.constant 0 : index
    %c896_242 = arith.constant 896 : index
    %313 = vector.load %arg4[%c0_241, %c896_242] : memref<384x3072xbf16, #tpu.memory_space<vmem>>, vector<384x128xbf16>
    %cst_243 = arith.constant dense<0.000000e+00> : vector<8x128xf32>
    %314 = tpu.matmul %312, %313, %cst_243 {dimension_numbers = #tpu.dot_dimension_numbers<[1], [0], [0], [1], [0, 0, 1, 1], [], []>} : vector<8x384xbf16>, vector<384x128xbf16>, vector<8x128xf32> -> vector<8x128xf32>
    %c0_244 = arith.constant 0 : index
    %c896_245 = arith.constant 896 : index
    %315 = vector.load %arg5[%c0_244, %c896_245] : memref<1x3072xf32, #tpu.memory_space<vmem>>, vector<1x128xf32>
    %316 = vector.broadcast %315 : vector<1x128xf32> to vector<8x128xf32>
    %317 = arith.addf %314, %316 : vector<8x128xf32>
    %cst_246 = arith.constant 0.000000e+00 : f32
    %318 = vector.broadcast %cst_246 : f32 to vector<8x128xf32>
    %319 = arith.maximumf %317, %318 : vector<8x128xf32>
    %320 = arith.truncf %319 : vector<8x128xf32> to vector<8x128xbf16>
    %c0_247 = arith.constant 0 : index
    %c896_248 = arith.constant 896 : index
    %321 = vector.load %arg14[%c0_247, %c896_248] : memref<8x3072xbf16, #tpu.memory_space<vmem>>, vector<8x128xbf16>
    tpu.vector_store %arg14[%c0_247, %c896_248], %320 {strides = array<i32>} : memref<8x3072xbf16, #tpu.memory_space<vmem>>, vector<8x128xbf16>,
    %c0_249 = arith.constant 0 : index
    %c896_250 = arith.constant 896 : index
    %322 = vector.load %arg13[%c0_249, %c896_250] : memref<8x3072xbf16, #tpu.memory_space<vmem>>, vector<8x384xbf16>
    %c0_251 = arith.constant 0 : index
    %c1024_252 = arith.constant 1024 : index
    %323 = vector.load %arg4[%c0_251, %c1024_252] : memref<384x3072xbf16, #tpu.memory_space<vmem>>, vector<384x128xbf16>
    %cst_253 = arith.constant dense<0.000000e+00> : vector<8x128xf32>
    %324 = tpu.matmul %322, %323, %cst_253 {dimension_numbers = #tpu.dot_dimension_numbers<[1], [0], [0], [1], [0, 0, 1, 1], [], []>} : vector<8x384xbf16>, vector<384x128xbf16>, vector<8x128xf32> -> vector<8x128xf32>
    %c0_254 = arith.constant 0 : index
    %c1024_255 = arith.constant 1024 : index
    %325 = vector.load %arg5[%c0_254, %c1024_255] : memref<1x3072xf32, #tpu.memory_space<vmem>>, vector<1x128xf32>
    %326 = vector.broadcast %325 : vector<1x128xf32> to vector<8x128xf32>
    %327 = arith.addf %324, %326 : vector<8x128xf32>
    %cst_256 = arith.constant 0.000000e+00 : f32
    %328 = vector.broadcast %cst_256 : f32 to vector<8x128xf32>
    %329 = arith.maximumf %327, %328 : vector<8x128xf32>
    %330 = arith.truncf %329 : vector<8x128xf32> to vector<8x128xbf16>
    %c0_257 = arith.constant 0 : index
    %c1024_258 = arith.constant 1024 : index
    %331 = vector.load %arg14[%c0_257, %c1024_258] : memref<8x3072xbf16, #tpu.memory_space<vmem>>, vector<8x128xbf16>
    tpu.vector_store %arg14[%c0_257, %c1024_258], %330 {strides = array<i32>} : memref<8x3072xbf16, #tpu.memory_space<vmem>>, vector<8x128xbf16>,
    %c0_259 = arith.constant 0 : index
    %c1152_260 = arith.constant 1152 : index
    %332 = vector.load %arg13[%c0_259, %c1152_260] : memref<8x3072xbf16, #tpu.memory_space<vmem>>, vector<8x256xbf16>
    %c0_261 = arith.constant 0 : index
    %c1152_262 = arith.constant 1152 : index
    %333 = vector.load %arg4[%c0_261, %c1152_262] : memref<384x3072xbf16, #tpu.memory_space<vmem>>, vector<256x128xbf16>
    %cst_263 = arith.constant dense<0.000000e+00> : vector<8x128xf32>
    %334 = tpu.matmul %332, %333, %cst_263 {dimension_numbers = #tpu.dot_dimension_numbers<[1], [0], [0], [1], [0, 0, 1, 1], [], []>} : vector<8x256xbf16>, vector<256x128xbf16>, vector<8x128xf32> -> vector<8x128xf32>
    %c0_264 = arith.constant 0 : index
    %c1152_265 = arith.constant 1152 : index
    %335 = vector.load %arg5[%c0_264, %c1152_265] : memref<1x3072xf32, #tpu.memory_space<vmem>>, vector<1x128xf32>
    %336 = vector.broadcast %335 : vector<1x128xf32> to vector<8x128xf32>
    %337 = arith.addf %334, %336 : vector<8x128xf32>
    %cst_266 = arith.constant 0.000000e+00 : f32
    %338 = vector.broadcast %cst_266 : f32 to vector<8x128xf32>
    %339 = arith.maximumf %337, %338 : vector<8x128xf32>
    %340 = arith.truncf %339 : vector<8x128xf32> to vector<8x128xbf16>
    %c0_267 = arith.constant 0 : index
    %c1152_268 = arith.constant 1152 : index
    %341 = vector.load %arg14[%c0_267, %c1152_268] : memref<8x3072xbf16, #tpu.memory_space<vmem>>, vector<8x128xbf16>
    tpu.vector_store %arg14[%c0_267, %c1152_268], %340 {strides = array<i32>} : memref<8x3072xbf16, #tpu.memory_space<vmem>>, vector<8x128xbf16>,
    %c0_269 = arith.constant 0 : index
    %c1152_270 = arith.constant 1152 : index
    %342 = vector.load %arg13[%c0_269, %c1152_270] : memref<8x3072xbf16, #tpu.memory_space<vmem>>, vector<8x384xbf16>
    %c0_271 = arith.constant 0 : index
    %c1280_272 = arith.constant 1280 : index
    %343 = vector.load %arg4[%c0_271, %c1280_272] : memref<384x3072xbf16, #tpu.memory_space<vmem>>, vector<384x128xbf16>
    %cst_273 = arith.constant dense<0.000000e+00> : vector<8x128xf32>
    %344 = tpu.matmul %342, %343, %cst_273 {dimension_numbers = #tpu.dot_dimension_numbers<[1], [0], [0], [1], [0, 0, 1, 1], [], []>} : vector<8x384xbf16>, vector<384x128xbf16>, vector<8x128xf32> -> vector<8x128xf32>
    %c0_274 = arith.constant 0 : index
    %c1280_275 = arith.constant 1280 : index
    %345 = vector.load %arg5[%c0_274, %c1280_275] : memref<1x3072xf32, #tpu.memory_space<vmem>>, vector<1x128xf32>
    %346 = vector.broadcast %345 : vector<1x128xf32> to vector<8x128xf32>
    %347 = arith.addf %344, %346 : vector<8x128xf32>
    %cst_276 = arith.constant 0.000000e+00 : f32
    %348 = vector.broadcast %cst_276 : f32 to vector<8x128xf32>
    %349 = arith.maximumf %347, %348 : vector<8x128xf32>
    %350 = arith.truncf %349 : vector<8x128xf32> to vector<8x128xbf16>
    %c0_277 = arith.constant 0 : index
    %c1280_278 = arith.constant 1280 : index
    %351 = vector.load %arg14[%c0_277, %c1280_278] : memref<8x3072xbf16, #tpu.memory_space<vmem>>, vector<8x128xbf16>
    tpu.vector_store %arg14[%c0_277, %c1280_278], %350 {strides = array<i32>} : memref<8x3072xbf16, #tpu.memory_space<vmem>>, vector<8x128xbf16>,
    %c0_279 = arith.constant 0 : index
    %c1280_280 = arith.constant 1280 : index
    %352 = vector.load %arg13[%c0_279, %c1280_280] : memref<8x3072xbf16, #tpu.memory_space<vmem>>, vector<8x384xbf16>
    %c0_281 = arith.constant 0 : index
    %c1408_282 = arith.constant 1408 : index
    %353 = vector.load %arg4[%c0_281, %c1408_282] : memref<384x3072xbf16, #tpu.memory_space<vmem>>, vector<384x128xbf16>
    %cst_283 = arith.constant dense<0.000000e+00> : vector<8x128xf32>
    %354 = tpu.matmul %352, %353, %cst_283 {dimension_numbers = #tpu.dot_dimension_numbers<[1], [0], [0], [1], [0, 0, 1, 1], [], []>} : vector<8x384xbf16>, vector<384x128xbf16>, vector<8x128xf32> -> vector<8x128xf32>
    %c0_284 = arith.constant 0 : index
    %c1408_285 = arith.constant 1408 : index
    %355 = vector.load %arg5[%c0_284, %c1408_285] : memref<1x3072xf32, #tpu.memory_space<vmem>>, vector<1x128xf32>
    %356 = vector.broadcast %355 : vector<1x128xf32> to vector<8x128xf32>
    %357 = arith.addf %354, %356 : vector<8x128xf32>
    %cst_286 = arith.constant 0.000000e+00 : f32
    %358 = vector.broadcast %cst_286 : f32 to vector<8x128xf32>
    %359 = arith.maximumf %357, %358 : vector<8x128xf32>
    %360 = arith.truncf %359 : vector<8x128xf32> to vector<8x128xbf16>
    %c0_287 = arith.constant 0 : index
    %c1408_288 = arith.constant 1408 : index
    %361 = vector.load %arg14[%c0_287, %c1408_288] : memref<8x3072xbf16, #tpu.memory_space<vmem>>, vector<8x128xbf16>
    tpu.vector_store %arg14[%c0_287, %c1408_288], %360 {strides = array<i32>} : memref<8x3072xbf16, #tpu.memory_space<vmem>>, vector<8x128xbf16>,
    %c0_289 = arith.constant 0 : index
    %c1536_290 = arith.constant 1536 : index
    %362 = vector.load %arg13[%c0_289, %c1536_290] : memref<8x3072xbf16, #tpu.memory_space<vmem>>, vector<8x256xbf16>
    %c0_291 = arith.constant 0 : index
    %c1536_292 = arith.constant 1536 : index
    %363 = vector.load %arg4[%c0_291, %c1536_292] : memref<384x3072xbf16, #tpu.memory_space<vmem>>, vector<256x128xbf16>
    %cst_293 = arith.constant dense<0.000000e+00> : vector<8x128xf32>
    %364 = tpu.matmul %362, %363, %cst_293 {dimension_numbers = #tpu.dot_dimension_numbers<[1], [0], [0], [1], [0, 0, 1, 1], [], []>} : vector<8x256xbf16>, vector<256x128xbf16>, vector<8x128xf32> -> vector<8x128xf32>
    %c0_294 = arith.constant 0 : index
    %c1536_295 = arith.constant 1536 : index
    %365 = vector.load %arg5[%c0_294, %c1536_295] : memref<1x3072xf32, #tpu.memory_space<vmem>>, vector<1x128xf32>
    %366 = vector.broadcast %365 : vector<1x128xf32> to vector<8x128xf32>
    %367 = arith.addf %364, %366 : vector<8x128xf32>
    %cst_296 = arith.constant 0.000000e+00 : f32
    %368 = vector.broadcast %cst_296 : f32 to vector<8x128xf32>
    %369 = arith.maximumf %367, %368 : vector<8x128xf32>
    %370 = arith.truncf %369 : vector<8x128xf32> to vector<8x128xbf16>
    %c0_297 = arith.constant 0 : index
    %c1536_298 = arith.constant 1536 : index
    %371 = vector.load %arg14[%c0_297, %c1536_298] : memref<8x3072xbf16, #tpu.memory_space<vmem>>, vector<8x128xbf16>
    tpu.vector_store %arg14[%c0_297, %c1536_298], %370 {strides = array<i32>} : memref<8x3072xbf16, #tpu.memory_space<vmem>>, vector<8x128xbf16>,
    %c0_299 = arith.constant 0 : index
    %c1536_300 = arith.constant 1536 : index
    %372 = vector.load %arg13[%c0_299, %c1536_300] : memref<8x3072xbf16, #tpu.memory_space<vmem>>, vector<8x384xbf16>
    %c0_301 = arith.constant 0 : index
    %c1664_302 = arith.constant 1664 : index
    %373 = vector.load %arg4[%c0_301, %c1664_302] : memref<384x3072xbf16, #tpu.memory_space<vmem>>, vector<384x128xbf16>
    %cst_303 = arith.constant dense<0.000000e+00> : vector<8x128xf32>
    %374 = tpu.matmul %372, %373, %cst_303 {dimension_numbers = #tpu.dot_dimension_numbers<[1], [0], [0], [1], [0, 0, 1, 1], [], []>} : vector<8x384xbf16>, vector<384x128xbf16>, vector<8x128xf32> -> vector<8x128xf32>
    %c0_304 = arith.constant 0 : index
    %c1664_305 = arith.constant 1664 : index
    %375 = vector.load %arg5[%c0_304, %c1664_305] : memref<1x3072xf32, #tpu.memory_space<vmem>>, vector<1x128xf32>
    %376 = vector.broadcast %375 : vector<1x128xf32> to vector<8x128xf32>
    %377 = arith.addf %374, %376 : vector<8x128xf32>
    %cst_306 = arith.constant 0.000000e+00 : f32
    %378 = vector.broadcast %cst_306 : f32 to vector<8x128xf32>
    %379 = arith.maximumf %377, %378 : vector<8x128xf32>
    %380 = arith.truncf %379 : vector<8x128xf32> to vector<8x128xbf16>
    %c0_307 = arith.constant 0 : index
    %c1664_308 = arith.constant 1664 : index
    %381 = vector.load %arg14[%c0_307, %c1664_308] : memref<8x3072xbf16, #tpu.memory_space<vmem>>, vector<8x128xbf16>
    tpu.vector_store %arg14[%c0_307, %c1664_308], %380 {strides = array<i32>} : memref<8x3072xbf16, #tpu.memory_space<vmem>>, vector<8x128xbf16>,
    %c0_309 = arith.constant 0 : index
    %c1664_310 = arith.constant 1664 : index
    %382 = vector.load %arg13[%c0_309, %c1664_310] : memref<8x3072xbf16, #tpu.memory_space<vmem>>, vector<8x384xbf16>
    %c0_311 = arith.constant 0 : index
    %c1792_312 = arith.constant 1792 : index
    %383 = vector.load %arg4[%c0_311, %c1792_312] : memref<384x3072xbf16, #tpu.memory_space<vmem>>, vector<384x128xbf16>
    %cst_313 = arith.constant dense<0.000000e+00> : vector<8x128xf32>
    %384 = tpu.matmul %382, %383, %cst_313 {dimension_numbers = #tpu.dot_dimension_numbers<[1], [0], [0], [1], [0, 0, 1, 1], [], []>} : vector<8x384xbf16>, vector<384x128xbf16>, vector<8x128xf32> -> vector<8x128xf32>
    %c0_314 = arith.constant 0 : index
    %c1792_315 = arith.constant 1792 : index
    %385 = vector.load %arg5[%c0_314, %c1792_315] : memref<1x3072xf32, #tpu.memory_space<vmem>>, vector<1x128xf32>
    %386 = vector.broadcast %385 : vector<1x128xf32> to vector<8x128xf32>
    %387 = arith.addf %384, %386 : vector<8x128xf32>
    %cst_316 = arith.constant 0.000000e+00 : f32
    %388 = vector.broadcast %cst_316 : f32 to vector<8x128xf32>
    %389 = arith.maximumf %387, %388 : vector<8x128xf32>
    %390 = arith.truncf %389 : vector<8x128xf32> to vector<8x128xbf16>
    %c0_317 = arith.constant 0 : index
    %c1792_318 = arith.constant 1792 : index
    %391 = vector.load %arg14[%c0_317, %c1792_318] : memref<8x3072xbf16, #tpu.memory_space<vmem>>, vector<8x128xbf16>
    tpu.vector_store %arg14[%c0_317, %c1792_318], %390 {strides = array<i32>} : memref<8x3072xbf16, #tpu.memory_space<vmem>>, vector<8x128xbf16>,
    %c0_319 = arith.constant 0 : index
    %c1920_320 = arith.constant 1920 : index
    %392 = vector.load %arg13[%c0_319, %c1920_320] : memref<8x3072xbf16, #tpu.memory_space<vmem>>, vector<8x256xbf16>
    %c0_321 = arith.constant 0 : index
    %c1920_322 = arith.constant 1920 : index
    %393 = vector.load %arg4[%c0_321, %c1920_322] : memref<384x3072xbf16, #tpu.memory_space<vmem>>, vector<256x128xbf16>
    %cst_323 = arith.constant dense<0.000000e+00> : vector<8x128xf32>
    %394 = tpu.matmul %392, %393, %cst_323 {dimension_numbers = #tpu.dot_dimension_numbers<[1], [0], [0], [1], [0, 0, 1, 1], [], []>} : vector<8x256xbf16>, vector<256x128xbf16>, vector<8x128xf32> -> vector<8x128xf32>
    %c0_324 = arith.constant 0 : index
    %c1920_325 = arith.constant 1920 : index
    %395 = vector.load %arg5[%c0_324, %c1920_325] : memref<1x3072xf32, #tpu.memory_space<vmem>>, vector<1x128xf32>
    %396 = vector.broadcast %395 : vector<1x128xf32> to vector<8x128xf32>
    %397 = arith.addf %394, %396 : vector<8x128xf32>
    %cst_326 = arith.constant 0.000000e+00 : f32
    %398 = vector.broadcast %cst_326 : f32 to vector<8x128xf32>
    %399 = arith.maximumf %397, %398 : vector<8x128xf32>
    %400 = arith.truncf %399 : vector<8x128xf32> to vector<8x128xbf16>
    %c0_327 = arith.constant 0 : index
    %c1920_328 = arith.constant 1920 : index
    %401 = vector.load %arg14[%c0_327, %c1920_328] : memref<8x3072xbf16, #tpu.memory_space<vmem>>, vector<8x128xbf16>
    tpu.vector_store %arg14[%c0_327, %c1920_328], %400 {strides = array<i32>} : memref<8x3072xbf16, #tpu.memory_space<vmem>>, vector<8x128xbf16>,
    %c0_329 = arith.constant 0 : index
    %c1920_330 = arith.constant 1920 : index
    %402 = vector.load %arg13[%c0_329, %c1920_330] : memref<8x3072xbf16, #tpu.memory_space<vmem>>, vector<8x384xbf16>
    %c0_331 = arith.constant 0 : index
    %c2048_332 = arith.constant 2048 : index
    %403 = vector.load %arg4[%c0_331, %c2048_332] : memref<384x3072xbf16, #tpu.memory_space<vmem>>, vector<384x128xbf16>
    %cst_333 = arith.constant dense<0.000000e+00> : vector<8x128xf32>
    %404 = tpu.matmul %402, %403, %cst_333 {dimension_numbers = #tpu.dot_dimension_numbers<[1], [0], [0], [1], [0, 0, 1, 1], [], []>} : vector<8x384xbf16>, vector<384x128xbf16>, vector<8x128xf32> -> vector<8x128xf32>
    %c0_334 = arith.constant 0 : index
    %c2048_335 = arith.constant 2048 : index
    %405 = vector.load %arg5[%c0_334, %c2048_335] : memref<1x3072xf32, #tpu.memory_space<vmem>>, vector<1x128xf32>
    %406 = vector.broadcast %405 : vector<1x128xf32> to vector<8x128xf32>
    %407 = arith.addf %404, %406 : vector<8x128xf32>
    %cst_336 = arith.constant 0.000000e+00 : f32
    %408 = vector.broadcast %cst_336 : f32 to vector<8x128xf32>
    %409 = arith.maximumf %407, %408 : vector<8x128xf32>
    %410 = arith.truncf %409 : vector<8x128xf32> to vector<8x128xbf16>
    %c0_337 = arith.constant 0 : index
    %c2048_338 = arith.constant 2048 : index
    %411 = vector.load %arg14[%c0_337, %c2048_338] : memref<8x3072xbf16, #tpu.memory_space<vmem>>, vector<8x128xbf16>
    tpu.vector_store %arg14[%c0_337, %c2048_338], %410 {strides = array<i32>} : memref<8x3072xbf16, #tpu.memory_space<vmem>>, vector<8x128xbf16>,
    %c0_339 = arith.constant 0 : index
    %c2048_340 = arith.constant 2048 : index
    %412 = vector.load %arg13[%c0_339, %c2048_340] : memref<8x3072xbf16, #tpu.memory_space<vmem>>, vector<8x384xbf16>
    %c0_341 = arith.constant 0 : index
    %c2176_342 = arith.constant 2176 : index
    %413 = vector.load %arg4[%c0_341, %c2176_342] : memref<384x3072xbf16, #tpu.memory_space<vmem>>, vector<384x128xbf16>
    %cst_343 = arith.constant dense<0.000000e+00> : vector<8x128xf32>
    %414 = tpu.matmul %412, %413, %cst_343 {dimension_numbers = #tpu.dot_dimension_numbers<[1], [0], [0], [1], [0, 0, 1, 1], [], []>} : vector<8x384xbf16>, vector<384x128xbf16>, vector<8x128xf32> -> vector<8x128xf32>
    %c0_344 = arith.constant 0 : index
    %c2176_345 = arith.constant 2176 : index
    %415 = vector.load %arg5[%c0_344, %c2176_345] : memref<1x3072xf32, #tpu.memory_space<vmem>>, vector<1x128xf32>
    %416 = vector.broadcast %415 : vector<1x128xf32> to vector<8x128xf32>
    %417 = arith.addf %414, %416 : vector<8x128xf32>
    %cst_346 = arith.constant 0.000000e+00 : f32
    %418 = vector.broadcast %cst_346 : f32 to vector<8x128xf32>
    %419 = arith.maximumf %417, %418 : vector<8x128xf32>
    %420 = arith.truncf %419 : vector<8x128xf32> to vector<8x128xbf16>
    %c0_347 = arith.constant 0 : index
    %c2176_348 = arith.constant 2176 : index
    %421 = vector.load %arg14[%c0_347, %c2176_348] : memref<8x3072xbf16, #tpu.memory_space<vmem>>, vector<8x128xbf16>
    tpu.vector_store %arg14[%c0_347, %c2176_348], %420 {strides = array<i32>} : memref<8x3072xbf16, #tpu.memory_space<vmem>>, vector<8x128xbf16>,
    %c0_349 = arith.constant 0 : index
    %c2304_350 = arith.constant 2304 : index
    %422 = vector.load %arg13[%c0_349, %c2304_350] : memref<8x3072xbf16, #tpu.memory_space<vmem>>, vector<8x256xbf16>
    %c0_351 = arith.constant 0 : index
    %c2304_352 = arith.constant 2304 : index
    %423 = vector.load %arg4[%c0_351, %c2304_352] : memref<384x3072xbf16, #tpu.memory_space<vmem>>, vector<256x128xbf16>
    %cst_353 = arith.constant dense<0.000000e+00> : vector<8x128xf32>
    %424 = tpu.matmul %422, %423, %cst_353 {dimension_numbers = #tpu.dot_dimension_numbers<[1], [0], [0], [1], [0, 0, 1, 1], [], []>} : vector<8x256xbf16>, vector<256x128xbf16>, vector<8x128xf32> -> vector<8x128xf32>
    %c0_354 = arith.constant 0 : index
    %c2304_355 = arith.constant 2304 : index
    %425 = vector.load %arg5[%c0_354, %c2304_355] : memref<1x3072xf32, #tpu.memory_space<vmem>>, vector<1x128xf32>
    %426 = vector.broadcast %425 : vector<1x128xf32> to vector<8x128xf32>
    %427 = arith.addf %424, %426 : vector<8x128xf32>
    %cst_356 = arith.constant 0.000000e+00 : f32
    %428 = vector.broadcast %cst_356 : f32 to vector<8x128xf32>
    %429 = arith.maximumf %427, %428 : vector<8x128xf32>
    %430 = arith.truncf %429 : vector<8x128xf32> to vector<8x128xbf16>
    %c0_357 = arith.constant 0 : index
    %c2304_358 = arith.constant 2304 : index
    %431 = vector.load %arg14[%c0_357, %c2304_358] : memref<8x3072xbf16, #tpu.memory_space<vmem>>, vector<8x128xbf16>
    tpu.vector_store %arg14[%c0_357, %c2304_358], %430 {strides = array<i32>} : memref<8x3072xbf16, #tpu.memory_space<vmem>>, vector<8x128xbf16>,
    %c0_359 = arith.constant 0 : index
    %c2304_360 = arith.constant 2304 : index
    %432 = vector.load %arg13[%c0_359, %c2304_360] : memref<8x3072xbf16, #tpu.memory_space<vmem>>, vector<8x384xbf16>
    %c0_361 = arith.constant 0 : index
    %c2432_362 = arith.constant 2432 : index
    %433 = vector.load %arg4[%c0_361, %c2432_362] : memref<384x3072xbf16, #tpu.memory_space<vmem>>, vector<384x128xbf16>
    %cst_363 = arith.constant dense<0.000000e+00> : vector<8x128xf32>
    %434 = tpu.matmul %432, %433, %cst_363 {dimension_numbers = #tpu.dot_dimension_numbers<[1], [0], [0], [1], [0, 0, 1, 1], [], []>} : vector<8x384xbf16>, vector<384x128xbf16>, vector<8x128xf32> -> vector<8x128xf32>
    %c0_364 = arith.constant 0 : index
    %c2432_365 = arith.constant 2432 : index
    %435 = vector.load %arg5[%c0_364, %c2432_365] : memref<1x3072xf32, #tpu.memory_space<vmem>>, vector<1x128xf32>
    %436 = vector.broadcast %435 : vector<1x128xf32> to vector<8x128xf32>
    %437 = arith.addf %434, %436 : vector<8x128xf32>
    %cst_366 = arith.constant 0.000000e+00 : f32
    %438 = vector.broadcast %cst_366 : f32 to vector<8x128xf32>
    %439 = arith.maximumf %437, %438 : vector<8x128xf32>
    %440 = arith.truncf %439 : vector<8x128xf32> to vector<8x128xbf16>
    %c0_367 = arith.constant 0 : index
    %c2432_368 = arith.constant 2432 : index
    %441 = vector.load %arg14[%c0_367, %c2432_368] : memref<8x3072xbf16, #tpu.memory_space<vmem>>, vector<8x128xbf16>
    tpu.vector_store %arg14[%c0_367, %c2432_368], %440 {strides = array<i32>} : memref<8x3072xbf16, #tpu.memory_space<vmem>>, vector<8x128xbf16>,
    %c0_369 = arith.constant 0 : index
    %c2432_370 = arith.constant 2432 : index
    %442 = vector.load %arg13[%c0_369, %c2432_370] : memref<8x3072xbf16, #tpu.memory_space<vmem>>, vector<8x384xbf16>
    %c0_371 = arith.constant 0 : index
    %c2560_372 = arith.constant 2560 : index
    %443 = vector.load %arg4[%c0_371, %c2560_372] : memref<384x3072xbf16, #tpu.memory_space<vmem>>, vector<384x128xbf16>
    %cst_373 = arith.constant dense<0.000000e+00> : vector<8x128xf32>
    %444 = tpu.matmul %442, %443, %cst_373 {dimension_numbers = #tpu.dot_dimension_numbers<[1], [0], [0], [1], [0, 0, 1, 1], [], []>} : vector<8x384xbf16>, vector<384x128xbf16>, vector<8x128xf32> -> vector<8x128xf32>
    %c0_374 = arith.constant 0 : index
    %c2560_375 = arith.constant 2560 : index
    %445 = vector.load %arg5[%c0_374, %c2560_375] : memref<1x3072xf32, #tpu.memory_space<vmem>>, vector<1x128xf32>
    %446 = vector.broadcast %445 : vector<1x128xf32> to vector<8x128xf32>
    %447 = arith.addf %444, %446 : vector<8x128xf32>
    %cst_376 = arith.constant 0.000000e+00 : f32
    %448 = vector.broadcast %cst_376 : f32 to vector<8x128xf32>
    %449 = arith.maximumf %447, %448 : vector<8x128xf32>
    %450 = arith.truncf %449 : vector<8x128xf32> to vector<8x128xbf16>
    %c0_377 = arith.constant 0 : index
    %c2560_378 = arith.constant 2560 : index
    %451 = vector.load %arg14[%c0_377, %c2560_378] : memref<8x3072xbf16, #tpu.memory_space<vmem>>, vector<8x128xbf16>
    tpu.vector_store %arg14[%c0_377, %c2560_378], %450 {strides = array<i32>} : memref<8x3072xbf16, #tpu.memory_space<vmem>>, vector<8x128xbf16>,
    %c0_379 = arith.constant 0 : index
    %c2688_380 = arith.constant 2688 : index
    %452 = vector.load %arg13[%c0_379, %c2688_380] : memref<8x3072xbf16, #tpu.memory_space<vmem>>, vector<8x256xbf16>
    %c0_381 = arith.constant 0 : index
    %c2688_382 = arith.constant 2688 : index
    %453 = vector.load %arg4[%c0_381, %c2688_382] : memref<384x3072xbf16, #tpu.memory_space<vmem>>, vector<256x128xbf16>
    %cst_383 = arith.constant dense<0.000000e+00> : vector<8x128xf32>
    %454 = tpu.matmul %452, %453, %cst_383 {dimension_numbers = #tpu.dot_dimension_numbers<[1], [0], [0], [1], [0, 0, 1, 1], [], []>} : vector<8x256xbf16>, vector<256x128xbf16>, vector<8x128xf32> -> vector<8x128xf32>
    %c0_384 = arith.constant 0 : index
    %c2688_385 = arith.constant 2688 : index
    %455 = vector.load %arg5[%c0_384, %c2688_385] : memref<1x3072xf32, #tpu.memory_space<vmem>>, vector<1x128xf32>
    %456 = vector.broadcast %455 : vector<1x128xf32> to vector<8x128xf32>
    %457 = arith.addf %454, %456 : vector<8x128xf32>
    %cst_386 = arith.constant 0.000000e+00 : f32
    %458 = vector.broadcast %cst_386 : f32 to vector<8x128xf32>
    %459 = arith.maximumf %457, %458 : vector<8x128xf32>
    %460 = arith.truncf %459 : vector<8x128xf32> to vector<8x128xbf16>
    %c0_387 = arith.constant 0 : index
    %c2688_388 = arith.constant 2688 : index
    %461 = vector.load %arg14[%c0_387, %c2688_388] : memref<8x3072xbf16, #tpu.memory_space<vmem>>, vector<8x128xbf16>
    tpu.vector_store %arg14[%c0_387, %c2688_388], %460 {strides = array<i32>} : memref<8x3072xbf16, #tpu.memory_space<vmem>>, vector<8x128xbf16>,
    %c0_389 = arith.constant 0 : index
    %c2688_390 = arith.constant 2688 : index
    %462 = vector.load %arg13[%c0_389, %c2688_390] : memref<8x3072xbf16, #tpu.memory_space<vmem>>, vector<8x384xbf16>
    %c0_391 = arith.constant 0 : index
    %c2816_392 = arith.constant 2816 : index
    %463 = vector.load %arg4[%c0_391, %c2816_392] : memref<384x3072xbf16, #tpu.memory_space<vmem>>, vector<384x128xbf16>
    %cst_393 = arith.constant dense<0.000000e+00> : vector<8x128xf32>
    %464 = tpu.matmul %462, %463, %cst_393 {dimension_numbers = #tpu.dot_dimension_numbers<[1], [0], [0], [1], [0, 0, 1, 1], [], []>} : vector<8x384xbf16>, vector<384x128xbf16>, vector<8x128xf32> -> vector<8x128xf32>
    %c0_394 = arith.constant 0 : index
    %c2816_395 = arith.constant 2816 : index
    %465 = vector.load %arg5[%c0_394, %c2816_395] : memref<1x3072xf32, #tpu.memory_space<vmem>>, vector<1x128xf32>
    %466 = vector.broadcast %465 : vector<1x128xf32> to vector<8x128xf32>
    %467 = arith.addf %464, %466 : vector<8x128xf32>
    %cst_396 = arith.constant 0.000000e+00 : f32
    %468 = vector.broadcast %cst_396 : f32 to vector<8x128xf32>
    %469 = arith.maximumf %467, %468 : vector<8x128xf32>
    %470 = arith.truncf %469 : vector<8x128xf32> to vector<8x128xbf16>
    %c0_397 = arith.constant 0 : index
    %c2816_398 = arith.constant 2816 : index
    %471 = vector.load %arg14[%c0_397, %c2816_398] : memref<8x3072xbf16, #tpu.memory_space<vmem>>, vector<8x128xbf16>
    tpu.vector_store %arg14[%c0_397, %c2816_398], %470 {strides = array<i32>} : memref<8x3072xbf16, #tpu.memory_space<vmem>>, vector<8x128xbf16>,
    %cst_399 = arith.constant 0.000000e+00 : bf16
    %472 = vector.broadcast %cst_399 : bf16 to vector<8x128xbf16>
    %c0_400 = arith.constant 0 : index
    %c2944_401 = arith.constant 2944 : index
    %473 = vector.load %arg14[%c0_400, %c2944_401] : memref<8x3072xbf16, #tpu.memory_space<vmem>>, vector<8x128xbf16>
    tpu.vector_store %arg14[%c0_400, %c2944_401], %472 {strides = array<i32>} : memref<8x3072xbf16, #tpu.memory_space<vmem>>, vector<8x128xbf16>,
    %c0_402 = arith.constant 0 : index
    %c0_403 = arith.constant 0 : index
    %474 = vector.load %arg14[%c0_402, %c0_403] : memref<8x3072xbf16, #tpu.memory_space<vmem>>, vector<8x3072xbf16>
    %c0_404 = arith.constant 0 : index
    %c0_405 = arith.constant 0 : index
    %475 = vector.load %arg6[%c0_404, %c0_405] : memref<3072x16xbf16, #tpu.memory_space<vmem>>, vector<3072x16xbf16>
    %cst_406 = arith.constant dense<0.000000e+00> : vector<8x16xf32>
    %476 = tpu.matmul %474, %475, %cst_406 {dimension_numbers = #tpu.dot_dimension_numbers<[1], [0], [0], [1], [0, 0, 1, 1], [], []>} : vector<8x3072xbf16>, vector<3072x16xbf16>, vector<8x16xf32> -> vector<8x16xf32>
    %c0_407 = arith.constant 0 : index
    %c0_408 = arith.constant 0 : index
    %477 = vector.load %arg7[%c0_407, %c0_408] : memref<1x16xf32, #tpu.memory_space<vmem>>, vector<1x16xf32>
    %478 = vector.broadcast %477 : vector<1x16xf32> to vector<8x16xf32>
    %479 = arith.addf %476, %478 : vector<8x16xf32>
    %cst_409 = arith.constant 0.000000e+00 : f32
    %480 = vector.broadcast %cst_409 : f32 to vector<8x16xf32>
    %481 = arith.maximumf %479, %480 : vector<8x16xf32>
    %482 = arith.truncf %481 : vector<8x16xf32> to vector<8x16xbf16>
    %c0_410 = arith.constant 0 : index
    %c0_411 = arith.constant 0 : index
    %483 = vector.load %arg8[%c0_410, %c0_411] : memref<16x64xbf16, #tpu.memory_space<vmem>>, vector<16x64xbf16>
    %cst_412 = arith.constant dense<0.000000e+00> : vector<8x64xf32>
    %484 = tpu.matmul %482, %483, %cst_412 {dimension_numbers = #tpu.dot_dimension_numbers<[1], [0], [0], [1], [0, 0, 1, 1], [], []>} : vector<8x16xbf16>, vector<16x64xbf16>, vector<8x64xf32> -> vector<8x64xf32>
    %c0_413 = arith.constant 0 : index
    %c0_414 = arith.constant 0 : index
    %485 = vector.load %arg9[%c0_413, %c0_414] : memref<1x64xf32, #tpu.memory_space<vmem>>, vector<1x64xf32>
    %486 = vector.broadcast %485 : vector<1x64xf32> to vector<8x64xf32>
    %487 = arith.addf %484, %486 : vector<8x64xf32>
    %cst_415 = arith.constant 0.000000e+00 : f32
    %488 = vector.broadcast %cst_415 : f32 to vector<8x64xf32>
    %489 = arith.maximumf %487, %488 : vector<8x64xf32>
    %c0_416 = arith.constant 0 : index
    %c0_417 = arith.constant 0 : index
    %490 = vector.load %arg10[%c0_416, %c0_417] : memref<1x64xf32, #tpu.memory_space<vmem>>, vector<1x64xf32>
    %491 = vector.broadcast %490 : vector<1x64xf32> to vector<8x64xf32>
    %492 = arith.mulf %489, %491 : vector<8x64xf32>
    %cst_418 = arith.constant dense<0.000000e+00> : vector<8xf32>
    %493 = vector.multi_reduction <add>, %492, %cst_418 [1] : vector<8x64xf32> to vector<8xf32>
    %494 = vector.shape_cast %493 : vector<8xf32> to vector<8x1xf32>
    %c0_419 = arith.constant 0 : index
    %c0_420 = arith.constant 0 : index
    %495 = vector.load %arg11[%c0_419, %c0_420] : memref<1x1xf32, #tpu.memory_space<vmem>>, vector<1x1xf32>
    %496 = vector.broadcast %495 : vector<1x1xf32> to vector<8x1xf32>
    %497 = arith.addf %494, %496 : vector<8x1xf32>
    %c0_421 = arith.constant 0 : index
    %c0_422 = arith.constant 0 : index
    %498 = vector.load %arg12[%c0_421, %c0_422] : memref<8x1xf32, #tpu.memory_space<vmem>>, vector<8x1xf32>
    tpu.vector_store %arg12[%c0_421, %c0_422], %497 {strides = array<i32>} : memref<8x1xf32, #tpu.memory_space<vmem>>, vector<8x1xf32>,
    return
  }
  func.func @transform_0(%arg0: i32) -> (i32, i32) {
    %c0_i32 = arith.constant 0 : i32
    %c0_i32_0 = arith.constant 0 : i32
    return %arg0, %c0_i32 : i32, i32
  }
  func.func @transform_1(%arg0: i32) -> (i32, i32) {
    %c0_i32 = arith.constant 0 : i32
    %c0_i32_0 = arith.constant 0 : i32
    %c0_i32_1 = arith.constant 0 : i32
    return %c0_i32, %c0_i32_0 : i32, i32
  }
  func.func @transform_2(%arg0: i32) -> (i32, i32) {
    %c0_i32 = arith.constant 0 : i32
    %c0_i32_0 = arith.constant 0 : i32
    %c0_i32_1 = arith.constant 0 : i32
    return %c0_i32, %c0_i32_0 : i32, i32
  }
  func.func @transform_3(%arg0: i32) -> (i32, i32) {
    %c0_i32 = arith.constant 0 : i32
    %c0_i32_0 = arith.constant 0 : i32
    %c0_i32_1 = arith.constant 0 : i32
    return %c0_i32, %c0_i32_0 : i32, i32
  }
  func.func @transform_4(%arg0: i32) -> (i32, i32) {
    %c0_i32 = arith.constant 0 : i32
    %c0_i32_0 = arith.constant 0 : i32
    %c0_i32_1 = arith.constant 0 : i32
    return %c0_i32, %c0_i32_0 : i32, i32
  }
  func.func @transform_5(%arg0: i32) -> (i32, i32) {
    %c0_i32 = arith.constant 0 : i32
    %c0_i32_0 = arith.constant 0 : i32
    %c0_i32_1 = arith.constant 0 : i32
    return %c0_i32, %c0_i32_0 : i32, i32
  }
  func.func @transform_6(%arg0: i32) -> (i32, i32) {
    %c0_i32 = arith.constant 0 : i32
    %c0_i32_0 = arith.constant 0 : i32
    %c0_i32_1 = arith.constant 0 : i32
    return %c0_i32, %c0_i32_0 : i32, i32
  }
  func.func @transform_7(%arg0: i32) -> (i32, i32) {
    %c0_i32 = arith.constant 0 : i32
    %c0_i32_0 = arith.constant 0 : i32
    %c0_i32_1 = arith.constant 0 : i32
    return %c0_i32, %c0_i32_0 : i32, i32
  }
  func.func @transform_8(%arg0: i32) -> (i32, i32) {
    %c0_i32 = arith.constant 0 : i32
    %c0_i32_0 = arith.constant 0 : i32
    %c0_i32_1 = arith.constant 0 : i32
    return %c0_i32, %c0_i32_0 : i32, i32
  }
  func.func @transform_9(%arg0: i32) -> (i32, i32) {
    %c0_i32 = arith.constant 0 : i32
    %c0_i32_0 = arith.constant 0 : i32
    %c0_i32_1 = arith.constant 0 : i32
    return %c0_i32, %c0_i32_0 : i32, i32
  }
  func.func @transform_10(%arg0: i32) -> (i32, i32) {
    %c0_i32 = arith.constant 0 : i32
    %c0_i32_0 = arith.constant 0 : i32
    %c0_i32_1 = arith.constant 0 : i32
    return %c0_i32, %c0_i32_0 : i32, i32
  }
  func.func @transform_11(%arg0: i32) -> (i32, i32) {
    %c0_i32 = arith.constant 0 : i32
    %c0_i32_0 = arith.constant 0 : i32
    return %arg0, %c0_i32 : i32, i32
  }
}

</mosaic_0001>

<bundles_post_ra>
// kernel: tpu_custom_call.1
= control target key start
LH: loop header
LB: loop body
LE: loop exit
PB: predicated region body
PF: predicated region fallthrough
CT: control target
= control target key end

     0   :  { %s17136_s0 = inlined_call_operand.hbm [shape: f32[8,1536], index: 0, kind: input, shape index: {}]   ;;  %s17137_s1 = inlined_call_operand.hbm [shape: bf16[256,3072], index: 1, kind: input, shape index: {}]   ;;  %s17138_s2 = inlined_call_operand.hbm [shape: f32[1,3072], index: 2, kind: input, shape index: {}]   ;;  %s17139_s3 = inlined_call_operand.hbm [shape: bf16[384,3072], index: 3, kind: input, shape index: {}]   ;;  %s17140_s4 = inlined_call_operand.hbm [shape: f32[1,3072], index: 4, kind: input, shape index: {}]   ;;  %s17141_s5 = inlined_call_operand.vmem [shape: bf16[3072,16], index: 5, kind: input, shape index: {}]   ;;  %s17142_s6 = inlined_call_operand.hbm [shape: f32[1,16], index: 6, kind: input, shape index: {}]   ;;  %s17143_s7 = inlined_call_operand.hbm [shape: bf16[16,64], index: 7, kind: input, shape index: {}]   ;;  %s17144_s8 = inlined_call_operand.hbm [shape: f32[1,64], index: 8, kind: input, shape index: {}]   ;;  %s17145_s9 = inlined_call_operand.hbm [shape: f32[1,64], index: 9, kind: input, shape index: {}]   ;;  %s17146_s10 = inlined_call_operand.<no memory space> [shape: f32[1,1], index: 10, kind: input, shape index: {}]   ;;  %s17147_s11 = inlined_call_operand.vmem [shape: f32[8,1], index: 11, kind: output, shape index: {}]  }
   0x1   :  { %v16_v0 = vstv %s17146_s10 }
   0x2   :  { %17 = vst [vmem:[#allocation4] sm:$0x1] %v16_v0 }
   0x3   :  { %18 = vsyncpa [#allocation6], 0 }
   0x4   :  { %19 = vsyncpa [#allocation8], 0 }
   0x5   :  { %20 = vsyncpa [#allocation11], 0 }
   0x6   :  { %21 = vsyncpa [#allocation14], 0  ;;  %s38_s21 = sshll.u32 %s17137_s1, 4  ;;  %s39_s21 = int_to_ptr.hbm [resolvable:$true] %s38_s21 }
   0x7   :  { %22 = vsyncpa [#allocation17], 0  ;;  %s16248_s22 = smov [#allocation7]   ;;  %s62_s26 = sshll.u32 %s17139_s3, 4  ;;  %s63_s26 = int_to_ptr.hbm [resolvable:$true] %s62_s26 }
   0x8   :  { %s40_s23 = sshll.u32 %s16248_s22, 4  ;;  %s16249_s27 = smov 1536   ;;  %s41_s23 = int_to_ptr.vmem [resolvable:$true] %s40_s23 }
   0x9   :  { %s16250_s10 = smov 96   ;;  %s16251_s28 = smov [#allocation10]  }
   0xa   :  { %46 = dma.hbm_to_vmem [thread:$0]  %s39_s21, 49152, %s41_s23, [#allocation8], %s16249_s27, %s16249_s27, %s16250_s10  }
   0xb   :  { %s64_s29 = sshll.u32 %s16251_s28, 4  ;;  %s89_s13 = sshll.u32 %s17142_s6, 4  ;;  %s65_s29 = int_to_ptr.vmem [resolvable:$true] %s64_s29  ;;  %s90_s13 = int_to_ptr.hbm [resolvable:$true] %s89_s13 }
   0xc   :  { %70 = dma.hbm_to_vmem [thread:$0]  %s63_s26, 73728, %s65_s29, [#allocation11], %s16249_s27, %s16249_s27, %s16250_s10  }
   0xd   :  { %s113_s15 = sshll.u32 %s17144_s8, 4  ;;  %s16252_s16 = smov [#allocation13]   ;;  %s114_s15 = int_to_ptr.hbm [resolvable:$true] %s113_s15 }
   0xe   :  { %s91_s17 = sshll.u32 %s16252_s16, 4  ;;  %s16253_s3 = smov [#allocation16]   ;;  %s92_s17 = int_to_ptr.vmem [resolvable:$true] %s91_s17 }
   0xf   :  { %94 = dma.hbm_to_vmem [thread:$0]  %s90_s13, 16, %s92_s17, [#allocation14]  }
  0x10   :  { %s115_s18 = sshll.u32 %s16253_s3, 4  ;;  %s28_s21 = sshll.u32 %s17136_s0, 4  ;;  %s116_s18 = int_to_ptr.vmem [resolvable:$true] %s115_s18  ;;  %s29_s21 = int_to_ptr.hbm [resolvable:$true] %s28_s21 }
  0x11   :  { %118 = dma.hbm_to_vmem [thread:$0]  %s114_s15, 16, %s116_s18, [#allocation17]  }
  0x12   :  { %s52_s23 = sshll.u32 %s17138_s2, 4  ;;  %s16254_s24 = smov [#allocation5]   ;;  %s53_s23 = int_to_ptr.hbm [resolvable:$true] %s52_s23 }
  0x13   :  { %s30_s8 = sshll.u32 %s16254_s24, 4  ;;  %s16255_s25 = smov [#allocation9]   ;;  %s31_s8 = int_to_ptr.vmem [resolvable:$true] %s30_s8 }
  0x14   :  { %33 = dma.hbm_to_vmem [thread:$0]  %s29_s21, 1536, %s31_s8, [#allocation6]  }
  0x15   :  { %s54_s26 = sshll.u32 %s16255_s25, 4  ;;  %s76_s28 = sshll.u32 %s17140_s4, 4  ;;  %s55_s26 = int_to_ptr.vmem [resolvable:$true] %s54_s26  ;;  %s77_s28 = int_to_ptr.hbm [resolvable:$true] %s76_s28 }
  0x16   :  { %57 = dma.hbm_to_vmem [thread:$0]  %s53_s23, 384, %s55_s26, [#allocation8]  }
  0x17   :  { %s99_s30 = sshll.u32 %s17143_s7, 4  ;;  %s16256_s12 = smov [#allocation12]   ;;  %s100_s30 = int_to_ptr.hbm [resolvable:$true] %s99_s30 }
  0x18   :  { %s78_s2 = sshll.u32 %s16256_s12, 4  ;;  %s16257_s13 = smov [#allocation15]   ;;  %s79_s2 = int_to_ptr.vmem [resolvable:$true] %s78_s2 }
  0x19   :  { %81 = dma.hbm_to_vmem [thread:$0]  %s77_s28, 384, %s79_s2, [#allocation11]  }
  0x1a   :  { %s101_s1 = sshll.u32 %s16257_s13, 4  ;;  %s16258_s14 = smov 64   ;;  %s102_s1 = int_to_ptr.vmem [resolvable:$true] %s101_s1 }
  0x1b   :  { %s16259_s15 = smov 4   ;;  %s124_s17 = sshll.u32 %s17145_s9, 4  ;;  %s125_s17 = int_to_ptr.hbm [resolvable:$true] %s124_s17 }
  0x1c   :  { %107 = dma.hbm_to_vmem [thread:$0]  %s100_s30, 128, %s102_s1, [#allocation14], %s16258_s14, %s16258_s14, %s16259_s15  }
  0x1d   :  { %s16260_s3 = smov [#allocation18]  }
  0x1e   :  { %s126_s18 = sshll.u32 %s16260_s3, 4  ;;  %s127_s18 = int_to_ptr.vmem [resolvable:$true] %s126_s18 }
  0x1f   :  { %129 = dma.hbm_to_vmem [thread:$0]  %s125_s17, 16, %s127_s18, [#allocation17]  }
  0x20   :  { %16238 = dma.done.wait [#allocation6], 1536  }
  0x21   :  { %16239 = vsyncadd [#allocation6], 4294965760 }
  0x22   :  { %16240 = dma.done.wait [#allocation8], 49536  }
  0x23   :  { %16241 = vsyncadd [#allocation8], 4294917760 }
  0x24   :  { %16242 = dma.done.wait [#allocation11], 74112  }
  0x25   :  { %16243 = vsyncadd [#allocation11], 4294893184 }
  0x26   :  { %16244 = dma.done.wait [#allocation14], 144  }
  0x27   :  { %16245 = vsyncadd [#allocation14], 4294967152 }
  0x28   :  { %16246 = dma.done.wait [#allocation17], 32  }
  0x29   :  { %16247 = vsyncadd [#allocation17], 4294967264  ;;  %v10861_v1 = vld [vmem:[#allocation7 + $0x540] sm:$0xf]  ;;  %v10893_v3 = vld [vmem:[#allocation7 + $0x544] sm:$0xf] }
  0x2a   :  { %v14939_v2 = vld [vmem:[#allocation7 + $0x59c] sm:$0xf0]  ;;  %v14947_v5 = vld [vmem:[#allocation7 + $0x5a0] sm:$0xf0]  ;;  %v10957_v10 = vld [vmem:[#allocation7 + $0x548] sm:$0xf] }
  0x2b   :  { %v10862_v4 = vor.u32 %v14939_v2, %v10861_v1  ;;  %v10925_v6 = vld [vmem:[#allocation7 + $0xb44] sm:$0xf]  ;;  %v10894_v8 = vor.u32 %v14947_v5, %v10893_v3  ;;  %v14963_v11 = vld [vmem:[#allocation7 + $0x5a4] sm:$0xf0]  ;;  %v10857_v12 = vld [vmem:[#allocation7 + $0x480] sm:$0xf] }
  0x2c   :  { %v14955_v7 = vld [vmem:[#allocation7 + $0xba0] sm:$0xf0]  ;;  %v10958_v13 = vor.u32 %v14963_v11, %v10957_v10  ;;  %v14938_v14 = vld [vmem:[#allocation7 + $0x4dc] sm:$0xf0]  ;;  %v10953_v21 = vld [vmem:[#allocation7 + $0x488] sm:$0xf] }
  0x2d   :  { %v10926_v9 = vor.u32 %v14955_v7, %v10925_v6  ;;  %255 = vmatpush.bf16.msra.mxu0 %v10862_v4  ;;  %v10889_v15 = vld [vmem:[#allocation7 + $0x484] sm:$0xf]  ;;  %410 = vmatpush.bf16.msra.mxu1 %v10894_v8  ;;  %v10858_v17 = vor.u32 %v14938_v14, %v10857_v12  ;;  %v14962_v23 = vld [vmem:[#allocation7 + $0x4e4] sm:$0xf0]  ;;  %v10853_v24 = vld [vmem:[#allocation7 + $0x3c0] sm:$0xf] }
  0x2e   :  { %v14946_v16 = vld [vmem:[#allocation7 + $0x4e0] sm:$0xf0]  ;;  %571 = vmatpush.bf16.msra.mxu3 %v10958_v13  ;;  %v14937_v25 = vld [vmem:[#allocation7 + $0x41c] sm:$0xf0]  ;;  %v10954_v26 = vor.u32 %v14962_v23, %v10953_v21  ;;  %v10949_v32 = vld [vmem:[#allocation7 + $0x3c8] sm:$0xf] }
  0x2f   :  { %423 = vmatpush.bf16.msra.mxu2 %v10926_v9  ;;  %v10890_v18 = vor.u32 %v14946_v16, %v10889_v15  ;;  %v10921_v19 = vld [vmem:[#allocation7 + $0xa84] sm:$0xf]  ;;  %v10854_v30 = vor.u32 %v14937_v25, %v10853_v24  ;;  %v14961_v33 = vld [vmem:[#allocation7 + $0x424] sm:$0xf0]  ;;  %v10849_v36 = vld [vmem:[#allocation7 + $0x300] sm:$0xf] }
  0x30   :  { %v14954_v20 = vld [vmem:[#allocation7 + $0xae0] sm:$0xf0]  ;;  %v14936_v37 = vld [vmem:[#allocation7 + $0x35c] sm:$0xf0]  ;;  %v10950_v39 = vor.u32 %v14961_v33, %v10949_v32  ;;  %v10945_v43 = vld [vmem:[#allocation7 + $0x308] sm:$0xf] }
  0x31   :  { %v10922_v22 = vor.u32 %v14954_v20, %v10921_v19  ;;  %v10885_v27 = vld [vmem:[#allocation7 + $0x3c4] sm:$0xf]  ;;  %256 = vmatpush.bf16.msra.mxu0 %v10858_v17  ;;  %411 = vmatpush.bf16.msra.mxu1 %v10890_v18  ;;  %v14960_v44 = vld [vmem:[#allocation7 + $0x364] sm:$0xf0]  ;;  %v10850_v45 = vor.u32 %v14936_v37, %v10849_v36  ;;  %v10845_v48 = vld [vmem:[#allocation7 + $0x240] sm:$0xf] }
  0x32   :  { %v14945_v28 = vld [vmem:[#allocation7 + $0x420] sm:$0xf0]  ;;  %572 = vmatpush.bf16.msra.mxu3 %v10954_v26  ;;  %v14935_v49 = vld [vmem:[#allocation7 + $0x29c] sm:$0xf0]  ;;  %v10946_v51 = vor.u32 %v14960_v44, %v10945_v43  ;;  %v10941_v55 = vld [vmem:[#allocation7 + $0x248] sm:$0xf] }
  0x33   :  { %v10917_v29 = vld [vmem:[#allocation7 + $0x9c4] sm:$0xf]  ;;  %424 = vmatpush.bf16.msra.mxu2 %v10922_v22  ;;  %v10886_v34 = vor.u32 %v14945_v28, %v10885_v27  ;;  %v14959_v56 = vld [vmem:[#allocation7 + $0x2a4] sm:$0xf0]  ;;  %v10846_v57 = vor.u32 %v14935_v49, %v10845_v48  ;;  %v10841_v60 = vld [vmem:[#allocation7 + $0x180] sm:$0xf] }
  0x34   :  { %v14953_v31 = vld [vmem:[#allocation7 + $0xa20] sm:$0xf0]  ;;  %v14934_v61 = vld [vmem:[#allocation7 + $0x1dc] sm:$0xf0]  ;;  %v10942_v63 = vor.u32 %v14959_v56, %v10941_v55  ;;  %v10937_v3 = vld [vmem:[#allocation7 + $0x188] sm:$0xf] }
  0x35   :  { %v10918_v35 = vor.u32 %v14953_v31, %v10917_v29  ;;  %v10881_v38 = vld [vmem:[#allocation7 + $0x304] sm:$0xf]  ;;  %257 = vmatpush.bf16.msra.mxu0 %v10854_v30  ;;  %412 = vmatpush.bf16.msra.mxu1 %v10886_v34  ;;  %v14958_v4 = vld [vmem:[#allocation7 + $0x1e4] sm:$0xf0]  ;;  %v10842_v5 = vor.u32 %v14934_v61, %v10841_v60  ;;  %v10837_v8 = vld [vmem:[#allocation7 + $0xc0] sm:$0xf] }
  0x36   :  { %v14944_v40 = vld [vmem:[#allocation7 + $0x360] sm:$0xf0]  ;;  %573 = vmatpush.bf16.msra.mxu3 %v10950_v39  ;;  %v14933_v9 = vld [vmem:[#allocation7 + $0x11c] sm:$0xf0]  ;;  %v10938_v11 = vor.u32 %v14958_v4, %v10937_v3  ;;  %v10933_v15 = vld [vmem:[#allocation7 + $0xc8] sm:$0xf] }
  0x37   :  { %v10913_v41 = vld [vmem:[#allocation7 + $0x904] sm:$0xf]  ;;  %425 = vmatpush.bf16.msra.mxu2 %v10918_v35  ;;  %v10882_v46 = vor.u32 %v14944_v40, %v10881_v38  ;;  %v14957_v16 = vld [vmem:[#allocation7 + $0x124] sm:$0xf0]  ;;  %v10838_v17 = vor.u32 %v14933_v9, %v10837_v8  ;;  %v10833_v18 = vld [vmem:[#allocation7] sm:$0xf] }
  0x38   :  { %v14952_v42 = vld [vmem:[#allocation7 + $0x960] sm:$0xf0]  ;;  %v14932_v19 = vld [vmem:[#allocation7 + $0x5c] sm:$0xf0]  ;;  %v10934_v25 = vor.u32 %v14957_v16, %v10933_v15  ;;  %v10929_v27 = vld [vmem:[#allocation7 + $0x8] sm:$0xf] }
  0x39   :  { %v10914_v47 = vor.u32 %v14952_v42, %v10913_v41  ;;  %v10877_v50 = vld [vmem:[#allocation7 + $0x244] sm:$0xf]  ;;  %258 = vmatpush.bf16.msra.mxu0 %v10850_v45  ;;  %413 = vmatpush.bf16.msra.mxu1 %v10882_v46  ;;  %v14956_v28 = vld [vmem:[#allocation7 + $0x64] sm:$0xf0]  ;;  %v11021_v31 = vld [vmem:[#allocation7 + $0x54c] sm:$0xf]  ;;  %v10834_v32 = vor.u32 %v14932_v19, %v10833_v18 }
  0x3a   :  { %v14943_v52 = vld [vmem:[#allocation7 + $0x2a0] sm:$0xf0]  ;;  %574 = vmatpush.bf16.msra.mxu3 %v10946_v51  ;;  %v10989_v29 = vld [vmem:[#allocation7 + $0xb48] sm:$0xf]  ;;  %v14979_v33 = vld [vmem:[#allocation7 + $0x5a8] sm:$0xf0]  ;;  %v10930_v40 = vor.u32 %v14956_v28, %v10929_v27 }
  0x3b   :  { %v10909_v53 = vld [vmem:[#allocation7 + $0x844] sm:$0xf]  ;;  %426 = vmatpush.bf16.msra.mxu2 %v10914_v47  ;;  %v10878_v58 = vor.u32 %v14943_v52, %v10877_v50  ;;  %v14971_v30 = vld [vmem:[#allocation7 + $0xba4] sm:$0xf0]  ;;  %v11053_v34 = vld [vmem:[#allocation7 + $0xb4c] sm:$0xf]  ;;  %v11022_v42 = vor.u32 %v14979_v33, %v11021_v31 }
  0x3c   :  { %v14951_v54 = vld [vmem:[#allocation7 + $0x8a0] sm:$0xf0]  ;;  %v14987_v35 = vld [vmem:[#allocation7 + $0xba8] sm:$0xf0]  ;;  %v11085_v38 = vld [vmem:[#allocation7 + $0x550] sm:$0xf]  ;;  %v10990_v41 = vor.u32 %v14971_v30, %v10989_v29 }
  0x3d   :  { %v10910_v59 = vor.u32 %v14951_v54, %v10909_v53  ;;  %v10873_v62 = vld [vmem:[#allocation7 + $0x184] sm:$0xf]  ;;  %259 = vmatpush.bf16.msra.mxu0 %v10846_v57  ;;  %414 = vmatpush.bf16.msra.mxu1 %v10878_v58  ;;  %v14995_v39 = vld [vmem:[#allocation7 + $0x5ac] sm:$0xf0]  ;;  %v11054_v43 = vor.u32 %v14987_v35, %v11053_v34  ;;  %v10985_v44 = vld [vmem:[#allocation7 + $0xa88] sm:$0xf] }
  0x3e   :  { %v14942_v0 = vld [vmem:[#allocation7 + $0x1e0] sm:$0xf0]  ;;  %575 = vmatpush.bf16.msra.mxu3 %v10942_v63  ;;  %v14970_v45 = vld [vmem:[#allocation7 + $0xae4] sm:$0xf0]  ;;  %v11017_v46 = vld [vmem:[#allocation7 + $0x48c] sm:$0xf]  ;;  %v11086_v47 = vor.u32 %v14995_v39, %v11085_v38 }
  0x3f   :  { %v10905_v1 = vld [vmem:[#allocation7 + $0x784] sm:$0xf]  ;;  %427 = vmatpush.bf16.msra.mxu2 %v10910_v59  ;;  %v10874_v6 = vor.u32 %v14942_v0, %v10873_v62  ;;  %v14978_v48 = vld [vmem:[#allocation7 + $0x4e8] sm:$0xf0]  ;;  %v11081_v51 = vld [vmem:[#allocation7 + $0x490] sm:$0xf]  ;;  %v10986_v53 = vor.u32 %v14970_v45, %v10985_v44 }
  0x40   :  { %v14950_v2 = vld [vmem:[#allocation7 + $0x7e0] sm:$0xf0]  ;;  %v11049_v49 = vld [vmem:[#allocation7 + $0xa8c] sm:$0xf]  ;;  %v14994_v52 = vld [vmem:[#allocation7 + $0x4ec] sm:$0xf0]  ;;  %v11018_v56 = vor.u32 %v14978_v48, %v11017_v46 }
  0x41   :  { %v10906_v7 = vor.u32 %v14950_v2, %v10905_v1  ;;  %v10869_v10 = vld [vmem:[#allocation7 + $0xc4] sm:$0xf]  ;;  %260 = vmatpush.bf16.msra.mxu0 %v10842_v5  ;;  %415 = vmatpush.bf16.msra.mxu1 %v10874_v6  ;;  %v14986_v50 = vld [vmem:[#allocation7 + $0xae8] sm:$0xf0]  ;;  %v10981_v54 = vld [vmem:[#allocation7 + $0x9c8] sm:$0xf]  ;;  %v11082_v61 = vor.u32 %v14994_v52, %v11081_v51 }
  0x42   :  { %v14941_v12 = vld [vmem:[#allocation7 + $0x120] sm:$0xf0]  ;;  %576 = vmatpush.bf16.msra.mxu3 %v10938_v11  ;;  %v14969_v55 = vld [vmem:[#allocation7 + $0xa24] sm:$0xf0]  ;;  %v11050_v57 = vor.u32 %v14986_v50, %v11049_v49  ;;  %v11013_v58 = vld [vmem:[#allocation7 + $0x3cc] sm:$0xf] }
  0x43   :  { %v10901_v13 = vld [vmem:[#allocation7 + $0x6c4] sm:$0xf]  ;;  %428 = vmatpush.bf16.msra.mxu2 %v10906_v7  ;;  %v10870_v20 = vor.u32 %v14941_v12, %v10869_v10  ;;  %v14977_v59 = vld [vmem:[#allocation7 + $0x428] sm:$0xf0]  ;;  %v11077_v1 = vld [vmem:[#allocation7 + $0x3d0] sm:$0xf]  ;;  %v10982_v4 = vor.u32 %v14969_v55, %v10981_v54 }
  0x44   :  { %v14949_v14 = vld [vmem:[#allocation7 + $0x720] sm:$0xf0]  ;;  %v11045_v62 = vld [vmem:[#allocation7 + $0x9cc] sm:$0xf]  ;;  %v14993_v2 = vld [vmem:[#allocation7 + $0x42c] sm:$0xf0]  ;;  %v11014_v5 = vor.u32 %v14977_v59, %v11013_v58 }
  0x45   :  { %v10902_v21 = vor.u32 %v14949_v14, %v10901_v13  ;;  %v10865_v22 = vld [vmem:[#allocation7 + $0x4] sm:$0xf]  ;;  %261 = vmatpush.bf16.msra.mxu0 %v10838_v17  ;;  %416 = vmatpush.bf16.msra.mxu1 %v10870_v20  ;;  %v14985_v63 = vld [vmem:[#allocation7 + $0xa28] sm:$0xf0]  ;;  %v10977_v7 = vld [vmem:[#allocation7 + $0x908] sm:$0xf]  ;;  %v11078_v12 = vor.u32 %v14993_v2, %v11077_v1 }
  0x46   :  { %v14940_v23 = vld [vmem:[#allocation7 + $0x60] sm:$0xf0]  ;;  %577 = vmatpush.bf16.msra.mxu3 %v10934_v25  ;;  %v170_v0 = vld [vmem:[#allocation5 + $0x8] sm:$0xff]  ;;  %v11046_v6 = vor.u32 %v14985_v63, %v11045_v62  ;;  %v11073_v16 = vld [vmem:[#allocation7 + $0x310] sm:$0xf]  ;;  %vm10788_vm0 = vcmask 130048  }
  0x47   :  { %v10897_v24 = vld [vmem:[#allocation7 + $0x604] sm:$0xf]  ;;  %429 = vmatpush.bf16.msra.mxu2 %v10902_v21  ;;  %v10866_v36 = vor.u32 %v14940_v23, %v10865_v22  ;;  %v14968_v8 = vld [vmem:[#allocation7 + $0x964] sm:$0xf0]  ;;  %v11009_v9 = vld [vmem:[#allocation7 + $0x30c] sm:$0xf] }
  0x48   :  { %v14948_v26 = vld [vmem:[#allocation7 + $0x660] sm:$0xf0]  ;;  %v14976_v13 = vld [vmem:[#allocation7 + $0x368] sm:$0xf0]  ;;  %v14992_v17 = vld [vmem:[#allocation7 + $0x36c] sm:$0xf0]  ;;  %v10978_v20 = vor.u32 %v14968_v8, %v10977_v7 }
  0x49   :  { %v10898_v37 = vor.u32 %v14948_v26, %v10897_v24  ;;  %262 = vmatpush.bf16.msra.mxu0 %v10834_v32  ;;  %417 = vmatpush.bf16.msra.mxu1 %v10866_v36  ;;  %v169_v60 = vld [vmem:[#allocation5] sm:$0xff]  ;;  %v11041_v14 = vld [vmem:[#allocation7 + $0x90c] sm:$0xf]  ;;  %v11010_v21 = vor.u32 %v14976_v13, %v11009_v9  ;;  %v10973_v23 = vld [vmem:[#allocation7 + $0x848] sm:$0xf]  ;;  %v11074_v26 = vor.u32 %v14992_v17, %v11073_v16  ;;  %vm10811_vm1 = vcmask 523264  }
  0x4a   :  { %578 = vmatpush.bf16.msra.mxu3 %v10930_v40  ;;  %v181_v3 = vpack.c.bf16 %v170_v0, %v169_v60  ;;  %v14984_v15 = vld [vmem:[#allocation7 + $0x968] sm:$0xf0]  ;;  %v14967_v24 = vld [vmem:[#allocation7 + $0x8a4] sm:$0xf0]  ;;  %v11069_v30 = vld [vmem:[#allocation7 + $0x250] sm:$0xf] }
  0x4b   :  { %430 = vmatpush.bf16.msra.mxu2 %v10898_v37  ;;  %v11042_v22 = vor.u32 %v14984_v15, %v11041_v14  ;;  %v11005_v25 = vld [vmem:[#allocation7 + $0x24c] sm:$0xf]  ;;  %v14991_v31 = vld [vmem:[#allocation7 + $0x2ac] sm:$0xf0]  ;;  %v10974_v32 = vor.u32 %v14967_v24, %v10973_v23  ;;  %v10969_v35 = vld [vmem:[#allocation7 + $0x788] sm:$0xf] }
  0x4c   :  { %v309_v10 = vunpack.c.h.b16 %v181_v3  ;;  %v308_v11 = vunpack.c.l.b16 %v181_v3  ;;  %263 = vmatmul.bf16.vlgmr.msra.gmra.mxu0 %v181_v3  ;;  %v14975_v27 = vld [vmem:[#allocation7 + $0x2a8] sm:$0xf0]  ;;  %v14966_v36 = vld [vmem:[#allocation7 + $0x7e4] sm:$0xf0]  ;;  %v11070_v38 = vor.u32 %v14991_v31, %v11069_v30  ;;  %v11061_v54 = vld [vmem:[#allocation7 + $0xd0] sm:$0xf] }
  0x4d   :  { %584 = vmatpush.bf16.msrb.mxu0 %v10990_v41  ;;  %736 = vmatpush.bf16.msrb.mxu1 %v11022_v42  ;;  %v11037_v28 = vld [vmem:[#allocation7 + $0x84c] sm:$0xf]  ;;  %v11006_v33 = vor.u32 %v14975_v27, %v11005_v25  ;;  %v11065_v42 = vld [vmem:[#allocation7 + $0x190] sm:$0xf]  ;;  %v10970_v44 = vor.u32 %v14966_v36, %v10969_v35  ;;  %v14965_v48 = vld [vmem:[#allocation7 + $0x724] sm:$0xf0] }
  0x4e   :  { %897 = vmatpush.bf16.msrb.mxu3 %v11086_v47  ;;  %v16352_v18 = vpack.c.b16 %v309_v10, %v309_v10  ;;  %v310_v19 = vpack.c.b16 %v308_v11, %v308_v11  ;;  %v14983_v29 = vld [vmem:[#allocation7 + $0x8a8] sm:$0xf0]  ;;  %v10965_v47 = vld [vmem:[#allocation7 + $0x6c8] sm:$0xf]  ;;  %v14989_v55 = vld [vmem:[#allocation7 + $0x12c] sm:$0xf0] }
  0x4f   :  { %749 = vmatpush.bf16.msrb.mxu2 %v11054_v43  ;;  %v11038_v34 = vor.u32 %v14983_v29, %v11037_v28  ;;  %v11001_v37 = vld [vmem:[#allocation7 + $0x18c] sm:$0xf]  ;;  %v14990_v43 = vld [vmem:[#allocation7 + $0x1ec] sm:$0xf0]  ;;  %v14964_v58 = vld [vmem:[#allocation7 + $0x664] sm:$0xf0]  ;;  %v11062_v2 = vor.u32 %v14989_v55, %v11061_v54 }
  0x50   :  { %431 = vmatmul.bf16.vlgmr.msra.gmra.mxu2 %v16352_v18  ;;  %579 = vmatmul.bf16.vlgmr.msra.gmra.mxu3 %v310_v19  ;;  %v14974_v39 = vld [vmem:[#allocation7 + $0x1e8] sm:$0xf0]  ;;  %v11066_v50 = vor.u32 %v14990_v43, %v11065_v42  ;;  %v11057_v1 = vld [vmem:[#allocation7 + $0x10] sm:$0xf]  ;;  %v15011_v7 = vld [vmem:[#allocation7 + $0x5b0] sm:$0xf0] }
  0x51   :  { %585 = vmatpush.bf16.msrb.mxu0 %v10986_v53  ;;  %737 = vmatpush.bf16.msrb.mxu1 %v11018_v56  ;;  %v11033_v40 = vld [vmem:[#allocation7 + $0x78c] sm:$0xf]  ;;  %v11002_v45 = vor.u32 %v14974_v39, %v11001_v37  ;;  %v10961_v56 = vld [vmem:[#allocation7 + $0x608] sm:$0xf]  ;;  %v14988_v3 = vld [vmem:[#allocation7 + $0x6c] sm:$0xf0] }
  0x52   :  { %898 = vmatpush.bf16.msrb.mxu3 %v11082_v61  ;;  %418 = vmatmul.bf16.vlgmr.msra.gmra.mxu1 %v310_v19  ;;  %v14982_v41 = vld [vmem:[#allocation7 + $0x7e8] sm:$0xf0]  ;;  %v171_v8 = vld [vmem:[#allocation5 + $0x10] sm:$0xff]  ;;  %v10962_v9 = vor.u32 %v14964_v58, %v10961_v56  ;;  %v11213_v15 = vld [vmem:[#allocation7 + $0x558] sm:$0xf]  ;;  %v11058_v19 = vor.u32 %v14988_v3, %v11057_v1  ;;  %vm10820_vm2 = vcmask 7168  }
  0x53   :  { %750 = vmatpush.bf16.msrb.mxu2 %v11050_v57  ;;  %v11034_v46 = vor.u32 %v14982_v41, %v11033_v40  ;;  %v10997_v49 = vld [vmem:[#allocation7 + $0xcc] sm:$0xf]  ;;  %v10966_v57 = vor.u32 %v14965_v48, %v10965_v47  ;;  %v11181_v10 = vld [vmem:[#allocation7 + $0xb54] sm:$0xf]  ;;  %v15027_v16 = vld [vmem:[#allocation7 + $0x5b4] sm:$0xf0] }
  0x54   :  { %v14973_v51 = vld [vmem:[#allocation7 + $0x128] sm:$0xf0]  ;;  %v15019_v11 = vld [vmem:[#allocation7 + $0xbb0] sm:$0xf0]  ;;  %v11113_v23 = vld [vmem:[#allocation7 + $0xa90] sm:$0xf]  ;;  %v11214_v27 = vor.u32 %v15027_v16, %v11213_v15 }
  0x55   :  { %586 = vmatpush.bf16.msrb.mxu0 %v10982_v4  ;;  %738 = vmatpush.bf16.msrb.mxu1 %v11014_v5  ;;  %v11029_v52 = vld [vmem:[#allocation7 + $0x6cc] sm:$0xf]  ;;  %v10998_v61 = vor.u32 %v14973_v51, %v10997_v49  ;;  %v11117_v4 = vld [vmem:[#allocation7 + $0xb50] sm:$0xf]  ;;  %v11145_v25 = vld [vmem:[#allocation7 + $0x494] sm:$0xf] }
  0x56   :  { %899 = vmatpush.bf16.msrb.mxu3 %v11078_v12  ;;  %v14981_v53 = vld [vmem:[#allocation7 + $0x728] sm:$0xf0]  ;;  %v15003_v5 = vld [vmem:[#allocation7 + $0xbac] sm:$0xf0]  ;;  %v172_v12 = vld [vmem:[#allocation5 + $0x18] sm:$0xff] }
  0x57   :  { %751 = vmatpush.bf16.msrb.mxu2 %v11046_v6  ;;  %v10993_v59 = vld [vmem:[#allocation7 + $0xc] sm:$0xf]  ;;  %v11030_v62 = vor.u32 %v14981_v53, %v11029_v52  ;;  %v11149_v6 = vld [vmem:[#allocation7 + $0x554] sm:$0xf]  ;;  %v16355_v17 = vpack.c.bf16 %v172_v12, %v171_v8  ;;  %v15002_v24 = vld [vmem:[#allocation7 + $0xaec] sm:$0xf0] }
  0x58   :  { %v14972_v60 = vld [vmem:[#allocation7 + $0x68] sm:$0xf0]  ;;  %v15010_v28 = vld [vmem:[#allocation7 + $0x4f0] sm:$0xf0]  ;;  %v11209_v31 = vld [vmem:[#allocation7 + $0x498] sm:$0xf] }
  0x59   :  { %587 = vmatpush.bf16.msrb.mxu0 %v10978_v20  ;;  %739 = vmatpush.bf16.msrb.mxu1 %v11010_v21  ;;  %v11025_v63 = vld [vmem:[#allocation7 + $0x60c] sm:$0xf]  ;;  %v10994_v13 = vor.u32 %v14972_v60, %v10993_v59  ;;  %v11118_v20 = vor.u32 %v15003_v5, %v11117_v4  ;;  %v11150_v21 = vor.u32 %v15011_v7, %v11149_v6  ;;  %v11177_v29 = vld [vmem:[#allocation7 + $0xa94] sm:$0xf]  ;;  %v11109_v37 = vld [vmem:[#allocation7 + $0x9d0] sm:$0xf] }
  0x5a   :  { %900 = vmatpush.bf16.msrb.mxu3 %v11074_v26  ;;  %v14980_v0 = vld [vmem:[#allocation7 + $0x668] sm:$0xf0]  ;;  %v637_v26 = vunpack.c.l.b16 %v16355_v17  ;;  %v15018_v30 = vld [vmem:[#allocation7 + $0xaf0] sm:$0xf0]  ;;  %v11146_v35 = vor.u32 %v15010_v28, %v11145_v25  ;;  %v11105_v49 = vld [vmem:[#allocation7 + $0x910] sm:$0xf] }
  0x5b   :  { %752 = vmatpush.bf16.msrb.mxu2 %v11042_v22  ;;  %v11026_v14 = vor.u32 %v14980_v0, %v11025_v63  ;;  %v11182_v22 = vor.u32 %v15019_v11, %v11181_v10  ;;  %v11178_v36 = vor.u32 %v15018_v30, %v11177_v29  ;;  %v11141_v39 = vld [vmem:[#allocation7 + $0x3d4] sm:$0xf]  ;;  %v11201_v56 = vld [vmem:[#allocation7 + $0x318] sm:$0xf]  ;;  %v11101_v60 = vld [vmem:[#allocation7 + $0x850] sm:$0xf] }
  0x5c   :  { %v15009_v41 = vld [vmem:[#allocation7 + $0x430] sm:$0xf0]  ;;  %v11197_v3 = vld [vmem:[#allocation7 + $0x258] sm:$0xf]  ;;  %v11097_v8 = vld [vmem:[#allocation7 + $0x790] sm:$0xf] }
  0x5d   :  { %588 = vmatpush.bf16.msrb.mxu0 %v10974_v32  ;;  %740 = vmatpush.bf16.msrb.mxu1 %v11006_v33  ;;  %v15026_v32 = vld [vmem:[#allocation7 + $0x4f4] sm:$0xf0]  ;;  %v16358_v33 = vpack.c.b16 %v637_v26, %v637_v26  ;;  %v11173_v42 = vld [vmem:[#allocation7 + $0x9d4] sm:$0xf]  ;;  %v11142_v47 = vor.u32 %v15009_v41, %v11141_v39 }
  0x5e   :  { %901 = vmatpush.bf16.msrb.mxu3 %v11070_v38  ;;  %v15001_v38 = vld [vmem:[#allocation7 + $0xa2c] sm:$0xf0]  ;;  %v11210_v40 = vor.u32 %v15026_v32, %v11209_v31  ;;  %v15017_v43 = vld [vmem:[#allocation7 + $0xa30] sm:$0xf0]  ;;  %v15023_v4 = vld [vmem:[#allocation7 + $0x2b4] sm:$0xf0] }
  0x5f   :  { %753 = vmatpush.bf16.msrb.mxu2 %v11038_v34  ;;  %v11114_v34 = vor.u32 %v15002_v24, %v11113_v23  ;;  %v11174_v48 = vor.u32 %v15017_v43, %v11173_v42  ;;  %v11137_v51 = vld [vmem:[#allocation7 + $0x314] sm:$0xf]  ;;  %v11198_v11 = vor.u32 %v15023_v4, %v11197_v3  ;;  %v11193_v15 = vld [vmem:[#allocation7 + $0x198] sm:$0xf]  ;;  %v11089_v31 = vld [vmem:[#allocation7 + $0x610] sm:$0xf] }
  0x60   :  { %v15008_v53 = vld [vmem:[#allocation7 + $0x370] sm:$0xf0]  ;;  %v15022_v16 = vld [vmem:[#allocation7 + $0x1f4] sm:$0xf0]  ;;  %v14996_v32 = vld [vmem:[#allocation7 + $0x66c] sm:$0xf0] }
  0x61   :  { %589 = vmatpush.bf16.msrb.mxu0 %v10970_v44  ;;  %741 = vmatpush.bf16.msrb.mxu1 %v11002_v45  ;;  %v11205_v44 = vld [vmem:[#allocation7 + $0x3d8] sm:$0xf]  ;;  %v11169_v54 = vld [vmem:[#allocation7 + $0x914] sm:$0xf]  ;;  %v11138_v59 = vor.u32 %v15008_v53, %v11137_v51  ;;  %v11245_v43 = vld [vmem:[#allocation7 + $0x55c] sm:$0xf]  ;;  %v962_v51 = vunpack.c.h.b16 %v16355_v17 }
  0x62   :  { %902 = vmatpush.bf16.msrb.mxu3 %v11066_v50  ;;  %v15025_v45 = vld [vmem:[#allocation7 + $0x434] sm:$0xf0]  ;;  %v15000_v50 = vld [vmem:[#allocation7 + $0x96c] sm:$0xf0]  ;;  %v15016_v55 = vld [vmem:[#allocation7 + $0x970] sm:$0xf0] }
  0x63   :  { %754 = vmatpush.bf16.msrb.mxu2 %v11034_v46  ;;  %v11110_v46 = vor.u32 %v15001_v38, %v11109_v37  ;;  %v11206_v52 = vor.u32 %v15025_v45, %v11205_v44  ;;  %v11106_v58 = vor.u32 %v15000_v50, %v11105_v49  ;;  %v15007_v0 = vld [vmem:[#allocation7 + $0x2b0] sm:$0xf0]  ;;  %v11189_v29 = vld [vmem:[#allocation7 + $0xd8] sm:$0xf]  ;;  %v15035_v45 = vld [vmem:[#allocation7 + $0x5b8] sm:$0xf0] }
  0x64   :  { %v11165_v1 = vld [vmem:[#allocation7 + $0x854] sm:$0xf]  ;;  %v15021_v30 = vld [vmem:[#allocation7 + $0x134] sm:$0xf0]  ;;  %v11309_v49 = vld [vmem:[#allocation7 + $0x560] sm:$0xf] }
  0x65   :  { %590 = vmatpush.bf16.msrb.mxu0 %v10966_v57  ;;  %742 = vmatpush.bf16.msrb.mxu1 %v10998_v61  ;;  %v15024_v57 = vld [vmem:[#allocation7 + $0x374] sm:$0xf0]  ;;  %v14999_v61 = vld [vmem:[#allocation7 + $0x8ac] sm:$0xf0]  ;;  %v11129_v10 = vld [vmem:[#allocation7 + $0x194] sm:$0xf]  ;;  %v11190_v44 = vor.u32 %v15021_v30, %v11189_v29 }
  0x66   :  { %903 = vmatpush.bf16.msrb.mxu3 %v11062_v2  ;;  %v11202_v63 = vor.u32 %v15024_v57, %v11201_v56  ;;  %v15015_v2 = vld [vmem:[#allocation7 + $0x8b0] sm:$0xf0]  ;;  %v11102_v5 = vor.u32 %v14999_v61, %v11101_v60  ;;  %v11185_v41 = vld [vmem:[#allocation7 + $0x18] sm:$0xf]  ;;  %v15051_v50 = vld [vmem:[#allocation7 + $0x5bc] sm:$0xf0]  ;;  %v11246_v57 = vor.u32 %v15035_v45, %v11245_v43 }
  0x67   :  { %755 = vmatpush.bf16.msrb.mxu2 %v11030_v62  ;;  %v11133_v62 = vld [vmem:[#allocation7 + $0x254] sm:$0xf]  ;;  %v11166_v7 = vor.u32 %v15015_v2, %v11165_v1  ;;  %v15020_v42 = vld [vmem:[#allocation7 + $0x74] sm:$0xf0]  ;;  %v15034_v60 = vld [vmem:[#allocation7 + $0x4f8] sm:$0xf0] }
  0x68   :  { %v11134_v6 = vor.u32 %v15007_v0, %v11133_v62  ;;  %v15006_v12 = vld [vmem:[#allocation7 + $0x1f0] sm:$0xf0]  ;;  %v11186_v56 = vor.u32 %v15020_v42, %v11185_v41  ;;  %v11273_v61 = vld [vmem:[#allocation7 + $0xa9c] sm:$0xf]  ;;  %v11305_v17 = vld [vmem:[#allocation7 + $0x4a0] sm:$0xf] }
  0x69   :  { %591 = vmatpush.bf16.msrb.mxu0 %v10962_v9  ;;  %743 = vmatpush.bf16.msrb.mxu1 %v10994_v13  ;;  %v14998_v9 = vld [vmem:[#allocation7 + $0x7ec] sm:$0xf0]  ;;  %v11161_v13 = vld [vmem:[#allocation7 + $0x794] sm:$0xf]  ;;  %v15042_v0 = vld [vmem:[#allocation7 + $0xaf8] sm:$0xf0] }
  0x6a   :  { %904 = vmatpush.bf16.msrb.mxu3 %v11058_v19  ;;  %v11098_v19 = vor.u32 %v14998_v9, %v11097_v8  ;;  %v11125_v24 = vld [vmem:[#allocation7 + $0xd4] sm:$0xf]  ;;  %v15050_v1 = vld [vmem:[#allocation7 + $0x4fc] sm:$0xf0]  ;;  %v15033_v8 = vld [vmem:[#allocation7 + $0x438] sm:$0xf0] }
  0x6b   :  { %756 = vmatpush.bf16.msrb.mxu2 %v11026_v14  ;;  %v15014_v14 = vld [vmem:[#allocation7 + $0x7f0] sm:$0xf0]  ;;  %v11337_v2 = vld [vmem:[#allocation7 + $0xaa0] sm:$0xf]  ;;  %v11269_v9 = vld [vmem:[#allocation7 + $0x9dc] sm:$0xf] }
  0x6c   :  { %592 = vmatmul.bf16.vlgmr.msrb.gmra.mxu0 %v16352_v18  ;;  %744 = vmatmul.bf16.vlgmr.msrb.gmra.mxu1 %v16352_v18  ;;  %v11162_v23 = vor.u32 %v15014_v14, %v11161_v13  ;;  %v15005_v25 = vld [vmem:[#allocation7 + $0x130] sm:$0xf0]  ;;  %v15058_v3 = vld [vmem:[#allocation7 + $0xafc] sm:$0xf0]  ;;  %v11229_v30 = vld [vmem:[#allocation7 + $0x25c] sm:$0xf] }
  0x6d   :  { %910 = vmatpush.bf16.msra.mxu0 %v11118_v20  ;;  %1061 = vmatpush.bf16.msra.mxu1 %v11150_v21  ;;  %v11093_v20 = vld [vmem:[#allocation7 + $0x6d0] sm:$0xf]  ;;  %v11157_v26 = vld [vmem:[#allocation7 + $0x6d4] sm:$0xf]  ;;  %v11126_v39 = vor.u32 %v15005_v25, %v11125_v24  ;;  %v15049_v13 = vld [vmem:[#allocation7 + $0x43c] sm:$0xf0] }
  0x6e   :  { %1158 = vmatpush.bf16.msra.mxu3 %v11214_v27  ;;  %757 = vmatmul.bf16.vlgmr.msrb.gmra.mxu2 %v16358_v33  ;;  %v14997_v21 = vld [vmem:[#allocation7 + $0x72c] sm:$0xf0]  ;;  %v11194_v27 = vor.u32 %v15022_v16, %v11193_v15  ;;  %v15013_v28 = vld [vmem:[#allocation7 + $0x730] sm:$0xf0]  ;;  %v11333_v14 = vld [vmem:[#allocation7 + $0x9e0] sm:$0xf] }
  0x6f   :  { %1074 = vmatpush.bf16.msra.mxu2 %v11182_v22  ;;  %905 = vmatmul.bf16.vlgmr.msrb.gmra.mxu3 %v16352_v18  ;;  %v11170_v18 = vor.u32 %v15016_v55, %v11169_v54  ;;  %v11130_v22 = vor.u32 %v15006_v12, %v11129_v10  ;;  %v11153_v37 = vld [vmem:[#allocation7 + $0x614] sm:$0xf]  ;;  %v11341_v54 = vld [vmem:[#allocation7 + $0xb60] sm:$0xf]  ;;  %v11338_v10 = vor.u32 %v15058_v3, %v11337_v2  ;;  %v15040_v24 = vld [vmem:[#allocation7 + $0x978] sm:$0xf0] }
  0x70   :  { %v15012_v38 = vld [vmem:[#allocation7 + $0x670] sm:$0xf0]  ;;  %v15059_v55 = vld [vmem:[#allocation7 + $0xbbc] sm:$0xf0]  ;;  %v11225_v43 = vld [vmem:[#allocation7 + $0x19c] sm:$0xf] }
  0x71   :  { %911 = vmatpush.bf16.msra.mxu0 %v11114_v34  ;;  %1062 = vmatpush.bf16.msra.mxu1 %v11146_v35  ;;  %v11094_v34 = vor.u32 %v14997_v21, %v11093_v20  ;;  %v11121_v35 = vld [vmem:[#allocation7 + $0x14] sm:$0xf]  ;;  %v11154_v53 = vor.u32 %v15012_v38, %v11153_v37  ;;  %v11342_v62 = vor.u32 %v15059_v55, %v11341_v54  ;;  %v11301_v12 = vld [vmem:[#allocation7 + $0x3e0] sm:$0xf]  ;;  %v15032_v20 = vld [vmem:[#allocation7 + $0x378] sm:$0xf0] }
  0x72   :  { %1159 = vmatpush.bf16.msra.mxu3 %v11210_v40  ;;  %v11158_v40 = vor.u32 %v15013_v28, %v11157_v26  ;;  %v15057_v15 = vld [vmem:[#allocation7 + $0xa3c] sm:$0xf0]  ;;  %v11221_v54 = vld [vmem:[#allocation7 + $0xdc] sm:$0xf]  ;;  %v174_v2 = vld [vmem:[#allocation5 + $0x28] sm:$0xff] }
  0x73   :  { %1075 = vmatpush.bf16.msra.mxu2 %v11178_v36  ;;  %v15004_v36 = vld [vmem:[#allocation7 + $0x70] sm:$0xf0]  ;;  %v11297_v25 = vld [vmem:[#allocation7 + $0x320] sm:$0xf]  ;;  %v11334_v26 = vor.u32 %v15057_v15, %v11333_v14  ;;  %v15029_v55 = vld [vmem:[#allocation7 + $0x138] sm:$0xf0] }
  0x74   :  { %v11329_v28 = vld [vmem:[#allocation7 + $0x920] sm:$0xf]  ;;  %v11217_v3 = vld [vmem:[#allocation7 + $0x1c] sm:$0xf]  ;;  %v11373_v14 = vld [vmem:[#allocation7 + $0x564] sm:$0xf] }
  0x75   :  { %912 = vmatpush.bf16.msra.mxu0 %v11110_v46  ;;  %1063 = vmatpush.bf16.msra.mxu1 %v11142_v47  ;;  %v11277_v46 = vld [vmem:[#allocation7 + $0xb5c] sm:$0xf]  ;;  %v11293_v37 = vld [vmem:[#allocation7 + $0x260] sm:$0xf] }
  0x76   :  { %1160 = vmatpush.bf16.msra.mxu3 %v11206_v52  ;;  %v15043_v47 = vld [vmem:[#allocation7 + $0xbb8] sm:$0xf0]  ;;  %v11122_v52 = vor.u32 %v15004_v36, %v11121_v35  ;;  %v15055_v41 = vld [vmem:[#allocation7 + $0x8bc] sm:$0xf0] }
  0x77   :  { %1076 = vmatpush.bf16.msra.mxu2 %v11174_v48  ;;  %v11090_v48 = vor.u32 %v14996_v32, %v11089_v31  ;;  %v15031_v31 = vld [vmem:[#allocation7 + $0x2b8] sm:$0xf0] }
  0x78   :  { %v11261_v35 = vld [vmem:[#allocation7 + $0x85c] sm:$0xf]  ;;  %v11230_v42 = vor.u32 %v15031_v31, %v11229_v30 }
  0x79   :  { %913 = vmatpush.bf16.msra.mxu0 %v11106_v58  ;;  %1064 = vmatpush.bf16.msra.mxu1 %v11138_v59  ;;  %v11278_v58 = vor.u32 %v15043_v47, %v11277_v46  ;;  %v11310_v59 = vor.u32 %v15051_v50, %v11309_v49  ;;  %v15039_v36 = vld [vmem:[#allocation7 + $0x8b8] sm:$0xf0]  ;;  %v11289_v49 = vld [vmem:[#allocation7 + $0x1a0] sm:$0xf] }
  0x7a   :  { %1161 = vmatpush.bf16.msra.mxu3 %v11202_v63  ;;  %v16365_v63 = vpack.c.b16 %v962_v51, %v962_v51  ;;  %v11262_v45 = vor.u32 %v15039_v36, %v11261_v35  ;;  %v11257_v47 = vld [vmem:[#allocation7 + $0x79c] sm:$0xf]  ;;  %v15046_v51 = vld [vmem:[#allocation7 + $0x1fc] sm:$0xf0]  ;;  %v15066_v35 = vld [vmem:[#allocation7 + $0x500] sm:$0xf0] }
  0x7b   :  { %1077 = vmatpush.bf16.msra.mxu2 %v11170_v18  ;;  %v11241_v18 = vld [vmem:[#allocation7 + $0x49c] sm:$0xf]  ;;  %v11401_v36 = vld [vmem:[#allocation7 + $0xaa4] sm:$0xf] }
  0x7c   :  { %v11242_v4 = vor.u32 %v15034_v60, %v11241_v18  ;;  %v11290_v18 = vor.u32 %v15046_v51, %v11289_v49  ;;  %v11285_v60 = vld [vmem:[#allocation7 + $0xe0] sm:$0xf]  ;;  %v11397_v49 = vld [vmem:[#allocation7 + $0x9e4] sm:$0xf]  ;;  %v11429_v51 = vld [vmem:[#allocation7 + $0x3e8] sm:$0xf] }
  0x7d   :  { %914 = vmatpush.bf16.msra.mxu0 %v11102_v5  ;;  %1065 = vmatpush.bf16.msra.mxu1 %v11134_v6  ;;  %v11274_v5 = vor.u32 %v15042_v0, %v11273_v61  ;;  %v11306_v6 = vor.u32 %v15050_v1, %v11305_v17  ;;  %v15045_v61 = vld [vmem:[#allocation7 + $0x13c] sm:$0xf0] }
  0x7e   :  { %1162 = vmatpush.bf16.msra.mxu3 %v11198_v11  ;;  %v15041_v11 = vld [vmem:[#allocation7 + $0xa38] sm:$0xf0]  ;;  %v15053_v17 = vld [vmem:[#allocation7 + $0x73c] sm:$0xf0] }
  0x7f   :  { %1078 = vmatpush.bf16.msra.mxu2 %v11166_v7  ;;  %v11237_v7 = vld [vmem:[#allocation7 + $0x3dc] sm:$0xf]  ;;  %v11270_v21 = vor.u32 %v15041_v11, %v11269_v9  ;;  %v173_v1 = vld [vmem:[#allocation5 + $0x20] sm:$0xff]  ;;  %v11286_v11 = vor.u32 %v15045_v61, %v11285_v60 }
  0x80   :  { %v11238_v16 = vor.u32 %v15033_v8, %v11237_v7  ;;  %v15036_v7 = vld [vmem:[#allocation7 + $0x678] sm:$0xf0]  ;;  %v11281_v8 = vld [vmem:[#allocation7 + $0x20] sm:$0xf]  ;;  %v16371_v15 = vpack.c.bf16 %v174_v2, %v173_v1  ;;  %v11393_v60 = vld [vmem:[#allocation7 + $0x924] sm:$0xf] }
  0x81   :  { %915 = vmatpush.bf16.msra.mxu0 %v11098_v19  ;;  %1066 = vmatpush.bf16.msra.mxu1 %v11130_v22  ;;  %v11233_v19 = vld [vmem:[#allocation7 + $0x31c] sm:$0xf]  ;;  %v11302_v22 = vor.u32 %v15049_v13, %v11301_v12  ;;  %v15044_v9 = vld [vmem:[#allocation7 + $0x7c] sm:$0xf0]  ;;  %v15072_v61 = vld [vmem:[#allocation7 + $0x980] sm:$0xf0] }
  0x82   :  { %1163 = vmatpush.bf16.msra.mxu3 %v11194_v27  ;;  %v15048_v27 = vld [vmem:[#allocation7 + $0x37c] sm:$0xf0]  ;;  %v11234_v29 = vor.u32 %v15032_v20, %v11233_v19  ;;  %v15067_v19 = vld [vmem:[#allocation7 + $0x5c0] sm:$0xf0]  ;;  %v11457_v1 = vld [vmem:[#allocation7 + $0x928] sm:$0xf] }
  0x83   :  { %1079 = vmatpush.bf16.msra.mxu2 %v11162_v23  ;;  %v11265_v23 = vld [vmem:[#allocation7 + $0x91c] sm:$0xf]  ;;  %v11313_v12 = vld [vmem:[#allocation7 + $0x620] sm:$0xf]  ;;  %v11405_v20 = vld [vmem:[#allocation7 + $0xb64] sm:$0xf]  ;;  %v11374_v30 = vor.u32 %v15067_v19, %v11373_v14 }
  0x84   :  { %v11266_v32 = vor.u32 %v15040_v24, %v11265_v23  ;;  %v15052_v13 = vld [vmem:[#allocation7 + $0x67c] sm:$0xf0]  ;;  %v11437_v23 = vld [vmem:[#allocation7 + $0x568] sm:$0xf]  ;;  %v15062_v19 = vld [vmem:[#allocation7 + $0x200] sm:$0xf0] }
  0x85   :  { %916 = vmatpush.bf16.msra.mxu0 %v11094_v34  ;;  %1067 = vmatpush.bf16.msra.mxu1 %v11126_v39  ;;  %v11298_v34 = vor.u32 %v15048_v27, %v11297_v25  ;;  %v15047_v39 = vld [vmem:[#allocation7 + $0x2bc] sm:$0xf0]  ;;  %v15083_v24 = vld [vmem:[#allocation7 + $0x5c4] sm:$0xf0] }
  0x86   :  { %1164 = vmatpush.bf16.msra.mxu3 %v11190_v44  ;;  %v15030_v44 = vld [vmem:[#allocation7 + $0x1f8] sm:$0xf0]  ;;  %v11294_v46 = vor.u32 %v15047_v39, %v11293_v37  ;;  %v11469_v27 = vld [vmem:[#allocation7 + $0xb68] sm:$0xf] }
  0x87   :  { %1080 = vmatpush.bf16.msra.mxu2 %v11158_v40  ;;  %v11325_v40 = vld [vmem:[#allocation7 + $0x860] sm:$0xf]  ;;  %v11433_v39 = vld [vmem:[#allocation7 + $0x4a8] sm:$0xf] }
  0x88   :  { %v11326_v50 = vor.u32 %v15055_v41, %v11325_v40  ;;  %v15082_v40 = vld [vmem:[#allocation7 + $0x504] sm:$0xf0] }
  0x89   :  { %917 = vmatpush.bf16.msra.mxu0 %v11090_v48  ;;  %1068 = vmatpush.bf16.msra.mxu1 %v11122_v52  ;;  %v15038_v48 = vld [vmem:[#allocation7 + $0x7f8] sm:$0xf0]  ;;  %v11321_v52 = vld [vmem:[#allocation7 + $0x7a0] sm:$0xf]  ;;  %v11465_v41 = vld [vmem:[#allocation7 + $0xaa8] sm:$0xf] }
  0x8a   :  { %1165 = vmatpush.bf16.msra.mxu3 %v11186_v56  ;;  %v11226_v56 = vor.u32 %v15030_v44, %v11225_v43  ;;  %v15088_v2 = vld [vmem:[#allocation7 + $0x984] sm:$0xf0] }
  0x8b   :  { %1081 = vmatpush.bf16.msra.mxu2 %v11154_v53  ;;  %v15054_v53 = vld [vmem:[#allocation7 + $0x7fc] sm:$0xf0] }
  0x8c   :  { %918 = vmatmul.bf16.vlgmr.msra.gmra.mxu0 %v16358_v33  ;;  %1069 = vmatmul.bf16.vlgmr.msra.gmra.mxu1 %v16358_v33  ;;  %v15056_v33 = vld [vmem:[#allocation7 + $0x97c] sm:$0xf0]  ;;  %v11322_v0 = vor.u32 %v15054_v53, %v11321_v52  ;;  %v15081_v53 = vld [vmem:[#allocation7 + $0x444] sm:$0xf0] }
  0x8d   :  { %1310 = vmatpush.bf16.msrb.mxu0 %v11246_v57  ;;  %1323 = vmatpush.bf16.msrb.mxu1 %v11278_v58  ;;  %v11330_v38 = vor.u32 %v15056_v33, %v11329_v28  ;;  %v11253_v57 = vld [vmem:[#allocation7 + $0x6dc] sm:$0xf]  ;;  %v15091_v28 = vld [vmem:[#allocation7 + $0xbc4] sm:$0xf0]  ;;  %v1211_v33 = vunpack.c.l.b16 %v16371_v15 }
  0x8e   :  { %1484 = vmatpush.bf16.msrb.mxu3 %v11342_v62  ;;  %1082 = vmatmul.bf16.vlgmr.msra.gmra.mxu2 %v16365_v63  ;;  %v15037_v58 = vld [vmem:[#allocation7 + $0x738] sm:$0xf0]  ;;  %v11317_v62 = vld [vmem:[#allocation7 + $0x6e0] sm:$0xf]  ;;  %v11470_v37 = vor.u32 %v15091_v28, %v11469_v27  ;;  %v11449_v27 = vld [vmem:[#allocation7 + $0x7a8] sm:$0xf] }
  0x8f   :  { %1471 = vmatpush.bf16.msrb.mxu2 %v11310_v59  ;;  %1166 = vmatmul.bf16.vlgmr.msra.gmra.mxu3 %v16365_v63  ;;  %v11258_v59 = vor.u32 %v15038_v48, %v11257_v47  ;;  %v16374_v43 = vpack.c.b16 %v1211_v33, %v1211_v33  ;;  %v11434_v48 = vor.u32 %v15082_v40, %v11433_v39  ;;  %v15086_v28 = vld [vmem:[#allocation7 + $0x804] sm:$0xf0] }
  0x90   :  { %v11445_v39 = vld [vmem:[#allocation7 + $0x6e8] sm:$0xf] }
  0x91   :  { %1311 = vmatpush.bf16.msrb.mxu0 %v11242_v4  ;;  %1324 = vmatpush.bf16.msrb.mxu1 %v11274_v5  ;;  %v15028_v4 = vld [vmem:[#allocation7 + $0x78] sm:$0xf0]  ;;  %v11222_v5 = vor.u32 %v15029_v55, %v11221_v54  ;;  %v11461_v54 = vld [vmem:[#allocation7 + $0x9e8] sm:$0xf] }
  0x92   :  { %1485 = vmatpush.bf16.msrb.mxu3 %v11338_v10  ;;  %v11254_v10 = vor.u32 %v15037_v58, %v11253_v57  ;;  %v15089_v55 = vld [vmem:[#allocation7 + $0xa44] sm:$0xf0]  ;;  %v11361_v57 = vld [vmem:[#allocation7 + $0x324] sm:$0xf] }
  0x93   :  { %1472 = vmatpush.bf16.msrb.mxu2 %v11306_v6  ;;  %v11249_v6 = vld [vmem:[#allocation7 + $0x61c] sm:$0xf]  ;;  %v15064_v58 = vld [vmem:[#allocation7 + $0x380] sm:$0xf0]  ;;  %v15085_v40 = vld [vmem:[#allocation7 + $0x744] sm:$0xf0] }
  0x94   :  { %v11250_v25 = vor.u32 %v15036_v7, %v11249_v6  ;;  %v11389_v7 = vld [vmem:[#allocation7 + $0x864] sm:$0xf] }
  0x95   :  { %1312 = vmatpush.bf16.msrb.mxu0 %v11238_v16  ;;  %1325 = vmatpush.bf16.msrb.mxu1 %v11270_v21  ;;  %v11318_v16 = vor.u32 %v15053_v17, %v11317_v62  ;;  %v15075_v21 = vld [vmem:[#allocation7 + $0xbc0] sm:$0xf0]  ;;  %v11425_v62 = vld [vmem:[#allocation7 + $0x328] sm:$0xf] }
  0x96   :  { %1486 = vmatpush.bf16.msrb.mxu3 %v11334_v26  ;;  %v11282_v26 = vor.u32 %v15044_v9, %v11281_v8  ;;  %v11406_v31 = vor.u32 %v15075_v21, %v11405_v20  ;;  %v15080_v17 = vld [vmem:[#allocation7 + $0x384] sm:$0xf0]  ;;  %v15071_v8 = vld [vmem:[#allocation7 + $0x8c0] sm:$0xf0] }
  0x97   :  { %1473 = vmatpush.bf16.msrb.mxu2 %v11302_v22  ;;  %v11218_v22 = vor.u32 %v15028_v4, %v11217_v3  ;;  %v11357_v3 = vld [vmem:[#allocation7 + $0x264] sm:$0xf]  ;;  %v11426_v6 = vor.u32 %v15080_v17, %v11425_v62  ;;  %v11421_v9 = vld [vmem:[#allocation7 + $0x268] sm:$0xf]  ;;  %v11390_v20 = vor.u32 %v15071_v8, %v11389_v7  ;;  %v11597_v62 = vld [vmem:[#allocation7 + $0x574] sm:$0xf]  ;;  %v1536_v17 = vunpack.c.h.b16 %v16371_v15 }
  0x98   :  { %v15063_v4 = vld [vmem:[#allocation7 + $0x2c0] sm:$0xf0]  ;;  %v15106_v8 = vld [vmem:[#allocation7 + $0xb08] sm:$0xf0] }
  0x99   :  { %1313 = vmatpush.bf16.msrb.mxu0 %v11234_v29  ;;  %1326 = vmatpush.bf16.msrb.mxu1 %v11266_v32  ;;  %v11314_v29 = vor.u32 %v15052_v13, %v11313_v12  ;;  %v11438_v32 = vor.u32 %v15083_v24, %v11437_v23  ;;  %v11453_v12 = vld [vmem:[#allocation7 + $0x868] sm:$0xf]  ;;  %v11358_v14 = vor.u32 %v15063_v4, %v11357_v3  ;;  %v15070_v23 = vld [vmem:[#allocation7 + $0x800] sm:$0xf0]  ;;  %v11497_v4 = vld [vmem:[#allocation7 + $0x4ac] sm:$0xf] }
  0x9a   :  { %1487 = vmatpush.bf16.msrb.mxu3 %v11330_v38  ;;  %v15074_v38 = vld [vmem:[#allocation7 + $0xb00] sm:$0xf0]  ;;  %v15087_v13 = vld [vmem:[#allocation7 + $0x8c4] sm:$0xf0] }
  0x9b   :  { %1474 = vmatpush.bf16.msrb.mxu2 %v11298_v34  ;;  %v11369_v34 = vld [vmem:[#allocation7 + $0x4a4] sm:$0xf]  ;;  %v11402_v47 = vor.u32 %v15074_v38, %v11401_v36  ;;  %v11417_v24 = vld [vmem:[#allocation7 + $0x1a8] sm:$0xf] }
  0x9c   :  { %v11370_v44 = vor.u32 %v15066_v35, %v11369_v34  ;;  %v11381_v34 = vld [vmem:[#allocation7 + $0x6e4] sm:$0xf]  ;;  %v11450_v35 = vor.u32 %v15086_v28, %v11449_v27  ;;  %v15077_v38 = vld [vmem:[#allocation7 + $0x144] sm:$0xf0]  ;;  %v15121_v27 = vld [vmem:[#allocation7 + $0x450] sm:$0xf0] }
  0x9d   :  { %1314 = vmatpush.bf16.msrb.mxu0 %v11230_v42  ;;  %1327 = vmatpush.bf16.msrb.mxu1 %v11262_v45  ;;  %v15090_v42 = vld [vmem:[#allocation7 + $0xb04] sm:$0xf0]  ;;  %v11365_v45 = vld [vmem:[#allocation7 + $0x3e4] sm:$0xf] }
  0x9e   :  { %1488 = vmatpush.bf16.msrb.mxu3 %v11326_v50  ;;  %v15073_v50 = vld [vmem:[#allocation7 + $0xa40] sm:$0xf0]  ;;  %v11466_v52 = vor.u32 %v15090_v42, %v11465_v41 }
  0x9f   :  { %1475 = vmatpush.bf16.msrb.mxu2 %v11294_v46  ;;  %v15065_v46 = vld [vmem:[#allocation7 + $0x440] sm:$0xf0] }
  0xa0   :  { %v15069_v36 = vld [vmem:[#allocation7 + $0x740] sm:$0xf0] }
  0xa1   :  { %1315 = vmatpush.bf16.msrb.mxu0 %v11226_v56  ;;  %1328 = vmatpush.bf16.msrb.mxu1 %v11258_v59  ;;  %v11366_v56 = vor.u32 %v15065_v46, %v11365_v45  ;;  %v11398_v59 = vor.u32 %v15073_v50, %v11397_v49  ;;  %v11345_v42 = vld [vmem:[#allocation7 + $0x24] sm:$0xf]  ;;  %v11382_v45 = vor.u32 %v15069_v36, %v11381_v34  ;;  %v11409_v49 = vld [vmem:[#allocation7 + $0x28] sm:$0xf]  ;;  %v11553_v36 = vld [vmem:[#allocation7 + $0x330] sm:$0xf] }
  0xa2   :  { %1489 = vmatpush.bf16.msrb.mxu3 %v11322_v0  ;;  %v11462_v0 = vor.u32 %v15089_v55, %v11461_v54  ;;  %v11446_v50 = vor.u32 %v15085_v40, %v11445_v39  ;;  %v11501_v54 = vld [vmem:[#allocation7 + $0x56c] sm:$0xf]  ;;  %v15120_v39 = vld [vmem:[#allocation7 + $0x390] sm:$0xf0]  ;;  %v15971_v40 = vld [vmem:[#allocation9] ss:$0 sm:$0xff] }
  0xa3   :  { %1476 = vmatpush.bf16.msrb.mxu2 %v11290_v18  ;;  %v11430_v18 = vor.u32 %v15081_v53, %v11429_v51  ;;  %v15076_v51 = vld [vmem:[#allocation7 + $0x84] sm:$0xf0]  ;;  %v15099_v55 = vld [vmem:[#allocation7 + $0x5c8] sm:$0xf0] }
  0xa4   :  { %v15084_v53 = vld [vmem:[#allocation7 + $0x684] sm:$0xf0] }
  0xa5   :  { %1316 = vmatpush.bf16.msrb.mxu0 %v11222_v5  ;;  %1329 = vmatpush.bf16.msrb.mxu1 %v11254_v10  ;;  %v11394_v5 = vor.u32 %v15072_v61, %v11393_v60  ;;  %v11458_v10 = vor.u32 %v15088_v2, %v11457_v1  ;;  %v11410_v61 = vor.u32 %v15076_v51, %v11409_v49  ;;  %v11549_v49 = vld [vmem:[#allocation7 + $0x270] sm:$0xf]  ;;  %v11581_v51 = vld [vmem:[#allocation7 + $0x274] sm:$0xf] }
  0xa6   :  { %1490 = vmatpush.bf16.msrb.mxu3 %v11318_v16  ;;  %v11353_v16 = vld [vmem:[#allocation7 + $0x1a4] sm:$0xf]  ;;  %v11502_v2 = vor.u32 %v15099_v55, %v11501_v54  ;;  %v11481_v55 = vld [vmem:[#allocation7 + $0x1ac] sm:$0xf] }
  0xa7   :  { %1477 = vmatpush.bf16.msrb.mxu2 %v11286_v11  ;;  %v15079_v11 = vld [vmem:[#allocation7 + $0x2c4] sm:$0xf0]  ;;  %v11354_v33 = vor.u32 %v15062_v19, %v11353_v16  ;;  %v11493_v19 = vld [vmem:[#allocation7 + $0x3ec] sm:$0xf] }
  0xa8   :  { %v11422_v21 = vor.u32 %v15079_v11, %v11421_v9  ;;  %v11561_v9 = vld [vmem:[#allocation7 + $0x4b0] sm:$0xf]  ;;  %v11593_v11 = vld [vmem:[#allocation7 + $0x4b4] sm:$0xf] }
  0xa9   :  { %1317 = vmatpush.bf16.msrb.mxu0 %v11218_v22  ;;  %1330 = vmatpush.bf16.msrb.mxu1 %v11250_v25  ;;  %v11385_v22 = vld [vmem:[#allocation7 + $0x7a4] sm:$0xf]  ;;  %v11454_v25 = vor.u32 %v15087_v13, %v11453_v12  ;;  %v15122_v12 = vld [vmem:[#allocation7 + $0x510] sm:$0xf0]  ;;  %v16381_v13 = vpack.c.b16 %v1536_v17, %v1536_v17 }
  0xaa   :  { %1491 = vmatpush.bf16.msrb.mxu3 %v11314_v29  ;;  %v11386_v29 = vor.u32 %v15070_v23, %v11385_v22  ;;  %v11594_v22 = vor.u32 %v15122_v12, %v11593_v11  ;;  %v15105_v23 = vld [vmem:[#allocation7 + $0xa48] sm:$0xf0]  ;;  %v11541_v12 = vld [vmem:[#allocation7 + $0xf0] sm:$0xf] }
  0xab   :  { %1478 = vmatpush.bf16.msrb.mxu2 %v11282_v26  ;;  %v15078_v26 = vld [vmem:[#allocation7 + $0x204] sm:$0xf0]  ;;  %v15101_v11 = vld [vmem:[#allocation7 + $0x748] sm:$0xf0] }
  0xac   :  { %1318 = vmatmul.bf16.vlgmr.msrb.gmra.mxu0 %v16365_v63  ;;  %1331 = vmatmul.bf16.vlgmr.msrb.gmra.mxu1 %v16374_v43 }
  0xad   :  { %1635 = vmatpush.bf16.msra.mxu0 %v11374_v30  ;;  %1648 = vmatpush.bf16.msra.mxu1 %v11406_v31  ;;  %v11418_v30 = vor.u32 %v15078_v26, %v11417_v24  ;;  %v11349_v31 = vld [vmem:[#allocation7 + $0xe4] sm:$0xf]  ;;  %v11557_v24 = vld [vmem:[#allocation7 + $0x3f0] sm:$0xf]  ;;  %v11589_v26 = vld [vmem:[#allocation7 + $0x3f4] sm:$0xf] }
  0xae   :  { %1809 = vmatpush.bf16.msra.mxu3 %v11470_v37  ;;  %1479 = vmatmul.bf16.vlgmr.msrb.gmra.mxu2 %v16365_v63  ;;  %v11362_v63 = vor.u32 %v15064_v58, %v11361_v57  ;;  %v11413_v37 = vld [vmem:[#allocation7 + $0xe8] sm:$0xf]  ;;  %v15107_v58 = vld [vmem:[#allocation7 + $0xbc8] sm:$0xf0]  ;;  %v11590_v34 = vor.u32 %v15121_v27, %v11589_v26 }
  0xaf   :  { %1796 = vmatpush.bf16.msra.mxu2 %v11438_v32  ;;  %1492 = vmatmul.bf16.vlgmr.msrb.gmra.mxu3 %v16374_v43  ;;  %v15061_v32 = vld [vmem:[#allocation7 + $0x140] sm:$0xf0]  ;;  %v11414_v46 = vor.u32 %v15077_v38, %v11413_v37  ;;  %v15112_v37 = vld [vmem:[#allocation7 + $0x38c] sm:$0xf0]  ;;  %v11585_v38 = vld [vmem:[#allocation7 + $0x334] sm:$0xf] }
  0xb0   :  { %v11350_v41 = vor.u32 %v15061_v32, %v11349_v31  ;;  %v15096_v31 = vld [vmem:[#allocation7 + $0x388] sm:$0xf0] }
  0xb1   :  { %1636 = vmatpush.bf16.msra.mxu0 %v11370_v44  ;;  %1649 = vmatpush.bf16.msra.mxu1 %v11402_v47  ;;  %v15060_v44 = vld [vmem:[#allocation7 + $0x80] sm:$0xf0]  ;;  %v11521_v32 = vld [vmem:[#allocation7 + $0x92c] sm:$0xf] }
  0xb2   :  { %1810 = vmatpush.bf16.msra.mxu3 %v11466_v52  ;;  %v11377_v47 = vld [vmem:[#allocation7 + $0x624] sm:$0xf]  ;;  %v11441_v52 = vld [vmem:[#allocation7 + $0x628] sm:$0xf]  ;;  %v11346_v57 = vor.u32 %v15060_v44, %v11345_v42  ;;  %v11554_v42 = vor.u32 %v15112_v37, %v11553_v36  ;;  %v11485_v44 = vld [vmem:[#allocation7 + $0x26c] sm:$0xf] }
  0xb3   :  { %1797 = vmatpush.bf16.msra.mxu2 %v11434_v48  ;;  %v15068_v48 = vld [vmem:[#allocation7 + $0x680] sm:$0xf0]  ;;  %v11442_v1 = vor.u32 %v15084_v53, %v11441_v52  ;;  %v15119_v52 = vld [vmem:[#allocation7 + $0x2d0] sm:$0xf0]  ;;  %v15092_v26 = vld [vmem:[#allocation7 + $0x88] sm:$0xf0] }
  0xb4   :  { %v11378_v60 = vor.u32 %v15068_v48, %v11377_v47  ;;  %v11586_v47 = vor.u32 %v15120_v39, %v11585_v38  ;;  %v15103_v48 = vld [vmem:[#allocation7 + $0x8c8] sm:$0xf0]  ;;  %v11569_v36 = vld [vmem:[#allocation7 + $0x34] sm:$0xf] }
  0xb5   :  { %1637 = vmatpush.bf16.msra.mxu0 %v11366_v56  ;;  %1650 = vmatpush.bf16.msra.mxu1 %v11398_v59  ;;  %v11533_v56 = vld [vmem:[#allocation7 + $0xb6c] sm:$0xf]  ;;  %v11565_v59 = vld [vmem:[#allocation7 + $0x570] sm:$0xf]  ;;  %v15116_v37 = vld [vmem:[#allocation7 + $0x90] sm:$0xf0] }
  0xb6   :  { %1811 = vmatpush.bf16.msra.mxu3 %v11462_v0  ;;  %v15123_v0 = vld [vmem:[#allocation7 + $0x5d0] sm:$0xf0]  ;;  %v11505_v27 = vld [vmem:[#allocation7 + $0x62c] sm:$0xf] }
  0xb7   :  { %1798 = vmatpush.bf16.msra.mxu2 %v11430_v18  ;;  %v15115_v18 = vld [vmem:[#allocation7 + $0x5cc] sm:$0xf0]  ;;  %v11598_v7 = vor.u32 %v15123_v0, %v11597_v62  ;;  %v11582_v62 = vor.u32 %v15119_v52, %v11581_v51  ;;  %v11629_v38 = vld [vmem:[#allocation7 + $0xb74] sm:$0xf]  ;;  %v11725_v51 = vld [vmem:[#allocation7 + $0x57c] sm:$0xf] }
  0xb8   :  { %v11566_v3 = vor.u32 %v15115_v18, %v11565_v59  ;;  %v11513_v18 = vld [vmem:[#allocation7 + $0x7ac] sm:$0xf]  ;;  %v15110_v0 = vld [vmem:[#allocation7 + $0x20c] sm:$0xf0]  ;;  %v15155_v52 = vld [vmem:[#allocation7 + $0x5d8] sm:$0xf0] }
  0xb9   :  { %1638 = vmatpush.bf16.msra.mxu0 %v11362_v63  ;;  %1651 = vmatpush.bf16.msra.mxu1 %v11394_v5  ;;  %v11534_v63 = vor.u32 %v15107_v58, %v11533_v56  ;;  %v15098_v5 = vld [vmem:[#allocation7 + $0x508] sm:$0xf0] }
  0xba   :  { %1812 = vmatpush.bf16.msra.mxu3 %v11458_v10  ;;  %v15114_v10 = vld [vmem:[#allocation7 + $0x50c] sm:$0xf0]  ;;  %v11498_v15 = vor.u32 %v15098_v5, %v11497_v4  ;;  %v15094_v56 = vld [vmem:[#allocation7 + $0x208] sm:$0xf0] }
  0xbb   :  { %1799 = vmatpush.bf16.msra.mxu2 %v11426_v6  ;;  %v11529_v6 = vld [vmem:[#allocation7 + $0xaac] sm:$0xf]  ;;  %v11562_v16 = vor.u32 %v15114_v10, %v11561_v9 }
  0xbc   :  { %v11477_v4 = vld [vmem:[#allocation7 + $0xec] sm:$0xf] }
  0xbd   :  { %1639 = vmatpush.bf16.msra.mxu0 %v11358_v14  ;;  %1652 = vmatpush.bf16.msra.mxu1 %v11390_v20  ;;  %v11530_v14 = vor.u32 %v15106_v8, %v11529_v6  ;;  %v15097_v20 = vld [vmem:[#allocation7 + $0x448] sm:$0xf0] }
  0xbe   :  { %1813 = vmatpush.bf16.msra.mxu3 %v11454_v25  ;;  %v15113_v25 = vld [vmem:[#allocation7 + $0x44c] sm:$0xf0]  ;;  %v11494_v28 = vor.u32 %v15097_v20, %v11493_v19  ;;  %v15093_v5 = vld [vmem:[#allocation7 + $0x148] sm:$0xf0]  ;;  %v176_v20 = vld [vmem:[#allocation5 + $0x38] sm:$0xff] }
  0xbf   :  { %1800 = vmatpush.bf16.msra.mxu2 %v11422_v21  ;;  %v11525_v21 = vld [vmem:[#allocation7 + $0x9ec] sm:$0xf]  ;;  %v175_v19 = vld [vmem:[#allocation5 + $0x30] sm:$0xff] }
  0xc0   :  { %v11509_v10 = vld [vmem:[#allocation7 + $0x6ec] sm:$0xf] }
  0xc1   :  { %1640 = vmatpush.bf16.msra.mxu0 %v11354_v33  ;;  %1653 = vmatpush.bf16.msra.mxu1 %v11386_v29  ;;  %v11526_v33 = vor.u32 %v15105_v23, %v11525_v21  ;;  %v11558_v29 = vor.u32 %v15113_v25, %v11557_v24  ;;  %v11573_v21 = vld [vmem:[#allocation7 + $0xf4] sm:$0xf]  ;;  %v11478_v24 = vor.u32 %v15093_v5, %v11477_v4  ;;  %v11473_v25 = vld [vmem:[#allocation7 + $0x2c] sm:$0xf]  ;;  %v15973_v5 = vld [vmem:[#allocation9 + $0x2] ss:$0 sm:$0xff] }
  0xc2   :  { %1814 = vmatpush.bf16.msra.mxu3 %v11450_v35  ;;  %v15104_v35 = vld [vmem:[#allocation7 + $0x988] sm:$0xf0] }
  0xc3   :  { %1801 = vmatpush.bf16.msra.mxu2 %v11418_v30  ;;  %v11489_v30 = vld [vmem:[#allocation7 + $0x32c] sm:$0xf] }
  0xc5   :  { %1641 = vmatpush.bf16.msra.mxu0 %v11350_v41  ;;  %1654 = vmatpush.bf16.msra.mxu1 %v11382_v45  ;;  %v11522_v41 = vor.u32 %v15104_v35, %v11521_v32  ;;  %v15095_v45 = vld [vmem:[#allocation7 + $0x2c8] sm:$0xf0] }
  0xc6   :  { %1815 = vmatpush.bf16.msra.mxu3 %v11446_v50  ;;  %v15111_v50 = vld [vmem:[#allocation7 + $0x2cc] sm:$0xf0]  ;;  %v11486_v54 = vor.u32 %v15095_v45, %v11485_v44  ;;  %v11474_v44 = vor.u32 %v15092_v26, %v11473_v25  ;;  %v11693_v45 = vld [vmem:[#allocation7 + $0xb78] sm:$0xf]  ;;  %v11617_v25 = vld [vmem:[#allocation7 + $0x934] sm:$0xf] }
  0xc7   :  { %1802 = vmatpush.bf16.msra.mxu2 %v11414_v46  ;;  %v11517_v46 = vld [vmem:[#allocation7 + $0x86c] sm:$0xf]  ;;  %v11550_v59 = vor.u32 %v15111_v50, %v11549_v49  ;;  %v11649_v26 = vld [vmem:[#allocation7 + $0x338] sm:$0xf] }
  0xc8   :  { %v11518_v58 = vor.u32 %v15103_v48, %v11517_v46  ;;  %v15147_v46 = vld [vmem:[#allocation7 + $0xbd4] sm:$0xf0] }
  0xc9   :  { %1642 = vmatpush.bf16.msra.mxu0 %v11346_v57  ;;  %1655 = vmatpush.bf16.msra.mxu1 %v11378_v60  ;;  %v264_v53 = vpop.f32.mrf.mxu0  ;;  %v15102_v60 = vld [vmem:[#allocation7 + $0x808] sm:$0xf0] }
  0xca   :  { %1816 = vmatpush.bf16.msra.mxu3 %v11442_v1  ;;  %v265_v57 = vadd.f32 %v15971_v40, %v264_v53  ;;  %v15972_v1 = vld [vmem:[#allocation9 + $0x1] ss:$0 sm:$0xff]  ;;  %v11514_v8 = vor.u32 %v15102_v60, %v11513_v18  ;;  %v15131_v40 = vld [vmem:[#allocation7 + $0xbd0] sm:$0xf0]  ;;  %v11657_v60 = vld [vmem:[#allocation7 + $0x4b8] sm:$0xf] }
  0xcb   :  { %1803 = vmatpush.bf16.msra.mxu2 %v11410_v61  ;;  %v11545_v61 = vld [vmem:[#allocation7 + $0x1b0] sm:$0xf]  ;;  %v15130_v18 = vld [vmem:[#allocation7 + $0xb10] sm:$0xf0] }
  0xcc   :  { %1643 = vmatmul.bf16.vlgmr.msra.gmra.mxu0 %v16374_v43  ;;  %1656 = vmatmul.bf16.vlgmr.msra.gmra.mxu1 %v16381_v13  ;;  %v268_v17 = vmax.f32 %v265_v57, 0.0  ;;  %v11546_v9 = vor.u32 %v15110_v0, %v11545_v61  ;;  %v15138_v61 = vld [vmem:[#allocation7 + $0x514] sm:$0xf0] }
  0xcd   :  { %1961 = vmatpush.bf16.msrb.mxu0 %v11502_v2  ;;  %1974 = vmatpush.bf16.msrb.mxu1 %v11534_v63  ;;  %v11577_v2 = vld [vmem:[#allocation7 + $0x1b4] sm:$0xf]  ;;  %v11689_v0 = vld [vmem:[#allocation7 + $0xab8] sm:$0xf] }
  0xce   :  { %2209 = vmatpush.bf16.msrb.mxu3 %v11598_v7  ;;  %1804 = vmatmul.bf16.vlgmr.msra.gmra.mxu2 %v16374_v43  ;;  %v11490_v43 = vor.u32 %v15096_v31, %v11489_v30  ;;  %v15118_v63 = vld [vmem:[#allocation7 + $0x210] sm:$0xf0]  ;;  %v269_v6 = vpack.c.bf16 %v268_v17, %v268_v17  ;;  %v11537_v30 = vld [vmem:[#allocation7 + $0x30] sm:$0xf]  ;;  %v15146_v17 = vld [vmem:[#allocation7 + $0xb14] sm:$0xf0] }
  0xcf   :  { %2058 = vmatpush.bf16.msrb.mxu2 %v11566_v3  ;;  %1817 = vmatmul.bf16.vlgmr.msra.gmra.mxu3 %v16381_v13  ;;  %v11482_v3 = vor.u32 %v15094_v56, %v11481_v55  ;;  %v419_v7 = vpop.f32.mrf.mxu1  ;;  %v15108_v31 = vld [vmem:[#allocation7 + $0x8c] sm:$0xf0]  ;;  %v11630_v55 = vor.u32 %v15131_v40, %v11629_v38  ;;  %v11625_v56 = vld [vmem:[#allocation7 + $0xab4] sm:$0xf] }
  0xd0   :  { %270 = vst [vmem:[#allocation2] sm:$0xf] %v269_v6  ;;  %v11538_v50 = vor.u32 %v15108_v31, %v11537_v30  ;;  %v11626_v4 = vor.u32 %v15130_v18, %v11625_v56  ;;  %v11713_v30 = vld [vmem:[#allocation7 + $0x33c] sm:$0xf]  ;;  %v11613_v38 = vld [vmem:[#allocation7 + $0x874] sm:$0xf] }
  0xd1   :  { %1962 = vmatpush.bf16.msrb.mxu0 %v11498_v15  ;;  %1975 = vmatpush.bf16.msrb.mxu1 %v11530_v14  ;;  %v11578_v15 = vor.u32 %v15118_v63, %v11577_v2  ;;  %v15109_v14 = vld [vmem:[#allocation7 + $0x14c] sm:$0xf0]  ;;  %v266_v23 = vpop.f32.mrf.mxu0  ;;  %v15154_v2 = vld [vmem:[#allocation7 + $0x518] sm:$0xf0] }
  0xd2   :  { %2210 = vmatpush.bf16.msrb.mxu3 %v11594_v22  ;;  %v15117_v22 = vld [vmem:[#allocation7 + $0x150] sm:$0xf0]  ;;  %v15152_v31 = vld [vmem:[#allocation7 + $0x398] sm:$0xf0] }
  0xd3   :  { %2059 = vmatpush.bf16.msrb.mxu2 %v11562_v16  ;;  %v420_v16 = vadd.f32 %v15972_v1, %v419_v7  ;;  %v432_v32 = vpop.f32.mrf.mxu2  ;;  %v11574_v35 = vor.u32 %v15117_v22, %v11573_v21  ;;  %v11721_v1 = vld [vmem:[#allocation7 + $0x4bc] sm:$0xf]  ;;  %v11658_v7 = vor.u32 %v15138_v61, %v11657_v60  ;;  %v11673_v60 = vld [vmem:[#allocation7 + $0x7b8] sm:$0xf] }
  0xd4   :  { %v15142_v61 = vld [vmem:[#allocation7 + $0x814] sm:$0xf0] }
  0xd5   :  { %1963 = vmatpush.bf16.msrb.mxu0 %v11494_v28  ;;  %1976 = vmatpush.bf16.msrb.mxu1 %v11526_v33  ;;  %v11510_v28 = vor.u32 %v15101_v11, %v11509_v10  ;;  %v11542_v33 = vor.u32 %v15109_v14, %v11541_v12  ;;  %v433_v39 = vadd.f32 %v432_v32, %v420_v16  ;;  %v15129_v10 = vld [vmem:[#allocation7 + $0xa50] sm:$0xf0]  ;;  %v11653_v11 = vld [vmem:[#allocation7 + $0x3f8] sm:$0xf] }
  0xd6   :  { %2211 = vmatpush.bf16.msrb.mxu3 %v11590_v34  ;;  %v16387_v34 = vpack.c.bf16 %v176_v20, %v175_v19  ;;  %v11722_v12 = vor.u32 %v15154_v2, %v11721_v1  ;;  %v11685_v14 = vld [vmem:[#allocation7 + $0x9f8] sm:$0xf]  ;;  %v11717_v19 = vld [vmem:[#allocation7 + $0x3fc] sm:$0xf] }
  0xd7   :  { %2060 = vmatpush.bf16.msrb.mxu2 %v11558_v29  ;;  %v15100_v29 = vld [vmem:[#allocation7 + $0x688] sm:$0xf0]  ;;  %v421_v48 = vpop.f32.mrf.mxu1  ;;  %v15145_v16 = vld [vmem:[#allocation7 + $0xa54] sm:$0xf0]  ;;  %v15153_v20 = vld [vmem:[#allocation7 + $0x458] sm:$0xf0] }
  0xd8   :  { %v11506_v49 = vor.u32 %v15100_v29, %v11505_v27  ;;  %v1862_v53 = vunpack.c.l.b16 %v16387_v34  ;;  %v11718_v27 = vor.u32 %v15153_v20, %v11717_v19  ;;  %v15144_v29 = vld [vmem:[#allocation7 + $0x994] sm:$0xf0]  ;;  %v11701_v19 = vld [vmem:[#allocation7 + $0xfc] sm:$0xf] }
  0xd9   :  { %1964 = vmatpush.bf16.msrb.mxu0 %v11490_v43  ;;  %1977 = vmatpush.bf16.msrb.mxu1 %v11522_v41  ;;  %v580_v43 = vpop.f32.mrf.mxu3  ;;  %v11661_v41 = vld [vmem:[#allocation7 + $0x578] sm:$0xf]  ;;  %v15149_v20 = vld [vmem:[#allocation7 + $0x158] sm:$0xf0] }
  0xda   :  { %2212 = vmatpush.bf16.msrb.mxu3 %v11586_v47  ;;  %v436_v47 = vmax.f32 %v433_v39, 0.0  ;;  %v16390_v63 = vpack.c.b16 %v1862_v53, %v1862_v53  ;;  %v581_v22 = vadd.f32 %v15973_v5, %v580_v43  ;;  %v15143_v48 = vld [vmem:[#allocation7 + $0x8d4] sm:$0xf0]  ;;  %v11605_v5 = vld [vmem:[#allocation7 + $0x6f4] sm:$0xf] }
  0xdb   :  { %2061 = vmatpush.bf16.msrb.mxu2 %v11554_v42  ;;  %v15139_v42 = vld [vmem:[#allocation7 + $0x5d4] sm:$0xf0] }
  0xdc   :  { %v437_v57 = vpack.c.bf16 %v436_v47, %v436_v47  ;;  %v11677_v47 = vld [vmem:[#allocation7 + $0x878] sm:$0xf] }
  0xdd   :  { %1965 = vmatpush.bf16.msrb.mxu0 %v11486_v54  ;;  %1978 = vmatpush.bf16.msrb.mxu1 %v11518_v58  ;;  %v11570_v54 = vor.u32 %v15116_v37, %v11569_v36  ;;  %v11662_v58 = vor.u32 %v15139_v42, %v11661_v41  ;;  %v15127_v41 = vld [vmem:[#allocation7 + $0x8d0] sm:$0xf0]  ;;  %v11645_v42 = vld [vmem:[#allocation7 + $0x278] sm:$0xf]  ;;  %v11678_v56 = vor.u32 %v15143_v48, %v11677_v47  ;;  %v15187_v47 = vld [vmem:[#allocation7 + $0x5e0] sm:$0xf0] }
  0xde   :  { %2213 = vmatpush.bf16.msrb.mxu3 %v11582_v62  ;;  %v11726_v62 = vor.u32 %v15155_v52, %v11725_v51  ;;  %438 = vst [vmem:[#allocation2 + $0x4] sm:$0xf] %v437_v57  ;;  %v11614_v53 = vor.u32 %v15127_v41, %v11613_v38  ;;  %v15126_v57 = vld [vmem:[#allocation7 + $0x810] sm:$0xf0]  ;;  %v15179_v41 = vld [vmem:[#allocation7 + $0xbdc] sm:$0xf0] }
  0xdf   :  { %2062 = vmatpush.bf16.msrb.mxu2 %v11550_v59  ;;  %v11694_v59 = vor.u32 %v15147_v46, %v11693_v45  ;;  %v11714_v45 = vor.u32 %v15152_v31, %v11713_v30  ;;  %v11697_v30 = vld [vmem:[#allocation7 + $0x3c] sm:$0xf] }
  0xe0   :  { %v15148_v31 = vld [vmem:[#allocation7 + $0x98] sm:$0xf0] }
  0xe1   :  { %1966 = vmatpush.bf16.msrb.mxu0 %v11482_v3  ;;  %1979 = vmatpush.bf16.msrb.mxu1 %v11514_v8  ;;  %v434_v3 = vpop.f32.mrf.mxu2  ;;  %v582_v6 = vpop.f32.mrf.mxu3  ;;  %v11690_v8 = vor.u32 %v15146_v17, %v11689_v0  ;;  %v11705_v0 = vld [vmem:[#allocation7 + $0x1bc] sm:$0xf]  ;;  %v11698_v48 = vor.u32 %v15148_v31, %v11697_v30  ;;  %v11773_v31 = vld [vmem:[#allocation7 + $0x280] sm:$0xf] }
  0xe2   :  { %2214 = vmatpush.bf16.msrb.mxu3 %v11578_v15  ;;  %v15137_v15 = vld [vmem:[#allocation7 + $0x454] sm:$0xf0]  ;;  %v15150_v17 = vld [vmem:[#allocation7 + $0x218] sm:$0xf0] }
  0xe3   :  { %2063 = vmatpush.bf16.msrb.mxu2 %v11546_v9  ;;  %v11621_v9 = vld [vmem:[#allocation7 + $0x9f4] sm:$0xf]  ;;  %v11654_v23 = vor.u32 %v15137_v15, %v11653_v11  ;;  %v15133_v15 = vld [vmem:[#allocation7 + $0x154] sm:$0xf0]  ;;  %v15159_v30 = vld [vmem:[#allocation7 + $0x8d8] sm:$0xf0] }
  0xe4   :  { %v11622_v21 = vor.u32 %v15129_v10, %v11621_v9  ;;  %v15125_v9 = vld [vmem:[#allocation7 + $0x750] sm:$0xf0]  ;;  %v11637_v10 = vld [vmem:[#allocation7 + $0xf8] sm:$0xf] }
  0xe5   :  { %1967 = vmatpush.bf16.msrb.mxu0 %v11478_v24  ;;  %1980 = vmatpush.bf16.msrb.mxu1 %v11510_v28  ;;  %v11686_v24 = vor.u32 %v15145_v16, %v11685_v14  ;;  %v15136_v28 = vld [vmem:[#allocation7 + $0x394] sm:$0xf0] }
  0xe6   :  { %2215 = vmatpush.bf16.msrb.mxu3 %v11574_v35  ;;  %v15974_v35 = vld [vmem:[#allocation9 + $0x3] ss:$0 sm:$0xff]  ;;  %v11650_v43 = vor.u32 %v15136_v28, %v11649_v26  ;;  %v11669_v14 = vld [vmem:[#allocation7 + $0x6f8] sm:$0xf] }
  0xe7   :  { %2064 = vmatpush.bf16.msrb.mxu2 %v11542_v33  ;;  %v11681_v33 = vld [vmem:[#allocation7 + $0x938] sm:$0xf] }
  0xe8   :  { %v11682_v40 = vor.u32 %v15144_v29, %v11681_v33  ;;  %v15141_v16 = vld [vmem:[#allocation7 + $0x754] sm:$0xf0]  ;;  %v11702_v33 = vor.u32 %v15149_v20, %v11701_v19  ;;  %v11777_v19 = vld [vmem:[#allocation7 + $0x340] sm:$0xf] }
  0xe9   :  { %1968 = vmatpush.bf16.msrb.mxu0 %v11474_v44  ;;  %1981 = vmatpush.bf16.msrb.mxu1 %v11506_v49  ;;  %v593_v32 = vpop.f32.mrf.mxu0  ;;  %v745_v39 = vpop.f32.mrf.mxu1  ;;  %v15135_v44 = vld [vmem:[#allocation7 + $0x2d4] sm:$0xf0]  ;;  %v11709_v49 = vld [vmem:[#allocation7 + $0x27c] sm:$0xf]  ;;  %v11670_v26 = vor.u32 %v15141_v16, %v11669_v14  ;;  %v15168_v20 = vld [vmem:[#allocation7 + $0x39c] sm:$0xf0] }
  0xea   :  { %2216 = vmatpush.bf16.msrb.mxu3 %v11570_v54  ;;  %v594_v37 = vadd.f32 %v593_v32, %v581_v22  ;;  %v746_v51 = vadd.f32 %v15974_v35, %v745_v39  ;;  %v11609_v54 = vld [vmem:[#allocation7 + $0x7b4] sm:$0xf]  ;;  %v11606_v22 = vor.u32 %v15125_v9, %v11605_v5  ;;  %v11665_v28 = vld [vmem:[#allocation7 + $0x638] sm:$0xf]  ;;  %v11757_v35 = vld [vmem:[#allocation7 + $0xb7c] sm:$0xf] }
  0xeb   :  { %2065 = vmatpush.bf16.msrb.mxu2 %v11538_v50  ;;  %v15151_v50 = vld [vmem:[#allocation7 + $0x2d8] sm:$0xf0]  ;;  %v15140_v29 = vld [vmem:[#allocation7 + $0x694] sm:$0xf0]  ;;  %v15169_v5 = vld [vmem:[#allocation7 + $0x45c] sm:$0xf0] }
  0xec   :  { %1969 = vmatmul.bf16.vlgmr.msrb.gmra.mxu0 %v16381_v13  ;;  %1982 = vmatmul.bf16.vlgmr.msrb.gmra.mxu1 %v16390_v63  ;;  %v15128_v13 = vld [vmem:[#allocation7 + $0x990] sm:$0xf0]  ;;  %v597_v46 = vmax.f32 %v594_v37, 0.0  ;;  %v11710_v18 = vor.u32 %v15151_v50, %v11709_v49  ;;  %v11789_v37 = vld [vmem:[#allocation7 + $0x580] sm:$0xf] }
  0xed   :  { %2222 = vmatpush.bf16.msra.mxu0 %v11630_v55  ;;  %2370 = vmatpush.bf16.msra.mxu1 %v11662_v58  ;;  %v11618_v36 = vor.u32 %v15128_v13, %v11617_v25  ;;  %v11646_v55 = vor.u32 %v15135_v44, %v11645_v42  ;;  %v11641_v58 = vld [vmem:[#allocation7 + $0x1b8] sm:$0xf]  ;;  %v11638_v13 = vor.u32 %v15133_v15, %v11637_v10  ;;  %v2110_v42 = vunpack.c.h.b16 %v16387_v34  ;;  %v15185_v9 = vld [vmem:[#allocation7 + $0x460] sm:$0xf0]  ;;  %v15160_v16 = vld [vmem:[#allocation7 + $0x998] sm:$0xf0] }
  0xee   :  { %2535 = vmatpush.bf16.msra.mxu3 %v11726_v62  ;;  %2066 = vmatmul.bf16.vlgmr.msrb.gmra.mxu2 %v16387_v34  ;;  %v598_v52 = vpack.c.bf16 %v597_v46, %v597_v46  ;;  %v11633_v25 = vld [vmem:[#allocation7 + $0x38] sm:$0xf]  ;;  %v11853_v46 = vld [vmem:[#allocation7 + $0x584] sm:$0xf]  ;;  %v11817_v34 = vld [vmem:[#allocation7 + $0xac0] sm:$0xf] }
  0xef   :  { %2383 = vmatpush.bf16.msra.mxu2 %v11694_v59  ;;  %2217 = vmatmul.bf16.vlgmr.msrb.gmra.mxu3 %v16390_v63  ;;  %v15134_v59 = vld [vmem:[#allocation7 + $0x214] sm:$0xf0] }
  0xf0   :  { %599 = vst [vmem:[#allocation2 + $0x8] sm:$0xf] %v598_v52  ;;  %v11753_v52 = vld [vmem:[#allocation7 + $0xabc] sm:$0xf] }
  0xf1   :  { %2223 = vmatpush.bf16.msra.mxu0 %v11626_v4  ;;  %2371 = vmatpush.bf16.msra.mxu1 %v11658_v7  ;;  %v758_v62 = vpop.f32.mrf.mxu2  ;;  %v595_v2 = vpop.f32.mrf.mxu0  ;;  %v11610_v4 = vor.u32 %v15126_v57, %v11609_v54  ;;  %v11642_v7 = vor.u32 %v15134_v59, %v11641_v58  ;;  %v11785_v54 = vld [vmem:[#allocation7 + $0x4c0] sm:$0xf]  ;;  %v11849_v59 = vld [vmem:[#allocation7 + $0x4c4] sm:$0xf] }
  0xf2   :  { %2536 = vmatpush.bf16.msra.mxu3 %v11722_v12  ;;  %v759_v1 = vadd.f32 %v758_v62, %v746_v51  ;;  %v16396_v3 = vpop.f32.mrf.mxu3  ;;  %v747_v6 = vpop.f32.mrf.mxu1  ;;  %v11706_v12 = vor.u32 %v15150_v17, %v11705_v0  ;;  %v15170_v57 = vld [vmem:[#allocation7 + $0x51c] sm:$0xf0]  ;;  %v15161_v17 = vld [vmem:[#allocation7 + $0xa58] sm:$0xf0]  ;;  %v15975_v2 = vld [vmem:[#allocation9 + $0x4] ss:$0 sm:$0xff] }
  0xf3   :  { %2384 = vmatpush.bf16.msra.mxu2 %v11690_v8  ;;  %v11674_v8 = vor.u32 %v15142_v61, %v11673_v60  ;;  %v15178_v58 = vld [vmem:[#allocation7 + $0xb1c] sm:$0xf0]  ;;  %v11749_v61 = vld [vmem:[#allocation7 + $0x9fc] sm:$0xf]  ;;  %v11786_v62 = vor.u32 %v15170_v57, %v11785_v54  ;;  %v907_v14 = vadd.f32 %v15975_v2, %v16396_v3  ;;  %v11833_v57 = vld [vmem:[#allocation7 + $0x1c4] sm:$0xf] }
  0xf4   :  { %v762_v11 = vmax.f32 %v759_v1, 0.0  ;;  %v11818_v0 = vor.u32 %v15178_v58, %v11817_v34  ;;  %v11781_v1 = vld [vmem:[#allocation7 + $0x400] sm:$0xf]  ;;  %v11750_v10 = vor.u32 %v15161_v17, %v11749_v61  ;;  %v11741_v3 = vld [vmem:[#allocation7 + $0x87c] sm:$0xf] }
  0xf5   :  { %2224 = vmatpush.bf16.msra.mxu0 %v11622_v21  ;;  %2372 = vmatpush.bf16.msra.mxu1 %v11654_v23  ;;  %v11601_v23 = vld [vmem:[#allocation7 + $0x634] sm:$0xf]  ;;  %v11813_v6 = vld [vmem:[#allocation7 + $0xa00] sm:$0xf]  ;;  %v15182_v34 = vld [vmem:[#allocation7 + $0x220] sm:$0xf0] }
  0xf6   :  { %2537 = vmatpush.bf16.msra.mxu3 %v11718_v27  ;;  %v763_v21 = vpack.c.bf16 %v762_v11, %v762_v11  ;;  %v15132_v27 = vld [vmem:[#allocation7 + $0x94] sm:$0xf0]  ;;  %v11745_v11 = vld [vmem:[#allocation7 + $0x93c] sm:$0xf]  ;;  %v11801_v54 = vld [vmem:[#allocation7 + $0x7c0] sm:$0xf] }
  0xf7   :  { %2385 = vmatpush.bf16.msra.mxu2 %v11686_v24  ;;  %v15124_v24 = vld [vmem:[#allocation7 + $0x690] sm:$0xf0]  ;;  %v11634_v44 = vor.u32 %v15132_v27, %v11633_v25  ;;  %v15184_v25 = vld [vmem:[#allocation7 + $0x3a0] sm:$0xf0]  ;;  %v11733_v58 = vld [vmem:[#allocation7 + $0x6fc] sm:$0xf] }
  0xf8   :  { %764 = vst [vmem:[#allocation2 + $0xc] sm:$0xf] %v763_v21  ;;  %v11602_v39 = vor.u32 %v15124_v24, %v11601_v23  ;;  %v15976_v23 = vld [vmem:[#allocation9 + $0x5] ss:$0 sm:$0xff]  ;;  %v15157_v61 = vld [vmem:[#allocation7 + $0x758] sm:$0xf0] }
  0xf9   :  { %2225 = vmatpush.bf16.msra.mxu0 %v11618_v36  ;;  %2373 = vmatpush.bf16.msra.mxu1 %v11650_v43  ;;  %v760_v32 = vpop.f32.mrf.mxu2  ;;  %v15163_v36 = vld [vmem:[#allocation7 + $0xbd8] sm:$0xf0]  ;;  %v15171_v43 = vld [vmem:[#allocation7 + $0x5dc] sm:$0xf0]  ;;  %v11841_v24 = vld [vmem:[#allocation7 + $0x344] sm:$0xf] }
  0xfa   :  { %2538 = vmatpush.bf16.msra.mxu3 %v11714_v45  ;;  %v908_v38 = vpop.f32.mrf.mxu3  ;;  %v11666_v45 = vor.u32 %v15140_v29, %v11665_v28  ;;  %v11758_v49 = vor.u32 %v15163_v36, %v11757_v35  ;;  %v11790_v50 = vor.u32 %v15171_v43, %v11789_v37  ;;  %v11778_v28 = vor.u32 %v15168_v20, %v11777_v19  ;;  %v15167_v35 = vld [vmem:[#allocation7 + $0x2dc] sm:$0xf0]  ;;  %v11837_v43 = vld [vmem:[#allocation7 + $0x284] sm:$0xf]  ;;  %v15156_v20 = vld [vmem:[#allocation7 + $0x698] sm:$0xf0] }
  0xfb   :  { %2386 = vmatpush.bf16.msra.mxu2 %v11682_v40  ;;  %v11821_v40 = vld [vmem:[#allocation7 + $0xb80] sm:$0xf]  ;;  %v11842_v32 = vor.u32 %v15184_v25, %v11841_v24  ;;  %v11734_v19 = vor.u32 %v15157_v61, %v11733_v58  ;;  %v15193_v61 = vld [vmem:[#allocation7 + $0xa60] sm:$0xf0] }
  0xfc   :  { %v11822_v51 = vor.u32 %v15179_v41, %v11821_v40  ;;  %v11805_v36 = vld [vmem:[#allocation7 + $0x880] sm:$0xf]  ;;  %v15183_v40 = vld [vmem:[#allocation7 + $0x2e0] sm:$0xf0]  ;;  %v11742_v41 = vor.u32 %v15159_v30, %v11741_v3 }
  0xfd   :  { %2226 = vmatpush.bf16.msra.mxu0 %v11614_v53  ;;  %2374 = vmatpush.bf16.msra.mxu1 %v11646_v55  ;;  %v15162_v53 = vld [vmem:[#allocation7 + $0xb18] sm:$0xf0]  ;;  %v11854_v55 = vor.u32 %v15187_v47, %v11853_v46  ;;  %v15175_v37 = vld [vmem:[#allocation7 + $0x8dc] sm:$0xf0]  ;;  %v11774_v46 = vor.u32 %v15167_v35, %v11773_v31  ;;  %v11885_v3 = vld [vmem:[#allocation7 + $0xb84] sm:$0xf] }
  0xfe   :  { %2539 = vmatpush.bf16.msra.mxu3 %v11710_v18  ;;  %v15186_v18 = vld [vmem:[#allocation7 + $0x520] sm:$0xf0]  ;;  %v11754_v60 = vor.u32 %v15162_v53, %v11753_v52  ;;  %v11806_v47 = vor.u32 %v15175_v37, %v11805_v36  ;;  %v11838_v52 = vor.u32 %v15183_v40, %v11837_v43  ;;  %v15164_v25 = vld [vmem:[#allocation7 + $0x9c] sm:$0xf0]  ;;  %v11917_v31 = vld [vmem:[#allocation7 + $0x588] sm:$0xf] }
  0xff   :  { %2387 = vmatpush.bf16.msra.mxu2 %v11678_v56  ;;  %v16399_v56 = vpack.c.b16 %v2110_v42, %v2110_v42  ;;  %v11737_v42 = vld [vmem:[#allocation7 + $0x7bc] sm:$0xf]  ;;  %v15195_v30 = vld [vmem:[#allocation7 + $0xbe0] sm:$0xf0]  ;;  %v15203_v36 = vld [vmem:[#allocation7 + $0x5e4] sm:$0xf0] }
 0x100   :  { %v11949_v37 = vld [vmem:[#allocation7 + $0x58c] sm:$0xf] }
 0x101   :  { %2227 = vmatpush.bf16.msra.mxu0 %v11610_v4  ;;  %2375 = vmatpush.bf16.msra.mxu1 %v11642_v7  ;;  %v11850_v4 = vor.u32 %v15186_v18, %v11849_v59  ;;  %v15177_v7 = vld [vmem:[#allocation7 + $0xa5c] sm:$0xf0] }
 0x102   :  { %2540 = vmatpush.bf16.msra.mxu3 %v11706_v12  ;;  %v11782_v12 = vor.u32 %v15169_v5, %v11781_v1  ;;  %v11814_v15 = vor.u32 %v15177_v7, %v11813_v6  ;;  %v15165_v5 = vld [vmem:[#allocation7 + $0x15c] sm:$0xf0]  ;;  %v178_v7 = vld [vmem:[#allocation5 + $0x48] sm:$0xff] }
 0x103   :  { %2388 = vmatpush.bf16.msra.mxu2 %v11674_v8  ;;  %v11845_v8 = vld [vmem:[#allocation7 + $0x404] sm:$0xf] }
 0x104   :  { %v11846_v21 = vor.u32 %v15185_v9, %v11845_v8  ;;  %v177_v6 = vld [vmem:[#allocation5 + $0x40] sm:$0xff]  ;;  %v11834_v9 = vor.u32 %v15182_v34, %v11833_v57  ;;  %v11977_v57 = vld [vmem:[#allocation7 + $0xacc] sm:$0xf] }
 0x105   :  { %2228 = vmatpush.bf16.msra.mxu0 %v11606_v22  ;;  %2376 = vmatpush.bf16.msra.mxu1 %v11638_v13  ;;  %v11809_v22 = vld [vmem:[#allocation7 + $0x940] sm:$0xf]  ;;  %v11746_v13 = vor.u32 %v15160_v16, %v11745_v11  ;;  %v11729_v16 = vld [vmem:[#allocation7 + $0x63c] sm:$0xf]  ;;  %v15218_v34 = vld [vmem:[#allocation7 + $0xb28] sm:$0xf0] }
 0x106   :  { %2541 = vmatpush.bf16.msra.mxu3 %v11702_v33  ;;  %v15173_v11 = vld [vmem:[#allocation7 + $0x75c] sm:$0xf0]  ;;  %v11730_v35 = vor.u32 %v15156_v20, %v11729_v16  ;;  %v11937_v16 = vld [vmem:[#allocation7 + $0x34c] sm:$0xf] }
 0x107   :  { %2389 = vmatpush.bf16.msra.mxu2 %v11670_v26  ;;  %v15216_v20 = vld [vmem:[#allocation7 + $0x9a8] sm:$0xf0] }
 0x109   :  { %2229 = vmatpush.bf16.msra.mxu0 %v11602_v39  ;;  %2377 = vmatpush.bf16.msra.mxu1 %v11634_v44  ;;  %v919_v26 = vpop.f32.mrf.mxu0  ;;  %v1070_v27 = vpop.f32.mrf.mxu1  ;;  %v15977_v44 = vld [vmem:[#allocation9 + $0x6] ss:$0 sm:$0xff] }
 0x10a   :  { %2542 = vmatpush.bf16.msra.mxu3 %v11698_v48  ;;  %v920_v29 = vadd.f32 %v919_v26, %v907_v14  ;;  %v1071_v38 = vadd.f32 %v15976_v23, %v1070_v27  ;;  %v15181_v14 = vld [vmem:[#allocation7 + $0x160] sm:$0xf0]  ;;  %v15172_v26 = vld [vmem:[#allocation7 + $0x69c] sm:$0xf0] }
 0x10b   :  { %2390 = vmatpush.bf16.msra.mxu2 %v11666_v45 }
 0x10c   :  { %2230 = vmatmul.bf16.vlgmr.msra.gmra.mxu0 %v16399_v56  ;;  %2378 = vmatmul.bf16.vlgmr.msra.gmra.mxu1 %v16390_v63  ;;  %v15176_v63 = vld [vmem:[#allocation7 + $0x99c] sm:$0xf0]  ;;  %v923_v39 = vmax.f32 %v920_v29, 0.0  ;;  %v15180_v29 = vld [vmem:[#allocation7 + $0xa0] sm:$0xf0] }
 0x10d   :  { %2548 = vmatpush.bf16.msrb.mxu0 %v11758_v49  ;;  %2696 = vmatpush.bf16.msrb.mxu1 %v11790_v50  ;;  %v11810_v33 = vor.u32 %v15176_v63, %v11809_v22  ;;  %v15158_v49 = vld [vmem:[#allocation7 + $0x818] sm:$0xf0]  ;;  %v11769_v50 = vld [vmem:[#allocation7 + $0x1c0] sm:$0xf]  ;;  %v16406_v22 = vpack.c.bf16 %v178_v7, %v177_v6  ;;  %v15978_v7 = vld [vmem:[#allocation9 + $0x7] ss:$0 sm:$0xff] }
 0x10e   :  { %2860 = vmatpush.bf16.msrb.mxu3 %v11854_v55  ;;  %2391 = vmatmul.bf16.vlgmr.msra.gmra.mxu2 %v16399_v56  ;;  %v924_v45 = vpack.c.bf16 %v923_v39, %v923_v39  ;;  %v15174_v55 = vld [vmem:[#allocation7 + $0x81c] sm:$0xf0] }
 0x10f   :  { %2709 = vmatpush.bf16.msrb.mxu2 %v11822_v51  ;;  %2543 = vmatmul.bf16.vlgmr.msra.gmra.mxu3 %v16399_v56  ;;  %v15166_v51 = vld [vmem:[#allocation7 + $0x21c] sm:$0xf0]  ;;  %v2436_v39 = vunpack.c.l.b16 %v16406_v22 }
 0x110   :  { %925 = vst [vmem:[#allocation2 + $0x10] sm:$0xf] %v924_v45  ;;  %v11770_v2 = vor.u32 %v15166_v51, %v11769_v50  ;;  %v11886_v45 = vor.u32 %v15195_v30, %v11885_v3  ;;  %v11913_v50 = vld [vmem:[#allocation7 + $0x4c8] sm:$0xf]  ;;  %v11933_v3 = vld [vmem:[#allocation7 + $0x28c] sm:$0xf] }
 0x111   :  { %2549 = vmatpush.bf16.msrb.mxu0 %v11754_v60  ;;  %2697 = vmatpush.bf16.msrb.mxu1 %v11786_v62  ;;  %v1083_v48 = vpop.f32.mrf.mxu2  ;;  %v11738_v60 = vor.u32 %v15158_v49, %v11737_v42  ;;  %v11765_v62 = vld [vmem:[#allocation7 + $0x100] sm:$0xf]  ;;  %v1072_v17 = vpop.f32.mrf.mxu1  ;;  %v15219_v42 = vld [vmem:[#allocation7 + $0xbe8] sm:$0xf0]  ;;  %v15194_v49 = vld [vmem:[#allocation7 + $0xb20] sm:$0xf0] }
 0x112   :  { %2861 = vmatpush.bf16.msrb.mxu3 %v11850_v4  ;;  %v1084_v53 = vadd.f32 %v1083_v48, %v1071_v38  ;;  %v1167_v59 = vpop.f32.mrf.mxu3  ;;  %v11802_v4 = vor.u32 %v15174_v55, %v11801_v54  ;;  %v11766_v23 = vor.u32 %v15165_v5, %v11765_v62  ;;  %v15211_v38 = vld [vmem:[#allocation7 + $0x5e8] sm:$0xf0]  ;;  %v11881_v48 = vld [vmem:[#allocation7 + $0xac4] sm:$0xf]  ;;  %v11909_v62 = vld [vmem:[#allocation7 + $0x408] sm:$0xf] }
 0x113   :  { %2710 = vmatpush.bf16.msrb.mxu2 %v11818_v0  ;;  %v921_v0 = vpop.f32.mrf.mxu0  ;;  %v1168_v1 = vadd.f32 %v15977_v44, %v1167_v59  ;;  %v11945_v54 = vld [vmem:[#allocation7 + $0x4cc] sm:$0xf]  ;;  %v11882_v58 = vor.u32 %v15194_v49, %v11881_v48  ;;  %v15201_v17 = vld [vmem:[#allocation7 + $0x464] sm:$0xf0] }
 0x114   :  { %v1087_v18 = vmax.f32 %v1084_v53, 0.0  ;;  %v15202_v53 = vld [vmem:[#allocation7 + $0x524] sm:$0xf0]  ;;  %v15210_v55 = vld [vmem:[#allocation7 + $0x528] sm:$0xf0]  ;;  %v11978_v0 = vor.u32 %v15218_v34, %v11977_v57 }
 0x115   :  { %2550 = vmatpush.bf16.msrb.mxu0 %v11750_v10  ;;  %2698 = vmatpush.bf16.msrb.mxu1 %v11782_v12  ;;  %v11797_v10 = vld [vmem:[#allocation7 + $0x700] sm:$0xf]  ;;  %v1171_v12 = vmax.f32 %v1168_v1, 0.0  ;;  %v11914_v59 = vor.u32 %v15202_v53, %v11913_v50  ;;  %v11941_v1 = vld [vmem:[#allocation7 + $0x40c] sm:$0xf] }
 0x116   :  { %2862 = vmatpush.bf16.msrb.mxu3 %v11846_v21  ;;  %v1088_v8 = vpack.c.bf16 %v1087_v18, %v1087_v18  ;;  %v11761_v21 = vld [vmem:[#allocation7 + $0x40] sm:$0xf]  ;;  %v11798_v24 = vor.u32 %v15173_v11, %v11797_v10  ;;  %v11946_v18 = vor.u32 %v15210_v55, %v11945_v54  ;;  %v15217_v5 = vld [vmem:[#allocation7 + $0xa68] sm:$0xf0]  ;;  %v11873_v10 = vld [vmem:[#allocation7 + $0x944] sm:$0xf] }
 0x117   :  { %2711 = vmatpush.bf16.msrb.mxu2 %v11814_v15  ;;  %v11829_v15 = vld [vmem:[#allocation7 + $0x104] sm:$0xf]  ;;  %v1172_v63 = vpack.c.bf16 %v1171_v12, %v1171_v12  ;;  %v11762_v43 = vor.u32 %v15164_v25, %v11761_v21  ;;  %v11905_v12 = vld [vmem:[#allocation7 + $0x348] sm:$0xf]  ;;  %v15207_v30 = vld [vmem:[#allocation7 + $0x2e8] sm:$0xf0] }
 0x118   :  { %1089 = vst [vmem:[#allocation2 + $0x14] sm:$0xf] %v1088_v8  ;;  %v11910_v8 = vor.u32 %v15201_v17, %v11909_v62  ;;  %v15192_v11 = vld [vmem:[#allocation7 + $0x9a0] sm:$0xf0]  ;;  %v15206_v48 = vld [vmem:[#allocation7 + $0x228] sm:$0xf0] }
 0x119   :  { %2551 = vmatpush.bf16.msrb.mxu0 %v11746_v13  ;;  %2699 = vmatpush.bf16.msrb.mxu1 %v11778_v28  ;;  %v11793_v13 = vld [vmem:[#allocation7 + $0x640] sm:$0xf]  ;;  %v1085_v27 = vpop.f32.mrf.mxu2  ;;  %v11830_v28 = vor.u32 %v15181_v14, %v11829_v15  ;;  %1173 = vst [vmem:[#allocation2 + $0x18] sm:$0xf] %v1172_v63  ;;  %v15200_v14 = vld [vmem:[#allocation7 + $0x3a4] sm:$0xf0]  ;;  %v11874_v63 = vor.u32 %v15192_v11, %v11873_v10 }
 0x11a   :  { %2863 = vmatpush.bf16.msrb.mxu3 %v11842_v32  ;;  %v1169_v32 = vpop.f32.mrf.mxu3  ;;  %v11794_v40 = vor.u32 %v15172_v26, %v11793_v13  ;;  %v11906_v25 = vor.u32 %v15200_v14, %v11905_v12  ;;  %v11869_v26 = vld [vmem:[#allocation7 + $0x884] sm:$0xf]  ;;  %v11961_v50 = vld [vmem:[#allocation7 + $0x7cc] sm:$0xf]  ;;  %v11889_v11 = vld [vmem:[#allocation7 + $0x48] sm:$0xf] }
 0x11b   :  { %2712 = vmatpush.bf16.msrb.mxu2 %v11810_v33  ;;  %v11825_v33 = vld [vmem:[#allocation7 + $0x44] sm:$0xf]  ;;  %v11965_v32 = vld [vmem:[#allocation7 + $0x88c] sm:$0xf]  ;;  %v15196_v14 = vld [vmem:[#allocation7 + $0xa4] sm:$0xf0] }
 0x11c   :  { %v11826_v44 = vor.u32 %v15180_v29, %v11825_v33  ;;  %v15191_v27 = vld [vmem:[#allocation7 + $0x8e0] sm:$0xf0]  ;;  %v15199_v29 = vld [vmem:[#allocation7 + $0x2e4] sm:$0xf0]  ;;  %v11925_v17 = vld [vmem:[#allocation7 + $0x10c] sm:$0xf] }
 0x11d   :  { %2552 = vmatpush.bf16.msrb.mxu0 %v11742_v41  ;;  %2700 = vmatpush.bf16.msrb.mxu1 %v11774_v46  ;;  %v11981_v41 = vld [vmem:[#allocation7 + $0xb8c] sm:$0xf]  ;;  %v11918_v46 = vor.u32 %v15203_v36, %v11917_v31  ;;  %v15979_v36 = vld [vmem:[#allocation9 + $0x8] ss:$0 sm:$0xff]  ;;  %v11861_v57 = vld [vmem:[#allocation7 + $0x704] sm:$0xf] }
 0x11e   :  { %2864 = vmatpush.bf16.msrb.mxu3 %v11838_v52  ;;  %v11982_v51 = vor.u32 %v15219_v42, %v11981_v41  ;;  %v2437_v52 = vpack.c.b16 %v2436_v39, %v2436_v39  ;;  %v15190_v41 = vld [vmem:[#allocation7 + $0x820] sm:$0xf0]  ;;  %v11897_v42 = vld [vmem:[#allocation7 + $0x1c8] sm:$0xf] }
 0x11f   :  { %2713 = vmatpush.bf16.msrb.mxu2 %v11806_v47  ;;  %v11950_v47 = vor.u32 %v15211_v38, %v11949_v37  ;;  %v11870_v37 = vor.u32 %v15191_v27, %v11869_v26  ;;  %v15188_v10 = vld [vmem:[#allocation7 + $0x6a0] sm:$0xf0]  ;;  %v12045_v26 = vld [vmem:[#allocation7 + $0xb90] sm:$0xf] }
 0x121   :  { %2553 = vmatpush.bf16.msrb.mxu0 %v11738_v60  ;;  %2701 = vmatpush.bf16.msrb.mxu1 %v11770_v2  ;;  %v11877_v60 = vld [vmem:[#allocation7 + $0xa04] sm:$0xf]  ;;  %v15209_v2 = vld [vmem:[#allocation7 + $0x468] sm:$0xf0] }
 0x122   :  { %2865 = vmatpush.bf16.msrb.mxu3 %v11834_v9  ;;  %v11878_v6 = vor.u32 %v15193_v61, %v11877_v60  ;;  %v11942_v9 = vor.u32 %v15209_v2, %v11941_v1  ;;  %v11893_v60 = vld [vmem:[#allocation7 + $0x108] sm:$0xf]  ;;  %v15205_v1 = vld [vmem:[#allocation7 + $0x168] sm:$0xf0] }
 0x123   :  { %2714 = vmatpush.bf16.msrb.mxu2 %v11802_v4  ;;  %v11973_v4 = vld [vmem:[#allocation7 + $0xa0c] sm:$0xf]  ;;  %v15197_v61 = vld [vmem:[#allocation7 + $0x164] sm:$0xf0] }
 0x124   :  { %v11974_v15 = vor.u32 %v15217_v5, %v11973_v4  ;;  %v11957_v2 = vld [vmem:[#allocation7 + $0x70c] sm:$0xf]  ;;  %v11894_v12 = vor.u32 %v15197_v61, %v11893_v60  ;;  %v15241_v60 = vld [vmem:[#allocation7 + $0x470] sm:$0xf0] }
 0x125   :  { %2554 = vmatpush.bf16.msrb.mxu0 %v11734_v19  ;;  %2702 = vmatpush.bf16.msrb.mxu1 %v11766_v23  ;;  %v15208_v19 = vld [vmem:[#allocation7 + $0x3a8] sm:$0xf0]  ;;  %v12101_v61 = vld [vmem:[#allocation7 + $0xa14] sm:$0xf] }
 0x126   :  { %2866 = vmatpush.bf16.msrb.mxu3 %v11830_v28  ;;  %v11938_v13 = vor.u32 %v15208_v19, %v11937_v16  ;;  %v11901_v28 = vld [vmem:[#allocation7 + $0x288] sm:$0xf]  ;;  %v15213_v4 = vld [vmem:[#allocation7 + $0x768] sm:$0xf0] }
 0x127   :  { %2715 = vmatpush.bf16.msrb.mxu2 %v11798_v24  ;;  %v11902_v39 = vor.u32 %v15199_v29, %v11901_v28  ;;  %v11921_v16 = vld [vmem:[#allocation7 + $0x4c] sm:$0xf]  ;;  %v12077_v29 = vld [vmem:[#allocation7 + $0x594] sm:$0xf] }
 0x128   :  { %v15204_v19 = vld [vmem:[#allocation7 + $0xa8] sm:$0xf0] }
 0x129   :  { %2555 = vmatpush.bf16.msrb.mxu0 %v11730_v35  ;;  %2703 = vmatpush.bf16.msrb.mxu1 %v11762_v43  ;;  %v1319_v21 = vpop.f32.mrf.mxu0  ;;  %v1332_v24 = vpop.f32.mrf.mxu1  ;;  %v15215_v35 = vld [vmem:[#allocation7 + $0x8e8] sm:$0xf0]  ;;  %v11934_v43 = vor.u32 %v15207_v30, %v11933_v3  ;;  %v15243_v3 = vld [vmem:[#allocation7 + $0x5f0] sm:$0xf0]  ;;  %v2761_v30 = vunpack.c.h.b16 %v16406_v22 }
 0x12a   :  { %2867 = vmatpush.bf16.msrb.mxu3 %v11826_v44  ;;  %v1320_v23 = vadd.f32 %v15978_v7, %v1319_v21  ;;  %v11966_v44 = vor.u32 %v15215_v35, %v11965_v32  ;;  %v180_v7 = vld [vmem:[#allocation5 + $0x58] sm:$0xff]  ;;  %v11953_v21 = vld [vmem:[#allocation7 + $0x64c] sm:$0xf]  ;;  %v11922_v32 = vor.u32 %v15204_v19, %v11921_v16  ;;  %v12109_v35 = vld [vmem:[#allocation7 + $0xb94] sm:$0xf] }
 0x12b   :  { %2716 = vmatpush.bf16.msrb.mxu2 %v11794_v40  ;;  %v11865_v40 = vld [vmem:[#allocation7 + $0x7c4] sm:$0xf]  ;;  %v12073_v22 = vld [vmem:[#allocation7 + $0x4d4] sm:$0xf] }
 0x12c   :  { %2704 = vmatmul.bf16.vlgmr.msrb.gmra.mxu1 %v16399_v56  ;;  %2556 = vmatmul.bf16.vlgmr.msrb.gmra.mxu0 %v2437_v52  ;;  %v11969_v56 = vld [vmem:[#allocation7 + $0x94c] sm:$0xf]  ;;  %v1333_v31 = vadd.f32 %v1332_v24, %v1320_v23  ;;  %v11866_v55 = vor.u32 %v15190_v41, %v11865_v40  ;;  %v12013_v23 = vld [vmem:[#allocation7 + $0x590] sm:$0xf]  ;;  %v12078_v40 = vor.u32 %v15243_v3, %v12077_v29  ;;  %v15247_v29 = vld [vmem:[#allocation7 + $0x8f0] sm:$0xf0] }
 0x12d   :  { %2873 = vmatpush.bf16.msra.mxu0 %v11886_v45  ;;  %2957 = vmatpush.bf16.msra.mxu1 %v11918_v46  ;;  %v11970_v33 = vor.u32 %v15216_v20, %v11969_v56  ;;  %v15198_v46 = vld [vmem:[#allocation7 + $0x224] sm:$0xf0]  ;;  %v11958_v20 = vor.u32 %v15213_v4, %v11957_v2  ;;  %v12009_v41 = vld [vmem:[#allocation7 + $0x4d0] sm:$0xf] }
 0x12e   :  { %3122 = vmatpush.bf16.msra.mxu3 %v11982_v51  ;;  %2717 = vmatmul.bf16.vlgmr.msrb.gmra.mxu2 %v2437_v52  ;;  %v1336_v38 = vmax.f32 %v1333_v31, 0.0  ;;  %v15214_v51 = vld [vmem:[#allocation7 + $0x828] sm:$0xf0]  ;;  %v11890_v31 = vor.u32 %v15196_v14, %v11889_v11  ;;  %v12001_v4 = vld [vmem:[#allocation7 + $0x350] sm:$0xf] }
 0x12f   :  { %3109 = vmatpush.bf16.msra.mxu2 %v11950_v47  ;;  %2868 = vmatmul.bf16.vlgmr.msrb.gmra.mxu3 %v2437_v52  ;;  %v11929_v47 = vld [vmem:[#allocation7 + $0x1cc] sm:$0xf]  ;;  %v12097_v11 = vld [vmem:[#allocation7 + $0x954] sm:$0xf]  ;;  %v15981_v3 = vld [vmem:[#allocation9 + $0xa] ss:$0 sm:$0xff] }
 0x130   :  { %v1337_v45 = vpack.c.bf16 %v1336_v38, %v1336_v38 }
 0x131   :  { %2874 = vmatpush.bf16.msra.mxu0 %v11882_v58  ;;  %2958 = vmatpush.bf16.msra.mxu1 %v11914_v59  ;;  %v1480_v49 = vpop.f32.mrf.mxu2  ;;  %v1321_v54 = vpop.f32.mrf.mxu0  ;;  %v11898_v58 = vor.u32 %v15198_v46, %v11897_v42  ;;  %v11930_v59 = vor.u32 %v15206_v48, %v11929_v47  ;;  %v15226_v42 = vld [vmem:[#allocation7 + $0x52c] sm:$0xf0]  ;;  %v15242_v47 = vld [vmem:[#allocation7 + $0x530] sm:$0xf0]  ;;  %v16414_v48 = vpack.c.b16 %v2761_v30, %v2761_v30 }
 0x132   :  { %3123 = vmatpush.bf16.msra.mxu3 %v11978_v0  ;;  %v1481_v52 = vadd.f32 %v15979_v36, %v1480_v49  ;;  %v1493_v53 = vpop.f32.mrf.mxu3  ;;  %1338 = vst [vmem:[#allocation2 + $0x1c] sm:$0xf] %v1337_v45  ;;  %v1334_v34 = vpop.f32.mrf.mxu1  ;;  %v11962_v0 = vor.u32 %v15214_v51, %v11961_v50  ;;  %v15251_v36 = vld [vmem:[#allocation7 + $0xbf0] sm:$0xf0]  ;;  %v15234_v46 = vld [vmem:[#allocation7 + $0xb2c] sm:$0xf0]  ;;  %v12010_v51 = vor.u32 %v15226_v42, %v12009_v41 }
 0x133   :  { %3110 = vmatpush.bf16.msra.mxu2 %v11946_v18  ;;  %v15189_v18 = vld [vmem:[#allocation7 + $0x760] sm:$0xf0]  ;;  %v12110_v45 = vor.u32 %v15251_v36, %v12109_v35  ;;  %v12105_v49 = vld [vmem:[#allocation7 + $0xad4] sm:$0xf]  ;;  %v12074_v54 = vor.u32 %v15242_v47, %v12073_v22  ;;  %v12037_v34 = vld [vmem:[#allocation7 + $0xa10] sm:$0xf] }
 0x134   :  { %v1494_v62 = vadd.f32 %v1493_v53, %v1481_v52  ;;  %v15250_v50 = vld [vmem:[#allocation7 + $0xb30] sm:$0xf0]  ;;  %v11993_v36 = vld [vmem:[#allocation7 + $0x1d0] sm:$0xf] }
 0x135   :  { %2875 = vmatpush.bf16.msra.mxu0 %v11878_v6  ;;  %2959 = vmatpush.bf16.msra.mxu1 %v11910_v8  ;;  %v179_v6 = vld [vmem:[#allocation5 + $0x50] sm:$0xff]  ;;  %v11862_v8 = vor.u32 %v15189_v18, %v11861_v57 }
 0x136   :  { %3124 = vmatpush.bf16.msra.mxu3 %v11974_v15  ;;  %v1497_v5 = vmax.f32 %v1494_v62, 0.0  ;;  %v11926_v15 = vor.u32 %v15205_v1, %v11925_v17  ;;  %v15225_v57 = vld [vmem:[#allocation7 + $0x46c] sm:$0xf0]  ;;  %v12069_v18 = vld [vmem:[#allocation7 + $0x414] sm:$0xf] }
 0x137   :  { %3111 = vmatpush.bf16.msra.mxu2 %v11942_v9  ;;  %v11857_v9 = vld [vmem:[#allocation7 + $0x644] sm:$0xf]  ;;  %v15249_v62 = vld [vmem:[#allocation7 + $0xa70] sm:$0xf0]  ;;  %v15980_v17 = vld [vmem:[#allocation9 + $0x9] ss:$0 sm:$0xff]  ;;  %v12070_v2 = vor.u32 %v15241_v60, %v12069_v18 }
 0x138   :  { %v1498_v56 = vpack.c.bf16 %v1497_v5, %v1497_v5  ;;  %v11858_v28 = vor.u32 %v15188_v10, %v11857_v9  ;;  %v15224_v5 = vld [vmem:[#allocation7 + $0x3ac] sm:$0xf0]  ;;  %v12065_v9 = vld [vmem:[#allocation7 + $0x354] sm:$0xf] }
 0x139   :  { %2876 = vmatpush.bf16.msra.mxu0 %v11874_v63  ;;  %2960 = vmatpush.bf16.msra.mxu1 %v11906_v25  ;;  %v15212_v63 = vld [vmem:[#allocation7 + $0x6a8] sm:$0xf0]  ;;  %v1482_v24 = vpop.f32.mrf.mxu2  ;;  %v16410_v25 = vpack.c.bf16 %v180_v7, %v179_v6  ;;  %v12033_v6 = vld [vmem:[#allocation7 + $0x950] sm:$0xf]  ;;  %v12102_v7 = vor.u32 %v15249_v62, %v12101_v61  ;;  %v15240_v10 = vld [vmem:[#allocation7 + $0x3b0] sm:$0xf0]  ;;  %v12002_v14 = vor.u32 %v15224_v5, %v12001_v4 }
 0x13a   :  { %3125 = vmatpush.bf16.msra.mxu3 %v11970_v33  ;;  %1499 = vst [vmem:[#allocation2 + $0x20] sm:$0xf] %v1498_v56  ;;  %v1495_v27 = vpop.f32.mrf.mxu3  ;;  %v15235_v33 = vld [vmem:[#allocation7 + $0xbec] sm:$0xf0]  ;;  %v15238_v41 = vld [vmem:[#allocation7 + $0x230] sm:$0xf0] }
 0x13b   :  { %3112 = vmatpush.bf16.msra.mxu2 %v11938_v13  ;;  %v15227_v13 = vld [vmem:[#allocation7 + $0x5ec] sm:$0xf0]  ;;  %v15239_v27 = vld [vmem:[#allocation7 + $0x2f0] sm:$0xf0] }
 0x13c   :  { %v12014_v38 = vor.u32 %v15227_v13, %v12013_v23  ;;  %v12029_v23 = vld [vmem:[#allocation7 + $0x890] sm:$0xf]  ;;  %v12053_v60 = vld [vmem:[#allocation7 + $0x114] sm:$0xf] }
 0x13d   :  { %2877 = vmatpush.bf16.msra.mxu0 %v11870_v37  ;;  %2961 = vmatpush.bf16.msra.mxu1 %v11902_v39  ;;  %v11954_v37 = vor.u32 %v15212_v63, %v11953_v21  ;;  %v3010_v39 = vunpack.c.l.b16 %v16410_v25  ;;  %v11997_v21 = vld [vmem:[#allocation7 + $0x290] sm:$0xf]  ;;  %v15237_v61 = vld [vmem:[#allocation7 + $0x170] sm:$0xf0] }
 0x13e   :  { %3126 = vmatpush.bf16.msra.mxu3 %v11966_v44  ;;  %v12041_v44 = vld [vmem:[#allocation7 + $0xad0] sm:$0xf]  ;;  %v12085_v62 = vld [vmem:[#allocation7 + $0x714] sm:$0xf] }
 0x13f   :  { %3113 = vmatpush.bf16.msra.mxu2 %v11934_v43  ;;  %v12046_v43 = vor.u32 %v15235_v33, %v12045_v26  ;;  %v16416_v52 = vpack.c.b16 %v3010_v39, %v3010_v39  ;;  %v12042_v53 = vor.u32 %v15234_v46, %v12041_v44  ;;  %v15223_v63 = vld [vmem:[#allocation7 + $0x2ec] sm:$0xf0]  ;;  %v12061_v26 = vld [vmem:[#allocation7 + $0x294] sm:$0xf] }
 0x140   :  { %v15231_v13 = vld [vmem:[#allocation7 + $0x8ec] sm:$0xf0]  ;;  %v12093_v33 = vld [vmem:[#allocation7 + $0x894] sm:$0xf]  ;;  %v11998_v30 = vor.u32 %v15223_v63, %v11997_v21  ;;  %v12062_v35 = vor.u32 %v15239_v27, %v12061_v26 }
 0x141   :  { %2878 = vmatpush.bf16.msra.mxu0 %v11866_v55  ;;  %2962 = vmatpush.bf16.msra.mxu1 %v11898_v58  ;;  %v12005_v55 = vld [vmem:[#allocation7 + $0x410] sm:$0xf]  ;;  %v12106_v58 = vor.u32 %v15250_v50, %v12105_v49  ;;  %v12094_v39 = vor.u32 %v15247_v29, %v12093_v33  ;;  %v15246_v46 = vld [vmem:[#allocation7 + $0x830] sm:$0xf0]  ;;  %v15283_v33 = vld [vmem:[#allocation10 + $0x59c] sm:$0xf0]  ;;  %v3335_v29 = vunpack.c.h.b16 %v16410_v25 }
 0x142   :  { %3127 = vmatpush.bf16.msra.mxu3 %v11962_v0  ;;  %v12006_v0 = vor.u32 %v15225_v57, %v12005_v55  ;;  %v11989_v55 = vld [vmem:[#allocation7 + $0x110] sm:$0xf] }
 0x143   :  { %3114 = vmatpush.bf16.msra.mxu2 %v11930_v59  ;;  %v15233_v59 = vld [vmem:[#allocation7 + $0xa6c] sm:$0xf0] }
 0x144   :  { %v12038_v1 = vor.u32 %v15233_v59, %v12037_v34  ;;  %v15221_v57 = vld [vmem:[#allocation7 + $0x16c] sm:$0xf0] }
 0x145   :  { %2879 = vmatpush.bf16.msra.mxu0 %v11862_v8  ;;  %2963 = vmatpush.bf16.msra.mxu1 %v11894_v12  ;;  %v15232_v8 = vld [vmem:[#allocation7 + $0x9ac] sm:$0xf0]  ;;  %v15248_v12 = vld [vmem:[#allocation7 + $0x9b0] sm:$0xf0] }
 0x146   :  { %3128 = vmatpush.bf16.msra.mxu3 %v11958_v20  ;;  %v12034_v56 = vor.u32 %v15232_v8, %v12033_v6  ;;  %v12066_v20 = vor.u32 %v15240_v10, %v12065_v9  ;;  %v12098_v24 = vor.u32 %v15248_v12, %v12097_v11  ;;  %v12021_v34 = vld [vmem:[#allocation7 + $0x710] sm:$0xf]  ;;  %v12049_v9 = vld [vmem:[#allocation7 + $0x54] sm:$0xf] }
 0x147   :  { %3115 = vmatpush.bf16.msra.mxu2 %v11926_v15  ;;  %v15229_v18 = vld [vmem:[#allocation7 + $0x76c] sm:$0xf0]  ;;  %v15236_v10 = vld [vmem:[#allocation7 + $0xb0] sm:$0xf0] }
 0x148   :  { %v15220_v4 = vld [vmem:[#allocation7 + $0xac] sm:$0xf0]  ;;  %v12022_v6 = vor.u32 %v15229_v18, %v12021_v34  ;;  %v12050_v27 = vor.u32 %v15236_v10, %v12049_v9 }
 0x149   :  { %2880 = vmatpush.bf16.msra.mxu0 %v11858_v28  ;;  %2964 = vmatpush.bf16.msra.mxu1 %v11890_v31  ;;  %v1644_v15 = vpop.f32.mrf.mxu0  ;;  %v1657_v19 = vpop.f32.mrf.mxu1  ;;  %v12017_v5 = vld [vmem:[#allocation7 + $0x650] sm:$0xf] }
 0x14a   :  { %3129 = vmatpush.bf16.msra.mxu3 %v11954_v37  ;;  %v1645_v16 = vadd.f32 %v15980_v17, %v1644_v15  ;;  %v15222_v37 = vld [vmem:[#allocation7 + $0x22c] sm:$0xf0]  ;;  %v12081_v15 = vld [vmem:[#allocation7 + $0x654] sm:$0xf] }
 0x14b   :  { %3116 = vmatpush.bf16.msra.mxu2 %v11922_v32  ;;  %v12030_v32 = vor.u32 %v15231_v13, %v12029_v23  ;;  %v11994_v50 = vor.u32 %v15222_v37, %v11993_v36  ;;  %v15228_v8 = vld [vmem:[#allocation7 + $0x6ac] sm:$0xf0]  ;;  %v15267_v23 = vld [vmem:[#allocation7 + $0xbf4] sm:$0xf0]  ;;  %v15275_v13 = vld [vmem:[#allocation7 + $0x5f8] sm:$0xf0] }
 0x14c   :  { %2881 = vmatmul.bf16.vlgmr.msra.gmra.mxu0 %v16414_v48  ;;  %2965 = vmatmul.bf16.vlgmr.msra.gmra.mxu1 %v16414_v48  ;;  %v1658_v28 = vadd.f32 %v1657_v19, %v1645_v16  ;;  %v12141_v16 = vld [vmem:[#allocation7 + $0x598] sm:$0xf]  ;;  %v12018_v26 = vor.u32 %v15228_v8, %v12017_v5 }
 0x14d   :  { %3270 = vmatpush.bf16.msrb.mxu0 %v12014_v38  ;;  %3283 = vmatpush.bf16.msrb.mxu1 %v12046_v43  ;;  %v12025_v38 = vld [vmem:[#allocation7 + $0x7d0] sm:$0xf]  ;;  %v15258_v36 = vld [vmem:[#allocation7 + $0x534] sm:$0xf0] }
 0x14e   :  { %3447 = vmatpush.bf16.msrb.mxu3 %v12110_v45  ;;  %3117 = vmatmul.bf16.vlgmr.msra.gmra.mxu2 %v16414_v48  ;;  %v1661_v31 = vmax.f32 %v1658_v28, 0.0  ;;  %v15230_v43 = vld [vmem:[#allocation7 + $0x82c] sm:$0xf0]  ;;  %v12089_v45 = vld [vmem:[#allocation7 + $0x7d4] sm:$0xf] }
 0x14f   :  { %3434 = vmatpush.bf16.msrb.mxu2 %v12078_v40  ;;  %3130 = vmatmul.bf16.vlgmr.msra.gmra.mxu3 %v16416_v52  ;;  %v12057_v40 = vld [vmem:[#allocation7 + $0x1d4] sm:$0xf]  ;;  %v12090_v59 = vor.u32 %v15246_v46, %v12089_v45  ;;  %v12237_v28 = vld [vmem:[#allocation10 + $0x540] sm:$0xf] }
 0x150   :  { %v1662_v42 = vpack.c.bf16 %v1661_v31, %v1661_v31  ;;  %v12169_v37 = vld [vmem:[#allocation7 + $0xad8] sm:$0xf] }
 0x151   :  { %3271 = vmatpush.bf16.msrb.mxu0 %v12010_v51  ;;  %3284 = vmatpush.bf16.msrb.mxu1 %v12042_v53  ;;  %v1805_v44 = vpop.f32.mrf.mxu2  ;;  %v1646_v22 = vpop.f32.mrf.mxu0  ;;  %v12026_v53 = vor.u32 %v15230_v43, %v12025_v38  ;;  %v12238_v38 = vor.u32 %v15283_v33, %v12237_v28  ;;  %v12201_v43 = vld [vmem:[#allocation7 + $0x4dc] sm:$0xf]  ;;  %v12121_v28 = vld [vmem:[#allocation7 + $0x1d8] sm:$0xf] }
 0x152   :  { %3448 = vmatpush.bf16.msrb.mxu3 %v12106_v58  ;;  %v1806_v47 = vadd.f32 %v15981_v3, %v1805_v44  ;;  %v1818_v49 = vpop.f32.mrf.mxu3  ;;  %1663 = vst [vmem:[#allocation2 + $0x24] sm:$0xf] %v1662_v42  ;;  %v1659_v51 = vpop.f32.mrf.mxu1  ;;  %v15282_v42 = vld [vmem:[#allocation10 + $0x4dc] sm:$0xf0]  ;;  %v16423_v44 = vpack.c.b16 %v3335_v29, %v3335_v29 }
 0x153   :  { %3435 = vmatpush.bf16.msrb.mxu2 %v12074_v54  ;;  %v12058_v54 = vor.u32 %v15238_v41, %v12057_v40  ;;  %v15274_v40 = vld [vmem:[#allocation7 + $0x538] sm:$0xf0]  ;;  %v12233_v41 = vld [vmem:[#allocation10 + $0x480] sm:$0xf] }
 0x154   :  { %v1819_v58 = vadd.f32 %v1818_v49, %v1806_v47  ;;  %v12202_v46 = vor.u32 %v15274_v40, %v12201_v43  ;;  %v12133_v22 = vld [vmem:[#allocation7 + $0x418] sm:$0xf] }
 0x155   :  { %3272 = vmatpush.bf16.msrb.mxu0 %v12006_v0  ;;  %3285 = vmatpush.bf16.msrb.mxu1 %v12038_v1  ;;  %v15245_v0 = vld [vmem:[#allocation7 + $0x770] sm:$0xf0]  ;;  %v11990_v1 = vor.u32 %v15221_v57, %v11989_v55  ;;  %v15257_v47 = vld [vmem:[#allocation7 + $0x474] sm:$0xf0] }
 0x156   :  { %3449 = vmatpush.bf16.msrb.mxu3 %v12102_v7  ;;  %v1822_v17 = vmax.f32 %v1819_v58, 0.0  ;;  %v12054_v7 = vor.u32 %v15237_v61, %v12053_v60  ;;  %v12086_v12 = vor.u32 %v15245_v0, %v12085_v62  ;;  %v12165_v49 = vld [vmem:[#allocation7 + $0xa18] sm:$0xf]  ;;  %v12134_v34 = vor.u32 %v15257_v47, %v12133_v22  ;;  %v15982_v58 = vld [vmem:[#allocation9 + $0xb] ss:$0 sm:$0xff] }
 0x157   :  { %3436 = vmatpush.bf16.msrb.mxu2 %v12070_v2  ;;  %v11985_v2 = vld [vmem:[#allocation7 + $0x50] sm:$0xf]  ;;  %v15265_v51 = vld [vmem:[#allocation7 + $0xa74] sm:$0xf0] }
 0x158   :  { %v1823_v11 = vpack.c.bf16 %v1822_v17, %v1822_v17  ;;  %v11986_v63 = vor.u32 %v15220_v4, %v11985_v2  ;;  %v12229_v55 = vld [vmem:[#allocation10 + $0x3c0] sm:$0xf]  ;;  %v12193_v17 = vld [vmem:[#allocation7 + $0x35c] sm:$0xf] }
 0x159   :  { %3273 = vmatpush.bf16.msrb.mxu0 %v12002_v14  ;;  %3286 = vmatpush.bf16.msrb.mxu1 %v12034_v56  ;;  %v15244_v14 = vld [vmem:[#allocation7 + $0x6b0] sm:$0xf0]  ;;  %v1807_v19 = vpop.f32.mrf.mxu2  ;;  %v15259_v56 = vld [vmem:[#allocation7 + $0x5f4] sm:$0xf0] }
 0x15a   :  { %3450 = vmatpush.bf16.msrb.mxu3 %v12098_v24  ;;  %1824 = vst [vmem:[#allocation2 + $0x28] sm:$0xf] %v1823_v11  ;;  %v1820_v21 = vpop.f32.mrf.mxu3  ;;  %v12205_v24 = vld [vmem:[#allocation7 + $0x59c] sm:$0xf]  ;;  %v12082_v3 = vor.u32 %v15244_v14, %v12081_v15  ;;  %v15281_v57 = vld [vmem:[#allocation10 + $0x41c] sm:$0xf0] }
 0x15b   :  { %3437 = vmatpush.bf16.msrb.mxu2 %v12066_v20  ;;  %v12173_v20 = vld [vmem:[#allocation7 + $0xb98] sm:$0xf]  ;;  %v12230_v62 = vor.u32 %v15281_v57, %v12229_v55  ;;  %v12189_v19 = vld [vmem:[#allocation7 + $0x29c] sm:$0xf] }
 0x15c   :  { %v12174_v31 = vor.u32 %v15267_v23, %v12173_v20  ;;  %v12129_v60 = vld [vmem:[#allocation7 + $0x358] sm:$0xf]  ;;  %v15983_v23 = vld [vmem:[#allocation9 + $0xc] ss:$0 sm:$0xff] }
 0x15d   :  { %3274 = vmatpush.bf16.msrb.mxu0 %v11998_v30  ;;  %3287 = vmatpush.bf16.msrb.mxu1 %v12030_v32  ;;  %v12142_v30 = vor.u32 %v15259_v56, %v12141_v16  ;;  %v12206_v32 = vor.u32 %v15275_v13, %v12205_v24  ;;  %v12161_v61 = vld [vmem:[#allocation7 + $0x958] sm:$0xf]  ;;  %v15271_v56 = vld [vmem:[#allocation7 + $0x2f8] sm:$0xf0] }
 0x15e   :  { %3451 = vmatpush.bf16.msrb.mxu3 %v12094_v39  ;;  %v15266_v39 = vld [vmem:[#allocation7 + $0xb34] sm:$0xf0] }
 0x15f   :  { %3438 = vmatpush.bf16.msrb.mxu2 %v12062_v35  ;;  %v12137_v35 = vld [vmem:[#allocation7 + $0x4d8] sm:$0xf]  ;;  %v12170_v45 = vor.u32 %v15266_v39, %v12169_v37 }
 0x160   :  { %v12138_v25 = vor.u32 %v15258_v36, %v12137_v35  ;;  %v15264_v0 = vld [vmem:[#allocation7 + $0x9b4] sm:$0xf0]  ;;  %v15270_v35 = vld [vmem:[#allocation7 + $0x238] sm:$0xf0] }
 0x161   :  { %3275 = vmatpush.bf16.msrb.mxu0 %v11994_v50  ;;  %3288 = vmatpush.bf16.msrb.mxu1 %v12026_v53  ;;  %v12234_v50 = vor.u32 %v15282_v42, %v12233_v41  ;;  %v12197_v53 = vld [vmem:[#allocation7 + $0x41c] sm:$0xf]  ;;  %v12225_v2 = vld [vmem:[#allocation10 + $0x300] sm:$0xf]  ;;  %v12162_v9 = vor.u32 %v15264_v0, %v12161_v61 }
 0x162   :  { %3452 = vmatpush.bf16.msrb.mxu3 %v12090_v59  ;;  %v12166_v59 = vor.u32 %v15265_v51, %v12165_v49  ;;  %v15280_v4 = vld [vmem:[#allocation10 + $0x35c] sm:$0xf0]  ;;  %v12177_v0 = vld [vmem:[#allocation7 + $0x5c] sm:$0xf] }
 0x163   :  { %3439 = vmatpush.bf16.msrb.mxu2 %v12058_v54  ;;  %v15273_v54 = vld [vmem:[#allocation7 + $0x478] sm:$0xf0]  ;;  %v12125_v11 = vld [vmem:[#allocation7 + $0x298] sm:$0xf]  ;;  %v12226_v14 = vor.u32 %v15280_v4, %v12225_v2 }
 0x164   :  { %v12198_v18 = vor.u32 %v15273_v54, %v12197_v53  ;;  %v12157_v15 = vld [vmem:[#allocation7 + $0x898] sm:$0xf]  ;;  %v12181_v53 = vld [vmem:[#allocation7 + $0x11c] sm:$0xf] }
 0x165   :  { %3276 = vmatpush.bf16.msrb.mxu0 %v11990_v1  ;;  %3289 = vmatpush.bf16.msrb.mxu1 %v12022_v6  ;;  %v15272_v1 = vld [vmem:[#allocation7 + $0x3b8] sm:$0xf0]  ;;  %v15263_v16 = vld [vmem:[#allocation7 + $0x8f4] sm:$0xf0] }
 0x166   :  { %3453 = vmatpush.bf16.msrb.mxu3 %v12086_v12  ;;  %v12194_v10 = vor.u32 %v15272_v1, %v12193_v17  ;;  %v15255_v12 = vld [vmem:[#allocation7 + $0x2f4] sm:$0xf0]  ;;  %v15269_v54 = vld [vmem:[#allocation7 + $0x178] sm:$0xf0] }
 0x167   :  { %3440 = vmatpush.bf16.msrb.mxu2 %v12054_v7  ;;  %v12221_v21 = vld [vmem:[#allocation10 + $0x240] sm:$0xf]  ;;  %v12126_v24 = vor.u32 %v15255_v12, %v12125_v11  ;;  %v12182_v61 = vor.u32 %v15269_v54, %v12181_v53  ;;  %v15268_v1 = vld [vmem:[#allocation7 + $0xb8] sm:$0xf0] }
 0x168   :  { %v15254_v33 = vld [vmem:[#allocation7 + $0x234] sm:$0xf0]  ;;  %v15299_v12 = vld [vmem:[#allocation10 + $0x5a0] sm:$0xf0] }
 0x169   :  { %3277 = vmatpush.bf16.msrb.mxu0 %v11986_v63  ;;  %3290 = vmatpush.bf16.msrb.mxu1 %v12018_v26  ;;  %v1970_v5 = vpop.f32.mrf.mxu0  ;;  %v1983_v8 = vpop.f32.mrf.mxu1  ;;  %v15279_v63 = vld [vmem:[#allocation10 + $0x29c] sm:$0xf0]  ;;  %v12158_v26 = vor.u32 %v15263_v16, %v12157_v15  ;;  %v12122_v41 = vor.u32 %v15254_v33, %v12121_v28  ;;  %v12333_v15 = vld [vmem:[#allocation10 + $0xb44] sm:$0xf] }
 0x16a   :  { %3454 = vmatpush.bf16.msrb.mxu3 %v12082_v3  ;;  %v1971_v7 = vadd.f32 %v15982_v58, %v1970_v5  ;;  %v12153_v29 = vld [vmem:[#allocation7 + $0x7d8] sm:$0xf]  ;;  %v12222_v3 = vor.u32 %v15279_v63, %v12221_v21  ;;  %v16431_v5 = vld [vmem:[#allocation2] sm:$0xff] }
 0x16b   :  { %3441 = vmatpush.bf16.msrb.mxu2 %v12050_v27  ;;  %v12190_v27 = vor.u32 %v15271_v56, %v12189_v19  ;;  %v12217_v37 = vld [vmem:[#allocation10 + $0x180] sm:$0xf]  ;;  %v12178_v19 = vor.u32 %v15268_v1, %v12177_v0  ;;  %v12365_v56 = vld [vmem:[#allocation10 + $0x1144] sm:$0xf] }
 0x16c   :  { %3278 = vmatmul.bf16.vlgmr.msrb.gmra.mxu0 %v16414_v48  ;;  %3291 = vmatmul.bf16.vlgmr.msrb.gmra.mxu1 %v16416_v52  ;;  %v15256_v48 = vld [vmem:[#allocation7 + $0x3b4] sm:$0xf0]  ;;  %v1984_v20 = vadd.f32 %v1983_v8, %v1971_v7  ;;  %v12297_v28 = vld [vmem:[#allocation10 + $0x484] sm:$0xf] }
 0x16d   :  { %3595 = vmatpush.bf16.msra.mxu0 %v12142_v30  ;;  %3608 = vmatpush.bf16.msra.mxu1 %v12174_v31  ;;  %v12130_v6 = vor.u32 %v15256_v48, %v12129_v60  ;;  %v15262_v31 = vld [vmem:[#allocation7 + $0x834] sm:$0xf0] }
 0x16e   :  { %3848 = vmatpush.bf16.msra.mxu3 %v12238_v38  ;;  %3442 = vmatmul.bf16.vlgmr.msrb.gmra.mxu2 %v16416_v52  ;;  %v1987_v13 = vmax.f32 %v1984_v20, 0.0  ;;  %v15278_v38 = vld [vmem:[#allocation10 + $0x1dc] sm:$0xf0]  ;;  %v15315_v20 = vld [vmem:[#allocation10 + $0x11a0] sm:$0xf0] }
 0x16f   :  { %3692 = vmatpush.bf16.msra.mxu2 %v12206_v32  ;;  %3455 = vmatmul.bf16.vlgmr.msrb.gmra.mxu3 %v16423_v44  ;;  %v12185_v32 = vld [vmem:[#allocation7 + $0x1dc] sm:$0xf]  ;;  %v12117_v42 = vld [vmem:[#allocation7 + $0x118] sm:$0xf]  ;;  %v12366_v33 = vor.u32 %v15315_v20, %v12365_v56 }
 0x170   :  { %v1988_v30 = vpack.c.bf16 %v1987_v13, %v1987_v13  ;;  %v15253_v22 = vld [vmem:[#allocation7 + $0x174] sm:$0xf0]  ;;  %v3746_v13 = vunpack.c.l.b16 %v16431_v5 }
 0x171   :  { %3596 = vmatpush.bf16.msra.mxu0 %v12138_v25  ;;  %3609 = vmatpush.bf16.msra.mxu1 %v12170_v45  ;;  %v2067_v36 = vpop.f32.mrf.mxu2  ;;  %v1972_v43 = vpop.f32.mrf.mxu0  ;;  %v12154_v45 = vor.u32 %v15262_v31, %v12153_v29  ;;  %v12149_v47 = vld [vmem:[#allocation7 + $0x718] sm:$0xf]  ;;  %v12118_v58 = vor.u32 %v15253_v22, %v12117_v42  ;;  %v15298_v29 = vld [vmem:[#allocation10 + $0x4e0] sm:$0xf0]  ;;  %v15984_v42 = vld [vmem:[#allocation9 + $0xd] ss:$0 sm:$0xff] }
 0x172   :  { %3849 = vmatpush.bf16.msra.mxu3 %v12234_v50  ;;  %v2068_v39 = vadd.f32 %v15983_v23, %v2067_v36  ;;  %v16429_v40 = vpop.f32.mrf.mxu3  ;;  %1989 = vst [vmem:[#allocation2 + $0x2c] sm:$0xf] %v1988_v30  ;;  %v1985_v25 = vpop.f32.mrf.mxu1  ;;  %v12218_v50 = vor.u32 %v15278_v38, %v12217_v37  ;;  %v15261_v51 = vld [vmem:[#allocation7 + $0x774] sm:$0xf0]  ;;  %v15306_v30 = vld [vmem:[#allocation10 + $0xae0] sm:$0xf0]  ;;  %v16434_v37 = vpack.c.b16 %v3746_v13, %v3746_v13 }
 0x173   :  { %3693 = vmatpush.bf16.msra.mxu2 %v12202_v46  ;;  %v12186_v46 = vor.u32 %v15270_v35, %v12185_v32  ;;  %v12213_v55 = vld [vmem:[#allocation10 + $0xc0] sm:$0xf]  ;;  %v12150_v48 = vor.u32 %v15261_v51, %v12149_v47  ;;  %v12361_v31 = vld [vmem:[#allocation10 + $0x1084] sm:$0xf]  ;;  %v12298_v38 = vor.u32 %v15298_v29, %v12297_v28 }
 0x174   :  { %v2071_v49 = vmax.f32 %v2068_v39, 0.0  ;;  %v15277_v57 = vld [vmem:[#allocation10 + $0x11c] sm:$0xf0]  ;;  %v15314_v32 = vld [vmem:[#allocation10 + $0x10e0] sm:$0xf0] }
 0x175   :  { %3597 = vmatpush.bf16.msra.mxu0 %v12134_v34  ;;  %3610 = vmatpush.bf16.msra.mxu1 %v12166_v59  ;;  %v12113_v59 = vld [vmem:[#allocation7 + $0x58] sm:$0xf]  ;;  %v12214_v17 = vor.u32 %v15277_v57, %v12213_v55  ;;  %v12362_v25 = vor.u32 %v15314_v32, %v12361_v31  ;;  %v15305_v22 = vld [vmem:[#allocation10 + $0xa20] sm:$0xf0] }
 0x176   :  { %3850 = vmatpush.bf16.msra.mxu3 %v12230_v62  ;;  %v2072_v34 = vpack.c.bf16 %v2071_v49, %v2071_v49  ;;  %v12145_v60 = vld [vmem:[#allocation7 + $0x658] sm:$0xf]  ;;  %v12357_v47 = vld [vmem:[#allocation10 + $0xfc4] sm:$0xf] }
 0x177   :  { %3694 = vmatpush.bf16.msra.mxu2 %v12198_v18  ;;  %v15252_v18 = vld [vmem:[#allocation7 + $0xb4] sm:$0xf0]  ;;  %v15313_v49 = vld [vmem:[#allocation10 + $0x1020] sm:$0xf0] }
 0x178   :  { %v15260_v62 = vld [vmem:[#allocation7 + $0x6b4] sm:$0xf0]  ;;  %2073 = vst [vmem:[#allocation2 + $0x30] sm:$0xf] %v2072_v34  ;;  %v12114_v11 = vor.u32 %v15252_v18, %v12113_v59  ;;  %v12289_v57 = vld [vmem:[#allocation10 + $0x304] sm:$0xf] }
 0x179   :  { %3598 = vmatpush.bf16.msra.mxu0 %v12130_v6  ;;  %3611 = vmatpush.bf16.msra.mxu1 %v12162_v9  ;;  %v12209_v2 = vld [vmem:[#allocation10] sm:$0xf]  ;;  %v2069_v6 = vpop.f32.mrf.mxu2  ;;  %v12301_v9 = vld [vmem:[#allocation10 + $0x544] sm:$0xf]  ;;  %v12146_v16 = vor.u32 %v15260_v62, %v12145_v60  ;;  %v15985_v60 = vld [vmem:[#allocation9 + $0xe] ss:$0 sm:$0xff] }
 0x17a   :  { %3851 = vmatpush.bf16.msra.mxu3 %v12226_v14  ;;  %v15276_v4 = vld [vmem:[#allocation10 + $0x5c] sm:$0xf0]  ;;  %v15307_v14 = vld [vmem:[#allocation10 + $0xba0] sm:$0xf0]  ;;  %v12302_v23 = vor.u32 %v15299_v12, %v12301_v9 }
 0x17b   :  { %3695 = vmatpush.bf16.msra.mxu2 %v12194_v10  ;;  %v12269_v7 = vld [vmem:[#allocation10 + $0xb40] sm:$0xf]  ;;  %v2220_v10 = vpop.f32.mrf.mxu3  ;;  %v12210_v21 = vor.u32 %v15276_v4, %v12209_v2  ;;  %v15296_v34 = vld [vmem:[#allocation10 + $0x360] sm:$0xf0] }
 0x17c   :  { %v15291_v8 = vld [vmem:[#allocation10 + $0xb9c] sm:$0xf0]  ;;  %v12321_v59 = vld [vmem:[#allocation10 + $0x904] sm:$0xf] }
 0x17d   :  { %3599 = vmatpush.bf16.msra.mxu0 %v12126_v24  ;;  %3612 = vmatpush.bf16.msra.mxu1 %v12158_v26  ;;  %v12270_v63 = vor.u32 %v15291_v8, %v12269_v7  ;;  %v12334_v24 = vor.u32 %v15307_v14, %v12333_v15  ;;  %v12265_v26 = vld [vmem:[#allocation10 + $0xa80] sm:$0xf]  ;;  %v15304_v18 = vld [vmem:[#allocation10 + $0x960] sm:$0xf0] }
 0x17e   :  { %3852 = vmatpush.bf16.msra.mxu3 %v12222_v3  ;;  %v12329_v3 = vld [vmem:[#allocation10 + $0xa84] sm:$0xf]  ;;  %v12261_v36 = vld [vmem:[#allocation10 + $0x9c0] sm:$0xf]  ;;  %v12322_v1 = vor.u32 %v15304_v18, %v12321_v59 }
 0x17f   :  { %3696 = vmatpush.bf16.msra.mxu2 %v12190_v27  ;;  %v15290_v27 = vld [vmem:[#allocation10 + $0xadc] sm:$0xf0]  ;;  %v12330_v39 = vor.u32 %v15306_v30, %v12329_v3  ;;  %v12285_v6 = vld [vmem:[#allocation10 + $0x244] sm:$0xf] }
 0x180   :  { %v12266_v35 = vor.u32 %v15290_v27, %v12265_v26  ;;  %v15289_v43 = vld [vmem:[#allocation10 + $0xa1c] sm:$0xf0]  ;;  %v15295_v8 = vld [vmem:[#allocation10 + $0x2a0] sm:$0xf0] }
 0x181   :  { %3600 = vmatpush.bf16.msra.mxu0 %v12122_v41  ;;  %3613 = vmatpush.bf16.msra.mxu1 %v12154_v45  ;;  %v12293_v41 = vld [vmem:[#allocation10 + $0x3c4] sm:$0xf]  ;;  %v12257_v51 = vld [vmem:[#allocation10 + $0x900] sm:$0xf]  ;;  %v12286_v56 = vor.u32 %v15295_v8, %v12285_v6  ;;  %v12493_v8 = vld [vmem:[#allocation10 + $0x54c] sm:$0xf] }
 0x182   :  { %3853 = vmatpush.bf16.msra.mxu3 %v12218_v50  ;;  %v15297_v45 = vld [vmem:[#allocation10 + $0x420] sm:$0xf0]  ;;  %v12262_v50 = vor.u32 %v15289_v43, %v12261_v36  ;;  %v15288_v55 = vld [vmem:[#allocation10 + $0x95c] sm:$0xf0] }
 0x183   :  { %3697 = vmatpush.bf16.msra.mxu2 %v12186_v46  ;;  %v12325_v46 = vld [vmem:[#allocation10 + $0x9c4] sm:$0xf]  ;;  %v12294_v53 = vor.u32 %v15297_v45, %v12293_v41  ;;  %v12258_v62 = vor.u32 %v15288_v55, %v12257_v51  ;;  %v15287_v4 = vld [vmem:[#allocation10 + $0x89c] sm:$0xf0] }
 0x184   :  { %v12326_v54 = vor.u32 %v15305_v22, %v12325_v46  ;;  %v12317_v9 = vld [vmem:[#allocation10 + $0x844] sm:$0xf]  ;;  %v12245_v43 = vld [vmem:[#allocation10 + $0x6c0] sm:$0xf] }
 0x185   :  { %3601 = vmatpush.bf16.msra.mxu0 %v12118_v58  ;;  %3614 = vmatpush.bf16.msra.mxu1 %v12150_v48  ;;  %v12358_v58 = vor.u32 %v15313_v49, %v12357_v47  ;;  %v12353_v48 = vld [vmem:[#allocation10 + $0xf04] sm:$0xf]  ;;  %v15285_v41 = vld [vmem:[#allocation10 + $0x71c] sm:$0xf0] }
 0x186   :  { %3854 = vmatpush.bf16.msra.mxu3 %v12214_v17  ;;  %v12290_v17 = vor.u32 %v15296_v34, %v12289_v57  ;;  %v15303_v10 = vld [vmem:[#allocation10 + $0x8a0] sm:$0xf0]  ;;  %v12246_v51 = vor.u32 %v15285_v41, %v12245_v43  ;;  %v12453_v43 = vld [vmem:[#allocation10 + $0xfc8] sm:$0xf] }
 0x187   :  { %3698 = vmatpush.bf16.msra.mxu2 %v12182_v61  ;;  %v15312_v61 = vld [vmem:[#allocation10 + $0xf60] sm:$0xf0]  ;;  %v12318_v20 = vor.u32 %v15303_v10, %v12317_v9  ;;  %v15347_v9 = vld [vmem:[#allocation10 + $0x5a8] sm:$0xf0]  ;;  %v15337_v41 = vld [vmem:[#allocation10 + $0x1024] sm:$0xf0] }
 0x188   :  { %v12354_v7 = vor.u32 %v15312_v61, %v12353_v48  ;;  %v12349_v15 = vld [vmem:[#allocation10 + $0xe44] sm:$0xf]  ;;  %v16443_v10 = vld [vmem:[#allocation2 + $0x8] sm:$0xff]  }
 0x189   :  { %3602 = vmatpush.bf16.msra.mxu0 %v12114_v11  ;;  %3615 = vmatpush.bf16.msra.mxu1 %v12146_v16  ;;  %v2231_v0 = vpop.f32.mrf.mxu0  ;;  %v15311_v14 = vld [vmem:[#allocation10 + $0xea0] sm:$0xf0] }
 0x18a   :  { %3855 = vmatpush.bf16.msra.mxu3 %v12210_v21  ;;  %v12350_v13 = vor.u32 %v15311_v14, %v12349_v15  ;;  %v15294_v27 = vld [vmem:[#allocation10 + $0x1e0] sm:$0xf0]  ;;  %v3747_v15 = vunpack.c.h.b16 %v16431_v5 }
 0x18b   :  { %3699 = vmatpush.bf16.msra.mxu2 %v12178_v19  ;;  %v12313_v28 = vld [vmem:[#allocation10 + $0x784] sm:$0xf] }
 0x18c   :  { %3603 = vmatmul.bf16.vlgmr.msra.gmra.mxu0 %v16416_v52  ;;  %3616 = vmatmul.bf16.vlgmr.msra.gmra.mxu1 %v16423_v44  ;;  %v2219_v52 = vadd.f32 %v15984_v42, %v16429_v40  ;;  %v12253_v40 = vld [vmem:[#allocation10 + $0x840] sm:$0xf]  ;;  %v12345_v29 = vld [vmem:[#allocation10 + $0xd84] sm:$0xf] }
 0x18d   :  { %3861 = vmatpush.bf16.msrb.mxu0 %v12270_v63  ;;  %4086 = vmatpush.bf16.msrb.mxu1 %v12302_v23  ;;  %v12254_v16 = vor.u32 %v15287_v4, %v12253_v40  ;;  %v12249_v63 = vld [vmem:[#allocation10 + $0x780] sm:$0xf]  ;;  %v15310_v3 = vld [vmem:[#allocation10 + $0xde0] sm:$0xf0]  ;;  %v12461_v40 = vld [vmem:[#allocation10 + $0x1148] sm:$0xf] }
 0x18e   :  { %4112 = vmatpush.bf16.msrb.mxu3 %v12366_v33  ;;  %3700 = vmatmul.bf16.vlgmr.msra.gmra.mxu2 %v16423_v44  ;;  %v2379_v44 = vpop.f32.mrf.mxu1  ;;  %v2232_v2 = vadd.f32 %v2231_v0, %v2219_v52  ;;  %v15286_v23 = vld [vmem:[#allocation10 + $0x7dc] sm:$0xf0]  ;;  %v15302_v33 = vld [vmem:[#allocation10 + $0x7e0] sm:$0xf0]  ;;  %v12346_v45 = vor.u32 %v15310_v3, %v12345_v29  ;;  %v15323_v0 = vld [vmem:[#allocation10 + $0x5a4] sm:$0xf0] }
 0x18f   :  { %4099 = vmatpush.bf16.msrb.mxu2 %v12334_v24  ;;  %3856 = vmatmul.bf16.vlgmr.msra.gmra.mxu3 %v16434_v37  ;;  %v2380_v11 = vadd.f32 %v15985_v60, %v2379_v44  ;;  %v12281_v24 = vld [vmem:[#allocation10 + $0x184] sm:$0xf]  ;;  %v12250_v32 = vor.u32 %v15286_v23, %v12249_v63  ;;  %v12429_v44 = vld [vmem:[#allocation10 + $0xb48] sm:$0xf]  ;;  %v3935_v63 = vunpack.c.l.b16 %v16443_v10 }
 0x190   :  { %v2235_v12 = vmax.f32 %v2232_v2, 0.0  ;;  %v12277_v42 = vld [vmem:[#allocation10 + $0xc4] sm:$0xf]  ;;  %v15331_v2 = vld [vmem:[#allocation10 + $0xba4] sm:$0xf0] }
 0x191   :  { %3862 = vmatpush.bf16.msrb.mxu0 %v12266_v35  ;;  %4087 = vmatpush.bf16.msrb.mxu1 %v12298_v38  ;;  %v2392_v21 = vpop.f32.mrf.mxu2  ;;  %v2233_v36 = vpop.f32.mrf.mxu0  ;;  %v12282_v38 = vor.u32 %v15294_v27, %v12281_v24  ;;  %v15293_v46 = vld [vmem:[#allocation10 + $0x120] sm:$0xf0]  ;;  %v15339_v4 = vld [vmem:[#allocation10 + $0x11a4] sm:$0xf0]  ;;  %v12430_v14 = vor.u32 %v15331_v2, %v12429_v44  ;;  %v15346_v27 = vld [vmem:[#allocation10 + $0x4e8] sm:$0xf0] }
 0x192   :  { %4113 = vmatpush.bf16.msrb.mxu3 %v12362_v25  ;;  %v2236_v19 = vpack.c.bf16 %v2235_v12, %v2235_v12  ;;  %v2393_v26 = vadd.f32 %v2392_v21, %v2380_v11  ;;  %v16441_v30 = vpop.f32.mrf.mxu3  ;;  %v12309_v22 = vld [vmem:[#allocation10 + $0x6c4] sm:$0xf]  ;;  %v12278_v52 = vor.u32 %v15293_v46, %v12277_v42  ;;  %v12494_v21 = vor.u32 %v15347_v9, %v12493_v8  ;;  %v15330_v23 = vld [vmem:[#allocation10 + $0xae4] sm:$0xf0]  ;;  %v12485_v42 = vld [vmem:[#allocation10 + $0x3cc] sm:$0xf] }
 0x193   :  { %4100 = vmatpush.bf16.msrb.mxu2 %v12330_v39  ;;  %v12314_v39 = vor.u32 %v15302_v33, %v12313_v28  ;;  %v15301_v47 = vld [vmem:[#allocation10 + $0x720] sm:$0xf0]  ;;  %v12457_v24 = vld [vmem:[#allocation10 + $0x1088] sm:$0xf]  ;;  %v3749_v28 = vpack.c.b16 %v3747_v15, %v3747_v15  ;;  %v3938_v36 = vpack.c.b16 %v3935_v63, %v3935_v63 }
 0x194   :  { %2237 = vst [vmem:[#allocation2 + $0x34] sm:$0xf] %v2236_v19  ;;  %v2396_v31 = vmax.f32 %v2393_v26, 0.0  ;;  %v12341_v49 = vld [vmem:[#allocation10 + $0xcc4] sm:$0xf]  ;;  %v12310_v55 = vor.u32 %v15301_v47, %v12309_v22  ;;  %v12454_v47 = vor.u32 %v15337_v41, %v12453_v43 }
 0x195   :  { %3863 = vmatpush.bf16.msrb.mxu0 %v12262_v50  ;;  %4088 = vmatpush.bf16.msrb.mxu1 %v12294_v53  ;;  %v15309_v50 = vld [vmem:[#allocation10 + $0xd20] sm:$0xf0]  ;;  %v12241_v53 = vld [vmem:[#allocation10 + $0x600] sm:$0xf]  ;;  %v12393_v19 = vld [vmem:[#allocation10 + $0x488] sm:$0xf] }
 0x196   :  { %4114 = vmatpush.bf16.msrb.mxu3 %v12358_v58  ;;  %v2381_v35 = vpop.f32.mrf.mxu1  ;;  %v2397_v25 = vpack.c.bf16 %v2396_v31, %v2396_v31  ;;  %v12273_v57 = vld [vmem:[#allocation10 + $0x4] sm:$0xf]  ;;  %v12342_v18 = vor.u32 %v15309_v50, %v12341_v49  ;;  %v12489_v26 = vld [vmem:[#allocation10 + $0x48c] sm:$0xf]  ;;  %v12389_v33 = vld [vmem:[#allocation10 + $0x3c8] sm:$0xf] }
 0x197   :  { %4101 = vmatpush.bf16.msrb.mxu2 %v12326_v54  ;;  %v15284_v54 = vld [vmem:[#allocation10 + $0x65c] sm:$0xf0]  ;;  %v15292_v34 = vld [vmem:[#allocation10 + $0x60] sm:$0xf0]  ;;  %v15321_v31 = vld [vmem:[#allocation10 + $0x424] sm:$0xf0] }
 0x198   :  { %2398 = vst [vmem:[#allocation2 + $0x38] sm:$0xf] %v2397_v25  ;;  %v12305_v58 = vld [vmem:[#allocation10 + $0x604] sm:$0xf]  ;;  %v12274_v6 = vor.u32 %v15292_v34, %v12273_v57  ;;  %v15986_v35 = vld [vmem:[#allocation9 + $0xf] ss:$0 sm:$0xff] }
 0x199   :  { %3864 = vmatpush.bf16.msrb.mxu0 %v12258_v62  ;;  %4089 = vmatpush.bf16.msrb.mxu1 %v12290_v17  ;;  %v2394_v59 = vpop.f32.mrf.mxu2  ;;  %v15300_v60 = vld [vmem:[#allocation10 + $0x660] sm:$0xf0]  ;;  %v12397_v62 = vld [vmem:[#allocation10 + $0x548] sm:$0xf]  ;;  %v15345_v25 = vld [vmem:[#allocation10 + $0x428] sm:$0xf0]  ;;  %v2545_v49 = vadd.f32 %v15986_v35, %v16441_v30 }
 0x19a   :  { %4115 = vmatpush.bf16.msrb.mxu3 %v12354_v7  ;;  %v12337_v48 = vld [vmem:[#allocation10 + $0xc04] sm:$0xf]  ;;  %v2546_v17 = vpop.f32.mrf.mxu3  ;;  %v12306_v7 = vor.u32 %v15300_v60, %v12305_v58  ;;  %v12398_v12 = vor.u32 %v15323_v0, %v12397_v62  ;;  %v12385_v46 = vld [vmem:[#allocation10 + $0x308] sm:$0xf]  ;;  %v12481_v57 = vld [vmem:[#allocation10 + $0x30c] sm:$0xf] }
 0x19b   :  { %4102 = vmatpush.bf16.msrb.mxu2 %v12322_v1  ;;  %v15308_v61 = vld [vmem:[#allocation10 + $0xc60] sm:$0xf0]  ;;  %v12242_v1 = vor.u32 %v15284_v54, %v12241_v53  ;;  %v15320_v50 = vld [vmem:[#allocation10 + $0x364] sm:$0xf0]  ;;  %v12486_v54 = vor.u32 %v15345_v25, %v12485_v42  ;;  %v15344_v34 = vld [vmem:[#allocation10 + $0x368] sm:$0xf0] }
 0x19c   :  { %v12338_v11 = vor.u32 %v15308_v61, %v12337_v48  ;;  %v15328_v53 = vld [vmem:[#allocation10 + $0x964] sm:$0xf0]  ;;  %v12386_v58 = vor.u32 %v15320_v50, %v12385_v46  ;;  %v12482_v44 = vor.u32 %v15344_v34, %v12481_v57  ;;  %v12469_v42 = vld [vmem:[#allocation10 + $0xcc] sm:$0xf] }
 0x19d   :  { %3865 = vmatpush.bf16.msrb.mxu0 %v12254_v16  ;;  %4090 = vmatpush.bf16.msrb.mxu1 %v12286_v56  ;;  %v12462_v16 = vor.u32 %v15339_v4, %v12461_v40  ;;  %v15322_v56 = vld [vmem:[#allocation10 + $0x4e4] sm:$0xf0]  ;;  %v12477_v4 = vld [vmem:[#allocation10 + $0x24c] sm:$0xf] }
 0x19e   :  { %4116 = vmatpush.bf16.msrb.mxu3 %v12350_v13  ;;  %v15338_v13 = vld [vmem:[#allocation10 + $0x10e4] sm:$0xf0]  ;;  %v12394_v5 = vor.u32 %v15322_v56, %v12393_v19  ;;  %v15341_v25 = vld [vmem:[#allocation10 + $0x128] sm:$0xf0] }
 0x19f   :  { %4103 = vmatpush.bf16.msrb.mxu2 %v12318_v20  ;;  %v12425_v20 = vld [vmem:[#allocation10 + $0xa88] sm:$0xf]  ;;  %v12458_v3 = vor.u32 %v15338_v13, %v12457_v24  ;;  %v12473_v24 = vld [vmem:[#allocation10 + $0x18c] sm:$0xf] }
 0x1a0   :  { %v12426_v29 = vor.u32 %v15330_v23, %v12425_v20  ;;  %v12381_v61 = vld [vmem:[#allocation10 + $0x248] sm:$0xf]  ;;  %v15342_v13 = vld [vmem:[#allocation10 + $0x1e8] sm:$0xf0] }
 0x1a1   :  { %3866 = vmatpush.bf16.msrb.mxu0 %v12250_v32  ;;  %4091 = vmatpush.bf16.msrb.mxu1 %v12282_v38  ;;  %v12421_v32 = vld [vmem:[#allocation10 + $0x9c8] sm:$0xf]  ;;  %v12490_v38 = vor.u32 %v15346_v27, %v12489_v26  ;;  %v12465_v57 = vld [vmem:[#allocation10 + $0xc] sm:$0xf] }
 0x1a2   :  { %4117 = vmatpush.bf16.msrb.mxu3 %v12346_v45  ;;  %v12390_v45 = vor.u32 %v15321_v31, %v12389_v33  ;;  %v15319_v30 = vld [vmem:[#allocation10 + $0x2a4] sm:$0xf0]  ;;  %v15340_v34 = vld [vmem:[#allocation10 + $0x68] sm:$0xf0] }
 0x1a3   :  { %4104 = vmatpush.bf16.msrb.mxu2 %v12314_v39  ;;  %v15329_v39 = vld [vmem:[#allocation10 + $0xa24] sm:$0xf0]  ;;  %v12382_v8 = vor.u32 %v15319_v30, %v12381_v61  ;;  %v15363_v61 = vld [vmem:[#allocation10 + $0x5ac] sm:$0xf0] }
 0x1a4   :  { %v12422_v22 = vor.u32 %v15329_v39, %v12421_v32  ;;  %v12413_v62 = vld [vmem:[#allocation10 + $0x848] sm:$0xf]  ;;  %v12589_v30 = vld [vmem:[#allocation10 + $0xb50] sm:$0xf] }
 0x1a5   :  { %3867 = vmatpush.bf16.msrb.mxu0 %v12246_v51  ;;  %4092 = vmatpush.bf16.msrb.mxu1 %v12278_v52  ;;  %v12417_v51 = vld [vmem:[#allocation10 + $0x908] sm:$0xf] }
 0x1a6   :  { %4118 = vmatpush.bf16.msrb.mxu3 %v12342_v18  ;;  %v12449_v52 = vld [vmem:[#allocation10 + $0xf08] sm:$0xf]  ;;  %v12418_v60 = vor.u32 %v15328_v53, %v12417_v51 }
 0x1a7   :  { %4105 = vmatpush.bf16.msrb.mxu2 %v12310_v55  ;;  %v15987_v55 = vld [vmem:[#allocation9 + $0x10] ss:$0 sm:$0xff]  ;;  %v15327_v17 = vld [vmem:[#allocation10 + $0x8a4] sm:$0xf0] }
 0x1a8   :  { %v15335_v2 = vld [vmem:[#allocation10 + $0xea4] sm:$0xf0]  ;;  %v12414_v9 = vor.u32 %v15327_v17, %v12413_v62  ;;  %v15371_v62 = vld [vmem:[#allocation10 + $0xbac] sm:$0xf0] }
 0x1a9   :  { %3868 = vmatpush.bf16.msrb.mxu0 %v12242_v1  ;;  %4093 = vmatpush.bf16.msrb.mxu1 %v12274_v6  ;;  %v2705_v59 = vpop.f32.mrf.mxu1  ;;  %v2557_v18 = vpop.f32.mrf.mxu0  ;;  %v12445_v1 = vld [vmem:[#allocation10 + $0xe48] sm:$0xf]  ;;  %v15343_v6 = vld [vmem:[#allocation10 + $0x2a8] sm:$0xf0]  ;;  %v12621_v17 = vld [vmem:[#allocation10 + $0x1150] sm:$0xf] }
 0x1aa   :  { %4119 = vmatpush.bf16.msrb.mxu3 %v12338_v11  ;;  %v2558_v0 = vadd.f32 %v2557_v18, %v2545_v49  ;;  %v2706_v40 = vadd.f32 %v15987_v55, %v2705_v59  ;;  %v12446_v11 = vor.u32 %v15335_v2, %v12445_v1  ;;  %v12409_v19 = vld [vmem:[#allocation10 + $0x788] sm:$0xf]  ;;  %v12478_v56 = vor.u32 %v15343_v6, %v12477_v4  ;;  %v15355_v59 = vld [vmem:[#allocation10 + $0xba8] sm:$0xf0]  ;;  %v12557_v18 = vld [vmem:[#allocation10 + $0x550] sm:$0xf] }
 0x1ab   :  { %4106 = vmatpush.bf16.msrb.mxu2 %v12306_v7  ;;  %v12441_v63 = vld [vmem:[#allocation10 + $0xd88] sm:$0xf]  ;;  %v15379_v1 = vld [vmem:[#allocation10 + $0x11ac] sm:$0xf0] }
 0x1ac   :  { %3869 = vmatmul.bf16.vlgmr.msrb.gmra.mxu0 %v3749_v28  ;;  %4094 = vmatmul.bf16.vlgmr.msrb.gmra.mxu1 %v16434_v37  ;;  %v15336_v37 = vld [vmem:[#allocation10 + $0xf64] sm:$0xf0]  ;;  %v2561_v7 = vmax.f32 %v2558_v0, 0.0  ;;  %v16451_v2 = vld [vmem:[#allocation2 + $0xc] sm:$0xff] }
 0x1ad   :  { %4337 = vmatpush.bf16.msra.mxu0 %v12398_v12  ;;  %4350 = vmatpush.bf16.msra.mxu1 %v12430_v14  ;;  %v12450_v48 = vor.u32 %v15336_v37, %v12449_v52  ;;  %v12377_v14 = vld [vmem:[#allocation10 + $0x188] sm:$0xf]  ;;  %v12470_v37 = vor.u32 %v15341_v25, %v12469_v42 }
 0x1ae   :  { %4519 = vmatpush.bf16.msra.mxu3 %v12494_v21  ;;  %4107 = vmatmul.bf16.vlgmr.msrb.gmra.mxu2 %v3749_v28  ;;  %v2562_v12 = vpack.c.bf16 %v2561_v7, %v2561_v7  ;;  %v15326_v21 = vld [vmem:[#allocation10 + $0x7e4] sm:$0xf0] }
 0x1af   :  { %4363 = vmatpush.bf16.msra.mxu2 %v12462_v16  ;;  %4120 = vmatmul.bf16.vlgmr.msrb.gmra.mxu3 %v3938_v36  ;;  %v15318_v16 = vld [vmem:[#allocation10 + $0x1e4] sm:$0xf0] }
 0x1b0   :  { %v15334_v23 = vld [vmem:[#allocation10 + $0xde4] sm:$0xf0]  ;;  %2563 = vst [vmem:[#allocation2 + $0x3c] sm:$0xf] %v2562_v12  ;;  %v12378_v28 = vor.u32 %v15318_v16, %v12377_v14  ;;  %v12521_v12 = vld [vmem:[#allocation10 + $0xa8c] sm:$0xf]  ;;  %v12622_v16 = vor.u32 %v15379_v1, %v12621_v17 }
 0x1b1   :  { %4338 = vmatpush.bf16.msra.mxu0 %v12394_v5  ;;  %4351 = vmatpush.bf16.msra.mxu1 %v12426_v29  ;;  %v2718_v15 = vpop.f32.mrf.mxu2  ;;  %v2559_v5 = vpop.f32.mrf.mxu0  ;;  %v12410_v29 = vor.u32 %v15326_v21, %v12409_v19  ;;  %v12373_v31 = vld [vmem:[#allocation10 + $0xc8] sm:$0xf]  ;;  %v12553_v14 = vld [vmem:[#allocation10 + $0x490] sm:$0xf]  ;;  %v4417_v19 = vunpack.c.l.b16 %v16451_v2 }
 0x1b2   :  { %4520 = vmatpush.bf16.msra.mxu3 %v12490_v38  ;;  %v2719_v20 = vadd.f32 %v2718_v15, %v2706_v40  ;;  %v16449_v26 = vpop.f32.mrf.mxu3  ;;  %v2707_v33 = vpop.f32.mrf.mxu1  ;;  %v15317_v32 = vld [vmem:[#allocation10 + $0x124] sm:$0xf0]  ;;  %v12474_v38 = vor.u32 %v15342_v13, %v12473_v24  ;;  %v12466_v40 = vor.u32 %v15340_v34, %v12465_v57  ;;  %v15354_v15 = vld [vmem:[#allocation10 + $0xae8] sm:$0xf0]  ;;  %v15370_v21 = vld [vmem:[#allocation10 + $0xaec] sm:$0xf0] }
 0x1b3   :  { %4364 = vmatpush.bf16.msra.mxu2 %v12458_v3  ;;  %v12442_v3 = vor.u32 %v15334_v23, %v12441_v63  ;;  %v12405_v35 = vld [vmem:[#allocation10 + $0x6c8] sm:$0xf]  ;;  %v12617_v63 = vld [vmem:[#allocation10 + $0x1090] sm:$0xf] }
 0x1b4   :  { %v2722_v27 = vmax.f32 %v2719_v20, 0.0  ;;  %v15325_v39 = vld [vmem:[#allocation10 + $0x724] sm:$0xf0]  ;;  %v12585_v20 = vld [vmem:[#allocation10 + $0xa90] sm:$0xf] }
 0x1b5   :  { %4339 = vmatpush.bf16.msra.mxu0 %v12390_v45  ;;  %4352 = vmatpush.bf16.msra.mxu1 %v12422_v22  ;;  %v12437_v43 = vld [vmem:[#allocation10 + $0xcc8] sm:$0xf]  ;;  %v12374_v45 = vor.u32 %v15317_v32, %v12373_v31  ;;  %v15378_v23 = vld [vmem:[#allocation10 + $0x10ec] sm:$0xf0]  ;;  %v12586_v33 = vor.u32 %v15370_v21, %v12585_v20  ;;  %v16455_v32 = vpack.c.b16 %v4417_v19, %v4417_v19 }
 0x1b6   :  { %4521 = vmatpush.bf16.msra.mxu3 %v12486_v54  ;;  %v2723_v36 = vpack.c.bf16 %v2722_v27, %v2722_v27  ;;  %v15333_v41 = vld [vmem:[#allocation10 + $0xd24] sm:$0xf0]  ;;  %v12522_v27 = vor.u32 %v15354_v15, %v12521_v12  ;;  %v12549_v31 = vld [vmem:[#allocation10 + $0x3d0] sm:$0xf] }
 0x1b7   :  { %4365 = vmatpush.bf16.msra.mxu2 %v12454_v47  ;;  %v12369_v46 = vld [vmem:[#allocation10 + $0x8] sm:$0xf]  ;;  %v12406_v47 = vor.u32 %v15325_v39, %v12405_v35  ;;  %v12438_v49 = vor.u32 %v15333_v41, %v12437_v43  ;;  %v12618_v35 = vor.u32 %v15378_v23, %v12617_v63  ;;  %v15369_v39 = vld [vmem:[#allocation10 + $0xa2c] sm:$0xf0] }
 0x1b8   :  { %2724 = vst [vmem:[#allocation2 + $0x40] sm:$0xf] %v2723_v36  ;;  %v15316_v22 = vld [vmem:[#allocation10 + $0x64] sm:$0xf0]  ;;  %v15361_v36 = vld [vmem:[#allocation10 + $0x42c] sm:$0xf0] }
 0x1b9   :  { %4340 = vmatpush.bf16.msra.mxu0 %v12386_v58  ;;  %4353 = vmatpush.bf16.msra.mxu1 %v12418_v60  ;;  %v12401_v50 = vld [vmem:[#allocation10 + $0x608] sm:$0xf]  ;;  %v2720_v52 = vpop.f32.mrf.mxu2  ;;  %v12525_v58 = vld [vmem:[#allocation10 + $0xb4c] sm:$0xf]  ;;  %v12613_v43 = vld [vmem:[#allocation10 + $0xfd0] sm:$0xf] }
 0x1ba   :  { %4522 = vmatpush.bf16.msra.mxu3 %v12482_v44  ;;  %v15324_v51 = vld [vmem:[#allocation10 + $0x664] sm:$0xf0]  ;;  %v2871_v60 = vpop.f32.mrf.mxu3  ;;  %v12526_v4 = vor.u32 %v15355_v59, %v12525_v58  ;;  %v15377_v41 = vld [vmem:[#allocation10 + $0x102c] sm:$0xf0]  ;;  %v15351_v59 = vld [vmem:[#allocation10 + $0x8a8] sm:$0xf0] }
 0x1bb   :  { %4366 = vmatpush.bf16.msra.mxu2 %v12450_v48  ;;  %v12433_v53 = vld [vmem:[#allocation10 + $0xc08] sm:$0xf]  ;;  %v12370_v48 = vor.u32 %v15316_v22, %v12369_v46  ;;  %v12402_v0 = vor.u32 %v15324_v51, %v12401_v50  ;;  %v12550_v46 = vor.u32 %v15361_v36, %v12549_v31  ;;  %v15989_v50 = vld [vmem:[#allocation9 + $0x12] ss:$0 sm:$0xff]  ;;  %v12614_v51 = vor.u32 %v15377_v41, %v12613_v43  ;;  %v15368_v52 = vld [vmem:[#allocation10 + $0x96c] sm:$0xf0] }
 0x1bc   :  { %v4128_v54 = vld [vmem:[#allocation2 + $0x4] sm:$0xff] }
 0x1bd   :  { %4341 = vmatpush.bf16.msra.mxu0 %v12382_v8  ;;  %4354 = vmatpush.bf16.msra.mxu1 %v12414_v9  ;;  %v15332_v55 = vld [vmem:[#allocation10 + $0xc64] sm:$0xf0]  ;;  %v4184_v6 = vunpack.c.l.b16 %v4128_v54  ;;  %v4185_v7 = vunpack.c.h.b16 %v4128_v54  ;;  %v12558_v8 = vor.u32 %v15363_v61, %v12557_v18  ;;  %v12590_v9 = vor.u32 %v15371_v62, %v12589_v30  ;;  %v12577_v54 = vld [vmem:[#allocation10 + $0x910] sm:$0xf]  ;;  %v12501_v31 = vld [vmem:[#allocation10 + $0x6cc] sm:$0xf] }
 0x1be   :  { %4523 = vmatpush.bf16.msra.mxu3 %v12478_v56  ;;  %v12434_v44 = vor.u32 %v15332_v55, %v12433_v53  ;;  %v15362_v56 = vld [vmem:[#allocation10 + $0x4ec] sm:$0xf0] }
 0x1bf   :  { %4367 = vmatpush.bf16.msra.mxu2 %v12446_v11  ;;  %v4186_v11 = vunpack.c.h.b16 %v16443_v10  ;;  %v4187_v24 = vpack.c.b16 %v4184_v6, %v4184_v6  ;;  %v4188_v13 = vpack.c.b16 %v4185_v7, %v4185_v7  ;;  %v15988_v10 = vld [vmem:[#allocation9 + $0x11] ss:$0 sm:$0xff]  ;;  %v12554_v5 = vor.u32 %v15362_v56, %v12553_v14  ;;  %v15360_v53 = vld [vmem:[#allocation10 + $0x36c] sm:$0xf0]  ;;  %v15990_v7 = vld [vmem:[#allocation9 + $0x13] ss:$0 sm:$0xff] }
 0x1c0   :  { %v2870_v25 = vadd.f32 %v15988_v10, %v16449_v26  ;;  %v15376_v55 = vld [vmem:[#allocation10 + $0xf6c] sm:$0xf0]  ;;  %v12509_v26 = vld [vmem:[#allocation10 + $0x84c] sm:$0xf] }
 0x1c1   :  { %4342 = vmatpush.bf16.msra.mxu0 %v12378_v28  ;;  %4355 = vmatpush.bf16.msra.mxu1 %v12410_v29  ;;  %v4189_v28 = vpack.c.b16 %v4186_v11, %v4186_v11  ;;  %v12517_v29 = vld [vmem:[#allocation10 + $0x9cc] sm:$0xf]  ;;  %v12541_v61 = vld [vmem:[#allocation10 + $0x250] sm:$0xf] }
 0x1c2   :  { %4524 = vmatpush.bf16.msra.mxu3 %v12474_v38  ;;  %v12581_v38 = vld [vmem:[#allocation10 + $0x9d0] sm:$0xf]  ;;  %v12505_v11 = vld [vmem:[#allocation10 + $0x78c] sm:$0xf] }
 0x1c3   :  { %4368 = vmatpush.bf16.msra.mxu2 %v12442_v3  ;;  %v15353_v3 = vld [vmem:[#allocation10 + $0xa28] sm:$0xf0]  ;;  %v12582_v22 = vor.u32 %v15369_v39, %v12581_v38  ;;  %v15359_v30 = vld [vmem:[#allocation10 + $0x2ac] sm:$0xf0] }
 0x1c4   :  { %v12518_v42 = vor.u32 %v15353_v3, %v12517_v29  ;;  %v12573_v62 = vld [vmem:[#allocation10 + $0x850] sm:$0xf]  ;;  %v12542_v12 = vor.u32 %v15359_v30, %v12541_v61  ;;  %v15350_v14 = vld [vmem:[#allocation10 + $0x7e8] sm:$0xf0]  ;;  %v15395_v30 = vld [vmem:[#allocation10 + $0xbb0] sm:$0xf0] }
 0x1c5   :  { %4343 = vmatpush.bf16.msra.mxu0 %v12374_v45  ;;  %4356 = vmatpush.bf16.msra.mxu1 %v12406_v47  ;;  %v12513_v45 = vld [vmem:[#allocation10 + $0x90c] sm:$0xf]  ;;  %v15367_v1 = vld [vmem:[#allocation10 + $0x8ac] sm:$0xf0] }
 0x1c6   :  { %4525 = vmatpush.bf16.msra.mxu3 %v12470_v37  ;;  %v15352_v47 = vld [vmem:[#allocation10 + $0x968] sm:$0xf0]  ;;  %v12609_v37 = vld [vmem:[#allocation10 + $0xf10] sm:$0xf]  ;;  %v12574_v15 = vor.u32 %v15367_v1, %v12573_v62  ;;  %v12717_v62 = vld [vmem:[#allocation10 + $0x1154] sm:$0xf] }
 0x1c7   :  { %4369 = vmatpush.bf16.msra.mxu2 %v12438_v49  ;;  %v12545_v49 = vld [vmem:[#allocation10 + $0x310] sm:$0xf]  ;;  %v12514_v34 = vor.u32 %v15352_v47, %v12513_v45  ;;  %v12497_v47 = vld [vmem:[#allocation10 + $0x60c] sm:$0xf]  ;;  %v12749_v1 = vld [vmem:[#allocation10 + $0x558] sm:$0xf] }
 0x1c8   :  { %v12546_v60 = vor.u32 %v15360_v53, %v12545_v49  ;;  %v15358_v19 = vld [vmem:[#allocation10 + $0x1ec] sm:$0xf0]  ;;  %v15348_v49 = vld [vmem:[#allocation10 + $0x668] sm:$0xf0] }
 0x1c9   :  { %4344 = vmatpush.bf16.msra.mxu0 %v12370_v48  ;;  %4357 = vmatpush.bf16.msra.mxu1 %v12402_v0  ;;  %v2882_v57 = vpop.f32.mrf.mxu0  ;;  %v2966_v18 = vpop.f32.mrf.mxu1  ;;  %v12578_v48 = vor.u32 %v15368_v52, %v12577_v54  ;;  %v12569_v21 = vld [vmem:[#allocation10 + $0x790] sm:$0xf]  ;;  %v12498_v61 = vor.u32 %v15348_v49, %v12497_v47  ;;  %v15392_v47 = vld [vmem:[#allocation10 + $0x970] sm:$0xf0] }
 0x1ca   :  { %4526 = vmatpush.bf16.msra.mxu3 %v12466_v40  ;;  %v2883_v58 = vadd.f32 %v2882_v57, %v2870_v25  ;;  %v2967_v0 = vadd.f32 %v15989_v50, %v2966_v18  ;;  %v12605_v40 = vld [vmem:[#allocation10 + $0xe50] sm:$0xf]  ;;  %v15387_v18 = vld [vmem:[#allocation10 + $0x5b0] sm:$0xf0] }
 0x1cb   :  { %4370 = vmatpush.bf16.msra.mxu2 %v12434_v44  ;;  %v12610_v44 = vor.u32 %v15376_v55, %v12609_v37  ;;  %v15366_v63 = vld [vmem:[#allocation10 + $0x7ec] sm:$0xf0]  ;;  %v12705_v49 = vld [vmem:[#allocation10 + $0xf14] sm:$0xf] }
 0x1cc   :  { %4345 = vmatmul.bf16.vlgmr.msra.gmra.mxu0 %v4187_v24  ;;  %4358 = vmatmul.bf16.vlgmr.msra.gmra.mxu1 %v4188_v13  ;;  %v2886_v17 = vmax.f32 %v2883_v58, 0.0  ;;  %v2970_v6 = vmax.f32 %v2967_v0, 0.0  ;;  %v12601_v24 = vld [vmem:[#allocation10 + $0xd90] sm:$0xf]  ;;  %v12570_v3 = vor.u32 %v15366_v63, %v12569_v21  ;;  %v15403_v0 = vld [vmem:[#allocation10 + $0x11b0] sm:$0xf0] }
 0x1cd   :  { %4532 = vmatpush.bf16.msrb.mxu0 %v12526_v4  ;;  %4757 = vmatpush.bf16.msrb.mxu1 %v12558_v8  ;;  %v15375_v4 = vld [vmem:[#allocation10 + $0xeac] sm:$0xf0]  ;;  %v15402_v21 = vld [vmem:[#allocation10 + $0x10f0] sm:$0xf0]  ;;  %v12745_v63 = vld [vmem:[#allocation10 + $0x498] sm:$0xf] }
 0x1ce   :  { %4783 = vmatpush.bf16.msrb.mxu3 %v12622_v16  ;;  %4371 = vmatmul.bf16.vlgmr.msra.gmra.mxu2 %v4189_v28  ;;  %v2887_v8 = vpack.c.bf16 %v2886_v17, %v2886_v17  ;;  %v12537_v16 = vld [vmem:[#allocation10 + $0x190] sm:$0xf]  ;;  %v2971_v56 = vpack.c.bf16 %v2970_v6, %v2970_v6  ;;  %v12606_v20 = vor.u32 %v15375_v4, %v12605_v40  ;;  %v15411_v40 = vld [vmem:[#allocation10 + $0x5b4] sm:$0xf0] }
 0x1cf   :  { %4770 = vmatpush.bf16.msrb.mxu2 %v12590_v9  ;;  %4527 = vmatmul.bf16.vlgmr.msra.gmra.mxu3 %v16455_v32  ;;  %v12510_v9 = vor.u32 %v15351_v59, %v12509_v26  ;;  %v15374_v13 = vld [vmem:[#allocation10 + $0xdec] sm:$0xf0]  ;;  %v12538_v29 = vor.u32 %v15358_v19, %v12537_v16  ;;  %v12653_v26 = vld [vmem:[#allocation10 + $0x554] sm:$0xf]  ;;  %v16459_v4 = vld [vmem:[#allocation2 + $0x14] sm:$0xff]   ;;  %v12750_v16 = vor.u32 %v15411_v40, %v12749_v1 }
 0x1d0   :  { %2888 = vst [vmem:[#allocation2 + $0x44] sm:$0xf] %v2887_v8  ;;  %v12533_v36 = vld [vmem:[#allocation10 + $0xd0] sm:$0xf]  ;;  %v12602_v39 = vor.u32 %v15374_v13, %v12601_v24  ;;  %v4418_v8 = vunpack.c.h.b16 %v16451_v2  ;;  %v4606_v19 = vunpack.c.l.b16 %v16459_v4 }
 0x1d1   :  { %4533 = vmatpush.bf16.msrb.mxu0 %v12522_v27  ;;  %4758 = vmatpush.bf16.msrb.mxu1 %v12554_v5  ;;  %v3118_v23 = vpop.f32.mrf.mxu2  ;;  %2972 = vst [vmem:[#allocation2 + $0x48] sm:$0xf] %v2971_v56  ;;  %v2884_v27 = vpop.f32.mrf.mxu0  ;;  %v12506_v5 = vor.u32 %v15350_v14, %v12505_v11  ;;  %v15357_v43 = vld [vmem:[#allocation10 + $0x12c] sm:$0xf0]  ;;  %v12718_v11 = vor.u32 %v15403_v0, %v12717_v62  ;;  %v12681_v14 = vld [vmem:[#allocation10 + $0xa94] sm:$0xf] }
 0x1d2   :  { %4784 = vmatpush.bf16.msrb.mxu3 %v12618_v35  ;;  %v3119_v10 = vadd.f32 %v15990_v7, %v3118_v23  ;;  %v3131_v28 = vpop.f32.mrf.mxu3  ;;  %v15349_v35 = vld [vmem:[#allocation10 + $0x728] sm:$0xf0]  ;;  %v12565_v41 = vld [vmem:[#allocation10 + $0x6d0] sm:$0xf]  ;;  %v12654_v7 = vor.u32 %v15387_v18, %v12653_v26  ;;  %v15394_v56 = vld [vmem:[#allocation10 + $0xaf0] sm:$0xf0]  ;;  %v4420_v24 = vpack.c.b16 %v4418_v8, %v4418_v8 }
 0x1d3   :  { %4771 = vmatpush.bf16.msrb.mxu2 %v12586_v33  ;;  %v2968_v33 = vpop.f32.mrf.mxu1  ;;  %v12597_v25 = vld [vmem:[#allocation10 + $0xcd0] sm:$0xf]  ;;  %v15410_v23 = vld [vmem:[#allocation10 + $0x4f4] sm:$0xf0]  ;;  %v12682_v13 = vor.u32 %v15394_v56, %v12681_v14  ;;  %v12669_v26 = vld [vmem:[#allocation10 + $0x854] sm:$0xf] }
 0x1d4   :  { %v3132_v38 = vadd.f32 %v3131_v28, %v3119_v10  ;;  %v15373_v45 = vld [vmem:[#allocation10 + $0xd2c] sm:$0xf0]  ;;  %v12645_v10 = vld [vmem:[#allocation10 + $0x3d4] sm:$0xf]  ;;  %v4609_v33 = vpack.c.b16 %v4606_v19, %v4606_v19  ;;  %v15407_v62 = vld [vmem:[#allocation10 + $0x2b4] sm:$0xf0] }
 0x1d5   :  { %4534 = vmatpush.bf16.msrb.mxu0 %v12518_v42  ;;  %4759 = vmatpush.bf16.msrb.mxu1 %v12550_v46  ;;  %v15365_v42 = vld [vmem:[#allocation10 + $0x72c] sm:$0xf0]  ;;  %v12598_v57 = vor.u32 %v15373_v45, %v12597_v25  ;;  %v15385_v28 = vld [vmem:[#allocation10 + $0x430] sm:$0xf0]  ;;  %v12729_v19 = vld [vmem:[#allocation10 + $0x198] sm:$0xf] }
 0x1d6   :  { %4785 = vmatpush.bf16.msrb.mxu3 %v12614_v51  ;;  %v3135_v46 = vmax.f32 %v3132_v38, 0.0  ;;  %v12529_v50 = vld [vmem:[#allocation10 + $0x10] sm:$0xf]  ;;  %v12534_v51 = vor.u32 %v15357_v43, %v12533_v36  ;;  %v12566_v53 = vor.u32 %v15365_v42, %v12565_v41  ;;  %v12741_v36 = vld [vmem:[#allocation10 + $0x3d8] sm:$0xf] }
 0x1d7   :  { %4772 = vmatpush.bf16.msrb.mxu2 %v12582_v22  ;;  %v12502_v22 = vor.u32 %v15349_v35, %v12501_v31  ;;  %v15356_v54 = vld [vmem:[#allocation10 + $0x6c] sm:$0xf0]  ;;  %v12709_v31 = vld [vmem:[#allocation10 + $0xfd4] sm:$0xf]  ;;  %v15409_v38 = vld [vmem:[#allocation10 + $0x434] sm:$0xf0] }
 0x1d8   :  { %v12561_v52 = vld [vmem:[#allocation10 + $0x610] sm:$0xf]  ;;  %v3136_v55 = vpack.c.bf16 %v3135_v46, %v3135_v46  ;;  %v15401_v35 = vld [vmem:[#allocation10 + $0x1030] sm:$0xf0]  ;;  %v15991_v43 = vld [vmem:[#allocation9 + $0x14] ss:$0 sm:$0xff] }
 0x1d9   :  { %4535 = vmatpush.bf16.msrb.mxu0 %v12514_v34  ;;  %4760 = vmatpush.bf16.msrb.mxu1 %v12546_v60  ;;  %v15364_v37 = vld [vmem:[#allocation10 + $0x66c] sm:$0xf0]  ;;  %v3120_v59 = vpop.f32.mrf.mxu2  ;;  %v12685_v60 = vld [vmem:[#allocation10 + $0xb54] sm:$0xf]  ;;  %v12710_v42 = vor.u32 %v15401_v35, %v12709_v31  ;;  %v15406_v56 = vld [vmem:[#allocation10 + $0x1f4] sm:$0xf0] }
 0x1da   :  { %4786 = vmatpush.bf16.msrb.mxu3 %v12610_v44  ;;  %v12593_v34 = vld [vmem:[#allocation10 + $0xc10] sm:$0xf]  ;;  %3137 = vst [vmem:[#allocation2 + $0x4c] sm:$0xf] %v3136_v55  ;;  %v12530_v44 = vor.u32 %v15356_v54, %v12529_v50  ;;  %v12562_v17 = vor.u32 %v15364_v37, %v12561_v52  ;;  %v12641_v25 = vld [vmem:[#allocation10 + $0x314] sm:$0xf] }
 0x1db   :  { %4773 = vmatpush.bf16.msrb.mxu2 %v12578_v48  ;;  %v15372_v58 = vld [vmem:[#allocation10 + $0xc6c] sm:$0xf0]  ;;  %v3133_v48 = vpop.f32.mrf.mxu3  ;;  %v15384_v45 = vld [vmem:[#allocation10 + $0x370] sm:$0xf0]  ;;  %v12725_v35 = vld [vmem:[#allocation10 + $0xd8] sm:$0xf] }
 0x1dc   :  { %v12594_v6 = vor.u32 %v15372_v58, %v12593_v34  ;;  %v12673_v46 = vld [vmem:[#allocation10 + $0x914] sm:$0xf]  ;;  %v12642_v54 = vor.u32 %v15384_v45, %v12641_v25 }
 0x1dd   :  { %4536 = vmatpush.bf16.msrb.mxu0 %v12510_v9  ;;  %4761 = vmatpush.bf16.msrb.mxu1 %v12542_v12  ;;  %v12686_v9 = vor.u32 %v15395_v30, %v12685_v60  ;;  %v12649_v12 = vld [vmem:[#allocation10 + $0x494] sm:$0xf]  ;;  %v12674_v55 = vor.u32 %v15392_v47, %v12673_v46  ;;  %v12733_v30 = vld [vmem:[#allocation10 + $0x258] sm:$0xf] }
 0x1de   :  { %4787 = vmatpush.bf16.msrb.mxu3 %v12606_v20  ;;  %v12713_v20 = vld [vmem:[#allocation10 + $0x1094] sm:$0xf] }
 0x1df   :  { %4774 = vmatpush.bf16.msrb.mxu2 %v12574_v15  ;;  %v15386_v15 = vld [vmem:[#allocation10 + $0x4f0] sm:$0xf0]  ;;  %v12714_v27 = vor.u32 %v15402_v21, %v12713_v20 }
 0x1e0   :  { %v12650_v2 = vor.u32 %v15386_v15, %v12649_v12  ;;  %v15400_v50 = vld [vmem:[#allocation10 + $0xf70] sm:$0xf0] }
 0x1e1   :  { %4537 = vmatpush.bf16.msrb.mxu0 %v12506_v5  ;;  %4762 = vmatpush.bf16.msrb.mxu1 %v12538_v29  ;;  %v12677_v5 = vld [vmem:[#allocation10 + $0x9d4] sm:$0xf]  ;;  %v12746_v29 = vor.u32 %v15410_v23, %v12745_v63 }
 0x1e2   :  { %4788 = vmatpush.bf16.msrb.mxu3 %v12602_v39  ;;  %v12646_v39 = vor.u32 %v15385_v28, %v12645_v10  ;;  %v12637_v34 = vld [vmem:[#allocation10 + $0x254] sm:$0xf] }
 0x1e3   :  { %4775 = vmatpush.bf16.msrb.mxu2 %v12570_v3  ;;  %v15393_v3 = vld [vmem:[#allocation10 + $0xa30] sm:$0xf0] }
 0x1e4   :  { %v12678_v41 = vor.u32 %v15393_v3, %v12677_v5  ;;  %v15383_v58 = vld [vmem:[#allocation10 + $0x2b0] sm:$0xf0]  ;;  %v12730_v5 = vor.u32 %v15406_v56, %v12729_v19  ;;  %v12873_v19 = vld [vmem:[#allocation10 + $0x109c] sm:$0xf] }
 0x1e5   :  { %4538 = vmatpush.bf16.msrb.mxu0 %v12502_v22  ;;  %4763 = vmatpush.bf16.msrb.mxu1 %v12534_v51  ;;  %v12742_v22 = vor.u32 %v15409_v38, %v12741_v36  ;;  %v15408_v51 = vld [vmem:[#allocation10 + $0x374] sm:$0xf0]  ;;  %v15391_v18 = vld [vmem:[#allocation10 + $0x8b0] sm:$0xf0]  ;;  %v12638_v0 = vor.u32 %v15383_v58, %v12637_v34  ;;  %v15442_v56 = vld [vmem:[#allocation10 + $0x10f8] sm:$0xf0] }
 0x1e6   :  { %4789 = vmatpush.bf16.msrb.mxu3 %v12598_v57  ;;  %v12706_v57 = vor.u32 %v15400_v50, %v12705_v49  ;;  %v12701_v60 = vld [vmem:[#allocation10 + $0xe54] sm:$0xf]  ;;  %v12670_v1 = vor.u32 %v15391_v18, %v12669_v26  ;;  %v15405_v36 = vld [vmem:[#allocation10 + $0x134] sm:$0xf0]  ;;  %v12845_v26 = vld [vmem:[#allocation10 + $0xb5c] sm:$0xf] }
 0x1e7   :  { %4776 = vmatpush.bf16.msrb.mxu2 %v12566_v53  ;;  %v15399_v48 = vld [vmem:[#allocation10 + $0xeb0] sm:$0xf0]  ;;  %v12726_v50 = vor.u32 %v15405_v36, %v12725_v35  ;;  %v15993_v36 = vld [vmem:[#allocation9 + $0x16] ss:$0 sm:$0xff] }
 0x1e8   :  { %v12702_v40 = vor.u32 %v15399_v48, %v12701_v60  ;;  %v12665_v8 = vld [vmem:[#allocation10 + $0x794] sm:$0xf]  ;;  %v12877_v48 = vld [vmem:[#allocation10 + $0x115c] sm:$0xf] }
 0x1e9   :  { %4539 = vmatpush.bf16.msrb.mxu0 %v12498_v61  ;;  %4764 = vmatpush.bf16.msrb.mxu1 %v12530_v44  ;;  %v3279_v53 = vpop.f32.mrf.mxu0  ;;  %v3292_v37 = vpop.f32.mrf.mxu1  ;;  %v15390_v12 = vld [vmem:[#allocation10 + $0x7f0] sm:$0xf0] }
 0x1ea   :  { %4790 = vmatpush.bf16.msrb.mxu3 %v12594_v6  ;;  %v3280_v52 = vadd.f32 %v15991_v43, %v3279_v53  ;;  %v12633_v6 = vld [vmem:[#allocation10 + $0x194] sm:$0xf]  ;;  %v12781_v53 = vld [vmem:[#allocation10 + $0xb58] sm:$0xf] }
 0x1eb   :  { %4777 = vmatpush.bf16.msrb.mxu2 %v12562_v17  ;;  %v15992_v17 = vld [vmem:[#allocation9 + $0x15] ss:$0 sm:$0xff]  ;;  %v12697_v15 = vld [vmem:[#allocation10 + $0xd94] sm:$0xf] }
 0x1ec   :  { %4540 = vmatmul.bf16.vlgmr.msrb.gmra.mxu0 %v4420_v24  ;;  %4765 = vmatmul.bf16.vlgmr.msrb.gmra.mxu1 %v16455_v32  ;;  %v12737_v32 = vld [vmem:[#allocation10 + $0x318] sm:$0xf]  ;;  %v3293_v61 = vadd.f32 %v3292_v37, %v3280_v52  ;;  %v15398_v14 = vld [vmem:[#allocation10 + $0xdf0] sm:$0xf0] }
 0x1ed   :  { %5008 = vmatpush.bf16.msra.mxu0 %v12654_v7  ;;  %5021 = vmatpush.bf16.msra.mxu1 %v12686_v9  ;;  %v12738_v59 = vor.u32 %v15408_v51, %v12737_v32  ;;  %v15382_v7 = vld [vmem:[#allocation10 + $0x1f0] sm:$0xf0]  ;;  %v12734_v9 = vor.u32 %v15407_v62, %v12733_v30  ;;  %v12721_v32 = vld [vmem:[#allocation10 + $0x18] sm:$0xf]  ;;  %v16464_v30 = vld [vmem:[#allocation2 + $0x18] sm:$0xff] }
 0x1ee   :  { %5190 = vmatpush.bf16.msra.mxu3 %v12750_v16  ;;  %4778 = vmatmul.bf16.vlgmr.msrb.gmra.mxu2 %v4420_v24  ;;  %v3296_v44 = vmax.f32 %v3293_v61, 0.0  ;;  %v12634_v63 = vor.u32 %v15382_v7, %v12633_v6  ;;  %v15381_v10 = vld [vmem:[#allocation10 + $0x130] sm:$0xf0]  ;;  %v15404_v51 = vld [vmem:[#allocation10 + $0x74] sm:$0xf0]  ;;  %v4857_v6 = vunpack.c.h.b16 %v16459_v4 }
 0x1ef   :  { %5034 = vmatpush.bf16.msra.mxu2 %v12718_v11  ;;  %4791 = vmatmul.bf16.vlgmr.msrb.gmra.mxu3 %v4609_v33  ;;  %v12661_v28 = vld [vmem:[#allocation10 + $0x6d4] sm:$0xf]  ;;  %v15419_v37 = vld [vmem:[#allocation10 + $0xbb4] sm:$0xf0]  ;;  %v15443_v61 = vld [vmem:[#allocation10 + $0x11b8] sm:$0xf0]  ;;  %v12722_v62 = vor.u32 %v15404_v51, %v12721_v32 }
 0x1f0   :  { %v3297_v11 = vpack.c.bf16 %v3296_v44, %v3296_v44  ;;  %v15389_v33 = vld [vmem:[#allocation10 + $0x730] sm:$0xf0]  ;;  %v12777_v7 = vld [vmem:[#allocation10 + $0xa98] sm:$0xf]  ;;  %v4860_v4 = vpack.c.b16 %v4857_v6, %v4857_v6  ;;  %v12793_v6 = vld [vmem:[#allocation10 + $0x19c] sm:$0xf] }
 0x1f1   :  { %5009 = vmatpush.bf16.msra.mxu0 %v12650_v2  ;;  %5022 = vmatpush.bf16.msra.mxu1 %v12682_v13  ;;  %v3281_v20 = vpop.f32.mrf.mxu0  ;;  %v3443_v21 = vpop.f32.mrf.mxu2  ;;  %v12666_v2 = vor.u32 %v15390_v12, %v12665_v8  ;;  %v12698_v13 = vor.u32 %v15398_v14, %v12697_v15  ;;  %v15397_v3 = vld [vmem:[#allocation10 + $0xd30] sm:$0xf0]  ;;  %v12662_v25 = vor.u32 %v15389_v33, %v12661_v28  ;;  %v15418_v8 = vld [vmem:[#allocation10 + $0xaf4] sm:$0xf0]  ;;  %v5088_v12 = vunpack.c.l.b16 %v16464_v30  ;;  %v15426_v15 = vld [vmem:[#allocation10 + $0x4f8] sm:$0xf0] }
 0x1f2   :  { %5191 = vmatpush.bf16.msra.mxu3 %v12746_v29  ;;  %v3456_v16 = vpop.f32.mrf.mxu3  ;;  %3298 = vst [vmem:[#allocation2 + $0x50] sm:$0xf] %v3297_v11  ;;  %v3444_v23 = vadd.f32 %v15992_v17, %v3443_v21  ;;  %v3294_v24 = vpop.f32.mrf.mxu1  ;;  %v12693_v29 = vld [vmem:[#allocation10 + $0xcd4] sm:$0xf]  ;;  %v12878_v11 = vor.u32 %v15443_v61, %v12877_v48  ;;  %v12841_v14 = vld [vmem:[#allocation10 + $0xa9c] sm:$0xf]  ;;  %v12874_v28 = vor.u32 %v15442_v56, %v12873_v19 }
 0x1f3   :  { %5035 = vmatpush.bf16.msra.mxu2 %v12714_v27  ;;  %v12629_v27 = vld [vmem:[#allocation10 + $0xd4] sm:$0xf]  ;;  %v12694_v45 = vor.u32 %v15397_v3, %v12693_v29  ;;  %v12837_v33 = vld [vmem:[#allocation10 + $0x9dc] sm:$0xf] }
 0x1f4   :  { %v3457_v31 = vadd.f32 %v3456_v16, %v3444_v23  ;;  %v12625_v38 = vld [vmem:[#allocation10 + $0x14] sm:$0xf]  ;;  %v15434_v16 = vld [vmem:[#allocation10 + $0xaf8] sm:$0xf0] }
 0x1f5   :  { %5010 = vmatpush.bf16.msra.mxu0 %v12646_v39  ;;  %5023 = vmatpush.bf16.msra.mxu1 %v12678_v41  ;;  %v12630_v39 = vor.u32 %v15381_v10, %v12629_v27  ;;  %v15380_v43 = vld [vmem:[#allocation10 + $0x70] sm:$0xf0]  ;;  %v12842_v24 = vor.u32 %v15434_v16, %v12841_v14  ;;  %v12805_v27 = vld [vmem:[#allocation10 + $0x3dc] sm:$0xf]  ;;  %v16468_v10 = vpack.c.b16 %v5088_v12, %v5088_v12 }
 0x1f6   :  { %5192 = vmatpush.bf16.msra.mxu3 %v12742_v22  ;;  %v12657_v41 = vld [vmem:[#allocation10 + $0x614] sm:$0xf]  ;;  %v12626_v58 = vor.u32 %v15380_v43, %v12625_v38  ;;  %v15433_v29 = vld [vmem:[#allocation10 + $0xa38] sm:$0xf0]  ;;  %v12769_v43 = vld [vmem:[#allocation10 + $0x918] sm:$0xf] }
 0x1f7   :  { %5036 = vmatpush.bf16.msra.mxu2 %v12710_v42  ;;  %v3460_v42 = vmax.f32 %v3457_v31, 0.0  ;;  %v15388_v46 = vld [vmem:[#allocation10 + $0x670] sm:$0xf0]  ;;  %v12869_v3 = vld [vmem:[#allocation10 + $0xfdc] sm:$0xf] }
 0x1f8   :  { %v12689_v22 = vld [vmem:[#allocation10 + $0xc14] sm:$0xf]  ;;  %v12658_v18 = vor.u32 %v15388_v46, %v12657_v41  ;;  %v15441_v31 = vld [vmem:[#allocation10 + $0x1038] sm:$0xf0]  ;;  %v15416_v41 = vld [vmem:[#allocation10 + $0x974] sm:$0xf0] }
 0x1f9   :  { %5011 = vmatpush.bf16.msra.mxu0 %v12642_v54  ;;  %5024 = vmatpush.bf16.msra.mxu1 %v12674_v55  ;;  %v15396_v47 = vld [vmem:[#allocation10 + $0xc70] sm:$0xf0]  ;;  %v3461_v54 = vpack.c.bf16 %v3460_v42, %v3460_v42  ;;  %v12813_v55 = vld [vmem:[#allocation10 + $0x55c] sm:$0xf]  ;;  %v3445_v34 = vpop.f32.mrf.mxu2  ;;  %v12770_v32 = vor.u32 %v15416_v41, %v12769_v43 }
 0x1fa   :  { %5193 = vmatpush.bf16.msra.mxu3 %v12738_v59  ;;  %v4799_v49 = vld [vmem:[#allocation2 + $0x10] sm:$0xff]  ;;  %v3458_v52 = vpop.f32.mrf.mxu3  ;;  %v12690_v60 = vor.u32 %v15396_v47, %v12689_v22 }
 0x1fb   :  { %5037 = vmatpush.bf16.msra.mxu2 %v12706_v57  ;;  %v15427_v57 = vld [vmem:[#allocation10 + $0x5b8] sm:$0xf0]  ;;  %3462 = vst [vmem:[#allocation2 + $0x54] sm:$0xf] %v3461_v54  ;;  %v4855_v44 = vunpack.c.l.b16 %v4799_v49  ;;  %v4856_v17 = vunpack.c.h.b16 %v4799_v49 }
 0x1fc   :  { %v15435_v59 = vld [vmem:[#allocation10 + $0xbb8] sm:$0xf0] }
 0x1fd   :  { %5012 = vmatpush.bf16.msra.mxu0 %v12638_v0  ;;  %5025 = vmatpush.bf16.msra.mxu1 %v12670_v1  ;;  %v12782_v0 = vor.u32 %v15419_v37, %v12781_v53  ;;  %v12814_v1 = vor.u32 %v15427_v57, %v12813_v55  ;;  %v4858_v20 = vpack.c.b16 %v4855_v44, %v4855_v44  ;;  %v12801_v42 = vld [vmem:[#allocation10 + $0x31c] sm:$0xf]  ;;  %v12765_v37 = vld [vmem:[#allocation10 + $0x858] sm:$0xf] }
 0x1fe   :  { %5194 = vmatpush.bf16.msra.mxu3 %v12734_v9  ;;  %v12809_v9 = vld [vmem:[#allocation10 + $0x49c] sm:$0xf]  ;;  %v4859_v21 = vpack.c.b16 %v4856_v17, %v4856_v17  ;;  %v15415_v55 = vld [vmem:[#allocation10 + $0x8b4] sm:$0xf0] }
 0x1ff   :  { %5038 = vmatpush.bf16.msra.mxu2 %v12702_v40  ;;  %v12846_v40 = vor.u32 %v15435_v59, %v12845_v26  ;;  %v12810_v23 = vor.u32 %v15426_v15, %v12809_v9  ;;  %v12833_v46 = vld [vmem:[#allocation10 + $0x91c] sm:$0xf]  ;;  %v12766_v61 = vor.u32 %v15415_v55, %v12765_v37  ;;  %v15459_v37 = vld [vmem:[#allocation10 + $0xbbc] sm:$0xf0] }
 0x200   :  { %v15432_v22 = vld [vmem:[#allocation10 + $0x978] sm:$0xf0]  ;;  %v12973_v55 = vld [vmem:[#allocation10 + $0x1160] sm:$0xf] }
 0x201   :  { %5013 = vmatpush.bf16.msra.mxu0 %v12634_v63  ;;  %5026 = vmatpush.bf16.msra.mxu1 %v12666_v2  ;;  %v12778_v63 = vor.u32 %v15418_v8, %v12777_v7  ;;  %v12773_v2 = vld [vmem:[#allocation10 + $0x9d8] sm:$0xf]  ;;  %v12865_v47 = vld [vmem:[#allocation10 + $0xf1c] sm:$0xf]  ;;  %v12834_v52 = vor.u32 %v15432_v22, %v12833_v46 }
 0x202   :  { %5195 = vmatpush.bf16.msra.mxu3 %v12730_v5  ;;  %v15425_v5 = vld [vmem:[#allocation10 + $0x438] sm:$0xf0] }
 0x203   :  { %5039 = vmatpush.bf16.msra.mxu2 %v12698_v13  ;;  %v15417_v13 = vld [vmem:[#allocation10 + $0xa34] sm:$0xf0]  ;;  %v12806_v38 = vor.u32 %v15425_v5, %v12805_v27  ;;  %v15440_v49 = vld [vmem:[#allocation10 + $0xf78] sm:$0xf0] }
 0x204   :  { %v12774_v35 = vor.u32 %v15417_v13, %v12773_v2  ;;  %v12797_v57 = vld [vmem:[#allocation10 + $0x25c] sm:$0xf]  ;;  %v12866_v34 = vor.u32 %v15440_v49, %v12865_v47  ;;  %v15413_v2 = vld [vmem:[#allocation10 + $0x734] sm:$0xf0] }
 0x205   :  { %5014 = vmatpush.bf16.msra.mxu0 %v12630_v39  ;;  %5027 = vmatpush.bf16.msra.mxu1 %v12662_v25  ;;  %v12838_v39 = vor.u32 %v15433_v29, %v12837_v33  ;;  %v12870_v25 = vor.u32 %v15441_v31, %v12869_v3  ;;  %v12829_v26 = vld [vmem:[#allocation10 + $0x85c] sm:$0xf] }
 0x206   :  { %5196 = vmatpush.bf16.msra.mxu3 %v12726_v50  ;;  %v15431_v59 = vld [vmem:[#allocation10 + $0x8b8] sm:$0xf0] }
 0x207   :  { %5040 = vmatpush.bf16.msra.mxu2 %v12694_v45  ;;  %v15424_v45 = vld [vmem:[#allocation10 + $0x378] sm:$0xf0]  ;;  %v12830_v17 = vor.u32 %v15431_v59, %v12829_v26  ;;  %v13005_v26 = vld [vmem:[#allocation10 + $0x564] sm:$0xf] }
 0x208   :  { %v12802_v54 = vor.u32 %v15424_v45, %v12801_v42  ;;  %v15439_v48 = vld [vmem:[#allocation10 + $0xeb8] sm:$0xf0]  ;;  %v15475_v59 = vld [vmem:[#allocation10 + $0x5c0] sm:$0xf0] }
 0x209   :  { %5015 = vmatpush.bf16.msra.mxu0 %v12626_v58  ;;  %5028 = vmatpush.bf16.msra.mxu1 %v12658_v18  ;;  %v3604_v50 = vpop.f32.mrf.mxu0  ;;  %v3617_v53 = vpop.f32.mrf.mxu1  ;;  %v15423_v58 = vld [vmem:[#allocation10 + $0x2b8] sm:$0xf0] }
 0x20a   :  { %5197 = vmatpush.bf16.msra.mxu3 %v12722_v62  ;;  %v3605_v51 = vadd.f32 %v15993_v36, %v3604_v50  ;;  %v12798_v44 = vor.u32 %v15423_v58, %v12797_v57  ;;  %v12825_v12 = vld [vmem:[#allocation10 + $0x79c] sm:$0xf]  ;;  %v12753_v36 = vld [vmem:[#allocation10 + $0x618] sm:$0xf]  ;;  %v15467_v57 = vld [vmem:[#allocation10 + $0x11bc] sm:$0xf0] }
 0x20b   :  { %5041 = vmatpush.bf16.msra.mxu2 %v12690_v60  ;;  %v12861_v60 = vld [vmem:[#allocation10 + $0xe5c] sm:$0xf] }
 0x20c   :  { %5016 = vmatmul.bf16.vlgmr.msra.gmra.mxu0 %v4858_v20  ;;  %5029 = vmatmul.bf16.vlgmr.msra.gmra.mxu1 %v4859_v21  ;;  %v3618_v18 = vadd.f32 %v3617_v53, %v3605_v51  ;;  %v12862_v7 = vor.u32 %v15439_v48, %v12861_v60  ;;  %v15430_v15 = vld [vmem:[#allocation10 + $0x7f8] sm:$0xf0]  ;;  %v12757_v21 = vld [vmem:[#allocation10 + $0x6d8] sm:$0xf]  ;;  %v15451_v51 = vld [vmem:[#allocation10 + $0x5bc] sm:$0xf0] }
 0x20d   :  { %5203 = vmatpush.bf16.msrb.mxu0 %v12782_v0  ;;  %5428 = vmatpush.bf16.msrb.mxu1 %v12814_v1  ;;  %v15995_v0 = vld [vmem:[#allocation9 + $0x17] ss:$0 sm:$0xff]  ;;  %v12761_v1 = vld [vmem:[#allocation10 + $0x798] sm:$0xf]  ;;  %v12941_v53 = vld [vmem:[#allocation10 + $0xb60] sm:$0xf] }
 0x20e   :  { %5454 = vmatpush.bf16.msrb.mxu3 %v12878_v11  ;;  %5042 = vmatmul.bf16.vlgmr.msra.gmra.mxu2 %v4860_v4  ;;  %v3621_v62 = vmax.f32 %v3618_v18, 0.0  ;;  %v15422_v11 = vld [vmem:[#allocation10 + $0x1f8] sm:$0xf0]  ;;  %v16473_v18 = vld [vmem:[#allocation2 + $0x20] sm:$0xff]  }
 0x20f   :  { %5441 = vmatpush.bf16.msrb.mxu2 %v12846_v40  ;;  %5198 = vmatmul.bf16.vlgmr.msra.gmra.mxu3 %v16468_v10  ;;  %v15414_v40 = vld [vmem:[#allocation10 + $0x7f4] sm:$0xf0]  ;;  %v12857_v14 = vld [vmem:[#allocation10 + $0xd9c] sm:$0xf] }
 0x210   :  { %v3622_v8 = vpack.c.bf16 %v3621_v62, %v3621_v62  ;;  %v15438_v16 = vld [vmem:[#allocation10 + $0xdf8] sm:$0xf0]  ;;  %v12762_v20 = vor.u32 %v15414_v40, %v12761_v1  ;;  %v12942_v62 = vor.u32 %v15459_v37, %v12941_v53  ;;  %v12937_v1 = vld [vmem:[#allocation10 + $0xaa0] sm:$0xf]  ;;  %v13006_v40 = vor.u32 %v15475_v59, %v13005_v26 }
 0x211   :  { %5204 = vmatpush.bf16.msrb.mxu0 %v12778_v63  ;;  %5429 = vmatpush.bf16.msrb.mxu1 %v12810_v23  ;;  %v3701_v19 = vpop.f32.mrf.mxu2  ;;  %v3606_v56 = vpop.f32.mrf.mxu0  ;;  %v12794_v23 = vor.u32 %v15422_v11, %v12793_v6  ;;  %v12789_v13 = vld [vmem:[#allocation10 + $0xdc] sm:$0xf]  ;;  %v5277_v6 = vunpack.c.l.b16 %v16473_v18  ;;  %v15466_v11 = vld [vmem:[#allocation10 + $0x10fc] sm:$0xf0] }
 0x212   :  { %5455 = vmatpush.bf16.msrb.mxu3 %v12874_v28  ;;  %v16471_v9 = vpop.f32.mrf.mxu3  ;;  %3623 = vst [vmem:[#allocation2 + $0x58] sm:$0xf] %v3622_v8  ;;  %v3702_v63 = vadd.f32 %v15995_v0, %v3701_v19  ;;  %v3619_v4 = vpop.f32.mrf.mxu1  ;;  %v15421_v27 = vld [vmem:[#allocation10 + $0x138] sm:$0xf0]  ;;  %v12858_v28 = vor.u32 %v15438_v16, %v12857_v14  ;;  %v12974_v0 = vor.u32 %v15467_v57, %v12973_v55  ;;  %v12969_v8 = vld [vmem:[#allocation10 + $0x10a0] sm:$0xf] }
 0x213   :  { %5442 = vmatpush.bf16.msrb.mxu2 %v12842_v24  ;;  %v12826_v24 = vor.u32 %v15430_v15, %v12825_v12  ;;  %v12821_v5 = vld [vmem:[#allocation10 + $0x6dc] sm:$0xf]  ;;  %v12790_v41 = vor.u32 %v15421_v27, %v12789_v13  ;;  %v13001_v12 = vld [vmem:[#allocation10 + $0x4a4] sm:$0xf]  ;;  %v15994_v14 = vld [vmem:[#allocation12] ss:$0 sm:$0xff]  ;;  %v12970_v56 = vor.u32 %v15466_v11, %v12969_v8  ;;  %v5280_v4 = vpack.c.b16 %v5277_v6, %v5277_v6 }
 0x214   :  { %v15429_v33 = vld [vmem:[#allocation10 + $0x738] sm:$0xf0]  ;;  %v3705_v29 = vmax.f32 %v3702_v63, 0.0  ;;  %v15474_v15 = vld [vmem:[#allocation10 + $0x500] sm:$0xf0] }
 0x215   :  { %5205 = vmatpush.bf16.msrb.mxu0 %v12774_v35  ;;  %5430 = vmatpush.bf16.msrb.mxu1 %v12806_v38  ;;  %v12853_v3 = vld [vmem:[#allocation10 + $0xcdc] sm:$0xf]  ;;  %v12758_v35 = vor.u32 %v15413_v2, %v12757_v21  ;;  %v15412_v38 = vld [vmem:[#allocation10 + $0x674] sm:$0xf0]  ;;  %v12822_v42 = vor.u32 %v15429_v33, %v12821_v5  ;;  %v15449_v21 = vld [vmem:[#allocation10 + $0x43c] sm:$0xf0] }
 0x216   :  { %5456 = vmatpush.bf16.msrb.mxu3 %v12870_v25  ;;  %v15437_v31 = vld [vmem:[#allocation10 + $0xd38] sm:$0xf0]  ;;  %v3706_v43 = vpack.c.bf16 %v3705_v29, %v3705_v29  ;;  %v12933_v63 = vld [vmem:[#allocation10 + $0x9e0] sm:$0xf]  ;;  %v12997_v27 = vld [vmem:[#allocation10 + $0x3e4] sm:$0xf] }
 0x217   :  { %5443 = vmatpush.bf16.msrb.mxu2 %v12838_v39  ;;  %v12785_v39 = vld [vmem:[#allocation10 + $0x1c] sm:$0xf]  ;;  %v12854_v22 = vor.u32 %v15437_v31, %v12853_v3  ;;  %v12965_v2 = vld [vmem:[#allocation10 + $0xfe0] sm:$0xf]  ;;  %v12989_v57 = vld [vmem:[#allocation10 + $0x264] sm:$0xf] }
 0x218   :  { %v15420_v25 = vld [vmem:[#allocation10 + $0x78] sm:$0xf0]  ;;  %3707 = vst [vmem:[#allocation2 + $0x5c] sm:$0xf] %v3706_v43  ;;  %v15465_v13 = vld [vmem:[#allocation10 + $0x103c] sm:$0xf0] }
 0x219   :  { %5206 = vmatpush.bf16.msrb.mxu0 %v12770_v32  ;;  %5431 = vmatpush.bf16.msrb.mxu1 %v12802_v54  ;;  %v12817_v45 = vld [vmem:[#allocation10 + $0x61c] sm:$0xf]  ;;  %v12909_v32 = vld [vmem:[#allocation10 + $0x560] sm:$0xf]  ;;  %v3703_v54 = vpop.f32.mrf.mxu2  ;;  %v12966_v29 = vor.u32 %v15465_v13, %v12965_v2 }
 0x21a   :  { %5457 = vmatpush.bf16.msrb.mxu3 %v12866_v34  ;;  %v15428_v46 = vld [vmem:[#allocation10 + $0x678] sm:$0xf0]  ;;  %v3859_v47 = vpop.f32.mrf.mxu3  ;;  %v12786_v34 = vor.u32 %v15420_v25, %v12785_v39  ;;  %v12910_v48 = vor.u32 %v15451_v51, %v12909_v32  ;;  %v12897_v3 = vld [vmem:[#allocation10 + $0x320] sm:$0xf]  ;;  %v15472_v25 = vld [vmem:[#allocation10 + $0x380] sm:$0xf0] }
 0x21b   :  { %5444 = vmatpush.bf16.msrb.mxu2 %v12834_v52  ;;  %v12849_v49 = vld [vmem:[#allocation10 + $0xc1c] sm:$0xf]  ;;  %v12754_v52 = vor.u32 %v15412_v38, %v12753_v36  ;;  %v12818_v58 = vor.u32 %v15428_v46, %v12817_v45  ;;  %v15448_v31 = vld [vmem:[#allocation10 + $0x37c] sm:$0xf0]  ;;  %v3858_v36 = vadd.f32 %v15994_v14, %v16471_v9 }
 0x21c   :  { %v15436_v50 = vld [vmem:[#allocation10 + $0xc78] sm:$0xf0]  ;;  %v15456_v39 = vld [vmem:[#allocation10 + $0x97c] sm:$0xf0]  ;;  %v12898_v47 = vor.u32 %v15448_v31, %v12897_v3 }
 0x21d   :  { %5207 = vmatpush.bf16.msrb.mxu0 %v12766_v61  ;;  %5432 = vmatpush.bf16.msrb.mxu1 %v12798_v44  ;;  %v12850_v60 = vor.u32 %v15436_v50, %v12849_v49  ;;  %v5089_v61 = vunpack.c.h.b16 %v16464_v30  ;;  %v12905_v44 = vld [vmem:[#allocation10 + $0x4a0] sm:$0xf] }
 0x21e   :  { %5458 = vmatpush.bf16.msrb.mxu3 %v12862_v7  ;;  %v15458_v7 = vld [vmem:[#allocation10 + $0xafc] sm:$0xf0] }
 0x21f   :  { %5445 = vmatpush.bf16.msrb.mxu2 %v12830_v17  ;;  %v15450_v17 = vld [vmem:[#allocation10 + $0x4fc] sm:$0xf0]  ;;  %v5091_v30 = vpack.c.b16 %v5089_v61, %v5089_v61  ;;  %v12938_v19 = vor.u32 %v15458_v7, %v12937_v1 }
 0x220   :  { %v12906_v16 = vor.u32 %v15450_v17, %v12905_v44  ;;  %v12961_v43 = vld [vmem:[#allocation10 + $0xf20] sm:$0xf] }
 0x221   :  { %5208 = vmatpush.bf16.msrb.mxu0 %v12762_v20  ;;  %5433 = vmatpush.bf16.msrb.mxu1 %v12794_v23  ;;  %v12901_v20 = vld [vmem:[#allocation10 + $0x3e0] sm:$0xf]  ;;  %v13002_v23 = vor.u32 %v15474_v15, %v13001_v12  ;;  %v12985_v12 = vld [vmem:[#allocation10 + $0x1a4] sm:$0xf] }
 0x222   :  { %5459 = vmatpush.bf16.msrb.mxu3 %v12858_v28  ;;  %v15473_v28 = vld [vmem:[#allocation10 + $0x440] sm:$0xf0]  ;;  %v12902_v5 = vor.u32 %v15449_v21, %v12901_v20  ;;  %v15996_v46 = vld [vmem:[#allocation12 + $0x1] ss:$0 sm:$0xff] }
 0x223   :  { %5446 = vmatpush.bf16.msrb.mxu2 %v12826_v24  ;;  %v15457_v24 = vld [vmem:[#allocation10 + $0xa3c] sm:$0xf0]  ;;  %v12998_v38 = vor.u32 %v15473_v28, %v12997_v27  ;;  %v15470_v15 = vld [vmem:[#allocation10 + $0x200] sm:$0xf0] }
 0x224   :  { %v12934_v33 = vor.u32 %v15457_v24, %v12933_v63  ;;  %v12893_v49 = vld [vmem:[#allocation10 + $0x260] sm:$0xf]  ;;  %v12981_v27 = vld [vmem:[#allocation10 + $0xe4] sm:$0xf] }
 0x225   :  { %5209 = vmatpush.bf16.msrb.mxu0 %v12758_v35  ;;  %5434 = vmatpush.bf16.msrb.mxu1 %v12790_v41  ;;  %v12929_v35 = vld [vmem:[#allocation10 + $0x920] sm:$0xf]  ;;  %v15469_v28 = vld [vmem:[#allocation10 + $0x140] sm:$0xf0] }
 0x226   :  { %5460 = vmatpush.bf16.msrb.mxu3 %v12854_v22  ;;  %v12930_v50 = vor.u32 %v15456_v39, %v12929_v35  ;;  %v15447_v51 = vld [vmem:[#allocation10 + $0x2bc] sm:$0xf0] }
 0x227   :  { %5447 = vmatpush.bf16.msrb.mxu2 %v12822_v42  ;;  %v12993_v42 = vld [vmem:[#allocation10 + $0x324] sm:$0xf]  ;;  %v12925_v9 = vld [vmem:[#allocation10 + $0x860] sm:$0xf]  ;;  %v12894_v26 = vor.u32 %v15447_v51, %v12893_v49  ;;  %v13069_v49 = vld [vmem:[#allocation10 + $0x568] sm:$0xf] }
 0x228   :  { %v15455_v53 = vld [vmem:[#allocation10 + $0x8bc] sm:$0xf0]  ;;  %v13101_v51 = vld [vmem:[#allocation10 + $0xb68] sm:$0xf] }
 0x229   :  { %5210 = vmatpush.bf16.msrb.mxu0 %v12754_v52  ;;  %5435 = vmatpush.bf16.msrb.mxu1 %v12786_v34  ;;  %v3870_v41 = vpop.f32.mrf.mxu0  ;;  %v4095_v22 = vpop.f32.mrf.mxu1  ;;  %v12994_v52 = vor.u32 %v15472_v25, %v12993_v42  ;;  %v12957_v37 = vld [vmem:[#allocation10 + $0xe60] sm:$0xf]  ;;  %v15471_v34 = vld [vmem:[#allocation10 + $0x2c0] sm:$0xf0] }
 0x22a   :  { %5461 = vmatpush.bf16.msrb.mxu3 %v12850_v60  ;;  %v3871_v45 = vadd.f32 %v3870_v41, %v3858_v36  ;;  %v15463_v55 = vld [vmem:[#allocation10 + $0xebc] sm:$0xf0]  ;;  %v4096_v60 = vadd.f32 %v15996_v46, %v4095_v22  ;;  %v12990_v17 = vor.u32 %v15471_v34, %v12989_v57  ;;  %v12982_v41 = vor.u32 %v15469_v28, %v12981_v27  ;;  %v12977_v25 = vld [vmem:[#allocation10 + $0x24] sm:$0xf] }
 0x22b   :  { %5448 = vmatpush.bf16.msrb.mxu2 %v12818_v58  ;;  %v12889_v59 = vld [vmem:[#allocation10 + $0x1a0] sm:$0xf]  ;;  %v12958_v61 = vor.u32 %v15463_v55, %v12957_v37  ;;  %v13037_v46 = vld [vmem:[#allocation10 + $0xb64] sm:$0xf]  ;;  %v15507_v37 = vld [vmem:[#allocation10 + $0x11c4] sm:$0xf0] }
 0x22c   :  { %5211 = vmatmul.bf16.vlgmr.msrb.gmra.mxu0 %v5091_v30  ;;  %5436 = vmatmul.bf16.vlgmr.msrb.gmra.mxu1 %v16468_v10  ;;  %v15464_v10 = vld [vmem:[#allocation10 + $0xf7c] sm:$0xf0]  ;;  %v3874_v54 = vmax.f32 %v3871_v45, 0.0  ;;  %v15468_v45 = vld [vmem:[#allocation10 + $0x80] sm:$0xf0]  ;;  %v16479_v55 = vld [vmem:[#allocation2 + $0x24] sm:$0xff] }
 0x22d   :  { %5679 = vmatpush.bf16.msra.mxu0 %v12910_v48  ;;  %5692 = vmatpush.bf16.msra.mxu1 %v12942_v62  ;;  %v12962_v32 = vor.u32 %v15464_v10, %v12961_v43  ;;  %v12926_v48 = vor.u32 %v15455_v53, %v12925_v9  ;;  %v15446_v62 = vld [vmem:[#allocation10 + $0x1fc] sm:$0xf0]  ;;  %v15499_v9 = vld [vmem:[#allocation10 + $0xbc4] sm:$0xf0]  ;;  %v12978_v57 = vor.u32 %v15468_v45, %v12977_v25 }
 0x22e   :  { %5861 = vmatpush.bf16.msra.mxu3 %v13006_v40  ;;  %5449 = vmatmul.bf16.vlgmr.msrb.gmra.mxu2 %v5091_v30  ;;  %v3875_v58 = vpack.c.bf16 %v3874_v54, %v3874_v54  ;;  %v15454_v44 = vld [vmem:[#allocation10 + $0x7fc] sm:$0xf0]  ;;  %v12890_v30 = vor.u32 %v15446_v62, %v12889_v59  ;;  %v15482_v62 = vld [vmem:[#allocation10 + $0xb00] sm:$0xf0] }
 0x22f   :  { %5705 = vmatpush.bf16.msra.mxu2 %v12974_v0  ;;  %5462 = vmatmul.bf16.vlgmr.msrb.gmra.mxu3 %v5280_v4  ;;  %v12921_v0 = vld [vmem:[#allocation10 + $0x7a0] sm:$0xf]  ;;  %v12986_v4 = vor.u32 %v15470_v15, %v12985_v12 }
 0x230   :  { %3876 = vst [vmem:[#allocation3] sm:$0xf] %v3875_v58  ;;  %v12953_v40 = vld [vmem:[#allocation10 + $0xda0] sm:$0xf] }
 0x231   :  { %5680 = vmatpush.bf16.msra.mxu0 %v12906_v16  ;;  %5693 = vmatpush.bf16.msra.mxu1 %v12938_v19  ;;  %v4108_v1 = vpop.f32.mrf.mxu2  ;;  %v15462_v6 = vld [vmem:[#allocation10 + $0xdfc] sm:$0xf0]  ;;  %v3872_v11 = vpop.f32.mrf.mxu0  ;;  %v12922_v19 = vor.u32 %v15454_v44, %v12921_v0  ;;  %v13065_v0 = vld [vmem:[#allocation10 + $0x4a8] sm:$0xf] }
 0x232   :  { %5862 = vmatpush.bf16.msra.mxu3 %v13002_v23  ;;  %v4109_v7 = vadd.f32 %v4108_v1, %v4096_v60  ;;  %v4121_v8 = vpop.f32.mrf.mxu3  ;;  %v4097_v14 = vpop.f32.mrf.mxu1  ;;  %v12885_v20 = vld [vmem:[#allocation10 + $0xe0] sm:$0xf]  ;;  %v13102_v60 = vor.u32 %v15499_v9, %v13101_v51  ;;  %v15490_v1 = vld [vmem:[#allocation10 + $0x504] sm:$0xf0] }
 0x233   :  { %5706 = vmatpush.bf16.msra.mxu2 %v12970_v56  ;;  %v12954_v56 = vor.u32 %v15462_v6, %v12953_v40  ;;  %v15445_v21 = vld [vmem:[#allocation10 + $0x13c] sm:$0xf0]  ;;  %v13097_v40 = vld [vmem:[#allocation10 + $0xaa8] sm:$0xf]  ;;  %v13066_v14 = vor.u32 %v15490_v1, %v13065_v0 }
 0x234   :  { %v4122_v16 = vadd.f32 %v4121_v8, %v4109_v7  ;;  %v12917_v63 = vld [vmem:[#allocation10 + $0x6e0] sm:$0xf]  ;;  %v15498_v6 = vld [vmem:[#allocation10 + $0xb04] sm:$0xf0] }
 0x235   :  { %5681 = vmatpush.bf16.msra.mxu0 %v12902_v5  ;;  %5694 = vmatpush.bf16.msra.mxu1 %v12934_v33  ;;  %v15453_v23 = vld [vmem:[#allocation10 + $0x73c] sm:$0xf0]  ;;  %v12886_v5 = vor.u32 %v15445_v21, %v12885_v20  ;;  %v13129_v7 = vld [vmem:[#allocation10 + $0x10a8] sm:$0xf] }
 0x236   :  { %5863 = vmatpush.bf16.msra.mxu3 %v12998_v38  ;;  %v12949_v24 = vld [vmem:[#allocation10 + $0xce0] sm:$0xf]  ;;  %v4125_v13 = vmax.f32 %v4122_v16, 0.0  ;;  %v12918_v35 = vor.u32 %v15453_v23, %v12917_v63  ;;  %v15506_v8 = vld [vmem:[#allocation10 + $0x1104] sm:$0xf0] }
 0x237   :  { %5707 = vmatpush.bf16.msra.mxu2 %v12966_v29  ;;  %v15461_v2 = vld [vmem:[#allocation10 + $0xd3c] sm:$0xf0]  ;;  %v13029_v16 = vld [vmem:[#allocation10 + $0x9e4] sm:$0xf]  ;;  %v13130_v21 = vor.u32 %v15506_v8, %v13129_v7  ;;  %v15489_v63 = vld [vmem:[#allocation10 + $0x444] sm:$0xf0] }
 0x238   :  { %v12881_v33 = vld [vmem:[#allocation10 + $0x20] sm:$0xf]  ;;  %v4126_v31 = vpack.c.bf16 %v4125_v13, %v4125_v13  ;;  %v12950_v36 = vor.u32 %v15461_v2, %v12949_v24  ;;  %v15497_v23 = vld [vmem:[#allocation10 + $0xa44] sm:$0xf0] }
 0x239   :  { %5682 = vmatpush.bf16.msra.mxu0 %v12898_v47  ;;  %5695 = vmatpush.bf16.msra.mxu1 %v12930_v50  ;;  %v15444_v29 = vld [vmem:[#allocation10 + $0x7c] sm:$0xf0]  ;;  %v4110_v42 = vpop.f32.mrf.mxu2  ;;  %v15483_v47 = vld [vmem:[#allocation10 + $0xbc0] sm:$0xf0]  ;;  %v13125_v24 = vld [vmem:[#allocation10 + $0xfe8] sm:$0xf] }
 0x23a   :  { %5864 = vmatpush.bf16.msra.mxu3 %v12994_v52  ;;  %v12913_v3 = vld [vmem:[#allocation10 + $0x620] sm:$0xf]  ;;  %4127 = vst [vmem:[#allocation3 + $0x4] sm:$0xf] %v4126_v31  ;;  %v4123_v22 = vpop.f32.mrf.mxu3  ;;  %v12882_v50 = vor.u32 %v15444_v29, %v12881_v33  ;;  %v13133_v52 = vld [vmem:[#allocation10 + $0x1168] sm:$0xf]  ;;  %v13038_v34 = vor.u32 %v15483_v47, %v13037_v46 }
 0x23b   :  { %5708 = vmatpush.bf16.msra.mxu2 %v12962_v32  ;;  %v15452_v38 = vld [vmem:[#allocation10 + $0x67c] sm:$0xf0]  ;;  %v15491_v32 = vld [vmem:[#allocation10 + $0x5c4] sm:$0xf0]  ;;  %v13134_v44 = vor.u32 %v15507_v37, %v13133_v52  ;;  %v13025_v33 = vld [vmem:[#allocation10 + $0x924] sm:$0xf] }
 0x23c   :  { %v12945_v39 = vld [vmem:[#allocation10 + $0xc20] sm:$0xf]  ;;  %v12914_v53 = vor.u32 %v15452_v38, %v12913_v3  ;;  %v13070_v59 = vor.u32 %v15491_v32, %v13069_v49  ;;  %v15505_v2 = vld [vmem:[#allocation10 + $0x1044] sm:$0xf0]  ;;  %v15480_v29 = vld [vmem:[#allocation10 + $0x980] sm:$0xf0] }
 0x23d   :  { %5683 = vmatpush.bf16.msra.mxu0 %v12894_v26  ;;  %5696 = vmatpush.bf16.msra.mxu1 %v12926_v48  ;;  %v15460_v43 = vld [vmem:[#allocation10 + $0xc7c] sm:$0xf0]  ;;  %v5528_v48 = vunpack.c.h.b16 %v16473_v18  ;;  %v13057_v3 = vld [vmem:[#allocation10 + $0x328] sm:$0xf]  ;;  %v13126_v31 = vor.u32 %v15505_v2, %v13125_v24  ;;  %v13026_v42 = vor.u32 %v15480_v29, %v13025_v33  ;;  %v13021_v22 = vld [vmem:[#allocation10 + $0x864] sm:$0xf] }
 0x23e   :  { %5865 = vmatpush.bf16.msra.mxu3 %v12990_v17  ;;  %v5470_v10 = vld [vmem:[#allocation2 + $0x1c] sm:$0xff]  ;;  %v12946_v54 = vor.u32 %v15460_v43, %v12945_v39  ;;  %v5759_v17 = vunpack.c.l.b16 %v16479_v55  ;;  %v15997_v27 = vld [vmem:[#allocation12 + $0x2] ss:$0 sm:$0xff] }
 0x23f   :  { %5709 = vmatpush.bf16.msra.mxu2 %v12958_v61  ;;  %v5526_v58 = vunpack.c.l.b16 %v5470_v10  ;;  %v5527_v26 = vunpack.c.h.b16 %v5470_v10  ;;  %v13033_v61 = vld [vmem:[#allocation10 + $0xaa4] sm:$0xf]  ;;  %v5531_v18 = vpack.c.b16 %v5528_v48, %v5528_v48  ;;  %v15496_v38 = vld [vmem:[#allocation10 + $0x984] sm:$0xf0] }
 0x240   :  { %v13034_v15 = vor.u32 %v15482_v62, %v13033_v61  ;;  %v16483_v20 = vpack.c.b16 %v5759_v17, %v5759_v17  ;;  %v13121_v43 = vld [vmem:[#allocation10 + $0xf28] sm:$0xf]  ;;  %v15479_v47 = vld [vmem:[#allocation10 + $0x8c0] sm:$0xf0] }
 0x241   :  { %5684 = vmatpush.bf16.msra.mxu0 %v12890_v30  ;;  %5697 = vmatpush.bf16.msra.mxu1 %v12922_v19  ;;  %v5529_v11 = vpack.c.b16 %v5526_v58, %v5526_v58  ;;  %v5530_v12 = vpack.c.b16 %v5527_v26, %v5527_v26  ;;  %v13098_v30 = vor.u32 %v15498_v6, %v13097_v40  ;;  %v15481_v19 = vld [vmem:[#allocation10 + $0xa40] sm:$0xf0]  ;;  %v15504_v10 = vld [vmem:[#allocation10 + $0xf84] sm:$0xf0] }
 0x242   :  { %5866 = vmatpush.bf16.msra.mxu3 %v12986_v4  ;;  %v13093_v4 = vld [vmem:[#allocation10 + $0x9e8] sm:$0xf]  ;;  %v13030_v13 = vor.u32 %v15481_v19, %v13029_v16  ;;  %v13022_v52 = vor.u32 %v15479_v47, %v13021_v22  ;;  %v13017_v58 = vld [vmem:[#allocation10 + $0x7a4] sm:$0xf] }
 0x243   :  { %5710 = vmatpush.bf16.msra.mxu2 %v12954_v56  ;;  %v13061_v56 = vld [vmem:[#allocation10 + $0x3e8] sm:$0xf]  ;;  %v15478_v26 = vld [vmem:[#allocation10 + $0x800] sm:$0xf0] }
 0x244   :  { %v13062_v28 = vor.u32 %v15489_v63, %v13061_v56  ;;  %v13053_v49 = vld [vmem:[#allocation10 + $0x268] sm:$0xf]  ;;  %v13018_v8 = vor.u32 %v15478_v26, %v13017_v58  ;;  %v13009_v2 = vld [vmem:[#allocation10 + $0x624] sm:$0xf] }
 0x245   :  { %5685 = vmatpush.bf16.msra.mxu0 %v12886_v5  ;;  %5698 = vmatpush.bf16.msra.mxu1 %v12918_v35  ;;  %v13094_v5 = vor.u32 %v15497_v23, %v13093_v4  ;;  %v15488_v35 = vld [vmem:[#allocation10 + $0x384] sm:$0xf0] }
 0x246   :  { %5867 = vmatpush.bf16.msra.mxu3 %v12982_v41  ;;  %v13058_v45 = vor.u32 %v15488_v35, %v13057_v3  ;;  %v15487_v32 = vld [vmem:[#allocation10 + $0x2c4] sm:$0xf0] }
 0x247   :  { %5711 = vmatpush.bf16.msra.mxu2 %v12950_v36  ;;  %v13089_v36 = vld [vmem:[#allocation10 + $0x928] sm:$0xf] }
 0x248   :  { %v13090_v46 = vor.u32 %v15496_v38, %v13089_v36  ;;  %v13085_v51 = vld [vmem:[#allocation10 + $0x868] sm:$0xf] }
 0x249   :  { %5686 = vmatpush.bf16.msra.mxu0 %v12882_v50  ;;  %5699 = vmatpush.bf16.msra.mxu1 %v12914_v53  ;;  %v4346_v39 = vpop.f32.mrf.mxu0  ;;  %v4359_v41 = vpop.f32.mrf.mxu1  ;;  %v13122_v50 = vor.u32 %v15504_v10, %v13121_v43  ;;  %v15495_v9 = vld [vmem:[#allocation10 + $0x8c4] sm:$0xf0]  ;;  %v13165_v43 = vld [vmem:[#allocation10 + $0x56c] sm:$0xf] }
 0x24a   :  { %5868 = vmatpush.bf16.msra.mxu3 %v12978_v57  ;;  %v4347_v25 = vadd.f32 %v15997_v27, %v4346_v39  ;;  %v13117_v53 = vld [vmem:[#allocation10 + $0xe68] sm:$0xf]  ;;  %v13054_v57 = vor.u32 %v15487_v32, %v13053_v49  ;;  %v15515_v10 = vld [vmem:[#allocation10 + $0x5c8] sm:$0xf0]  ;;  %v13261_v49 = vld [vmem:[#allocation10 + $0x570] sm:$0xf] }
 0x24b   :  { %5712 = vmatpush.bf16.msra.mxu2 %v12946_v54  ;;  %v15503_v54 = vld [vmem:[#allocation10 + $0xec4] sm:$0xf0]  ;;  %v16488_v32 = vld [vmem:[#allocation2 + $0x2c] sm:$0xff]  }
 0x24c   :  { %5687 = vmatmul.bf16.vlgmr.msra.gmra.mxu0 %v5529_v11  ;;  %5700 = vmatmul.bf16.vlgmr.msra.gmra.mxu1 %v5530_v12  ;;  %v4360_v37 = vadd.f32 %v4359_v41, %v4347_v25  ;;  %v15486_v61 = vld [vmem:[#allocation10 + $0x204] sm:$0xf0]  ;;  %v13013_v11 = vld [vmem:[#allocation10 + $0x6e4] sm:$0xf]  ;;  %v13197_v41 = vld [vmem:[#allocation10 + $0xb6c] sm:$0xf]  ;;  %v5948_v26 = vunpack.c.l.b16 %v16488_v32 }
 0x24d   :  { %5874 = vmatpush.bf16.msrb.mxu0 %v13038_v34  ;;  %6099 = vmatpush.bf16.msrb.mxu1 %v13070_v59  ;;  %v13086_v34 = vor.u32 %v15495_v9, %v13085_v51  ;;  %v13049_v59 = vld [vmem:[#allocation10 + $0x1a8] sm:$0xf]  ;;  %v15523_v25 = vld [vmem:[#allocation10 + $0xbc8] sm:$0xf0]  ;;  %v13166_v9 = vor.u32 %v15515_v10, %v13165_v43 }
 0x24e   :  { %6125 = vmatpush.bf16.msrb.mxu3 %v13134_v44  ;;  %5713 = vmatmul.bf16.vlgmr.msra.gmra.mxu2 %v5531_v18  ;;  %v13081_v62 = vld [vmem:[#allocation10 + $0x7a8] sm:$0xf]  ;;  %v15511_v43 = vld [vmem:[#allocation10 + $0x2c8] sm:$0xf0] }
 0x24f   :  { %6112 = vmatpush.bf16.msrb.mxu2 %v13102_v60  ;;  %5869 = vmatmul.bf16.vlgmr.msra.gmra.mxu3 %v16483_v20  ;;  %v13118_v60 = vor.u32 %v15503_v54, %v13117_v53  ;;  %v15494_v0 = vld [vmem:[#allocation10 + $0x804] sm:$0xf0]  ;;  %v5760_v53 = vunpack.c.h.b16 %v16479_v55  ;;  %v13198_v54 = vor.u32 %v15523_v25, %v13197_v41  ;;  %v15519_v10 = vld [vmem:[#allocation10 + $0x8c8] sm:$0xf0] }
 0x250   :  { %v13113_v40 = vld [vmem:[#allocation10 + $0xda8] sm:$0xf]  ;;  %v13082_v18 = vor.u32 %v15494_v0, %v13081_v62  ;;  %v15538_v62 = vld [vmem:[#allocation10 + $0x50c] sm:$0xf0]  ;;  %v15998_v0 = vld [vmem:[#allocation12 + $0x3] ss:$0 sm:$0xff] }
 0x251   :  { %5875 = vmatpush.bf16.msrb.mxu0 %v13034_v15  ;;  %6100 = vmatpush.bf16.msrb.mxu1 %v13066_v14  ;;  %v4372_v48 = vpop.f32.mrf.mxu2  ;;  %v4348_v1 = vpop.f32.mrf.mxu0  ;;  %v15502_v6 = vld [vmem:[#allocation10 + $0xe04] sm:$0xf0]  ;;  %v13050_v15 = vor.u32 %v15486_v61, %v13049_v59  ;;  %v15477_v14 = vld [vmem:[#allocation10 + $0x740] sm:$0xf0]  ;;  %v15522_v59 = vld [vmem:[#allocation10 + $0xb08] sm:$0xf0]  ;;  %v5762_v55 = vpack.c.b16 %v5760_v53, %v5760_v53 }
 0x252   :  { %6126 = vmatpush.bf16.msrb.mxu3 %v13130_v21  ;;  %v4373_v44 = vadd.f32 %v4372_v48, %v4360_v37  ;;  %v16486_v17 = vpop.f32.mrf.mxu3  ;;  %v4361_v7 = vpop.f32.mrf.mxu1  ;;  %v13114_v16 = vor.u32 %v15502_v6, %v13113_v40  ;;  %v15485_v19 = vld [vmem:[#allocation10 + $0x144] sm:$0xf0]  ;;  %v13014_v24 = vor.u32 %v15477_v14, %v13013_v11  ;;  %v13161_v37 = vld [vmem:[#allocation10 + $0x4ac] sm:$0xf]  ;;  %v13257_v61 = vld [vmem:[#allocation10 + $0x4b0] sm:$0xf]  ;;  %v5951_v11 = vpack.c.b16 %v5948_v26, %v5948_v26 }
 0x253   :  { %6113 = vmatpush.bf16.msrb.mxu2 %v13098_v30  ;;  %v13045_v30 = vld [vmem:[#allocation10 + $0xe8] sm:$0xf]  ;;  %v15530_v48 = vld [vmem:[#allocation10 + $0x1108] sm:$0xf0] }
 0x254   :  { %v4376_v12 = vmax.f32 %v4373_v44, 0.0  ;;  %v13077_v56 = vld [vmem:[#allocation10 + $0x6e8] sm:$0xf]  ;;  %v13157_v6 = vld [vmem:[#allocation10 + $0x3ec] sm:$0xf] }
 0x255   :  { %5876 = vmatpush.bf16.msrb.mxu0 %v13030_v13  ;;  %6101 = vmatpush.bf16.msrb.mxu1 %v13062_v28  ;;  %v15493_v21 = vld [vmem:[#allocation10 + $0x744] sm:$0xf0]  ;;  %v15476_v13 = vld [vmem:[#allocation10 + $0x680] sm:$0xf0]  ;;  %v13046_v28 = vor.u32 %v15485_v19, %v13045_v30  ;;  %v15513_v7 = vld [vmem:[#allocation10 + $0x448] sm:$0xf0] }
 0x256   :  { %6127 = vmatpush.bf16.msrb.mxu3 %v13126_v31  ;;  %v4377_v63 = vpack.c.bf16 %v4376_v12, %v4376_v12  ;;  %v13109_v4 = vld [vmem:[#allocation10 + $0xce8] sm:$0xf]  ;;  %v13258_v12 = vor.u32 %v15538_v62, %v13257_v61  ;;  %v15529_v14 = vld [vmem:[#allocation10 + $0x1048] sm:$0xf0]  ;;  %v13253_v30 = vld [vmem:[#allocation10 + $0x3f0] sm:$0xf]  ;;  %v13158_v19 = vor.u32 %v15513_v7, %v13157_v6 }
 0x257   :  { %6114 = vmatpush.bf16.msrb.mxu2 %v13094_v5  ;;  %v15501_v23 = vld [vmem:[#allocation10 + $0xd44] sm:$0xf0]  ;;  %v13078_v5 = vor.u32 %v15493_v21, %v13077_v56  ;;  %v13213_v25 = vld [vmem:[#allocation10 + $0xe6c] sm:$0xf]  ;;  %v13241_v61 = vld [vmem:[#allocation10 + $0x1b0] sm:$0xf] }
 0x258   :  { %v13041_v27 = vld [vmem:[#allocation10 + $0x28] sm:$0xf]  ;;  %4378 = vst [vmem:[#allocation3 + $0x8] sm:$0xf] %v4377_v63  ;;  %v13110_v3 = vor.u32 %v15501_v23, %v13109_v4  ;;  %v13153_v63 = vld [vmem:[#allocation10 + $0x32c] sm:$0xf] }
 0x259   :  { %5877 = vmatpush.bf16.msrb.mxu0 %v13026_v42  ;;  %6102 = vmatpush.bf16.msrb.mxu1 %v13058_v45  ;;  %v15484_v33 = vld [vmem:[#allocation10 + $0x84] sm:$0xf0]  ;;  %v4374_v31 = vpop.f32.mrf.mxu2  ;;  %v13010_v42 = vor.u32 %v15476_v13, %v13009_v2  ;;  %v13229_v45 = vld [vmem:[#allocation10 + $0x116c] sm:$0xf]  ;;  %v15534_v62 = vld [vmem:[#allocation10 + $0x20c] sm:$0xf0] }
 0x25a   :  { %6128 = vmatpush.bf16.msrb.mxu3 %v13122_v50  ;;  %v13073_v29 = vld [vmem:[#allocation10 + $0x628] sm:$0xf]  ;;  %v4530_v39 = vpop.f32.mrf.mxu3  ;;  %v13042_v22 = vor.u32 %v15484_v33, %v13041_v27  ;;  %v15539_v50 = vld [vmem:[#allocation10 + $0x5cc] sm:$0xf0]  ;;  %v15512_v4 = vld [vmem:[#allocation10 + $0x388] sm:$0xf0] }
 0x25b   :  { %6115 = vmatpush.bf16.msrb.mxu2 %v13090_v46  ;;  %v15492_v35 = vld [vmem:[#allocation10 + $0x684] sm:$0xf0]  ;;  %v15531_v46 = vld [vmem:[#allocation10 + $0x11c8] sm:$0xf0]  ;;  %v13262_v58 = vor.u32 %v15539_v50, %v13261_v49  ;;  %v15536_v33 = vld [vmem:[#allocation10 + $0x38c] sm:$0xf0] }
 0x25c   :  { %v13105_v36 = vld [vmem:[#allocation10 + $0xc28] sm:$0xf]  ;;  %v13074_v47 = vor.u32 %v15492_v35, %v13073_v29  ;;  %v13185_v23 = vld [vmem:[#allocation10 + $0x92c] sm:$0xf]  ;;  %v13154_v35 = vor.u32 %v15512_v4, %v13153_v63 }
 0x25d   :  { %5878 = vmatpush.bf16.msrb.mxu0 %v13022_v52  ;;  %6103 = vmatpush.bf16.msrb.mxu1 %v13054_v57  ;;  %v15500_v38 = vld [vmem:[#allocation10 + $0xc84] sm:$0xf0]  ;;  %v13230_v52 = vor.u32 %v15531_v46, %v13229_v45  ;;  %v15514_v57 = vld [vmem:[#allocation10 + $0x508] sm:$0xf0]  ;;  %v13245_v46 = vld [vmem:[#allocation10 + $0x270] sm:$0xf] }
 0x25e   :  { %6129 = vmatpush.bf16.msrb.mxu3 %v13118_v60  ;;  %v13106_v51 = vor.u32 %v15500_v38, %v13105_v36  ;;  %v13225_v60 = vld [vmem:[#allocation10 + $0x10ac] sm:$0xf]  ;;  %v13162_v44 = vor.u32 %v15514_v57, %v13161_v37 }
 0x25f   :  { %6116 = vmatpush.bf16.msrb.mxu2 %v13086_v34  ;;  %v13193_v34 = vld [vmem:[#allocation10 + $0xaac] sm:$0xf]  ;;  %v13226_v40 = vor.u32 %v15530_v48, %v13225_v60 }
 0x260   :  { %v13194_v1 = vor.u32 %v15522_v59, %v13193_v34  ;;  %v15520_v13 = vld [vmem:[#allocation10 + $0x988] sm:$0xf0] }
 0x261   :  { %5879 = vmatpush.bf16.msrb.mxu0 %v13018_v8  ;;  %6104 = vmatpush.bf16.msrb.mxu1 %v13050_v15  ;;  %v13189_v8 = vld [vmem:[#allocation10 + $0x9ec] sm:$0xf]  ;;  %v13186_v38 = vor.u32 %v15520_v13, %v13185_v23 }
 0x262   :  { %6130 = vmatpush.bf16.msrb.mxu3 %v13114_v16  ;;  %v15521_v15 = vld [vmem:[#allocation10 + $0xa48] sm:$0xf0]  ;;  %v15537_v16 = vld [vmem:[#allocation10 + $0x44c] sm:$0xf0] }
 0x263   :  { %6117 = vmatpush.bf16.msrb.mxu2 %v13082_v18  ;;  %v13221_v18 = vld [vmem:[#allocation10 + $0xfec] sm:$0xf]  ;;  %v13190_v56 = vor.u32 %v15521_v15, %v13189_v8  ;;  %v13254_v2 = vor.u32 %v15537_v16, %v13253_v30  ;;  %v13237_v30 = vld [vmem:[#allocation10 + $0xf0] sm:$0xf] }
 0x264   :  { %v13222_v21 = vor.u32 %v15529_v14, %v13221_v18  ;;  %v13217_v27 = vld [vmem:[#allocation10 + $0xf2c] sm:$0xf]  ;;  %v15533_v16 = vld [vmem:[#allocation10 + $0x14c] sm:$0xf0] }
 0x265   :  { %5880 = vmatpush.bf16.msrb.mxu0 %v13014_v24  ;;  %6105 = vmatpush.bf16.msrb.mxu1 %v13046_v28  ;;  %v4529_v24 = vadd.f32 %v15998_v0, %v16486_v17  ;;  %v13149_v36 = vld [vmem:[#allocation10 + $0x26c] sm:$0xf] }
 0x266   :  { %6131 = vmatpush.bf16.msrb.mxu3 %v13110_v3  ;;  %v15999_v3 = vld [vmem:[#allocation12 + $0x4] ss:$0 sm:$0xff]  ;;  %v13181_v17 = vld [vmem:[#allocation10 + $0x86c] sm:$0xf]  ;;  %v13150_v49 = vor.u32 %v15511_v43, %v13149_v36  ;;  %v13325_v36 = vld [vmem:[#allocation10 + $0x574] sm:$0xf] }
 0x267   :  { %6118 = vmatpush.bf16.msrb.mxu2 %v13078_v5  ;;  %v13249_v5 = vld [vmem:[#allocation10 + $0x330] sm:$0xf]  ;;  %v15527_v45 = vld [vmem:[#allocation10 + $0xec8] sm:$0xf0]  ;;  %v13357_v43 = vld [vmem:[#allocation10 + $0xb74] sm:$0xf] }
 0x268   :  { %v13145_v50 = vld [vmem:[#allocation10 + $0x1ac] sm:$0xf]  ;;  %v13214_v53 = vor.u32 %v15527_v45, %v13213_v25  ;;  %v15571_v25 = vld [vmem:[#allocation10 + $0x11d0] sm:$0xf0] }
 0x269   :  { %5881 = vmatpush.bf16.msrb.mxu0 %v13010_v42  ;;  %6106 = vmatpush.bf16.msrb.mxu1 %v13042_v22  ;;  %v4541_v28 = vpop.f32.mrf.mxu0  ;;  %v4766_v31 = vpop.f32.mrf.mxu1  ;;  %v13250_v42 = vor.u32 %v15536_v33, %v13249_v5  ;;  %v15535_v22 = vld [vmem:[#allocation10 + $0x2cc] sm:$0xf0]  ;;  %v15518_v37 = vld [vmem:[#allocation10 + $0x808] sm:$0xf0]  ;;  %v16494_v45 = vld [vmem:[#allocation2 + $0x30] sm:$0xff] }
 0x26a   :  { %6132 = vmatpush.bf16.msrb.mxu3 %v13106_v51  ;;  %v4542_v29 = vadd.f32 %v4541_v28, %v4529_v24  ;;  %v4767_v51 = vadd.f32 %v15999_v3, %v4766_v31  ;;  %v13246_v57 = vor.u32 %v15535_v22, %v13245_v46  ;;  %v15526_v26 = vld [vmem:[#allocation10 + $0xe08] sm:$0xf0]  ;;  %v13238_v28 = vor.u32 %v15533_v16, %v13237_v30  ;;  %v13233_v33 = vld [vmem:[#allocation10 + $0x30] sm:$0xf]  ;;  %v16000_v30 = vld [vmem:[#allocation12 + $0x5] ss:$0 sm:$0xff] }
 0x26b   :  { %6119 = vmatpush.bf16.msrb.mxu2 %v13074_v47  ;;  %v13141_v6 = vld [vmem:[#allocation10 + $0xec] sm:$0xf]  ;;  %v13293_v3 = vld [vmem:[#allocation10 + $0xb70] sm:$0xf] }
 0x26c   :  { %5882 = vmatmul.bf16.vlgmr.msrb.gmra.mxu0 %v5762_v55  ;;  %6107 = vmatmul.bf16.vlgmr.msrb.gmra.mxu1 %v16483_v20  ;;  %v15528_v20 = vld [vmem:[#allocation10 + $0xf88] sm:$0xf0]  ;;  %v4545_v41 = vmax.f32 %v4542_v29, 0.0  ;;  %v15532_v29 = vld [vmem:[#allocation10 + $0x8c] sm:$0xf0] }
 0x26d   :  { %6350 = vmatpush.bf16.msra.mxu0 %v13166_v9  ;;  %6363 = vmatpush.bf16.msra.mxu1 %v13198_v54  ;;  %v13218_v39 = vor.u32 %v15528_v20, %v13217_v27  ;;  %v13182_v9 = vor.u32 %v15519_v10, %v13181_v17  ;;  %v15510_v54 = vld [vmem:[#allocation10 + $0x208] sm:$0xf0]  ;;  %v15563_v17 = vld [vmem:[#allocation10 + $0xbd0] sm:$0xf0]  ;;  %v13234_v46 = vor.u32 %v15532_v29, %v13233_v33 }
 0x26e   :  { %6532 = vmatpush.bf16.msra.mxu3 %v13262_v58  ;;  %6120 = vmatmul.bf16.vlgmr.msrb.gmra.mxu2 %v5762_v55  ;;  %v4546_v47 = vpack.c.bf16 %v4545_v41, %v4545_v41  ;;  %v13209_v58 = vld [vmem:[#allocation10 + $0xdac] sm:$0xf]  ;;  %v13146_v55 = vor.u32 %v15510_v54, %v13145_v50  ;;  %v15546_v54 = vld [vmem:[#allocation10 + $0xb0c] sm:$0xf0] }
 0x26f   :  { %6376 = vmatpush.bf16.msra.mxu2 %v13230_v52  ;;  %6133 = vmatmul.bf16.vlgmr.msrb.gmra.mxu3 %v5951_v11  ;;  %v13177_v52 = vld [vmem:[#allocation10 + $0x7ac] sm:$0xf]  ;;  %v13242_v11 = vor.u32 %v15534_v62, %v13241_v61 }
 0x270   :  { %4547 = vst [vmem:[#allocation3 + $0xc] sm:$0xf] %v4546_v47  ;;  %v15509_v7 = vld [vmem:[#allocation10 + $0x148] sm:$0xf0] }
 0x271   :  { %6351 = vmatpush.bf16.msra.mxu0 %v13162_v44  ;;  %6364 = vmatpush.bf16.msra.mxu1 %v13194_v1  ;;  %v4779_v34 = vpop.f32.mrf.mxu2  ;;  %v4543_v48 = vpop.f32.mrf.mxu0  ;;  %v13178_v1 = vor.u32 %v15518_v37, %v13177_v52  ;;  %v13173_v8 = vld [vmem:[#allocation10 + $0x6ec] sm:$0xf]  ;;  %v13321_v52 = vld [vmem:[#allocation10 + $0x4b4] sm:$0xf] }
 0x272   :  { %6533 = vmatpush.bf16.msra.mxu3 %v13258_v12  ;;  %v4780_v59 = vadd.f32 %v4779_v34, %v4767_v51  ;;  %v4792_v60 = vpop.f32.mrf.mxu3  ;;  %v4768_v0 = vpop.f32.mrf.mxu1  ;;  %v15517_v12 = vld [vmem:[#allocation10 + $0x748] sm:$0xf0]  ;;  %v13358_v51 = vor.u32 %v15563_v17, %v13357_v43  ;;  %v15554_v34 = vld [vmem:[#allocation10 + $0x510] sm:$0xf0] }
 0x273   :  { %6377 = vmatpush.bf16.msra.mxu2 %v13226_v40  ;;  %v13210_v40 = vor.u32 %v15526_v26, %v13209_v58  ;;  %v13205_v15 = vld [vmem:[#allocation10 + $0xcec] sm:$0xf]  ;;  %v13174_v23 = vor.u32 %v15517_v12, %v13173_v8  ;;  %v13353_v58 = vld [vmem:[#allocation10 + $0xab4] sm:$0xf]  ;;  %v13322_v0 = vor.u32 %v15554_v34, %v13321_v52 }
 0x274   :  { %v4793_v44 = vadd.f32 %v4792_v60, %v4780_v59  ;;  %v15525_v18 = vld [vmem:[#allocation10 + $0xd48] sm:$0xf0]  ;;  %v15562_v26 = vld [vmem:[#allocation10 + $0xb10] sm:$0xf0] }
 0x275   :  { %6352 = vmatpush.bf16.msra.mxu0 %v13158_v19  ;;  %6365 = vmatpush.bf16.msra.mxu1 %v13190_v56  ;;  %v13142_v19 = vor.u32 %v15509_v7, %v13141_v6  ;;  %v13137_v56 = vld [vmem:[#allocation10 + $0x2c] sm:$0xf]  ;;  %v13206_v24 = vor.u32 %v15525_v18, %v13205_v15  ;;  %v13385_v59 = vld [vmem:[#allocation10 + $0x10b4] sm:$0xf] }
 0x276   :  { %6534 = vmatpush.bf16.msra.mxu3 %v13254_v2  ;;  %v4796_v14 = vmax.f32 %v4793_v44, 0.0  ;;  %v13169_v63 = vld [vmem:[#allocation10 + $0x62c] sm:$0xf]  ;;  %v15570_v60 = vld [vmem:[#allocation10 + $0x1110] sm:$0xf0] }
 0x277   :  { %6378 = vmatpush.bf16.msra.mxu2 %v13222_v21  ;;  %v15508_v21 = vld [vmem:[#allocation10 + $0x88] sm:$0xf0]  ;;  %v13285_v44 = vld [vmem:[#allocation10 + $0x9f0] sm:$0xf]  ;;  %v13386_v7 = vor.u32 %v15570_v60, %v13385_v59  ;;  %v15553_v8 = vld [vmem:[#allocation10 + $0x450] sm:$0xf0] }
 0x278   :  { %v4797_v4 = vpack.c.bf16 %v4796_v14, %v4796_v14  ;;  %v15516_v2 = vld [vmem:[#allocation10 + $0x688] sm:$0xf0]  ;;  %v15561_v12 = vld [vmem:[#allocation10 + $0xa50] sm:$0xf0] }
 0x279   :  { %6353 = vmatpush.bf16.msra.mxu0 %v13154_v35  ;;  %6366 = vmatpush.bf16.msra.mxu1 %v13186_v38  ;;  %v13201_v13 = vld [vmem:[#allocation10 + $0xc2c] sm:$0xf]  ;;  %v4781_v5 = vpop.f32.mrf.mxu2  ;;  %v15547_v35 = vld [vmem:[#allocation10 + $0xbcc] sm:$0xf0]  ;;  %v13138_v38 = vor.u32 %v15508_v21, %v13137_v56  ;;  %v13170_v10 = vor.u32 %v15516_v2, %v13169_v63  ;;  %v13381_v15 = vld [vmem:[#allocation10 + $0xff4] sm:$0xf] }
 0x27a   :  { %6535 = vmatpush.bf16.msra.mxu3 %v13250_v42  ;;  %v15524_v27 = vld [vmem:[#allocation10 + $0xc88] sm:$0xf0]  ;;  %4798 = vst [vmem:[#allocation3 + $0x10] sm:$0xf] %v4797_v4  ;;  %v4794_v31 = vpop.f32.mrf.mxu3  ;;  %v13389_v42 = vld [vmem:[#allocation10 + $0x1174] sm:$0xf]  ;;  %v13294_v22 = vor.u32 %v15547_v35, %v13293_v3 }
 0x27b   :  { %6379 = vmatpush.bf16.msra.mxu2 %v13218_v39  ;;  %v6141_v20 = vld [vmem:[#allocation2 + $0x28] sm:$0xff]  ;;  %v13202_v41 = vor.u32 %v15524_v27, %v13201_v13  ;;  %v13390_v37 = vor.u32 %v15571_v25, %v13389_v42 }
 0x27c   :  { %v15555_v39 = vld [vmem:[#allocation10 + $0x5d0] sm:$0xf0]  ;;  %v6197_v47 = vunpack.c.l.b16 %v6141_v20  ;;  %v13281_v56 = vld [vmem:[#allocation10 + $0x930] sm:$0xf] }
 0x27d   :  { %6354 = vmatpush.bf16.msra.mxu0 %v13150_v49  ;;  %6367 = vmatpush.bf16.msra.mxu1 %v13182_v9  ;;  %v6198_v49 = vunpack.c.h.b16 %v6141_v20  ;;  %v13326_v50 = vor.u32 %v15555_v39, %v13325_v36  ;;  %v6199_v9 = vunpack.c.h.b16 %v16488_v32  ;;  %v15569_v18 = vld [vmem:[#allocation10 + $0x1050] sm:$0xf0]  ;;  %v15544_v21 = vld [vmem:[#allocation10 + $0x98c] sm:$0xf0] }
 0x27e   :  { %6536 = vmatpush.bf16.msra.mxu3 %v13246_v57  ;;  %v6430_v57 = vunpack.c.l.b16 %v16494_v45  ;;  %v6200_v48 = vpack.c.b16 %v6197_v47, %v6197_v47  ;;  %v13313_v63 = vld [vmem:[#allocation10 + $0x334] sm:$0xf]  ;;  %v13382_v4 = vor.u32 %v15569_v18, %v13381_v15  ;;  %v13282_v5 = vor.u32 %v15544_v21, %v13281_v56  ;;  %v13277_v31 = vld [vmem:[#allocation10 + $0x870] sm:$0xf] }
 0x27f   :  { %6380 = vmatpush.bf16.msra.mxu2 %v13214_v53  ;;  %v13289_v53 = vld [vmem:[#allocation10 + $0xab0] sm:$0xf]  ;;  %v6201_v61 = vpack.c.b16 %v6198_v49, %v6198_v49  ;;  %v6202_v32 = vpack.c.b16 %v6199_v9, %v6199_v9  ;;  %v15560_v2 = vld [vmem:[#allocation10 + $0x990] sm:$0xf0] }
 0x280   :  { %v13290_v62 = vor.u32 %v15546_v54, %v13289_v53  ;;  %v16498_v6 = vpack.c.b16 %v6430_v57, %v6430_v57  ;;  %v13377_v27 = vld [vmem:[#allocation10 + $0xf34] sm:$0xf]  ;;  %v15543_v35 = vld [vmem:[#allocation10 + $0x8cc] sm:$0xf0] }
 0x281   :  { %6355 = vmatpush.bf16.msra.mxu0 %v13146_v55  ;;  %6368 = vmatpush.bf16.msra.mxu1 %v13178_v1  ;;  %v13354_v55 = vor.u32 %v15562_v26, %v13353_v58  ;;  %v15545_v1 = vld [vmem:[#allocation10 + $0xa4c] sm:$0xf0]  ;;  %v15568_v20 = vld [vmem:[#allocation10 + $0xf90] sm:$0xf0]  ;;  %v13278_v42 = vor.u32 %v15543_v35, %v13277_v31 }
 0x282   :  { %6537 = vmatpush.bf16.msra.mxu3 %v13242_v11  ;;  %v13349_v11 = vld [vmem:[#allocation10 + $0x9f4] sm:$0xf]  ;;  %v13286_v14 = vor.u32 %v15545_v1, %v13285_v44  ;;  %v13273_v47 = vld [vmem:[#allocation10 + $0x7b0] sm:$0xf] }
 0x283   :  { %6381 = vmatpush.bf16.msra.mxu2 %v13210_v40  ;;  %v13317_v40 = vld [vmem:[#allocation10 + $0x3f4] sm:$0xf]  ;;  %v15542_v49 = vld [vmem:[#allocation10 + $0x80c] sm:$0xf0] }
 0x284   :  { %v13318_v16 = vor.u32 %v15553_v8, %v13317_v40  ;;  %v13309_v36 = vld [vmem:[#allocation10 + $0x274] sm:$0xf]  ;;  %v13274_v60 = vor.u32 %v15542_v49, %v13273_v47  ;;  %v13265_v18 = vld [vmem:[#allocation10 + $0x630] sm:$0xf] }
 0x285   :  { %6356 = vmatpush.bf16.msra.mxu0 %v13142_v19  ;;  %6369 = vmatpush.bf16.msra.mxu1 %v13174_v23  ;;  %v13350_v19 = vor.u32 %v15561_v12, %v13349_v11  ;;  %v15552_v23 = vld [vmem:[#allocation10 + $0x390] sm:$0xf0] }
 0x286   :  { %6538 = vmatpush.bf16.msra.mxu3 %v13238_v28  ;;  %v13314_v29 = vor.u32 %v15552_v23, %v13313_v63  ;;  %v15551_v39 = vld [vmem:[#allocation10 + $0x2d0] sm:$0xf0] }
 0x287   :  { %6382 = vmatpush.bf16.msra.mxu2 %v13206_v24  ;;  %v13345_v24 = vld [vmem:[#allocation10 + $0x934] sm:$0xf] }
 0x288   :  { %v13346_v3 = vor.u32 %v15560_v2, %v13345_v24  ;;  %v13341_v43 = vld [vmem:[#allocation10 + $0x874] sm:$0xf] }
 0x289   :  { %6357 = vmatpush.bf16.msra.mxu0 %v13138_v38  ;;  %6370 = vmatpush.bf16.msra.mxu1 %v13170_v10  ;;  %v5017_v13 = vpop.f32.mrf.mxu0  ;;  %v5030_v28 = vpop.f32.mrf.mxu1  ;;  %v13378_v38 = vor.u32 %v15568_v20, %v13377_v27  ;;  %v15559_v17 = vld [vmem:[#allocation10 + $0x8d0] sm:$0xf0]  ;;  %v13421_v27 = vld [vmem:[#allocation10 + $0x578] sm:$0xf] }
 0x28a   :  { %6539 = vmatpush.bf16.msra.mxu3 %v13234_v46  ;;  %v5018_v33 = vadd.f32 %v16000_v30, %v5017_v13  ;;  %v13373_v10 = vld [vmem:[#allocation10 + $0xe74] sm:$0xf]  ;;  %v13310_v46 = vor.u32 %v15551_v39, %v13309_v36  ;;  %v15579_v20 = vld [vmem:[#allocation10 + $0x5d4] sm:$0xf0]  ;;  %v13517_v36 = vld [vmem:[#allocation10 + $0x57c] sm:$0xf] }
 0x28b   :  { %6383 = vmatpush.bf16.msra.mxu2 %v13202_v41  ;;  %v15567_v41 = vld [vmem:[#allocation10 + $0xed0] sm:$0xf0]  ;;  %v16503_v39 = vld [vmem:[#allocation2 + $0x38] sm:$0xff]  }
 0x28c   :  { %6358 = vmatmul.bf16.vlgmr.msra.gmra.mxu0 %v6200_v48  ;;  %6371 = vmatmul.bf16.vlgmr.msra.gmra.mxu1 %v6201_v61  ;;  %v5031_v25 = vadd.f32 %v5030_v28, %v5018_v33  ;;  %v15550_v53 = vld [vmem:[#allocation10 + $0x210] sm:$0xf0]  ;;  %v13269_v48 = vld [vmem:[#allocation10 + $0x6f0] sm:$0xf]  ;;  %v13453_v28 = vld [vmem:[#allocation10 + $0xb78] sm:$0xf]  ;;  %v6619_v49 = vunpack.c.l.b16 %v16503_v39 }
 0x28d   :  { %6545 = vmatpush.bf16.msrb.mxu0 %v13294_v22  ;;  %6770 = vmatpush.bf16.msrb.mxu1 %v13326_v50  ;;  %v13342_v22 = vor.u32 %v15559_v17, %v13341_v43  ;;  %v13305_v50 = vld [vmem:[#allocation10 + $0x1b4] sm:$0xf]  ;;  %v15587_v33 = vld [vmem:[#allocation10 + $0xbd4] sm:$0xf0]  ;;  %v13422_v17 = vor.u32 %v15579_v20, %v13421_v27 }
 0x28e   :  { %6796 = vmatpush.bf16.msrb.mxu3 %v13390_v37  ;;  %6384 = vmatmul.bf16.vlgmr.msra.gmra.mxu2 %v6202_v32  ;;  %v13337_v54 = vld [vmem:[#allocation10 + $0x7b4] sm:$0xf]  ;;  %v15575_v27 = vld [vmem:[#allocation10 + $0x2d4] sm:$0xf0] }
 0x28f   :  { %6783 = vmatpush.bf16.msrb.mxu2 %v13358_v51  ;;  %6540 = vmatmul.bf16.vlgmr.msra.gmra.mxu3 %v16498_v6  ;;  %v13374_v51 = vor.u32 %v15567_v41, %v13373_v10  ;;  %v15558_v52 = vld [vmem:[#allocation10 + $0x810] sm:$0xf0]  ;;  %v6431_v10 = vunpack.c.h.b16 %v16494_v45  ;;  %v13454_v41 = vor.u32 %v15587_v33, %v13453_v28  ;;  %v15583_v20 = vld [vmem:[#allocation10 + $0x8d4] sm:$0xf0] }
 0x290   :  { %v13369_v58 = vld [vmem:[#allocation10 + $0xdb4] sm:$0xf]  ;;  %v13338_v32 = vor.u32 %v15558_v52, %v13337_v54  ;;  %v15602_v54 = vld [vmem:[#allocation10 + $0x518] sm:$0xf0]  ;;  %v16001_v52 = vld [vmem:[#allocation12 + $0x6] ss:$0 sm:$0xff] }
 0x291   :  { %6546 = vmatpush.bf16.msrb.mxu0 %v13290_v62  ;;  %6771 = vmatpush.bf16.msrb.mxu1 %v13322_v0  ;;  %v5043_v9 = vpop.f32.mrf.mxu2  ;;  %v5019_v34 = vpop.f32.mrf.mxu0  ;;  %v15566_v26 = vld [vmem:[#allocation10 + $0xe10] sm:$0xf0]  ;;  %v13306_v62 = vor.u32 %v15550_v53, %v13305_v50  ;;  %v15541_v0 = vld [vmem:[#allocation10 + $0x74c] sm:$0xf0]  ;;  %v15586_v50 = vld [vmem:[#allocation10 + $0xb14] sm:$0xf0]  ;;  %v6433_v45 = vpack.c.b16 %v6431_v10, %v6431_v10 }
 0x292   :  { %6797 = vmatpush.bf16.msrb.mxu3 %v13386_v7  ;;  %v5044_v37 = vadd.f32 %v5043_v9, %v5031_v25  ;;  %v16501_v57 = vpop.f32.mrf.mxu3  ;;  %v5032_v59 = vpop.f32.mrf.mxu1  ;;  %v13370_v44 = vor.u32 %v15566_v26, %v13369_v58  ;;  %v15549_v1 = vld [vmem:[#allocation10 + $0x150] sm:$0xf0]  ;;  %v13270_v15 = vor.u32 %v15541_v0, %v13269_v48  ;;  %v13417_v25 = vld [vmem:[#allocation10 + $0x4b8] sm:$0xf]  ;;  %v13513_v53 = vld [vmem:[#allocation10 + $0x4bc] sm:$0xf]  ;;  %v6622_v48 = vpack.c.b16 %v6619_v49, %v6619_v49 }
 0x293   :  { %6784 = vmatpush.bf16.msrb.mxu2 %v13354_v55  ;;  %v13301_v55 = vld [vmem:[#allocation10 + $0xf4] sm:$0xf]  ;;  %v15594_v9 = vld [vmem:[#allocation10 + $0x1114] sm:$0xf0] }
 0x294   :  { %v5047_v61 = vmax.f32 %v5044_v37, 0.0  ;;  %v13333_v40 = vld [vmem:[#allocation10 + $0x6f4] sm:$0xf]  ;;  %v13413_v26 = vld [vmem:[#allocation10 + $0x3f8] sm:$0xf] }
 0x295   :  { %6547 = vmatpush.bf16.msrb.mxu0 %v13286_v14  ;;  %6772 = vmatpush.bf16.msrb.mxu1 %v13318_v16  ;;  %v15557_v7 = vld [vmem:[#allocation10 + $0x750] sm:$0xf0]  ;;  %v15540_v14 = vld [vmem:[#allocation10 + $0x68c] sm:$0xf0]  ;;  %v13302_v16 = vor.u32 %v15549_v1, %v13301_v55  ;;  %v15577_v59 = vld [vmem:[#allocation10 + $0x454] sm:$0xf0] }
 0x296   :  { %6798 = vmatpush.bf16.msrb.mxu3 %v13382_v4  ;;  %v5048_v8 = vpack.c.bf16 %v5047_v61, %v5047_v61  ;;  %v13365_v11 = vld [vmem:[#allocation10 + $0xcf4] sm:$0xf]  ;;  %v13514_v61 = vor.u32 %v15602_v54, %v13513_v53  ;;  %v15593_v0 = vld [vmem:[#allocation10 + $0x1054] sm:$0xf0]  ;;  %v13509_v55 = vld [vmem:[#allocation10 + $0x3fc] sm:$0xf]  ;;  %v13414_v1 = vor.u32 %v15577_v59, %v13413_v26 }
 0x297   :  { %6785 = vmatpush.bf16.msrb.mxu2 %v13350_v19  ;;  %v15565_v12 = vld [vmem:[#allocation10 + $0xd50] sm:$0xf0]  ;;  %v13334_v19 = vor.u32 %v15557_v7, %v13333_v40  ;;  %v13469_v33 = vld [vmem:[#allocation10 + $0xe78] sm:$0xf]  ;;  %v13497_v53 = vld [vmem:[#allocation10 + $0x1bc] sm:$0xf] }
 0x298   :  { %v13297_v30 = vld [vmem:[#allocation10 + $0x34] sm:$0xf]  ;;  %5049 = vst [vmem:[#allocation3 + $0x14] sm:$0xf] %v5048_v8  ;;  %v13366_v63 = vor.u32 %v15565_v12, %v13365_v11  ;;  %v13409_v8 = vld [vmem:[#allocation10 + $0x338] sm:$0xf] }
 0x299   :  { %6548 = vmatpush.bf16.msrb.mxu0 %v13282_v5  ;;  %6773 = vmatpush.bf16.msrb.mxu1 %v13314_v29  ;;  %v15548_v56 = vld [vmem:[#allocation10 + $0x90] sm:$0xf0]  ;;  %v5045_v4 = vpop.f32.mrf.mxu2  ;;  %v13266_v5 = vor.u32 %v15540_v14, %v13265_v18  ;;  %v13485_v29 = vld [vmem:[#allocation10 + $0x1178] sm:$0xf]  ;;  %v15598_v54 = vld [vmem:[#allocation10 + $0x218] sm:$0xf0] }
 0x29a   :  { %6799 = vmatpush.bf16.msrb.mxu3 %v13378_v38  ;;  %v13329_v21 = vld [vmem:[#allocation10 + $0x634] sm:$0xf]  ;;  %v5201_v13 = vpop.f32.mrf.mxu3  ;;  %v13298_v31 = vor.u32 %v15548_v56, %v13297_v30  ;;  %v15603_v38 = vld [vmem:[#allocation10 + $0x5d8] sm:$0xf0]  ;;  %v15576_v11 = vld [vmem:[#allocation10 + $0x394] sm:$0xf0] }
 0x29b   :  { %6786 = vmatpush.bf16.msrb.mxu2 %v13346_v3  ;;  %v15556_v23 = vld [vmem:[#allocation10 + $0x690] sm:$0xf0]  ;;  %v15595_v3 = vld [vmem:[#allocation10 + $0x11d4] sm:$0xf0]  ;;  %v13518_v47 = vor.u32 %v15603_v38, %v13517_v36  ;;  %v15600_v56 = vld [vmem:[#allocation10 + $0x398] sm:$0xf0] }
 0x29c   :  { %v13361_v24 = vld [vmem:[#allocation10 + $0xc34] sm:$0xf]  ;;  %v13330_v35 = vor.u32 %v15556_v23, %v13329_v21  ;;  %v13441_v12 = vld [vmem:[#allocation10 + $0x938] sm:$0xf]  ;;  %v13410_v23 = vor.u32 %v15576_v11, %v13409_v8 }
 0x29d   :  { %6549 = vmatpush.bf16.msrb.mxu0 %v13278_v42  ;;  %6774 = vmatpush.bf16.msrb.mxu1 %v13310_v46  ;;  %v15564_v2 = vld [vmem:[#allocation10 + $0xc90] sm:$0xf0]  ;;  %v13486_v42 = vor.u32 %v15595_v3, %v13485_v29  ;;  %v15578_v46 = vld [vmem:[#allocation10 + $0x514] sm:$0xf0]  ;;  %v13501_v3 = vld [vmem:[#allocation10 + $0x27c] sm:$0xf] }
 0x29e   :  { %6800 = vmatpush.bf16.msrb.mxu3 %v13374_v51  ;;  %v13362_v43 = vor.u32 %v15564_v2, %v13361_v24  ;;  %v13481_v51 = vld [vmem:[#allocation10 + $0x10b8] sm:$0xf]  ;;  %v13418_v37 = vor.u32 %v15578_v46, %v13417_v25 }
 0x29f   :  { %6787 = vmatpush.bf16.msrb.mxu2 %v13342_v22  ;;  %v13449_v22 = vld [vmem:[#allocation10 + $0xab8] sm:$0xf]  ;;  %v13482_v58 = vor.u32 %v15594_v9, %v13481_v51 }
 0x2a0   :  { %v13450_v34 = vor.u32 %v15586_v50, %v13449_v22  ;;  %v15584_v14 = vld [vmem:[#allocation10 + $0x994] sm:$0xf0] }
 0x2a1   :  { %6550 = vmatpush.bf16.msrb.mxu0 %v13274_v60  ;;  %6775 = vmatpush.bf16.msrb.mxu1 %v13306_v62  ;;  %v13445_v60 = vld [vmem:[#allocation10 + $0x9f8] sm:$0xf]  ;;  %v13442_v2 = vor.u32 %v15584_v14, %v13441_v12 }
 0x2a2   :  { %6801 = vmatpush.bf16.msrb.mxu3 %v13370_v44  ;;  %v15585_v62 = vld [vmem:[#allocation10 + $0xa54] sm:$0xf0]  ;;  %v15601_v44 = vld [vmem:[#allocation10 + $0x458] sm:$0xf0] }
 0x2a3   :  { %6788 = vmatpush.bf16.msrb.mxu2 %v13338_v32  ;;  %v13477_v32 = vld [vmem:[#allocation10 + $0xff8] sm:$0xf]  ;;  %v13446_v40 = vor.u32 %v15585_v62, %v13445_v60  ;;  %v13510_v18 = vor.u32 %v15601_v44, %v13509_v55  ;;  %v13493_v55 = vld [vmem:[#allocation10 + $0xfc] sm:$0xf] }
 0x2a4   :  { %v13478_v7 = vor.u32 %v15593_v0, %v13477_v32  ;;  %v13473_v30 = vld [vmem:[#allocation10 + $0xf38] sm:$0xf]  ;;  %v15597_v44 = vld [vmem:[#allocation10 + $0x158] sm:$0xf0] }
 0x2a5   :  { %6551 = vmatpush.bf16.msrb.mxu0 %v13270_v15  ;;  %6776 = vmatpush.bf16.msrb.mxu1 %v13302_v16  ;;  %v5200_v15 = vadd.f32 %v16001_v52, %v16501_v57  ;;  %v13405_v24 = vld [vmem:[#allocation10 + $0x278] sm:$0xf] }
 0x2a6   :  { %6802 = vmatpush.bf16.msrb.mxu3 %v13366_v63  ;;  %v16002_v63 = vld [vmem:[#allocation12 + $0x7] ss:$0 sm:$0xff]  ;;  %v13437_v57 = vld [vmem:[#allocation10 + $0x878] sm:$0xf]  ;;  %v13406_v36 = vor.u32 %v15575_v27, %v13405_v24  ;;  %v13581_v24 = vld [vmem:[#allocation10 + $0x580] sm:$0xf] }
 0x2a7   :  { %6789 = vmatpush.bf16.msrb.mxu2 %v13334_v19  ;;  %v13505_v19 = vld [vmem:[#allocation10 + $0x33c] sm:$0xf]  ;;  %v15591_v29 = vld [vmem:[#allocation10 + $0xed4] sm:$0xf0]  ;;  %v13613_v27 = vld [vmem:[#allocation10 + $0xb80] sm:$0xf] }
 0x2a8   :  { %v13401_v38 = vld [vmem:[#allocation10 + $0x1b8] sm:$0xf]  ;;  %v13470_v10 = vor.u32 %v15591_v29, %v13469_v33  ;;  %v15635_v33 = vld [vmem:[#allocation10 + $0x11dc] sm:$0xf0] }
 0x2a9   :  { %6552 = vmatpush.bf16.msrb.mxu0 %v13266_v5  ;;  %6777 = vmatpush.bf16.msrb.mxu1 %v13298_v31  ;;  %v5212_v16 = vpop.f32.mrf.mxu0  ;;  %v5437_v4 = vpop.f32.mrf.mxu1  ;;  %v13506_v5 = vor.u32 %v15600_v56, %v13505_v19  ;;  %v15599_v31 = vld [vmem:[#allocation10 + $0x2d8] sm:$0xf0]  ;;  %v15582_v25 = vld [vmem:[#allocation10 + $0x814] sm:$0xf0]  ;;  %v16509_v29 = vld [vmem:[#allocation2 + $0x3c] sm:$0xff] }
 0x2aa   :  { %6803 = vmatpush.bf16.msrb.mxu3 %v13362_v43  ;;  %v5213_v21 = vadd.f32 %v5212_v16, %v5200_v15  ;;  %v5438_v43 = vadd.f32 %v16002_v63, %v5437_v4  ;;  %v13502_v46 = vor.u32 %v15599_v31, %v13501_v3  ;;  %v15590_v49 = vld [vmem:[#allocation10 + $0xe14] sm:$0xf0]  ;;  %v13494_v16 = vor.u32 %v15597_v44, %v13493_v55  ;;  %v13489_v56 = vld [vmem:[#allocation10 + $0x3c] sm:$0xf]  ;;  %v16003_v55 = vld [vmem:[#allocation12 + $0x8] ss:$0 sm:$0xff] }
 0x2ab   :  { %6790 = vmatpush.bf16.msrb.mxu2 %v13330_v35  ;;  %v13397_v26 = vld [vmem:[#allocation10 + $0xf8] sm:$0xf]  ;;  %v13549_v63 = vld [vmem:[#allocation10 + $0xb7c] sm:$0xf] }
 0x2ac   :  { %6553 = vmatmul.bf16.vlgmr.msrb.gmra.mxu0 %v6433_v45  ;;  %6778 = vmatmul.bf16.vlgmr.msrb.gmra.mxu1 %v16498_v6  ;;  %v15592_v6 = vld [vmem:[#allocation10 + $0xf94] sm:$0xf0]  ;;  %v5216_v28 = vmax.f32 %v5213_v21, 0.0  ;;  %v15596_v21 = vld [vmem:[#allocation10 + $0x98] sm:$0xf0] }
 0x2ad   :  { %7021 = vmatpush.bf16.msra.mxu0 %v13422_v17  ;;  %7034 = vmatpush.bf16.msra.mxu1 %v13454_v41  ;;  %v13474_v13 = vor.u32 %v15592_v6, %v13473_v30  ;;  %v13438_v17 = vor.u32 %v15583_v20, %v13437_v57  ;;  %v15574_v41 = vld [vmem:[#allocation10 + $0x214] sm:$0xf0]  ;;  %v15627_v57 = vld [vmem:[#allocation10 + $0xbdc] sm:$0xf0]  ;;  %v13490_v3 = vor.u32 %v15596_v21, %v13489_v56 }
 0x2ae   :  { %7203 = vmatpush.bf16.msra.mxu3 %v13518_v47  ;;  %6791 = vmatmul.bf16.vlgmr.msrb.gmra.mxu2 %v6433_v45  ;;  %v5217_v35 = vpack.c.bf16 %v5216_v28, %v5216_v28  ;;  %v13465_v47 = vld [vmem:[#allocation10 + $0xdb8] sm:$0xf]  ;;  %v13402_v45 = vor.u32 %v15574_v41, %v13401_v38  ;;  %v15610_v41 = vld [vmem:[#allocation10 + $0xb18] sm:$0xf0] }
 0x2af   :  { %7047 = vmatpush.bf16.msra.mxu2 %v13486_v42  ;;  %6804 = vmatmul.bf16.vlgmr.msrb.gmra.mxu3 %v6622_v48  ;;  %v13433_v42 = vld [vmem:[#allocation10 + $0x7b8] sm:$0xf]  ;;  %v13498_v48 = vor.u32 %v15598_v54, %v13497_v53 }
 0x2b0   :  { %5218 = vst [vmem:[#allocation3 + $0x18] sm:$0xf] %v5217_v35  ;;  %v15573_v59 = vld [vmem:[#allocation10 + $0x154] sm:$0xf0] }
 0x2b1   :  { %7022 = vmatpush.bf16.msra.mxu0 %v13418_v37  ;;  %7035 = vmatpush.bf16.msra.mxu1 %v13450_v34  ;;  %v5450_v22 = vpop.f32.mrf.mxu2  ;;  %v5214_v9 = vpop.f32.mrf.mxu0  ;;  %v13434_v34 = vor.u32 %v15582_v25, %v13433_v42  ;;  %v13429_v60 = vld [vmem:[#allocation10 + $0x6f8] sm:$0xf]  ;;  %v13577_v42 = vld [vmem:[#allocation10 + $0x4c0] sm:$0xf] }
 0x2b2   :  { %7204 = vmatpush.bf16.msra.mxu3 %v13514_v61  ;;  %v5451_v50 = vadd.f32 %v5450_v22, %v5438_v43  ;;  %v5463_v51 = vpop.f32.mrf.mxu3  ;;  %v5439_v52 = vpop.f32.mrf.mxu1  ;;  %v15581_v61 = vld [vmem:[#allocation10 + $0x754] sm:$0xf0]  ;;  %v13614_v43 = vor.u32 %v15627_v57, %v13613_v27  ;;  %v15618_v22 = vld [vmem:[#allocation10 + $0x51c] sm:$0xf0] }
 0x2b3   :  { %7048 = vmatpush.bf16.msra.mxu2 %v13482_v58  ;;  %v13466_v58 = vor.u32 %v15590_v49, %v13465_v47  ;;  %v13461_v62 = vld [vmem:[#allocation10 + $0xcf8] sm:$0xf]  ;;  %v13430_v12 = vor.u32 %v15581_v61, %v13429_v60  ;;  %v13609_v47 = vld [vmem:[#allocation10 + $0xac0] sm:$0xf]  ;;  %v13578_v52 = vor.u32 %v15618_v22, %v13577_v42 }
 0x2b4   :  { %v5464_v37 = vadd.f32 %v5463_v51, %v5451_v50  ;;  %v15589_v32 = vld [vmem:[#allocation10 + $0xd54] sm:$0xf0]  ;;  %v15626_v49 = vld [vmem:[#allocation10 + $0xb1c] sm:$0xf0] }
 0x2b5   :  { %7023 = vmatpush.bf16.msra.mxu0 %v13414_v1  ;;  %7036 = vmatpush.bf16.msra.mxu1 %v13446_v40  ;;  %v13398_v1 = vor.u32 %v15573_v59, %v13397_v26  ;;  %v13393_v40 = vld [vmem:[#allocation10 + $0x38] sm:$0xf]  ;;  %v13462_v15 = vor.u32 %v15589_v32, %v13461_v62  ;;  %v13641_v50 = vld [vmem:[#allocation10 + $0x10c0] sm:$0xf] }
 0x2b6   :  { %7205 = vmatpush.bf16.msra.mxu3 %v13510_v18  ;;  %v5467_v0 = vmax.f32 %v5464_v37, 0.0  ;;  %v13425_v8 = vld [vmem:[#allocation10 + $0x638] sm:$0xf]  ;;  %v15634_v51 = vld [vmem:[#allocation10 + $0x111c] sm:$0xf0] }
 0x2b7   :  { %7049 = vmatpush.bf16.msra.mxu2 %v13478_v7  ;;  %v15572_v7 = vld [vmem:[#allocation10 + $0x94] sm:$0xf0]  ;;  %v13541_v37 = vld [vmem:[#allocation10 + $0x9fc] sm:$0xf]  ;;  %v13642_v59 = vor.u32 %v15634_v51, %v13641_v50  ;;  %v15617_v60 = vld [vmem:[#allocation10 + $0x45c] sm:$0xf0] }
 0x2b8   :  { %v5468_v11 = vpack.c.bf16 %v5467_v0, %v5467_v0  ;;  %v15580_v18 = vld [vmem:[#allocation10 + $0x694] sm:$0xf0]  ;;  %v15625_v61 = vld [vmem:[#allocation10 + $0xa5c] sm:$0xf0] }
 0x2b9   :  { %7024 = vmatpush.bf16.msra.mxu0 %v13410_v23  ;;  %7037 = vmatpush.bf16.msra.mxu1 %v13442_v2  ;;  %v13457_v14 = vld [vmem:[#allocation10 + $0xc38] sm:$0xf]  ;;  %v5452_v19 = vpop.f32.mrf.mxu2  ;;  %v15611_v23 = vld [vmem:[#allocation10 + $0xbd8] sm:$0xf0]  ;;  %v13394_v2 = vor.u32 %v15572_v7, %v13393_v40  ;;  %v13426_v20 = vor.u32 %v15580_v18, %v13425_v8  ;;  %v13637_v62 = vld [vmem:[#allocation10 + $0x1000] sm:$0xf] }
 0x2ba   :  { %7206 = vmatpush.bf16.msra.mxu3 %v13506_v5  ;;  %v15588_v30 = vld [vmem:[#allocation10 + $0xc94] sm:$0xf0]  ;;  %5469 = vst [vmem:[#allocation3 + $0x1c] sm:$0xf] %v5468_v11  ;;  %v5465_v4 = vpop.f32.mrf.mxu3  ;;  %v13645_v5 = vld [vmem:[#allocation10 + $0x1180] sm:$0xf]  ;;  %v13550_v31 = vor.u32 %v15611_v23, %v13549_v63 }
 0x2bb   :  { %7050 = vmatpush.bf16.msra.mxu2 %v13474_v13  ;;  %v6812_v6 = vld [vmem:[#allocation2 + $0x34] sm:$0xff]  ;;  %v13458_v28 = vor.u32 %v15588_v30, %v13457_v14  ;;  %v13646_v25 = vor.u32 %v15635_v33, %v13645_v5 }
 0x2bc   :  { %v15619_v13 = vld [vmem:[#allocation10 + $0x5dc] sm:$0xf0]  ;;  %v6868_v35 = vunpack.c.l.b16 %v6812_v6  ;;  %v13537_v40 = vld [vmem:[#allocation10 + $0x93c] sm:$0xf] }
 0x2bd   :  { %7025 = vmatpush.bf16.msra.mxu0 %v13406_v36  ;;  %7038 = vmatpush.bf16.msra.mxu1 %v13438_v17  ;;  %v6869_v36 = vunpack.c.h.b16 %v6812_v6  ;;  %v13582_v38 = vor.u32 %v15619_v13, %v13581_v24  ;;  %v6870_v17 = vunpack.c.h.b16 %v16503_v39  ;;  %v15633_v32 = vld [vmem:[#allocation10 + $0x105c] sm:$0xf0]  ;;  %v15608_v7 = vld [vmem:[#allocation10 + $0x998] sm:$0xf0] }
 0x2be   :  { %7207 = vmatpush.bf16.msra.mxu3 %v13502_v46  ;;  %v7101_v46 = vunpack.c.l.b16 %v16509_v29  ;;  %v6871_v9 = vpack.c.b16 %v6868_v35, %v6868_v35  ;;  %v13569_v8 = vld [vmem:[#allocation10 + $0x340] sm:$0xf]  ;;  %v13638_v11 = vor.u32 %v15633_v32, %v13637_v62  ;;  %v13538_v19 = vor.u32 %v15608_v7, %v13537_v40  ;;  %v13533_v4 = vld [vmem:[#allocation10 + $0x87c] sm:$0xf] }
 0x2bf   :  { %7051 = vmatpush.bf16.msra.mxu2 %v13470_v10  ;;  %v13545_v10 = vld [vmem:[#allocation10 + $0xabc] sm:$0xf]  ;;  %v6872_v53 = vpack.c.b16 %v6869_v36, %v6869_v36  ;;  %v6873_v39 = vpack.c.b16 %v6870_v17, %v6870_v17  ;;  %v15624_v18 = vld [vmem:[#allocation10 + $0x99c] sm:$0xf0] }
 0x2c0   :  { %v13546_v54 = vor.u32 %v15610_v41, %v13545_v10  ;;  %v16513_v26 = vpack.c.b16 %v7101_v46, %v7101_v46  ;;  %v13633_v30 = vld [vmem:[#allocation10 + $0xf40] sm:$0xf]  ;;  %v15607_v23 = vld [vmem:[#allocation10 + $0x8d8] sm:$0xf0] }
 0x2c1   :  { %7026 = vmatpush.bf16.msra.mxu0 %v13402_v45  ;;  %7039 = vmatpush.bf16.msra.mxu1 %v13434_v34  ;;  %v13610_v45 = vor.u32 %v15626_v49, %v13609_v47  ;;  %v15609_v34 = vld [vmem:[#allocation10 + $0xa58] sm:$0xf0]  ;;  %v15632_v6 = vld [vmem:[#allocation10 + $0xf9c] sm:$0xf0]  ;;  %v13534_v5 = vor.u32 %v15607_v23, %v13533_v4 }
 0x2c2   :  { %7208 = vmatpush.bf16.msra.mxu3 %v13498_v48  ;;  %v13605_v48 = vld [vmem:[#allocation10 + $0xa00] sm:$0xf]  ;;  %v13542_v0 = vor.u32 %v15609_v34, %v13541_v37  ;;  %v13529_v35 = vld [vmem:[#allocation10 + $0x7bc] sm:$0xf] }
 0x2c3   :  { %7052 = vmatpush.bf16.msra.mxu2 %v13466_v58  ;;  %v13573_v58 = vld [vmem:[#allocation10 + $0x400] sm:$0xf]  ;;  %v15606_v36 = vld [vmem:[#allocation10 + $0x818] sm:$0xf0] }
 0x2c4   :  { %v13574_v44 = vor.u32 %v15617_v60, %v13573_v58  ;;  %v13565_v24 = vld [vmem:[#allocation10 + $0x280] sm:$0xf]  ;;  %v13530_v51 = vor.u32 %v15606_v36, %v13529_v35  ;;  %v13521_v32 = vld [vmem:[#allocation10 + $0x63c] sm:$0xf] }
 0x2c5   :  { %7027 = vmatpush.bf16.msra.mxu0 %v13398_v1  ;;  %7040 = vmatpush.bf16.msra.mxu1 %v13430_v12  ;;  %v13606_v1 = vor.u32 %v15625_v61, %v13605_v48  ;;  %v15616_v12 = vld [vmem:[#allocation10 + $0x39c] sm:$0xf0] }
 0x2c6   :  { %7209 = vmatpush.bf16.msra.mxu3 %v13494_v16  ;;  %v13570_v21 = vor.u32 %v15616_v12, %v13569_v8  ;;  %v15615_v13 = vld [vmem:[#allocation10 + $0x2dc] sm:$0xf0] }
 0x2c7   :  { %7053 = vmatpush.bf16.msra.mxu2 %v13462_v15  ;;  %v13601_v15 = vld [vmem:[#allocation10 + $0x940] sm:$0xf] }
 0x2c8   :  { %v13602_v63 = vor.u32 %v15624_v18, %v13601_v15  ;;  %v13597_v27 = vld [vmem:[#allocation10 + $0x880] sm:$0xf] }
 0x2c9   :  { %7028 = vmatpush.bf16.msra.mxu0 %v13394_v2  ;;  %7041 = vmatpush.bf16.msra.mxu1 %v13426_v20  ;;  %v5688_v14 = vpop.f32.mrf.mxu0  ;;  %v5701_v16 = vpop.f32.mrf.mxu1  ;;  %v13634_v2 = vor.u32 %v15632_v6, %v13633_v30  ;;  %v15623_v57 = vld [vmem:[#allocation10 + $0x8dc] sm:$0xf0]  ;;  %v13677_v30 = vld [vmem:[#allocation10 + $0x584] sm:$0xf] }
 0x2ca   :  { %7210 = vmatpush.bf16.msra.mxu3 %v13490_v3  ;;  %v5689_v56 = vadd.f32 %v16003_v55, %v5688_v14  ;;  %v13629_v20 = vld [vmem:[#allocation10 + $0xe80] sm:$0xf]  ;;  %v13566_v3 = vor.u32 %v15615_v13, %v13565_v24  ;;  %v15643_v6 = vld [vmem:[#allocation10 + $0x5e0] sm:$0xf0]  ;;  %v13773_v24 = vld [vmem:[#allocation10 + $0x588] sm:$0xf] }
 0x2cb   :  { %7054 = vmatpush.bf16.msra.mxu2 %v13458_v28  ;;  %v15631_v28 = vld [vmem:[#allocation10 + $0xedc] sm:$0xf0]  ;;  %v16518_v13 = vld [vmem:[#allocation2 + $0x44] sm:$0xff]  }
 0x2cc   :  { %7029 = vmatmul.bf16.vlgmr.msra.gmra.mxu0 %v6871_v9  ;;  %7042 = vmatmul.bf16.vlgmr.msra.gmra.mxu1 %v6872_v53  ;;  %v5702_v33 = vadd.f32 %v5701_v16, %v5689_v56  ;;  %v15614_v10 = vld [vmem:[#allocation10 + $0x21c] sm:$0xf0]  ;;  %v13525_v9 = vld [vmem:[#allocation10 + $0x6fc] sm:$0xf]  ;;  %v13709_v16 = vld [vmem:[#allocation10 + $0xb84] sm:$0xf]  ;;  %v7290_v36 = vunpack.c.l.b16 %v16518_v13 }
 0x2cd   :  { %7216 = vmatpush.bf16.msrb.mxu0 %v13550_v31  ;;  %7441 = vmatpush.bf16.msrb.mxu1 %v13582_v38  ;;  %v13598_v31 = vor.u32 %v15623_v57, %v13597_v27  ;;  %v13561_v38 = vld [vmem:[#allocation10 + $0x1c0] sm:$0xf]  ;;  %v15651_v56 = vld [vmem:[#allocation10 + $0xbe0] sm:$0xf0]  ;;  %v13678_v57 = vor.u32 %v15643_v6, %v13677_v30 }
 0x2ce   :  { %7467 = vmatpush.bf16.msrb.mxu3 %v13646_v25  ;;  %7055 = vmatmul.bf16.vlgmr.msra.gmra.mxu2 %v6873_v39  ;;  %v13593_v41 = vld [vmem:[#allocation10 + $0x7c0] sm:$0xf]  ;;  %v15639_v30 = vld [vmem:[#allocation10 + $0x2e0] sm:$0xf0] }
 0x2cf   :  { %7454 = vmatpush.bf16.msrb.mxu2 %v13614_v43  ;;  %7211 = vmatmul.bf16.vlgmr.msra.gmra.mxu3 %v16513_v26  ;;  %v13630_v43 = vor.u32 %v15631_v28, %v13629_v20  ;;  %v15622_v42 = vld [vmem:[#allocation10 + $0x81c] sm:$0xf0]  ;;  %v7102_v20 = vunpack.c.h.b16 %v16509_v29  ;;  %v13710_v28 = vor.u32 %v15651_v56, %v13709_v16  ;;  %v15647_v6 = vld [vmem:[#allocation10 + $0x8e0] sm:$0xf0] }
 0x2d0   :  { %v13625_v47 = vld [vmem:[#allocation10 + $0xdc0] sm:$0xf]  ;;  %v13594_v39 = vor.u32 %v15622_v42, %v13593_v41  ;;  %v15666_v41 = vld [vmem:[#allocation10 + $0x524] sm:$0xf0]  ;;  %v13725_v56 = vld [vmem:[#allocation10 + $0xe84] sm:$0xf] }
 0x2d1   :  { %7217 = vmatpush.bf16.msrb.mxu0 %v13546_v54  ;;  %7442 = vmatpush.bf16.msrb.mxu1 %v13578_v52  ;;  %v5714_v17 = vpop.f32.mrf.mxu2  ;;  %v5690_v22 = vpop.f32.mrf.mxu0  ;;  %v15630_v49 = vld [vmem:[#allocation10 + $0xe1c] sm:$0xf0]  ;;  %v13562_v54 = vor.u32 %v15614_v10, %v13561_v38  ;;  %v15605_v52 = vld [vmem:[#allocation10 + $0x758] sm:$0xf0]  ;;  %v15650_v38 = vld [vmem:[#allocation10 + $0xb20] sm:$0xf0]  ;;  %v7104_v29 = vpack.c.b16 %v7102_v20, %v7102_v20 }
 0x2d2   :  { %7468 = vmatpush.bf16.msrb.mxu3 %v13642_v59  ;;  %v5715_v25 = vadd.f32 %v5714_v17, %v5702_v33  ;;  %v16516_v46 = vpop.f32.mrf.mxu3  ;;  %v5703_v50 = vpop.f32.mrf.mxu1  ;;  %v13626_v37 = vor.u32 %v15630_v49, %v13625_v47  ;;  %v15613_v34 = vld [vmem:[#allocation10 + $0x15c] sm:$0xf0]  ;;  %v13526_v62 = vor.u32 %v15605_v52, %v13525_v9  ;;  %v13673_v33 = vld [vmem:[#allocation10 + $0x4c4] sm:$0xf]  ;;  %v13769_v10 = vld [vmem:[#allocation10 + $0x4c8] sm:$0xf]  ;;  %v7293_v9 = vpack.c.b16 %v7290_v36, %v7290_v36 }
 0x2d3   :  { %7455 = vmatpush.bf16.msrb.mxu2 %v13610_v45  ;;  %v13557_v45 = vld [vmem:[#allocation10 + $0x100] sm:$0xf]  ;;  %v15658_v17 = vld [vmem:[#allocation10 + $0x1120] sm:$0xf0]  ;;  %v16004_v42 = vld [vmem:[#allocation12 + $0x9] ss:$0 sm:$0xff] }
 0x2d4   :  { %v5718_v53 = vmax.f32 %v5715_v25, 0.0  ;;  %v13589_v58 = vld [vmem:[#allocation10 + $0x700] sm:$0xf]  ;;  %v13669_v49 = vld [vmem:[#allocation10 + $0x404] sm:$0xf] }
 0x2d5   :  { %7218 = vmatpush.bf16.msrb.mxu0 %v13542_v0  ;;  %7443 = vmatpush.bf16.msrb.mxu1 %v13574_v44  ;;  %v15621_v59 = vld [vmem:[#allocation10 + $0x75c] sm:$0xf0]  ;;  %v15604_v0 = vld [vmem:[#allocation10 + $0x698] sm:$0xf0]  ;;  %v13558_v44 = vor.u32 %v15613_v34, %v13557_v45  ;;  %v15641_v50 = vld [vmem:[#allocation10 + $0x460] sm:$0xf0] }
 0x2d6   :  { %7469 = vmatpush.bf16.msrb.mxu3 %v13638_v11  ;;  %v5719_v60 = vpack.c.bf16 %v5718_v53, %v5718_v53  ;;  %v13621_v48 = vld [vmem:[#allocation10 + $0xd00] sm:$0xf]  ;;  %v13770_v53 = vor.u32 %v15666_v41, %v13769_v10  ;;  %v15657_v52 = vld [vmem:[#allocation10 + $0x1060] sm:$0xf0]  ;;  %v13765_v45 = vld [vmem:[#allocation10 + $0x408] sm:$0xf]  ;;  %v13670_v34 = vor.u32 %v15641_v50, %v13669_v49 }
 0x2d7   :  { %7456 = vmatpush.bf16.msrb.mxu2 %v13606_v1  ;;  %v15629_v61 = vld [vmem:[#allocation10 + $0xd5c] sm:$0xf0]  ;;  %v13590_v1 = vor.u32 %v15621_v59, %v13589_v58  ;;  %v15654_v36 = vld [vmem:[#allocation10 + $0xe20] sm:$0xf0]  ;;  %v13753_v10 = vld [vmem:[#allocation10 + $0x1c8] sm:$0xf] }
 0x2d8   :  { %v13553_v55 = vld [vmem:[#allocation10 + $0x40] sm:$0xf]  ;;  %5720 = vst [vmem:[#allocation3 + $0x20] sm:$0xf] %v5719_v60  ;;  %v13622_v8 = vor.u32 %v15629_v61, %v13621_v48  ;;  %v13665_v60 = vld [vmem:[#allocation10 + $0x344] sm:$0xf] }
 0x2d9   :  { %7219 = vmatpush.bf16.msrb.mxu0 %v13538_v19  ;;  %7444 = vmatpush.bf16.msrb.mxu1 %v13570_v21  ;;  %v15612_v40 = vld [vmem:[#allocation10 + $0x9c] sm:$0xf0]  ;;  %v5716_v11 = vpop.f32.mrf.mxu2  ;;  %v13522_v19 = vor.u32 %v15604_v0, %v13521_v32  ;;  %v13741_v21 = vld [vmem:[#allocation10 + $0x1184] sm:$0xf]  ;;  %v15662_v41 = vld [vmem:[#allocation10 + $0x224] sm:$0xf0] }
 0x2da   :  { %7470 = vmatpush.bf16.msrb.mxu3 %v13634_v2  ;;  %v13585_v7 = vld [vmem:[#allocation10 + $0x640] sm:$0xf]  ;;  %v5872_v14 = vpop.f32.mrf.mxu3  ;;  %v13554_v4 = vor.u32 %v15612_v40, %v13553_v55  ;;  %v15667_v2 = vld [vmem:[#allocation10 + $0x5e4] sm:$0xf0]  ;;  %v15640_v48 = vld [vmem:[#allocation10 + $0x3a0] sm:$0xf0] }
 0x2db   :  { %7457 = vmatpush.bf16.msrb.mxu2 %v13602_v63  ;;  %v15620_v12 = vld [vmem:[#allocation10 + $0x69c] sm:$0xf0]  ;;  %v15659_v63 = vld [vmem:[#allocation10 + $0x11e0] sm:$0xf0]  ;;  %v13774_v35 = vor.u32 %v15667_v2, %v13773_v24  ;;  %v15664_v40 = vld [vmem:[#allocation10 + $0x3a4] sm:$0xf0] }
 0x2dc   :  { %v13617_v15 = vld [vmem:[#allocation10 + $0xc40] sm:$0xf]  ;;  %v13586_v23 = vor.u32 %v15620_v12, %v13585_v7  ;;  %v13697_v61 = vld [vmem:[#allocation10 + $0x944] sm:$0xf]  ;;  %v13666_v12 = vor.u32 %v15640_v48, %v13665_v60 }
 0x2dd   :  { %7220 = vmatpush.bf16.msrb.mxu0 %v13534_v5  ;;  %7445 = vmatpush.bf16.msrb.mxu1 %v13566_v3  ;;  %v15628_v18 = vld [vmem:[#allocation10 + $0xc9c] sm:$0xf0]  ;;  %v13742_v5 = vor.u32 %v15659_v63, %v13741_v21  ;;  %v15642_v3 = vld [vmem:[#allocation10 + $0x520] sm:$0xf0]  ;;  %v13757_v63 = vld [vmem:[#allocation10 + $0x288] sm:$0xf] }
 0x2de   :  { %7471 = vmatpush.bf16.msrb.mxu3 %v13630_v43  ;;  %v13618_v27 = vor.u32 %v15628_v18, %v13617_v15  ;;  %v13737_v43 = vld [vmem:[#allocation10 + $0x10c4] sm:$0xf]  ;;  %v13674_v25 = vor.u32 %v15642_v3, %v13673_v33 }
 0x2df   :  { %7458 = vmatpush.bf16.msrb.mxu2 %v13598_v31  ;;  %v13705_v31 = vld [vmem:[#allocation10 + $0xac4] sm:$0xf]  ;;  %v13738_v47 = vor.u32 %v15658_v17, %v13737_v43 }
 0x2e0   :  { %v13706_v22 = vor.u32 %v15650_v38, %v13705_v31  ;;  %v15648_v0 = vld [vmem:[#allocation10 + $0x9a0] sm:$0xf0] }
 0x2e1   :  { %7221 = vmatpush.bf16.msrb.mxu0 %v13530_v51  ;;  %7446 = vmatpush.bf16.msrb.mxu1 %v13562_v54  ;;  %v13701_v51 = vld [vmem:[#allocation10 + $0xa04] sm:$0xf]  ;;  %v13698_v18 = vor.u32 %v15648_v0, %v13697_v61 }
 0x2e2   :  { %7472 = vmatpush.bf16.msrb.mxu3 %v13626_v37  ;;  %v15649_v54 = vld [vmem:[#allocation10 + $0xa60] sm:$0xf0]  ;;  %v15665_v37 = vld [vmem:[#allocation10 + $0x464] sm:$0xf0] }
 0x2e3   :  { %7459 = vmatpush.bf16.msrb.mxu2 %v13594_v39  ;;  %v13733_v39 = vld [vmem:[#allocation10 + $0x1004] sm:$0xf]  ;;  %v13702_v58 = vor.u32 %v15649_v54, %v13701_v51  ;;  %v13766_v32 = vor.u32 %v15665_v37, %v13765_v45  ;;  %v13749_v45 = vld [vmem:[#allocation10 + $0x108] sm:$0xf] }
 0x2e4   :  { %v13734_v59 = vor.u32 %v15657_v52, %v13733_v39  ;;  %v13729_v55 = vld [vmem:[#allocation10 + $0xf44] sm:$0xf]  ;;  %v15661_v37 = vld [vmem:[#allocation10 + $0x164] sm:$0xf0] }
 0x2e5   :  { %7222 = vmatpush.bf16.msrb.mxu0 %v13526_v62  ;;  %7447 = vmatpush.bf16.msrb.mxu1 %v13558_v44  ;;  %v5871_v62 = vadd.f32 %v16004_v42, %v16516_v46  ;;  %v13661_v15 = vld [vmem:[#allocation10 + $0x284] sm:$0xf] }
 0x2e6   :  { %7473 = vmatpush.bf16.msrb.mxu3 %v13622_v8  ;;  %v16005_v8 = vld [vmem:[#allocation12 + $0xa] ss:$0 sm:$0xff]  ;;  %v13693_v46 = vld [vmem:[#allocation10 + $0x884] sm:$0xf]  ;;  %v13662_v24 = vor.u32 %v15639_v30, %v13661_v15  ;;  %v13837_v15 = vld [vmem:[#allocation10 + $0x58c] sm:$0xf] }
 0x2e7   :  { %7460 = vmatpush.bf16.msrb.mxu2 %v13590_v1  ;;  %v13761_v1 = vld [vmem:[#allocation10 + $0x348] sm:$0xf]  ;;  %v15655_v21 = vld [vmem:[#allocation10 + $0xee0] sm:$0xf0]  ;;  %v13869_v30 = vld [vmem:[#allocation10 + $0xb8c] sm:$0xf] }
 0x2e8   :  { %v13657_v2 = vld [vmem:[#allocation10 + $0x1c4] sm:$0xf]  ;;  %v13726_v20 = vor.u32 %v15655_v21, %v13725_v56  ;;  %v15699_v56 = vld [vmem:[#allocation10 + $0x11e8] sm:$0xf0] }
 0x2e9   :  { %7223 = vmatpush.bf16.msrb.mxu0 %v13522_v19  ;;  %7448 = vmatpush.bf16.msrb.mxu1 %v13554_v4  ;;  %v5883_v44 = vpop.f32.mrf.mxu0  ;;  %v6108_v11 = vpop.f32.mrf.mxu1  ;;  %v13762_v19 = vor.u32 %v15664_v40, %v13761_v1  ;;  %v15663_v4 = vld [vmem:[#allocation10 + $0x2e4] sm:$0xf0]  ;;  %v15646_v33 = vld [vmem:[#allocation10 + $0x820] sm:$0xf0]  ;;  %v16524_v21 = vld [vmem:[#allocation2 + $0x48] sm:$0xff] }
 0x2ea   :  { %7474 = vmatpush.bf16.msrb.mxu3 %v13618_v27  ;;  %v5884_v7 = vadd.f32 %v5883_v44, %v5871_v62  ;;  %v6109_v27 = vadd.f32 %v16005_v8, %v6108_v11  ;;  %v13758_v3 = vor.u32 %v15663_v4, %v13757_v63  ;;  %v13653_v49 = vld [vmem:[#allocation10 + $0x104] sm:$0xf]  ;;  %v13750_v44 = vor.u32 %v15661_v37, %v13749_v45  ;;  %v13745_v40 = vld [vmem:[#allocation10 + $0x48] sm:$0xf] }
 0x2eb   :  { %7461 = vmatpush.bf16.msrb.mxu2 %v13586_v23  ;;  %v15637_v50 = vld [vmem:[#allocation10 + $0x160] sm:$0xf0]  ;;  %v13805_v8 = vld [vmem:[#allocation10 + $0xb88] sm:$0xf] }
 0x2ec   :  { %7224 = vmatmul.bf16.vlgmr.msrb.gmra.mxu0 %v7104_v29  ;;  %7449 = vmatmul.bf16.vlgmr.msrb.gmra.mxu1 %v16513_v26  ;;  %v15656_v26 = vld [vmem:[#allocation10 + $0xfa0] sm:$0xf0]  ;;  %v5887_v16 = vmax.f32 %v5884_v7, 0.0  ;;  %v15660_v7 = vld [vmem:[#allocation10 + $0xa4] sm:$0xf0] }
 0x2ed   :  { %7692 = vmatpush.bf16.msra.mxu0 %v13678_v57  ;;  %7705 = vmatpush.bf16.msra.mxu1 %v13710_v28  ;;  %v13730_v14 = vor.u32 %v15656_v26, %v13729_v55  ;;  %v13694_v57 = vor.u32 %v15647_v6, %v13693_v46  ;;  %v15638_v28 = vld [vmem:[#allocation10 + $0x220] sm:$0xf0]  ;;  %v15691_v46 = vld [vmem:[#allocation10 + $0xbe8] sm:$0xf0]  ;;  %v13746_v63 = vor.u32 %v15660_v7, %v13745_v40  ;;  %v16006_v45 = vld [vmem:[#allocation12 + $0xb] ss:$0 sm:$0xff] }
 0x2ee   :  { %7874 = vmatpush.bf16.msra.mxu3 %v13774_v35  ;;  %7462 = vmatmul.bf16.vlgmr.msrb.gmra.mxu2 %v7104_v29  ;;  %v5888_v23 = vpack.c.bf16 %v5887_v16, %v5887_v16  ;;  %v13721_v35 = vld [vmem:[#allocation10 + $0xdc4] sm:$0xf]  ;;  %v13658_v29 = vor.u32 %v15638_v28, %v13657_v2  ;;  %v15674_v28 = vld [vmem:[#allocation10 + $0xb24] sm:$0xf0] }
 0x2ef   :  { %7718 = vmatpush.bf16.msra.mxu2 %v13742_v5  ;;  %7475 = vmatmul.bf16.vlgmr.msrb.gmra.mxu3 %v7293_v9  ;;  %v13689_v5 = vld [vmem:[#allocation10 + $0x7c4] sm:$0xf]  ;;  %v13754_v9 = vor.u32 %v15662_v41, %v13753_v10 }
 0x2f0   :  { %5889 = vst [vmem:[#allocation3 + $0x24] sm:$0xf] %v5888_v23  ;;  %v13685_v51 = vld [vmem:[#allocation10 + $0x704] sm:$0xf] }
 0x2f1   :  { %7693 = vmatpush.bf16.msra.mxu0 %v13674_v25  ;;  %7706 = vmatpush.bf16.msra.mxu1 %v13706_v22  ;;  %v6121_v31 = vpop.f32.mrf.mxu2  ;;  %v5885_v17 = vpop.f32.mrf.mxu0  ;;  %v13690_v22 = vor.u32 %v15646_v33, %v13689_v5  ;;  %v13717_v54 = vld [vmem:[#allocation10 + $0xd04] sm:$0xf]  ;;  %v13833_v5 = vld [vmem:[#allocation10 + $0x4cc] sm:$0xf] }
 0x2f2   :  { %7875 = vmatpush.bf16.msra.mxu3 %v13770_v53  ;;  %v6122_v38 = vadd.f32 %v6121_v31, %v6109_v27  ;;  %v6134_v43 = vpop.f32.mrf.mxu3  ;;  %v6110_v42 = vpop.f32.mrf.mxu1  ;;  %v15645_v53 = vld [vmem:[#allocation10 + $0x760] sm:$0xf0]  ;;  %v13870_v27 = vor.u32 %v15691_v46, %v13869_v30  ;;  %v15682_v31 = vld [vmem:[#allocation10 + $0x528] sm:$0xf0] }
 0x2f3   :  { %7719 = vmatpush.bf16.msra.mxu2 %v13738_v47  ;;  %v13722_v47 = vor.u32 %v15654_v36, %v13721_v35  ;;  %v15653_v39 = vld [vmem:[#allocation10 + $0xd60] sm:$0xf0]  ;;  %v13686_v61 = vor.u32 %v15645_v53, %v13685_v51  ;;  %v13865_v35 = vld [vmem:[#allocation10 + $0xacc] sm:$0xf]  ;;  %v13834_v42 = vor.u32 %v15682_v31, %v13833_v5 }
 0x2f4   :  { %v6135_v25 = vadd.f32 %v6134_v43, %v6122_v38  ;;  %v13681_v60 = vld [vmem:[#allocation10 + $0x644] sm:$0xf]  ;;  %v13718_v62 = vor.u32 %v15653_v39, %v13717_v54  ;;  %v15690_v36 = vld [vmem:[#allocation10 + $0xb28] sm:$0xf0] }
 0x2f5   :  { %7694 = vmatpush.bf16.msra.mxu0 %v13670_v34  ;;  %7707 = vmatpush.bf16.msra.mxu1 %v13702_v58  ;;  %v13654_v34 = vor.u32 %v15637_v50, %v13653_v49  ;;  %v13649_v58 = vld [vmem:[#allocation10 + $0x44] sm:$0xf]  ;;  %v13897_v38 = vld [vmem:[#allocation10 + $0x10cc] sm:$0xf] }
 0x2f6   :  { %7876 = vmatpush.bf16.msra.mxu3 %v13766_v32  ;;  %v6138_v52 = vmax.f32 %v6135_v25, 0.0  ;;  %v15644_v32 = vld [vmem:[#allocation10 + $0x6a0] sm:$0xf0]  ;;  %v15698_v43 = vld [vmem:[#allocation10 + $0x1128] sm:$0xf0] }
 0x2f7   :  { %7720 = vmatpush.bf16.msra.mxu2 %v13734_v59  ;;  %v15636_v59 = vld [vmem:[#allocation10 + $0xa0] sm:$0xf0]  ;;  %v13682_v6 = vor.u32 %v15644_v32, %v13681_v60  ;;  %v13797_v25 = vld [vmem:[#allocation10 + $0xa08] sm:$0xf]  ;;  %v13898_v50 = vor.u32 %v15698_v43, %v13897_v38  ;;  %v15681_v51 = vld [vmem:[#allocation10 + $0x468] sm:$0xf0] }
 0x2f8   :  { %v6139_v48 = vpack.c.bf16 %v6138_v52, %v6138_v52  ;;  %v13713_v0 = vld [vmem:[#allocation10 + $0xc44] sm:$0xf]  ;;  %v15689_v53 = vld [vmem:[#allocation10 + $0xa68] sm:$0xf0] }
 0x2f9   :  { %7695 = vmatpush.bf16.msra.mxu0 %v13666_v12  ;;  %7708 = vmatpush.bf16.msra.mxu1 %v13698_v18  ;;  %v15652_v55 = vld [vmem:[#allocation10 + $0xca0] sm:$0xf0]  ;;  %v6123_v1 = vpop.f32.mrf.mxu2  ;;  %v15675_v12 = vld [vmem:[#allocation10 + $0xbe4] sm:$0xf0]  ;;  %v13650_v18 = vor.u32 %v15636_v59, %v13649_v58  ;;  %v13893_v54 = vld [vmem:[#allocation10 + $0x100c] sm:$0xf] }
 0x2fa   :  { %7877 = vmatpush.bf16.msra.mxu3 %v13762_v19  ;;  %v7483_v26 = vld [vmem:[#allocation2 + $0x40] sm:$0xff]  ;;  %6140 = vst [vmem:[#allocation3 + $0x28] sm:$0xf] %v6139_v48  ;;  %v6136_v11 = vpop.f32.mrf.mxu3  ;;  %v13714_v16 = vor.u32 %v15652_v55, %v13713_v0  ;;  %v13806_v4 = vor.u32 %v15675_v12, %v13805_v8 }
 0x2fb   :  { %7721 = vmatpush.bf16.msra.mxu2 %v13730_v14  ;;  %v15683_v14 = vld [vmem:[#allocation10 + $0x5e8] sm:$0xf0]  ;;  %v7539_v23 = vunpack.c.l.b16 %v7483_v26  ;;  %v13793_v58 = vld [vmem:[#allocation10 + $0x948] sm:$0xf] }
 0x2fc   :  { %v13901_v19 = vld [vmem:[#allocation10 + $0x118c] sm:$0xf]  ;;  %v13838_v2 = vor.u32 %v15683_v14, %v13837_v15  ;;  %v15672_v59 = vld [vmem:[#allocation10 + $0x9a4] sm:$0xf0] }
 0x2fd   :  { %7696 = vmatpush.bf16.msra.mxu0 %v13662_v24  ;;  %7709 = vmatpush.bf16.msra.mxu1 %v13694_v57  ;;  %v7540_v24 = vunpack.c.h.b16 %v7483_v26  ;;  %v7541_v57 = vunpack.c.h.b16 %v16518_v13  ;;  %v13902_v33 = vor.u32 %v15699_v56, %v13901_v19  ;;  %v7542_v17 = vpack.c.b16 %v7539_v23, %v7539_v23  ;;  %v15697_v39 = vld [vmem:[#allocation10 + $0x1068] sm:$0xf0]  ;;  %v13789_v11 = vld [vmem:[#allocation10 + $0x888] sm:$0xf] }
 0x2fe   :  { %7878 = vmatpush.bf16.msra.mxu3 %v13758_v3  ;;  %v7772_v3 = vunpack.c.l.b16 %v16524_v21  ;;  %v13825_v60 = vld [vmem:[#allocation10 + $0x34c] sm:$0xf]  ;;  %v13894_v48 = vor.u32 %v15697_v39, %v13893_v54  ;;  %v13794_v1 = vor.u32 %v15672_v59, %v13793_v58  ;;  %v15671_v12 = vld [vmem:[#allocation10 + $0x8e4] sm:$0xf0] }
 0x2ff   :  { %7722 = vmatpush.bf16.msra.mxu2 %v13726_v20  ;;  %v13801_v20 = vld [vmem:[#allocation10 + $0xac8] sm:$0xf]  ;;  %v7543_v10 = vpack.c.b16 %v7540_v24, %v7540_v24  ;;  %v7544_v13 = vpack.c.b16 %v7541_v57, %v7541_v57  ;;  %v15688_v32 = vld [vmem:[#allocation10 + $0x9a8] sm:$0xf0]  ;;  %v13790_v19 = vor.u32 %v15671_v12, %v13789_v11 }
 0x300   :  { %v13802_v41 = vor.u32 %v15674_v28, %v13801_v20  ;;  %v16528_v49 = vpack.c.b16 %v7772_v3, %v7772_v3  ;;  %v13889_v55 = vld [vmem:[#allocation10 + $0xf4c] sm:$0xf]  ;;  %v13785_v23 = vld [vmem:[#allocation10 + $0x7c8] sm:$0xf] }
 0x301   :  { %7697 = vmatpush.bf16.msra.mxu0 %v13658_v29  ;;  %7710 = vmatpush.bf16.msra.mxu1 %v13690_v22  ;;  %v13866_v29 = vor.u32 %v15690_v36, %v13865_v35  ;;  %v15673_v22 = vld [vmem:[#allocation10 + $0xa64] sm:$0xf0]  ;;  %v15696_v26 = vld [vmem:[#allocation10 + $0xfa8] sm:$0xf0] }
 0x302   :  { %7879 = vmatpush.bf16.msra.mxu3 %v13754_v9  ;;  %v13861_v9 = vld [vmem:[#allocation10 + $0xa0c] sm:$0xf]  ;;  %v13798_v52 = vor.u32 %v15673_v22, %v13797_v25  ;;  %v15670_v24 = vld [vmem:[#allocation10 + $0x824] sm:$0xf0] }
 0x303   :  { %7723 = vmatpush.bf16.msra.mxu2 %v13722_v47  ;;  %v13829_v47 = vld [vmem:[#allocation10 + $0x40c] sm:$0xf]  ;;  %v13786_v43 = vor.u32 %v15670_v24, %v13785_v23  ;;  %v13777_v39 = vld [vmem:[#allocation10 + $0x648] sm:$0xf] }
 0x304   :  { %v13830_v37 = vor.u32 %v15681_v51, %v13829_v47  ;;  %v13821_v15 = vld [vmem:[#allocation10 + $0x28c] sm:$0xf] }
 0x305   :  { %7698 = vmatpush.bf16.msra.mxu0 %v13654_v34  ;;  %7711 = vmatpush.bf16.msra.mxu1 %v13686_v61  ;;  %v13862_v34 = vor.u32 %v15689_v53, %v13861_v9  ;;  %v15680_v61 = vld [vmem:[#allocation10 + $0x3a8] sm:$0xf0] }
 0x306   :  { %7880 = vmatpush.bf16.msra.mxu3 %v13750_v44  ;;  %v13826_v7 = vor.u32 %v15680_v61, %v13825_v60  ;;  %v15679_v14 = vld [vmem:[#allocation10 + $0x2e8] sm:$0xf0] }
 0x307   :  { %7724 = vmatpush.bf16.msra.mxu2 %v13718_v62  ;;  %v13857_v62 = vld [vmem:[#allocation10 + $0x94c] sm:$0xf] }
 0x308   :  { %v13858_v8 = vor.u32 %v15688_v32, %v13857_v62  ;;  %v13853_v30 = vld [vmem:[#allocation10 + $0x88c] sm:$0xf] }
 0x309   :  { %7699 = vmatpush.bf16.msra.mxu0 %v13650_v18  ;;  %7712 = vmatpush.bf16.msra.mxu1 %v13682_v6  ;;  %v6359_v0 = vpop.f32.mrf.mxu0  ;;  %v6372_v44 = vpop.f32.mrf.mxu1  ;;  %v13890_v18 = vor.u32 %v15696_v26, %v13889_v55  ;;  %v15687_v46 = vld [vmem:[#allocation10 + $0x8e8] sm:$0xf0]  ;;  %v13933_v55 = vld [vmem:[#allocation10 + $0x590] sm:$0xf] }
 0x30a   :  { %7881 = vmatpush.bf16.msra.mxu3 %v13746_v63  ;;  %v6360_v40 = vadd.f32 %v16006_v45, %v6359_v0  ;;  %v13885_v6 = vld [vmem:[#allocation10 + $0xe8c] sm:$0xf]  ;;  %v13822_v63 = vor.u32 %v15679_v14, %v13821_v15  ;;  %v15707_v26 = vld [vmem:[#allocation10 + $0x5ec] sm:$0xf0]  ;;  %v14029_v15 = vld [vmem:[#allocation10 + $0x594] sm:$0xf] }
 0x30b   :  { %7725 = vmatpush.bf16.msra.mxu2 %v13714_v16  ;;  %v15695_v16 = vld [vmem:[#allocation10 + $0xee8] sm:$0xf0]  ;;  %v16533_v14 = vld [vmem:[#allocation2 + $0x50] sm:$0xff]  }
 0x30c   :  { %7700 = vmatmul.bf16.vlgmr.msra.gmra.mxu0 %v7542_v17  ;;  %7713 = vmatmul.bf16.vlgmr.msra.gmra.mxu1 %v7543_v10  ;;  %v6373_v56 = vadd.f32 %v6372_v44, %v6360_v40  ;;  %v15678_v20 = vld [vmem:[#allocation10 + $0x228] sm:$0xf0]  ;;  %v13781_v17 = vld [vmem:[#allocation10 + $0x708] sm:$0xf]  ;;  %v13965_v44 = vld [vmem:[#allocation10 + $0xb90] sm:$0xf]  ;;  %v7961_v24 = vunpack.c.l.b16 %v16533_v14 }
 0x30d   :  { %7887 = vmatpush.bf16.msrb.mxu0 %v13806_v4  ;;  %8112 = vmatpush.bf16.msrb.mxu1 %v13838_v2  ;;  %v13854_v4 = vor.u32 %v15687_v46, %v13853_v30  ;;  %v13817_v2 = vld [vmem:[#allocation10 + $0x1cc] sm:$0xf]  ;;  %v15715_v40 = vld [vmem:[#allocation10 + $0xbec] sm:$0xf0]  ;;  %v13934_v46 = vor.u32 %v15707_v26, %v13933_v55 }
 0x30e   :  { %8138 = vmatpush.bf16.msrb.mxu3 %v13902_v33  ;;  %7726 = vmatmul.bf16.vlgmr.msra.gmra.mxu2 %v7544_v13  ;;  %v13849_v28 = vld [vmem:[#allocation10 + $0x7cc] sm:$0xf]  ;;  %v15703_v55 = vld [vmem:[#allocation10 + $0x2ec] sm:$0xf0] }
 0x30f   :  { %8125 = vmatpush.bf16.msrb.mxu2 %v13870_v27  ;;  %7882 = vmatmul.bf16.vlgmr.msra.gmra.mxu3 %v16528_v49  ;;  %v13886_v27 = vor.u32 %v15695_v16, %v13885_v6  ;;  %v15686_v5 = vld [vmem:[#allocation10 + $0x828] sm:$0xf0]  ;;  %v7773_v6 = vunpack.c.h.b16 %v16524_v21  ;;  %v13966_v16 = vor.u32 %v15715_v40, %v13965_v44  ;;  %v15711_v26 = vld [vmem:[#allocation10 + $0x8ec] sm:$0xf0] }
 0x310   :  { %v13881_v35 = vld [vmem:[#allocation10 + $0xdcc] sm:$0xf]  ;;  %v13850_v13 = vor.u32 %v15686_v5, %v13849_v28  ;;  %v15730_v28 = vld [vmem:[#allocation10 + $0x530] sm:$0xf0]  ;;  %v13981_v40 = vld [vmem:[#allocation10 + $0xe90] sm:$0xf] }
 0x311   :  { %7888 = vmatpush.bf16.msrb.mxu0 %v13802_v41  ;;  %8113 = vmatpush.bf16.msrb.mxu1 %v13834_v42  ;;  %v6385_v57 = vpop.f32.mrf.mxu2  ;;  %v6361_v31 = vpop.f32.mrf.mxu0  ;;  %v15694_v36 = vld [vmem:[#allocation10 + $0xe28] sm:$0xf0]  ;;  %v13818_v41 = vor.u32 %v15678_v20, %v13817_v2  ;;  %v15669_v42 = vld [vmem:[#allocation10 + $0x764] sm:$0xf0]  ;;  %v15714_v2 = vld [vmem:[#allocation10 + $0xb2c] sm:$0xf0]  ;;  %v7775_v21 = vpack.c.b16 %v7773_v6, %v7773_v6 }
 0x312   :  { %8139 = vmatpush.bf16.msrb.mxu3 %v13898_v50  ;;  %v6386_v33 = vadd.f32 %v6385_v57, %v6373_v56  ;;  %v16531_v3 = vpop.f32.mrf.mxu3  ;;  %v6374_v38 = vpop.f32.mrf.mxu1  ;;  %v13882_v25 = vor.u32 %v15694_v36, %v13881_v35  ;;  %v15677_v22 = vld [vmem:[#allocation10 + $0x168] sm:$0xf0]  ;;  %v13782_v54 = vor.u32 %v15669_v42, %v13781_v17  ;;  %v13929_v56 = vld [vmem:[#allocation10 + $0x4d0] sm:$0xf]  ;;  %v14025_v20 = vld [vmem:[#allocation10 + $0x4d4] sm:$0xf]  ;;  %v7964_v17 = vpack.c.b16 %v7961_v24, %v7961_v24 }
 0x313   :  { %8126 = vmatpush.bf16.msrb.mxu2 %v13866_v29  ;;  %v13813_v29 = vld [vmem:[#allocation10 + $0x10c] sm:$0xf]  ;;  %v15722_v57 = vld [vmem:[#allocation10 + $0x112c] sm:$0xf0] }
 0x314   :  { %v6389_v10 = vmax.f32 %v6386_v33, 0.0  ;;  %v13845_v47 = vld [vmem:[#allocation10 + $0x70c] sm:$0xf]  ;;  %v13925_v36 = vld [vmem:[#allocation10 + $0x410] sm:$0xf] }
 0x315   :  { %7889 = vmatpush.bf16.msrb.mxu0 %v13798_v52  ;;  %8114 = vmatpush.bf16.msrb.mxu1 %v13830_v37  ;;  %v15685_v50 = vld [vmem:[#allocation10 + $0x768] sm:$0xf0]  ;;  %v15668_v52 = vld [vmem:[#allocation10 + $0x6a4] sm:$0xf0]  ;;  %v13814_v37 = vor.u32 %v15677_v22, %v13813_v29  ;;  %v15705_v38 = vld [vmem:[#allocation10 + $0x46c] sm:$0xf0] }
 0x316   :  { %8140 = vmatpush.bf16.msrb.mxu3 %v13894_v48  ;;  %v6390_v51 = vpack.c.bf16 %v6389_v10, %v6389_v10  ;;  %v13877_v9 = vld [vmem:[#allocation10 + $0xd0c] sm:$0xf]  ;;  %v14026_v10 = vor.u32 %v15730_v28, %v14025_v20  ;;  %v15721_v42 = vld [vmem:[#allocation10 + $0x106c] sm:$0xf0]  ;;  %v14021_v29 = vld [vmem:[#allocation10 + $0x414] sm:$0xf]  ;;  %v13926_v22 = vor.u32 %v15705_v38, %v13925_v36 }
 0x317   :  { %8127 = vmatpush.bf16.msrb.mxu2 %v13862_v34  ;;  %v15693_v53 = vld [vmem:[#allocation10 + $0xd68] sm:$0xf0]  ;;  %v13846_v34 = vor.u32 %v15685_v50, %v13845_v47  ;;  %v15718_v24 = vld [vmem:[#allocation10 + $0xe2c] sm:$0xf0]  ;;  %v14009_v20 = vld [vmem:[#allocation10 + $0x1d4] sm:$0xf] }
 0x318   :  { %v13809_v45 = vld [vmem:[#allocation10 + $0x4c] sm:$0xf]  ;;  %6391 = vst [vmem:[#allocation3 + $0x2c] sm:$0xf] %v6390_v51  ;;  %v13878_v60 = vor.u32 %v15693_v53, %v13877_v9  ;;  %v13921_v51 = vld [vmem:[#allocation10 + $0x350] sm:$0xf] }
 0x319   :  { %7890 = vmatpush.bf16.msrb.mxu0 %v13794_v1  ;;  %8115 = vmatpush.bf16.msrb.mxu1 %v13826_v7  ;;  %v15676_v58 = vld [vmem:[#allocation10 + $0xa8] sm:$0xf0]  ;;  %v6387_v48 = vpop.f32.mrf.mxu2  ;;  %v13778_v1 = vor.u32 %v15668_v52, %v13777_v39  ;;  %v13997_v7 = vld [vmem:[#allocation10 + $0x1190] sm:$0xf]  ;;  %v15726_v28 = vld [vmem:[#allocation10 + $0x230] sm:$0xf0] }
 0x31a   :  { %8141 = vmatpush.bf16.msrb.mxu3 %v13890_v18  ;;  %v13841_v59 = vld [vmem:[#allocation10 + $0x64c] sm:$0xf]  ;;  %v6543_v0 = vpop.f32.mrf.mxu3  ;;  %v13810_v11 = vor.u32 %v15676_v58, %v13809_v45  ;;  %v15731_v18 = vld [vmem:[#allocation10 + $0x5f0] sm:$0xf0]  ;;  %v15704_v9 = vld [vmem:[#allocation10 + $0x3ac] sm:$0xf0] }
 0x31b   :  { %8128 = vmatpush.bf16.msrb.mxu2 %v13858_v8  ;;  %v15684_v61 = vld [vmem:[#allocation10 + $0x6a8] sm:$0xf0]  ;;  %v15723_v8 = vld [vmem:[#allocation10 + $0x11ec] sm:$0xf0]  ;;  %v14030_v23 = vor.u32 %v15731_v18, %v14029_v15  ;;  %v15728_v58 = vld [vmem:[#allocation10 + $0x3b0] sm:$0xf0] }
 0x31c   :  { %v13873_v62 = vld [vmem:[#allocation10 + $0xc4c] sm:$0xf]  ;;  %v13842_v12 = vor.u32 %v15684_v61, %v13841_v59  ;;  %v13953_v53 = vld [vmem:[#allocation10 + $0x950] sm:$0xf]  ;;  %v13922_v61 = vor.u32 %v15704_v9, %v13921_v51 }
 0x31d   :  { %7891 = vmatpush.bf16.msrb.mxu0 %v13790_v19  ;;  %8116 = vmatpush.bf16.msrb.mxu1 %v13822_v63  ;;  %v15692_v32 = vld [vmem:[#allocation10 + $0xca8] sm:$0xf0]  ;;  %v13998_v19 = vor.u32 %v15723_v8, %v13997_v7  ;;  %v15706_v63 = vld [vmem:[#allocation10 + $0x52c] sm:$0xf0]  ;;  %v14013_v8 = vld [vmem:[#allocation10 + $0x294] sm:$0xf] }
 0x31e   :  { %8142 = vmatpush.bf16.msrb.mxu3 %v13886_v27  ;;  %v13874_v30 = vor.u32 %v15692_v32, %v13873_v62  ;;  %v13993_v27 = vld [vmem:[#allocation10 + $0x10d0] sm:$0xf]  ;;  %v16007_v5 = vld [vmem:[#allocation12 + $0xc] ss:$0 sm:$0xff]  ;;  %v13930_v33 = vor.u32 %v15706_v63, %v13929_v56 }
 0x31f   :  { %8129 = vmatpush.bf16.msrb.mxu2 %v13854_v4  ;;  %v13961_v4 = vld [vmem:[#allocation10 + $0xad0] sm:$0xf]  ;;  %v13994_v35 = vor.u32 %v15722_v57, %v13993_v27 }
 0x320   :  { %v13962_v31 = vor.u32 %v15714_v2, %v13961_v4  ;;  %v15712_v52 = vld [vmem:[#allocation10 + $0x9ac] sm:$0xf0] }
 0x321   :  { %7892 = vmatpush.bf16.msrb.mxu0 %v13786_v43  ;;  %8117 = vmatpush.bf16.msrb.mxu1 %v13818_v41  ;;  %v13957_v43 = vld [vmem:[#allocation10 + $0xa10] sm:$0xf]  ;;  %v13954_v32 = vor.u32 %v15712_v52, %v13953_v53 }
 0x322   :  { %8143 = vmatpush.bf16.msrb.mxu3 %v13882_v25  ;;  %v15713_v41 = vld [vmem:[#allocation10 + $0xa6c] sm:$0xf0]  ;;  %v15729_v25 = vld [vmem:[#allocation10 + $0x470] sm:$0xf0] }
 0x323   :  { %8130 = vmatpush.bf16.msrb.mxu2 %v13850_v13  ;;  %v13989_v13 = vld [vmem:[#allocation10 + $0x1010] sm:$0xf]  ;;  %v13958_v47 = vor.u32 %v15713_v41, %v13957_v43  ;;  %v14022_v39 = vor.u32 %v15729_v25, %v14021_v29  ;;  %v14005_v29 = vld [vmem:[#allocation10 + $0x114] sm:$0xf] }
 0x324   :  { %v13990_v50 = vor.u32 %v15721_v42, %v13989_v13  ;;  %v13985_v45 = vld [vmem:[#allocation10 + $0xf50] sm:$0xf]  ;;  %v15725_v25 = vld [vmem:[#allocation10 + $0x170] sm:$0xf0] }
 0x325   :  { %7893 = vmatpush.bf16.msrb.mxu0 %v13782_v54  ;;  %8118 = vmatpush.bf16.msrb.mxu1 %v13814_v37  ;;  %v6542_v54 = vadd.f32 %v16007_v5, %v16531_v3  ;;  %v13917_v62 = vld [vmem:[#allocation10 + $0x290] sm:$0xf] }
 0x326   :  { %8144 = vmatpush.bf16.msrb.mxu3 %v13878_v60  ;;  %v16008_v60 = vld [vmem:[#allocation12 + $0xd] ss:$0 sm:$0xff]  ;;  %v13949_v3 = vld [vmem:[#allocation10 + $0x890] sm:$0xf]  ;;  %v13918_v15 = vor.u32 %v15703_v55, %v13917_v62  ;;  %v14093_v62 = vld [vmem:[#allocation10 + $0x598] sm:$0xf] }
 0x327   :  { %8131 = vmatpush.bf16.msrb.mxu2 %v13846_v34  ;;  %v14017_v34 = vld [vmem:[#allocation10 + $0x354] sm:$0xf]  ;;  %v15719_v7 = vld [vmem:[#allocation10 + $0xeec] sm:$0xf0]  ;;  %v14125_v55 = vld [vmem:[#allocation10 + $0xb98] sm:$0xf] }
 0x328   :  { %v13913_v18 = vld [vmem:[#allocation10 + $0x1d0] sm:$0xf]  ;;  %v13982_v6 = vor.u32 %v15719_v7, %v13981_v40  ;;  %v15763_v40 = vld [vmem:[#allocation10 + $0x11f4] sm:$0xf0] }
 0x329   :  { %7894 = vmatpush.bf16.msrb.mxu0 %v13778_v1  ;;  %8119 = vmatpush.bf16.msrb.mxu1 %v13810_v11  ;;  %v6554_v37 = vpop.f32.mrf.mxu0  ;;  %v6779_v48 = vpop.f32.mrf.mxu1  ;;  %v14018_v1 = vor.u32 %v15728_v58, %v14017_v34  ;;  %v15727_v11 = vld [vmem:[#allocation10 + $0x2f0] sm:$0xf0]  ;;  %v15710_v56 = vld [vmem:[#allocation10 + $0x82c] sm:$0xf0]  ;;  %v16539_v7 = vld [vmem:[#allocation2 + $0x54] sm:$0xff] }
 0x32a   :  { %8145 = vmatpush.bf16.msrb.mxu3 %v13874_v30  ;;  %v6555_v59 = vadd.f32 %v6554_v37, %v6542_v54  ;;  %v6780_v30 = vadd.f32 %v16008_v60, %v6779_v48  ;;  %v14014_v63 = vor.u32 %v15727_v11, %v14013_v8  ;;  %v13909_v36 = vld [vmem:[#allocation10 + $0x110] sm:$0xf]  ;;  %v14006_v37 = vor.u32 %v15725_v25, %v14005_v29  ;;  %v14001_v58 = vld [vmem:[#allocation10 + $0x54] sm:$0xf]  ;;  %v16009_v29 = vld [vmem:[#allocation12 + $0xe] ss:$0 sm:$0xff] }
 0x32b   :  { %8132 = vmatpush.bf16.msrb.mxu2 %v13842_v12  ;;  %v15701_v38 = vld [vmem:[#allocation10 + $0x16c] sm:$0xf0]  ;;  %v14061_v60 = vld [vmem:[#allocation10 + $0xb94] sm:$0xf] }
 0x32c   :  { %7895 = vmatmul.bf16.vlgmr.msrb.gmra.mxu0 %v7775_v21  ;;  %8120 = vmatmul.bf16.vlgmr.msrb.gmra.mxu1 %v16528_v49  ;;  %v15720_v49 = vld [vmem:[#allocation10 + $0xfac] sm:$0xf0]  ;;  %v6558_v44 = vmax.f32 %v6555_v59, 0.0  ;;  %v15724_v59 = vld [vmem:[#allocation10 + $0xb0] sm:$0xf0] }
 0x32d   :  { %8363 = vmatpush.bf16.msra.mxu0 %v13934_v46  ;;  %8376 = vmatpush.bf16.msra.mxu1 %v13966_v16  ;;  %v13986_v0 = vor.u32 %v15720_v49, %v13985_v45  ;;  %v13950_v46 = vor.u32 %v15711_v26, %v13949_v3  ;;  %v15702_v16 = vld [vmem:[#allocation10 + $0x22c] sm:$0xf0]  ;;  %v15755_v3 = vld [vmem:[#allocation10 + $0xbf4] sm:$0xf0]  ;;  %v14002_v8 = vor.u32 %v15724_v59, %v14001_v58 }
 0x32e   :  { %8545 = vmatpush.bf16.msra.mxu3 %v14030_v23  ;;  %8133 = vmatmul.bf16.vlgmr.msrb.gmra.mxu2 %v7775_v21  ;;  %v6559_v12 = vpack.c.bf16 %v6558_v44, %v6558_v44  ;;  %v13977_v23 = vld [vmem:[#allocation10 + $0xdd0] sm:$0xf]  ;;  %v13914_v21 = vor.u32 %v15702_v16, %v13913_v18  ;;  %v15738_v16 = vld [vmem:[#allocation10 + $0xb30] sm:$0xf0] }
 0x32f   :  { %8389 = vmatpush.bf16.msra.mxu2 %v13998_v19  ;;  %8146 = vmatmul.bf16.vlgmr.msrb.gmra.mxu3 %v7964_v17  ;;  %v13945_v19 = vld [vmem:[#allocation10 + $0x7d0] sm:$0xf]  ;;  %v14010_v17 = vor.u32 %v15726_v28, %v14009_v20 }
 0x330   :  { %6560 = vst [vmem:[#allocation3 + $0x30] sm:$0xf] %v6559_v12  ;;  %v13941_v43 = vld [vmem:[#allocation10 + $0x710] sm:$0xf] }
 0x331   :  { %8364 = vmatpush.bf16.msra.mxu0 %v13930_v33  ;;  %8377 = vmatpush.bf16.msra.mxu1 %v13962_v31  ;;  %v6792_v4 = vpop.f32.mrf.mxu2  ;;  %v6556_v57 = vpop.f32.mrf.mxu0  ;;  %v13946_v31 = vor.u32 %v15710_v56, %v13945_v19  ;;  %v13973_v41 = vld [vmem:[#allocation10 + $0xd10] sm:$0xf]  ;;  %v14089_v19 = vld [vmem:[#allocation10 + $0x4d8] sm:$0xf] }
 0x332   :  { %8546 = vmatpush.bf16.msra.mxu3 %v14026_v10  ;;  %v6793_v2 = vadd.f32 %v6792_v4, %v6780_v30  ;;  %v6805_v27 = vpop.f32.mrf.mxu3  ;;  %v6781_v5 = vpop.f32.mrf.mxu1  ;;  %v15709_v10 = vld [vmem:[#allocation10 + $0x76c] sm:$0xf0]  ;;  %v14126_v30 = vor.u32 %v15755_v3, %v14125_v55  ;;  %v15746_v4 = vld [vmem:[#allocation10 + $0x534] sm:$0xf0] }
 0x333   :  { %8390 = vmatpush.bf16.msra.mxu2 %v13994_v35  ;;  %v13978_v35 = vor.u32 %v15718_v24, %v13977_v23  ;;  %v15717_v13 = vld [vmem:[#allocation10 + $0xd6c] sm:$0xf0]  ;;  %v13942_v53 = vor.u32 %v15709_v10, %v13941_v43  ;;  %v14121_v23 = vld [vmem:[#allocation10 + $0xad8] sm:$0xf]  ;;  %v14090_v5 = vor.u32 %v15746_v4, %v14089_v19 }
 0x334   :  { %v6806_v33 = vadd.f32 %v6805_v27, %v6793_v2  ;;  %v13937_v51 = vld [vmem:[#allocation10 + $0x650] sm:$0xf]  ;;  %v13974_v54 = vor.u32 %v15717_v13, %v13973_v41  ;;  %v15754_v24 = vld [vmem:[#allocation10 + $0xb34] sm:$0xf0] }
 0x335   :  { %8365 = vmatpush.bf16.msra.mxu0 %v13926_v22  ;;  %8378 = vmatpush.bf16.msra.mxu1 %v13958_v47  ;;  %v13910_v22 = vor.u32 %v15701_v38, %v13909_v36  ;;  %v13905_v47 = vld [vmem:[#allocation10 + $0x50] sm:$0xf]  ;;  %v14153_v2 = vld [vmem:[#allocation10 + $0x10d8] sm:$0xf] }
 0x336   :  { %8547 = vmatpush.bf16.msra.mxu3 %v14022_v39  ;;  %v6809_v42 = vmax.f32 %v6806_v33, 0.0  ;;  %v15708_v39 = vld [vmem:[#allocation10 + $0x6ac] sm:$0xf0]  ;;  %v15762_v27 = vld [vmem:[#allocation10 + $0x1134] sm:$0xf0] }
 0x337   :  { %8391 = vmatpush.bf16.msra.mxu2 %v13990_v50  ;;  %v15700_v50 = vld [vmem:[#allocation10 + $0xac] sm:$0xf0]  ;;  %v13938_v26 = vor.u32 %v15708_v39, %v13937_v51  ;;  %v14053_v33 = vld [vmem:[#allocation10 + $0xa14] sm:$0xf]  ;;  %v14154_v38 = vor.u32 %v15762_v27, %v14153_v2  ;;  %v15745_v43 = vld [vmem:[#allocation10 + $0x474] sm:$0xf0] }
 0x338   :  { %v6810_v9 = vpack.c.bf16 %v6809_v42, %v6809_v42  ;;  %v13969_v52 = vld [vmem:[#allocation10 + $0xc50] sm:$0xf]  ;;  %v15753_v10 = vld [vmem:[#allocation10 + $0xa74] sm:$0xf0] }
 0x339   :  { %8366 = vmatpush.bf16.msra.mxu0 %v13922_v61  ;;  %8379 = vmatpush.bf16.msra.mxu1 %v13954_v32  ;;  %v15716_v45 = vld [vmem:[#allocation10 + $0xcac] sm:$0xf0]  ;;  %v6794_v34 = vpop.f32.mrf.mxu2  ;;  %v15739_v61 = vld [vmem:[#allocation10 + $0xbf0] sm:$0xf0]  ;;  %v13906_v32 = vor.u32 %v15700_v50, %v13905_v47  ;;  %v14149_v41 = vld [vmem:[#allocation10 + $0x1018] sm:$0xf] }
 0x33a   :  { %8548 = vmatpush.bf16.msra.mxu3 %v14018_v1  ;;  %v8154_v49 = vld [vmem:[#allocation2 + $0x4c] sm:$0xff]  ;;  %6811 = vst [vmem:[#allocation3 + $0x34] sm:$0xf] %v6810_v9  ;;  %v6807_v48 = vpop.f32.mrf.mxu3  ;;  %v13970_v44 = vor.u32 %v15716_v45, %v13969_v52  ;;  %v14062_v11 = vor.u32 %v15739_v61, %v14061_v60 }
 0x33b   :  { %8392 = vmatpush.bf16.msra.mxu2 %v13986_v0  ;;  %v15747_v0 = vld [vmem:[#allocation10 + $0x5f4] sm:$0xf0]  ;;  %v8210_v12 = vunpack.c.l.b16 %v8154_v49  ;;  %v14049_v47 = vld [vmem:[#allocation10 + $0x954] sm:$0xf] }
 0x33c   :  { %v14157_v1 = vld [vmem:[#allocation10 + $0x1198] sm:$0xf]  ;;  %v14094_v18 = vor.u32 %v15747_v0, %v14093_v62  ;;  %v15736_v50 = vld [vmem:[#allocation10 + $0x9b0] sm:$0xf0] }
 0x33d   :  { %8367 = vmatpush.bf16.msra.mxu0 %v13918_v15  ;;  %8380 = vmatpush.bf16.msra.mxu1 %v13950_v46  ;;  %v8211_v15 = vunpack.c.h.b16 %v8154_v49  ;;  %v8212_v46 = vunpack.c.h.b16 %v16533_v14  ;;  %v14158_v56 = vor.u32 %v15763_v40, %v14157_v1  ;;  %v8213_v57 = vpack.c.b16 %v8210_v12, %v8210_v12  ;;  %v15761_v13 = vld [vmem:[#allocation10 + $0x1074] sm:$0xf0]  ;;  %v14045_v48 = vld [vmem:[#allocation10 + $0x894] sm:$0xf] }
 0x33e   :  { %8549 = vmatpush.bf16.msra.mxu3 %v14014_v63  ;;  %v8443_v63 = vunpack.c.l.b16 %v16539_v7  ;;  %v14081_v51 = vld [vmem:[#allocation10 + $0x358] sm:$0xf]  ;;  %v14150_v9 = vor.u32 %v15761_v13, %v14149_v41  ;;  %v14050_v34 = vor.u32 %v15736_v50, %v14049_v47  ;;  %v15735_v61 = vld [vmem:[#allocation10 + $0x8f0] sm:$0xf0] }
 0x33f   :  { %8393 = vmatpush.bf16.msra.mxu2 %v13982_v6  ;;  %v14057_v6 = vld [vmem:[#allocation10 + $0xad4] sm:$0xf]  ;;  %v8214_v20 = vpack.c.b16 %v8211_v15, %v8211_v15  ;;  %v8215_v14 = vpack.c.b16 %v8212_v46, %v8212_v46  ;;  %v15752_v39 = vld [vmem:[#allocation10 + $0x9b4] sm:$0xf0]  ;;  %v14046_v1 = vor.u32 %v15735_v61, %v14045_v48  ;;  %v15779_v48 = vld [vmem:[%s17141_s5 + $0x78] sm:$0xff] }
 0x340   :  { %v14058_v28 = vor.u32 %v15738_v16, %v14057_v6  ;;  %v16543_v36 = vpack.c.b16 %v8443_v63, %v8443_v63  ;;  %v14145_v45 = vld [vmem:[#allocation10 + $0xf58] sm:$0xf]  ;;  %v14041_v12 = vld [vmem:[#allocation10 + $0x7d4] sm:$0xf]  ;;  %v15787_v61 = vld [vmem:[%s17141_s5 + $0xb8] sm:$0xff] }
 0x341   :  { %8368 = vmatpush.bf16.msra.mxu0 %v13914_v21  ;;  %8381 = vmatpush.bf16.msra.mxu1 %v13946_v31  ;;  %v14122_v21 = vor.u32 %v15754_v24, %v14121_v23  ;;  %v15737_v31 = vld [vmem:[#allocation10 + $0xa70] sm:$0xf0]  ;;  %v15760_v49 = vld [vmem:[#allocation10 + $0xfb4] sm:$0xf0] }
 0x342   :  { %8550 = vmatpush.bf16.msra.mxu3 %v14010_v17  ;;  %v14117_v17 = vld [vmem:[#allocation10 + $0xa18] sm:$0xf]  ;;  %v14054_v42 = vor.u32 %v15737_v31, %v14053_v33  ;;  %v15734_v15 = vld [vmem:[#allocation10 + $0x830] sm:$0xf0] }
 0x343   :  { %8394 = vmatpush.bf16.msra.mxu2 %v13978_v35  ;;  %v14085_v35 = vld [vmem:[#allocation10 + $0x418] sm:$0xf]  ;;  %v14042_v27 = vor.u32 %v15734_v15, %v14041_v12  ;;  %v14033_v13 = vld [vmem:[#allocation10 + $0x654] sm:$0xf] }
 0x344   :  { %v14086_v25 = vor.u32 %v15745_v43, %v14085_v35  ;;  %v14077_v62 = vld [vmem:[#allocation10 + $0x298] sm:$0xf] }
 0x345   :  { %8369 = vmatpush.bf16.msra.mxu0 %v13910_v22  ;;  %8382 = vmatpush.bf16.msra.mxu1 %v13942_v53  ;;  %v14118_v22 = vor.u32 %v15753_v10, %v14117_v17  ;;  %v15744_v53 = vld [vmem:[#allocation10 + $0x3b4] sm:$0xf0] }
 0x346   :  { %8551 = vmatpush.bf16.msra.mxu3 %v14006_v37  ;;  %v14082_v59 = vor.u32 %v15744_v53, %v14081_v51  ;;  %v15743_v0 = vld [vmem:[#allocation10 + $0x2f4] sm:$0xf0] }
 0x347   :  { %8395 = vmatpush.bf16.msra.mxu2 %v13974_v54  ;;  %v14113_v54 = vld [vmem:[#allocation10 + $0x958] sm:$0xf] }
 0x348   :  { %v14114_v60 = vor.u32 %v15752_v39, %v14113_v54  ;;  %v14109_v55 = vld [vmem:[#allocation10 + $0x898] sm:$0xf] }
 0x349   :  { %8370 = vmatpush.bf16.msra.mxu0 %v13906_v32  ;;  %8383 = vmatpush.bf16.msra.mxu1 %v13938_v26  ;;  %v7030_v52 = vpop.f32.mrf.mxu0  ;;  %v7043_v37 = vpop.f32.mrf.mxu1  ;;  %v14146_v32 = vor.u32 %v15760_v49, %v14145_v45  ;;  %v15751_v3 = vld [vmem:[#allocation10 + $0x8f4] sm:$0xf0] }
 0x34a   :  { %8552 = vmatpush.bf16.msra.mxu3 %v14002_v8  ;;  %v7031_v58 = vadd.f32 %v16009_v29, %v7030_v52  ;;  %v14141_v26 = vld [vmem:[#allocation10 + $0xe98] sm:$0xf]  ;;  %v14078_v8 = vor.u32 %v15743_v0, %v14077_v62  ;;  %v15795_v62 = vld [vmem:[%s17141_s5 + $0xf8] sm:$0xff] }
 0x34b   :  { %8396 = vmatpush.bf16.msra.mxu2 %v13970_v44  ;;  %v15759_v44 = vld [vmem:[#allocation10 + $0xef4] sm:$0xf0] }
 0x34c   :  { %8371 = vmatmul.bf16.vlgmr.msra.gmra.mxu0 %v8213_v57  ;;  %8384 = vmatmul.bf16.vlgmr.msra.gmra.mxu1 %v8214_v20  ;;  %v7044_v40 = vadd.f32 %v7043_v37, %v7031_v58  ;;  %v15742_v6 = vld [vmem:[#allocation10 + $0x234] sm:$0xf0]  ;;  %v14037_v57 = vld [vmem:[#allocation10 + $0x714] sm:$0xf] }
 0x34d   :  { %8558 = vmatpush.bf16.msrb.mxu0 %v14062_v11  ;;  %8783 = vmatpush.bf16.msrb.mxu1 %v14094_v18  ;;  %v14110_v11 = vor.u32 %v15751_v3, %v14109_v55  ;;  %v14073_v18 = vld [vmem:[#allocation10 + $0x1d8] sm:$0xf] }
 0x34e   :  { %8809 = vmatpush.bf16.msrb.mxu3 %v14158_v56  ;;  %8397 = vmatmul.bf16.vlgmr.msra.gmra.mxu2 %v8215_v14  ;;  %v14105_v16 = vld [vmem:[#allocation10 + $0x7d8] sm:$0xf] }
 0x34f   :  { %8796 = vmatpush.bf16.msrb.mxu2 %v14126_v30  ;;  %8553 = vmatmul.bf16.vlgmr.msra.gmra.mxu3 %v16543_v36  ;;  %v14142_v30 = vor.u32 %v15759_v44, %v14141_v26  ;;  %v15750_v19 = vld [vmem:[#allocation10 + $0x834] sm:$0xf0]  ;;  %v16010_v26 = vld [vmem:[#allocation12 + $0xf] ss:$0 sm:$0xff] }
 0x350   :  { %v14137_v23 = vld [vmem:[#allocation10 + $0xdd8] sm:$0xf]  ;;  %v14106_v14 = vor.u32 %v15750_v19, %v14105_v16  ;;  %v15776_v16 = vld [vmem:[%s17141_s5 + $0x60] sm:$0xff] }
 0x351   :  { %8559 = vmatpush.bf16.msrb.mxu0 %v14058_v28  ;;  %8784 = vmatpush.bf16.msrb.mxu1 %v14090_v5  ;;  %v7056_v46 = vpop.f32.mrf.mxu2  ;;  %v7032_v4 = vpop.f32.mrf.mxu0  ;;  %v15758_v24 = vld [vmem:[#allocation10 + $0xe34] sm:$0xf0]  ;;  %v14074_v28 = vor.u32 %v15742_v6, %v14073_v18  ;;  %v15733_v5 = vld [vmem:[#allocation10 + $0x770] sm:$0xf0]  ;;  %v16011_v6 = vld [vmem:[#allocation12 + $0x10] ss:$0 sm:$0xff] }
 0x352   :  { %8810 = vmatpush.bf16.msrb.mxu3 %v14154_v38  ;;  %v7057_v56 = vadd.f32 %v7056_v46, %v7044_v40  ;;  %v16546_v63 = vpop.f32.mrf.mxu3  ;;  %v7045_v2 = vpop.f32.mrf.mxu1  ;;  %v14138_v33 = vor.u32 %v15758_v24, %v14137_v23  ;;  %v15741_v31 = vld [vmem:[#allocation10 + $0x174] sm:$0xf0]  ;;  %v14038_v41 = vor.u32 %v15733_v5, %v14037_v57  ;;  %v15769_v40 = vld [vmem:[%s17141_s5 + $0x28] sm:$0xff]  ;;  %v15768_v46 = vld [vmem:[%s17141_s5 + $0x20] sm:$0xff] }
 0x353   :  { %8797 = vmatpush.bf16.msrb.mxu2 %v14122_v21  ;;  %v14069_v21 = vld [vmem:[#allocation10 + $0x118] sm:$0xf]  ;;  %v7213_v12 = vadd.f32 %v16010_v26, %v16546_v63  ;;  %v15784_v19 = vld [vmem:[%s17141_s5 + $0xa0] sm:$0xff]  ;;  %v15767_v23 = vld [vmem:[%s17141_s5 + $0x18] sm:$0xff] }
 0x354   :  { %v7060_v20 = vmax.f32 %v7057_v56, 0.0  ;;  %v14101_v35 = vld [vmem:[#allocation10 + $0x718] sm:$0xf]  ;;  %v15792_v63 = vld [vmem:[%s17141_s5 + $0xe0] sm:$0xff]  ;;  %v15775_v2 = vld [vmem:[%s17141_s5 + $0x58] sm:$0xff] }
 0x355   :  { %8560 = vmatpush.bf16.msrb.mxu0 %v14054_v42  ;;  %8785 = vmatpush.bf16.msrb.mxu1 %v14086_v25  ;;  %v15749_v38 = vld [vmem:[#allocation10 + $0x774] sm:$0xf0]  ;;  %v14070_v42 = vor.u32 %v15741_v31, %v14069_v21  ;;  %v15732_v25 = vld [vmem:[#allocation10 + $0x6b0] sm:$0xf0]  ;;  %v15791_v57 = vld [vmem:[%s17141_s5 + $0xd8] sm:$0xff] }
 0x356   :  { %8811 = vmatpush.bf16.msrb.mxu3 %v14150_v9  ;;  %v7061_v43 = vpack.c.bf16 %v7060_v20, %v7060_v20  ;;  %v14133_v17 = vld [vmem:[#allocation10 + $0xd18] sm:$0xf]  ;;  %v14102_v29 = vor.u32 %v15749_v38, %v14101_v35  ;;  %v14034_v45 = vor.u32 %v15732_v25, %v14033_v13  ;;  %v15773_v13 = vld [vmem:[%s17141_s5 + $0x48] sm:$0xff] }
 0x357   :  { %8798 = vmatpush.bf16.msrb.mxu2 %v14118_v22  ;;  %v15757_v10 = vld [vmem:[#allocation10 + $0xd74] sm:$0xf0]  ;;  %v15809_v26 = vld [vmem:[%s17141_s5 + $0x168] sm:$0xff] }
 0x358   :  { %7062 = vst [vmem:[#allocation3 + $0x38] sm:$0xf] %v7061_v43  ;;  %v14065_v22 = vld [vmem:[#allocation10 + $0x58] sm:$0xf]  ;;  %v14134_v47 = vor.u32 %v15757_v10, %v14133_v17  ;;  %v15765_v10 = vld [vmem:[%s17141_s5 + $0x8] sm:$0xff] }
 0x359   :  { %8561 = vmatpush.bf16.msrb.mxu0 %v14050_v34  ;;  %8786 = vmatpush.bf16.msrb.mxu1 %v14082_v59  ;;  %v7058_v50 = vpop.f32.mrf.mxu2  ;;  %v15740_v51 = vld [vmem:[#allocation10 + $0xb4] sm:$0xf0]  ;;  %v8575_v34 = vld [vmem:[#allocation2 + $0x5c] sm:$0xf] }
 0x35a   :  { %8812 = vmatpush.bf16.msrb.mxu3 %v14146_v32  ;;  %v14097_v9 = vld [vmem:[#allocation10 + $0x658] sm:$0xf]  ;;  %v7214_v54 = vpop.f32.mrf.mxu3  ;;  %v14066_v49 = vor.u32 %v15740_v51, %v14065_v22  ;;  %v15771_v59 = vld [vmem:[%s17141_s5 + $0x38] sm:$0xff]  ;;  %v8632_v32 = vunpack.c.l.b16 %v8575_v34  ;;  %v15764_v50 = vld [vmem:[%s17141_s5] sm:$0xff] }
 0x35b   :  { %8799 = vmatpush.bf16.msrb.mxu2 %v14114_v60  ;;  %v15748_v53 = vld [vmem:[#allocation10 + $0x6b4] sm:$0xf0]  ;;  %v8444_v60 = vunpack.c.h.b16 %v16539_v7  ;;  %v8827_v51 = vld [vmem:[#allocation3 + $0x8] sm:$0xff]  ;;  %v15788_v54 = vld [vmem:[%s17141_s5 + $0xc0] sm:$0xff] }
 0x35c   :  { %v14129_v39 = vld [vmem:[#allocation10 + $0xc58] sm:$0xf]  ;;  %v14098_v37 = vor.u32 %v15748_v53, %v14097_v9  ;;  %v8635_v44 = vpack.c.b16 %v8632_v32, %v8632_v32  ;;  %v15772_v9 = vld [vmem:[%s17141_s5 + $0x40] sm:$0xff]  ;;  %v9240_v34 = vunpack.c.l.b16 %v8827_v51 }
 0x35d   :  { %8562 = vmatpush.bf16.msrb.mxu0 %v14046_v1  ;;  %8787 = vmatpush.bf16.msrb.mxu1 %v14078_v8  ;;  %v15756_v52 = vld [vmem:[#allocation10 + $0xcb4] sm:$0xf0]  ;;  %v8446_v0 = vpack.c.b16 %v8444_v60, %v8444_v60  ;;  %v15777_v8 = vld [vmem:[%s17141_s5 + $0x68] sm:$0xff]  ;;  %v15780_v53 = vld [vmem:[%s17141_s5 + $0x80] sm:$0xff] }
 0x35e   :  { %8813 = vmatpush.bf16.msrb.mxu3 %v14142_v30  ;;  %v14130_v58 = vor.u32 %v15756_v52, %v14129_v39  ;;  %v15770_v7 = vld [vmem:[%s17141_s5 + $0x30] sm:$0xff]  ;;  %v15803_v39 = vld [vmem:[%s17141_s5 + $0x138] sm:$0xff] }
 0x35f   :  { %8800 = vmatpush.bf16.msrb.mxu2 %v14110_v11  ;;  %v15778_v55 = vld [vmem:[%s17141_s5 + $0x70] sm:$0xff]  ;;  %v15785_v11 = vld [vmem:[%s17141_s5 + $0xa8] sm:$0xff] }
 0x360   :  { %v15786_v3 = vld [vmem:[%s17141_s5 + $0xb0] sm:$0xff] }
 0x361   :  { %8563 = vmatpush.bf16.msrb.mxu0 %v14042_v27  ;;  %8788 = vmatpush.bf16.msrb.mxu1 %v14074_v28  ;;  %v15794_v1 = vld [vmem:[%s17141_s5 + $0xf0] sm:$0xff]  ;;  %v15783_v27 = vld [vmem:[%s17141_s5 + $0x98] sm:$0xff] }
 0x362   :  { %8814 = vmatpush.bf16.msrb.mxu3 %v14138_v33  ;;  %v15766_v33 = vld [vmem:[%s17141_s5 + $0x10] sm:$0xff] }
 0x363   :  { %8801 = vmatpush.bf16.msrb.mxu2 %v14106_v14  ;;  %v15774_v35 = vld [vmem:[%s17141_s5 + $0x50] sm:$0xff] }
 0x364   :  { %v15782_v38 = vld [vmem:[%s17141_s5 + $0x90] sm:$0xff] }
 0x365   :  { %8564 = vmatpush.bf16.msrb.mxu0 %v14038_v41  ;;  %8789 = vmatpush.bf16.msrb.mxu1 %v14070_v42  ;;  %v15790_v43 = vld [vmem:[%s17141_s5 + $0xd0] sm:$0xff]  ;;  %v15781_v42 = vld [vmem:[%s17141_s5 + $0x88] sm:$0xff] }
 0x366   :  { %8815 = vmatpush.bf16.msrb.mxu3 %v14134_v47  ;;  %v8826_v47 = vld [vmem:[#allocation3] sm:$0xff]  ;;  %v15810_v32 = vld [vmem:[%s17141_s5 + $0x170] sm:$0xff] }
 0x367   :  { %8802 = vmatpush.bf16.msrb.mxu2 %v14102_v29  ;;  %v15789_v29 = vld [vmem:[%s17141_s5 + $0xc8] sm:$0xff]  ;;  %v9238_v52 = vunpack.c.l.b16 %v8826_v47 }
 0x369   :  { %8565 = vmatpush.bf16.msrb.mxu0 %v14034_v45  ;;  %8790 = vmatpush.bf16.msrb.mxu1 %v14066_v49  ;;  %v7225_v15 = vpop.f32.mrf.mxu0  ;;  %v7450_v30 = vpop.f32.mrf.mxu1  ;;  %v15811_v45 = vld [vmem:[%s17141_s5 + $0x178] sm:$0xff]  ;;  %v9262_v60 = vpack.c.b16 %v9238_v52, %v9238_v52  ;;  %v15834_v52 = vld [vmem:[%s17141_s5 + $0x230] sm:$0xff] }
 0x36a   :  { %8816 = vmatpush.bf16.msrb.mxu3 %v14130_v58  ;;  %v7226_v18 = vadd.f32 %v7225_v15, %v7213_v12  ;;  %v7451_v24 = vadd.f32 %v16011_v6, %v7450_v30  ;;  %v15819_v49 = vld [vmem:[%s17141_s5 + $0x1b8] sm:$0xff]  ;;  %v15800_v12 = vld [vmem:[%s17141_s5 + $0x120] sm:$0xff] }
 0x36b   :  { %8803 = vmatpush.bf16.msrb.mxu2 %v14098_v37  ;;  %v9239_v37 = vunpack.c.h.b16 %v8826_v47  ;;  %v15827_v58 = vld [vmem:[%s17141_s5 + $0x1f8] sm:$0xff]  ;;  %v15808_v15 = vld [vmem:[%s17141_s5 + $0x160] sm:$0xff] }
 0x36c   :  { %8566 = vmatmul.bf16.vlgmr.msrb.gmra.mxu0 %v8446_v0  ;;  %8791 = vmatmul.bf16.vlgmr.msrb.gmra.mxu1 %v16543_v36  ;;  %v15793_v36 = vld [vmem:[%s17141_s5 + $0xe8] sm:$0xff]  ;;  %v7229_v56 = vmax.f32 %v7226_v18, 0.0  ;;  %v15816_v18 = vld [vmem:[%s17141_s5 + $0x1a0] sm:$0xff]  ;;  %v15843_v47 = vld [vmem:[%s17141_s5 + $0x278] sm:$0xff] }
 0x36d   :  { %10462 = vmatpush.bf16.msra.mxu0 %v15771_v59  ;;  %10475 = vmatpush.bf16.msra.mxu1 %v15779_v48  ;;  %v9241_v59 = vunpack.c.h.b16 %v8827_v51  ;;  %v15802_v48 = vld [vmem:[%s17141_s5 + $0x130] sm:$0xff]  ;;  %v15824_v30 = vld [vmem:[%s17141_s5 + $0x1e0] sm:$0xff] }
 0x36e   :  { %10501 = vmatpush.bf16.msra.mxu3 %v15795_v62  ;;  %8804 = vmatmul.bf16.vlgmr.msrb.gmra.mxu2 %v8446_v0  ;;  %v7230_v4 = vpack.c.bf16 %v7229_v56, %v7229_v56  ;;  %v9264_v62 = vpack.c.b16 %v9240_v34, %v9240_v34  ;;  %v15818_v0 = vld [vmem:[%s17141_s5 + $0x1b0] sm:$0xff]  ;;  %v15823_v56 = vld [vmem:[%s17141_s5 + $0x1d8] sm:$0xff] }
 0x36f   :  { %10488 = vmatpush.bf16.msra.mxu2 %v15787_v61  ;;  %8817 = vmatmul.bf16.vlgmr.msrb.gmra.mxu3 %v8635_v44  ;;  %v9263_v61 = vpack.c.b16 %v9239_v37, %v9239_v37  ;;  %v15817_v44 = vld [vmem:[%s17141_s5 + $0x1a8] sm:$0xff]  ;;  %v15842_v37 = vld [vmem:[%s17141_s5 + $0x270] sm:$0xff] }
 0x370   :  { %7231 = vst [vmem:[#allocation3 + $0x3c] sm:$0xf] %v7230_v4  ;;  %v15850_v34 = vld [vmem:[%s17141_s5 + $0x2b0] sm:$0xff] }
 0x371   :  { %10463 = vmatpush.bf16.msra.mxu0 %v15770_v7  ;;  %10476 = vmatpush.bf16.msra.mxu1 %v15778_v55  ;;  %v7463_v20 = vpop.f32.mrf.mxu2  ;;  %v7227_v5 = vpop.f32.mrf.mxu0  ;;  %v9265_v7 = vpack.c.b16 %v9241_v59, %v9241_v59  ;;  %v15826_v55 = vld [vmem:[%s17141_s5 + $0x1f0] sm:$0xff] }
 0x372   :  { %10502 = vmatpush.bf16.msra.mxu3 %v15794_v1  ;;  %v7464_v28 = vadd.f32 %v7463_v20, %v7451_v24  ;;  %v7476_v14 = vpop.f32.mrf.mxu3  ;;  %v7452_v21 = vpop.f32.mrf.mxu1  ;;  %v16012_v1 = vld [vmem:[#allocation12 + $0x11] ss:$0 sm:$0xff]  ;;  %v15806_v20 = vld [vmem:[%s17141_s5 + $0x150] sm:$0xff] }
 0x373   :  { %10489 = vmatpush.bf16.msra.mxu2 %v15786_v3  ;;  %v15801_v3 = vld [vmem:[%s17141_s5 + $0x128] sm:$0xff] }
 0x374   :  { %v7477_v31 = vadd.f32 %v7476_v14, %v7464_v28  ;;  %v15814_v28 = vld [vmem:[%s17141_s5 + $0x190] sm:$0xff]  ;;  %v15797_v21 = vld [vmem:[%s17141_s5 + $0x108] sm:$0xff] }
 0x375   :  { %10464 = vmatpush.bf16.msra.mxu0 %v15769_v40  ;;  %10477 = vmatpush.bf16.msra.mxu1 %v15777_v8  ;;  %v15825_v40 = vld [vmem:[%s17141_s5 + $0x1e8] sm:$0xff]  ;;  %v15822_v14 = vld [vmem:[%s17141_s5 + $0x1d0] sm:$0xff] }
 0x376   :  { %10503 = vmatpush.bf16.msra.mxu3 %v15793_v36  ;;  %v7480_v17 = vmax.f32 %v7477_v31, 0.0  ;;  %v15813_v31 = vld [vmem:[%s17141_s5 + $0x188] sm:$0xff] }
 0x377   :  { %10490 = vmatpush.bf16.msra.mxu2 %v15785_v11 }
 0x378   :  { %v7481_v41 = vpack.c.bf16 %v7480_v17, %v7480_v17  ;;  %v8828_v17 = vld [vmem:[#allocation3 + $0x10] sm:$0xff] }
 0x379   :  { %10465 = vmatpush.bf16.msra.mxu0 %v15768_v46  ;;  %10478 = vmatpush.bf16.msra.mxu1 %v15776_v16  ;;  %v7465_v25 = vpop.f32.mrf.mxu2  ;;  %v15799_v46 = vld [vmem:[%s17141_s5 + $0x118] sm:$0xff]  ;;  %v9243_v51 = vunpack.c.h.b16 %v8828_v17 }
 0x37a   :  { %10504 = vmatpush.bf16.msra.mxu3 %v15792_v63  ;;  %7482 = vst [vmem:[#allocation3 + $0x40] sm:$0xf] %v7481_v41  ;;  %v7478_v22 = vpop.f32.mrf.mxu3  ;;  %v15807_v16 = vld [vmem:[%s17141_s5 + $0x158] sm:$0xff] }
 0x37b   :  { %10491 = vmatpush.bf16.msra.mxu2 %v15784_v19  ;;  %v15815_v19 = vld [vmem:[%s17141_s5 + $0x198] sm:$0xff]  ;;  %v9242_v22 = vunpack.c.l.b16 %v8828_v17  ;;  %v15836_v17 = vld [vmem:[%s17141_s5 + $0x240] sm:$0xff] }
 0x37c   :  { %v8829_v41 = vld [vmem:[#allocation3 + $0x18] sm:$0xff] }
 0x37d   :  { %10466 = vmatpush.bf16.msra.mxu0 %v15767_v23  ;;  %10479 = vmatpush.bf16.msra.mxu1 %v15775_v2  ;;  %v15835_v25 = vld [vmem:[%s17141_s5 + $0x238] sm:$0xff] }
 0x37e   :  { %10505 = vmatpush.bf16.msra.mxu3 %v15791_v57 }
 0x37f   :  { %10492 = vmatpush.bf16.msra.mxu2 %v15783_v27  ;;  %v15798_v27 = vld [vmem:[%s17141_s5 + $0x110] sm:$0xff] }
 0x381   :  { %10467 = vmatpush.bf16.msra.mxu0 %v15766_v33  ;;  %10480 = vmatpush.bf16.msra.mxu1 %v15774_v35  ;;  %v15805_v33 = vld [vmem:[%s17141_s5 + $0x148] sm:$0xff] }
 0x382   :  { %10506 = vmatpush.bf16.msra.mxu3 %v15790_v43  ;;  %v15821_v35 = vld [vmem:[%s17141_s5 + $0x1c8] sm:$0xff] }
 0x383   :  { %10493 = vmatpush.bf16.msra.mxu2 %v15782_v38 }
 0x385   :  { %10468 = vmatpush.bf16.msra.mxu0 %v15765_v10  ;;  %10481 = vmatpush.bf16.msra.mxu1 %v15773_v13  ;;  %v15796_v10 = vld [vmem:[%s17141_s5 + $0x100] sm:$0xff] }
 0x386   :  { %10507 = vmatpush.bf16.msra.mxu3 %v15789_v29  ;;  %v15804_v13 = vld [vmem:[%s17141_s5 + $0x140] sm:$0xff] }
 0x387   :  { %10494 = vmatpush.bf16.msra.mxu2 %v15781_v42  ;;  %v15812_v42 = vld [vmem:[%s17141_s5 + $0x180] sm:$0xff] }
 0x388   :  { %v15820_v29 = vld [vmem:[%s17141_s5 + $0x1c0] sm:$0xff] }
 0x389   :  { %10469 = vmatpush.bf16.msra.mxu0 %v15764_v50  ;;  %10482 = vmatpush.bf16.msra.mxu1 %v15772_v9  ;;  %v7701_v8 = vpop.f32.mrf.mxu0  ;;  %v7714_v11 = vpop.f32.mrf.mxu1  ;;  %v15851_v50 = vld [vmem:[%s17141_s5 + $0x2b8] sm:$0xff]  ;;  %v9244_v9 = vunpack.c.l.b16 %v8829_v41 }
 0x38a   :  { %10508 = vmatpush.bf16.msra.mxu3 %v15788_v54  ;;  %v7702_v36 = vadd.f32 %v16012_v1, %v7701_v8  ;;  %v9245_v54 = vunpack.c.h.b16 %v8829_v41  ;;  %v15840_v1 = vld [vmem:[%s17141_s5 + $0x260] sm:$0xff] }
 0x38b   :  { %10495 = vmatpush.bf16.msra.mxu2 %v15780_v53  ;;  %v15859_v53 = vld [vmem:[%s17141_s5 + $0x2f8] sm:$0xff]  ;;  %v15852_v41 = vld [vmem:[%s17141_s5 + $0x2c0] sm:$0xff] }
 0x38c   :  { %10470 = vmatmul.bf16.vlgmr.msra.gmra.mxu0 %v9262_v60  ;;  %10483 = vmatmul.bf16.vlgmr.msra.gmra.mxu1 %v9263_v61  ;;  %v7715_v6 = vadd.f32 %v7714_v11, %v7702_v36  ;;  %v9269_v59 = vpack.c.b16 %v9245_v54, %v9245_v54  ;;  %v15858_v60 = vld [vmem:[%s17141_s5 + $0x2f0] sm:$0xff]  ;;  %v15841_v61 = vld [vmem:[%s17141_s5 + $0x268] sm:$0xff]  ;;  %v15856_v11 = vld [vmem:[%s17141_s5 + $0x2e0] sm:$0xff] }
 0x38d   :  { %10514 = vmatpush.bf16.msrb.mxu0 %v15803_v39  ;;  %10527 = vmatpush.bf16.msrb.mxu1 %v15811_v45  ;;  %v9266_v39 = vpack.c.b16 %v9242_v22, %v9242_v22  ;;  %v9267_v45 = vpack.c.b16 %v9243_v51, %v9243_v51  ;;  %v15831_v36 = vld [vmem:[%s17141_s5 + $0x218] sm:$0xff] }
 0x38e   :  { %10553 = vmatpush.bf16.msrb.mxu3 %v15827_v58  ;;  %10496 = vmatmul.bf16.vlgmr.msra.gmra.mxu2 %v9264_v62  ;;  %v16013_v58 = vld [vmem:[#allocation12 + $0x12] ss:$0 sm:$0xff] }
 0x38f   :  { %10540 = vmatpush.bf16.msrb.mxu2 %v15819_v49  ;;  %10509 = vmatmul.bf16.vlgmr.msra.gmra.mxu3 %v9265_v7  ;;  %v9268_v49 = vpack.c.b16 %v9244_v9, %v9244_v9  ;;  %v15849_v62 = vld [vmem:[%s17141_s5 + $0x2a8] sm:$0xff] }
 0x391   :  { %10515 = vmatpush.bf16.msrb.mxu0 %v15802_v48  ;;  %10528 = vmatpush.bf16.msrb.mxu1 %v15810_v32  ;;  %v7727_v63 = vpop.f32.mrf.mxu2  ;;  %v7703_v24 = vpop.f32.mrf.mxu0  ;;  %v15833_v48 = vld [vmem:[%s17141_s5 + $0x228] sm:$0xff] }
 0x392   :  { %10554 = vmatpush.bf16.msrb.mxu3 %v15826_v55  ;;  %v7728_v4 = vadd.f32 %v7727_v63, %v7715_v6  ;;  %v16707_v23 = vpop.f32.mrf.mxu3  ;;  %v7716_v2 = vpop.f32.mrf.mxu1  ;;  %v15838_v24 = vld [vmem:[%s17141_s5 + $0x250] sm:$0xff] }
 0x393   :  { %10541 = vmatpush.bf16.msrb.mxu2 %v15818_v0  ;;  %v7884_v32 = vadd.f32 %v16013_v58, %v16707_v23  ;;  %v15857_v0 = vld [vmem:[%s17141_s5 + $0x2e8] sm:$0xff]  ;;  %v15846_v2 = vld [vmem:[%s17141_s5 + $0x290] sm:$0xff] }
 0x394   :  { %v7731_v57 = vmax.f32 %v7728_v4, 0.0  ;;  %v15830_v4 = vld [vmem:[%s17141_s5 + $0x210] sm:$0xff]  ;;  %v15873_v58 = vld [vmem:[%s17141_s5 + $0x368] sm:$0xff] }
 0x395   :  { %10516 = vmatpush.bf16.msrb.mxu0 %v15801_v3  ;;  %10529 = vmatpush.bf16.msrb.mxu1 %v15809_v26  ;;  %v15832_v26 = vld [vmem:[%s17141_s5 + $0x220] sm:$0xff] }
 0x396   :  { %10555 = vmatpush.bf16.msrb.mxu3 %v15825_v40  ;;  %v7732_v5 = vpack.c.bf16 %v7731_v57, %v7731_v57  ;;  %v15848_v40 = vld [vmem:[%s17141_s5 + $0x2a0] sm:$0xff] }
 0x397   :  { %10542 = vmatpush.bf16.msrb.mxu2 %v15817_v44  ;;  %v16014_v44 = vld [vmem:[#allocation12 + $0x13] ss:$0 sm:$0xff] }
 0x398   :  { %7733 = vst [vmem:[#allocation3 + $0x44] sm:$0xf] %v7732_v5  ;;  %v15845_v5 = vld [vmem:[%s17141_s5 + $0x288] sm:$0xff] }
 0x399   :  { %10517 = vmatpush.bf16.msrb.mxu0 %v15800_v12  ;;  %10530 = vmatpush.bf16.msrb.mxu1 %v15808_v15  ;;  %v7729_v38 = vpop.f32.mrf.mxu2 }
 0x39a   :  { %10556 = vmatpush.bf16.msrb.mxu3 %v15824_v30  ;;  %v7885_v43 = vpop.f32.mrf.mxu3  ;;  %v15847_v30 = vld [vmem:[%s17141_s5 + $0x298] sm:$0xff]  ;;  %v15828_v38 = vld [vmem:[%s17141_s5 + $0x200] sm:$0xff] }
 0x39b   :  { %10543 = vmatpush.bf16.msrb.mxu2 %v15816_v18  ;;  %v15839_v18 = vld [vmem:[%s17141_s5 + $0x258] sm:$0xff]  ;;  %v8831_v43 = vld [vmem:[#allocation3 + $0x28] sm:$0xff] }
 0x39c   :  { %v9249_v51 = vunpack.c.h.b16 %v8831_v43 }
 0x39d   :  { %10518 = vmatpush.bf16.msrb.mxu0 %v15799_v46  ;;  %10531 = vmatpush.bf16.msrb.mxu1 %v15807_v16  ;;  %v15855_v46 = vld [vmem:[%s17141_s5 + $0x2d8] sm:$0xff] }
 0x39e   :  { %10557 = vmatpush.bf16.msrb.mxu3 %v15823_v56 }
 0x39f   :  { %10544 = vmatpush.bf16.msrb.mxu2 %v15815_v19 }
 0x3a1   :  { %10519 = vmatpush.bf16.msrb.mxu0 %v15798_v27  ;;  %10532 = vmatpush.bf16.msrb.mxu1 %v15806_v20  ;;  %v15854_v27 = vld [vmem:[%s17141_s5 + $0x2d0] sm:$0xff]  ;;  %v15829_v20 = vld [vmem:[%s17141_s5 + $0x208] sm:$0xff] }
 0x3a2   :  { %10558 = vmatpush.bf16.msrb.mxu3 %v15822_v14  ;;  %v15837_v14 = vld [vmem:[%s17141_s5 + $0x248] sm:$0xff] }
 0x3a3   :  { %10545 = vmatpush.bf16.msrb.mxu2 %v15814_v28 }
 0x3a5   :  { %10520 = vmatpush.bf16.msrb.mxu0 %v15797_v21  ;;  %10533 = vmatpush.bf16.msrb.mxu1 %v15805_v33  ;;  %v15853_v21 = vld [vmem:[%s17141_s5 + $0x2c8] sm:$0xff] }
 0x3a6   :  { %10559 = vmatpush.bf16.msrb.mxu3 %v15821_v35  ;;  %v8830_v35 = vld [vmem:[#allocation3 + $0x20] sm:$0xff] }
 0x3a7   :  { %10546 = vmatpush.bf16.msrb.mxu2 %v15813_v31  ;;  %v9247_v22 = vunpack.c.h.b16 %v8830_v35 }
 0x3a9   :  { %10521 = vmatpush.bf16.msrb.mxu0 %v15796_v10  ;;  %10534 = vmatpush.bf16.msrb.mxu1 %v15804_v13  ;;  %v7896_v7 = vpop.f32.mrf.mxu0  ;;  %v8121_v3 = vpop.f32.mrf.mxu1  ;;  %v15844_v10 = vld [vmem:[%s17141_s5 + $0x280] sm:$0xff]  ;;  %v15867_v13 = vld [vmem:[%s17141_s5 + $0x338] sm:$0xff]  ;;  %v9271_v54 = vpack.c.b16 %v9247_v22, %v9247_v22 }
 0x3aa   :  { %10560 = vmatpush.bf16.msrb.mxu3 %v15820_v29  ;;  %v7897_v55 = vadd.f32 %v7896_v7, %v7884_v32  ;;  %v8122_v15 = vadd.f32 %v16014_v44, %v8121_v3  ;;  %v15875_v29 = vld [vmem:[%s17141_s5 + $0x378] sm:$0xff]  ;;  %v15864_v32 = vld [vmem:[%s17141_s5 + $0x320] sm:$0xff] }
 0x3ab   :  { %10547 = vmatpush.bf16.msrb.mxu2 %v15812_v42  ;;  %v9246_v42 = vunpack.c.l.b16 %v8830_v35  ;;  %v15872_v7 = vld [vmem:[%s17141_s5 + $0x360] sm:$0xff]  ;;  %v15907_v35 = vld [vmem:[%s17141_s5 + $0x478] sm:$0xff] }
 0x3ac   :  { %10522 = vmatmul.bf16.vlgmr.msrb.gmra.mxu0 %v9266_v39  ;;  %10535 = vmatmul.bf16.vlgmr.msrb.gmra.mxu1 %v9267_v45  ;;  %v7900_v8 = vmax.f32 %v7897_v55, 0.0  ;;  %v15882_v45 = vld [vmem:[%s17141_s5 + $0x3b0] sm:$0xff]  ;;  %v15880_v55 = vld [vmem:[%s17141_s5 + $0x3a0] sm:$0xff] }
 0x3ad   :  { %10566 = vmatpush.bf16.msra.mxu0 %v15835_v25  ;;  %10579 = vmatpush.bf16.msra.mxu1 %v15843_v47  ;;  %v15883_v25 = vld [vmem:[%s17141_s5 + $0x3b8] sm:$0xff]  ;;  %v9248_v47 = vunpack.c.l.b16 %v8831_v43  ;;  %v9270_v9 = vpack.c.b16 %v9246_v42, %v9246_v42  ;;  %v15888_v3 = vld [vmem:[%s17141_s5 + $0x3e0] sm:$0xff] }
 0x3ae   :  { %10605 = vmatpush.bf16.msra.mxu3 %v15859_v53  ;;  %10548 = vmatmul.bf16.vlgmr.msrb.gmra.mxu2 %v9268_v49  ;;  %v7901_v12 = vpack.c.bf16 %v7900_v8, %v7900_v8  ;;  %v15866_v53 = vld [vmem:[%s17141_s5 + $0x330] sm:$0xff]  ;;  %v9273_v49 = vpack.c.b16 %v9249_v51, %v9249_v51  ;;  %v15887_v8 = vld [vmem:[%s17141_s5 + $0x3d8] sm:$0xff]  ;;  %v16016_v51 = vld [vmem:[#allocation12 + $0x15] ss:$0 sm:$0xff] }
 0x3af   :  { %10592 = vmatpush.bf16.msra.mxu2 %v15851_v50  ;;  %10561 = vmatmul.bf16.vlgmr.msrb.gmra.mxu3 %v9269_v59  ;;  %v15891_v50 = vld [vmem:[%s17141_s5 + $0x3f8] sm:$0xff]  ;;  %v9272_v39 = vpack.c.b16 %v9248_v47, %v9248_v47  ;;  %v15881_v59 = vld [vmem:[%s17141_s5 + $0x3a8] sm:$0xff]  ;;  %v15906_v47 = vld [vmem:[%s17141_s5 + $0x470] sm:$0xff] }
 0x3b0   :  { %7902 = vst [vmem:[#allocation3 + $0x48] sm:$0xf] %v7901_v12 }
 0x3b1   :  { %10567 = vmatpush.bf16.msra.mxu0 %v15834_v52  ;;  %10580 = vmatpush.bf16.msra.mxu1 %v15842_v37  ;;  %v8134_v6 = vpop.f32.mrf.mxu2  ;;  %v7898_v56 = vpop.f32.mrf.mxu0  ;;  %v15874_v52 = vld [vmem:[%s17141_s5 + $0x370] sm:$0xff] }
 0x3b2   :  { %10606 = vmatpush.bf16.msra.mxu3 %v15858_v60  ;;  %v8135_v16 = vadd.f32 %v8134_v6, %v8122_v15  ;;  %v8147_v19 = vpop.f32.mrf.mxu3  ;;  %v8123_v63 = vpop.f32.mrf.mxu1  ;;  %v15890_v37 = vld [vmem:[%s17141_s5 + $0x3f0] sm:$0xff]  ;;  %v16015_v60 = vld [vmem:[#allocation12 + $0x14] ss:$0 sm:$0xff] }
 0x3b3   :  { %10593 = vmatpush.bf16.msra.mxu2 %v15850_v34  ;;  %v15865_v34 = vld [vmem:[%s17141_s5 + $0x328] sm:$0xff]  ;;  %v15870_v6 = vld [vmem:[%s17141_s5 + $0x350] sm:$0xff] }
 0x3b4   :  { %v8148_v23 = vadd.f32 %v8147_v19, %v8135_v16  ;;  %v15878_v16 = vld [vmem:[%s17141_s5 + $0x390] sm:$0xff]  ;;  %v15861_v63 = vld [vmem:[%s17141_s5 + $0x308] sm:$0xff] }
 0x3b5   :  { %10568 = vmatpush.bf16.msra.mxu0 %v15833_v48  ;;  %10581 = vmatpush.bf16.msra.mxu1 %v15841_v61  ;;  %v15889_v48 = vld [vmem:[%s17141_s5 + $0x3e8] sm:$0xff]  ;;  %v15886_v19 = vld [vmem:[%s17141_s5 + $0x3d0] sm:$0xff] }
 0x3b6   :  { %10607 = vmatpush.bf16.msra.mxu3 %v15857_v0  ;;  %v8151_v57 = vmax.f32 %v8148_v23, 0.0  ;;  %v15877_v23 = vld [vmem:[%s17141_s5 + $0x388] sm:$0xff] }
 0x3b7   :  { %10594 = vmatpush.bf16.msra.mxu2 %v15849_v62 }
 0x3b8   :  { %v8152_v28 = vpack.c.bf16 %v8151_v57, %v8151_v57  ;;  %v8832_v57 = vld [vmem:[#allocation3 + $0x30] sm:$0xff] }
 0x3b9   :  { %10569 = vmatpush.bf16.msra.mxu0 %v15832_v26  ;;  %10582 = vmatpush.bf16.msra.mxu1 %v15840_v1  ;;  %v8136_v33 = vpop.f32.mrf.mxu2  ;;  %v15863_v26 = vld [vmem:[%s17141_s5 + $0x318] sm:$0xff]  ;;  %v9251_v43 = vunpack.c.h.b16 %v8832_v57 }
 0x3ba   :  { %10608 = vmatpush.bf16.msra.mxu3 %v15856_v11  ;;  %8153 = vst [vmem:[#allocation3 + $0x4c] sm:$0xf] %v8152_v28  ;;  %v8149_v31 = vpop.f32.mrf.mxu3  ;;  %v15871_v1 = vld [vmem:[%s17141_s5 + $0x358] sm:$0xff] }
 0x3bb   :  { %10595 = vmatpush.bf16.msra.mxu2 %v15848_v40  ;;  %v15879_v40 = vld [vmem:[%s17141_s5 + $0x398] sm:$0xff]  ;;  %v9250_v31 = vunpack.c.l.b16 %v8832_v57 }
 0x3bc   :  { %v8833_v28 = vld [vmem:[#allocation3 + $0x38] sm:$0xff] }
 0x3bd   :  { %10570 = vmatpush.bf16.msra.mxu0 %v15831_v36  ;;  %10583 = vmatpush.bf16.msra.mxu1 %v15839_v18  ;;  %v15899_v33 = vld [vmem:[%s17141_s5 + $0x438] sm:$0xff]  ;;  %v9274_v42 = vpack.c.b16 %v9250_v31, %v9250_v31 }
 0x3be   :  { %10609 = vmatpush.bf16.msra.mxu3 %v15855_v46  ;;  %v15947_v31 = vld [vmem:[%s17141_s5 + $0x5b8] sm:$0xff] }
 0x3bf   :  { %10596 = vmatpush.bf16.msra.mxu2 %v15847_v30  ;;  %v15862_v30 = vld [vmem:[%s17141_s5 + $0x310] sm:$0xff] }
 0x3c1   :  { %10571 = vmatpush.bf16.msra.mxu0 %v15830_v4  ;;  %10584 = vmatpush.bf16.msra.mxu1 %v15838_v24  ;;  %v15869_v4 = vld [vmem:[%s17141_s5 + $0x348] sm:$0xff] }
 0x3c2   :  { %10610 = vmatpush.bf16.msra.mxu3 %v15854_v27  ;;  %v15885_v24 = vld [vmem:[%s17141_s5 + $0x3c8] sm:$0xff] }
 0x3c3   :  { %10597 = vmatpush.bf16.msra.mxu2 %v15846_v2  ;;  %v8835_v57 = vld [vmem:[#allocation3 + $0x48] sm:$0xff] }
 0x3c5   :  { %10572 = vmatpush.bf16.msra.mxu0 %v15829_v20  ;;  %10585 = vmatpush.bf16.msra.mxu1 %v15837_v14  ;;  %v15860_v20 = vld [vmem:[%s17141_s5 + $0x300] sm:$0xff] }
 0x3c6   :  { %10611 = vmatpush.bf16.msra.mxu3 %v15853_v21  ;;  %v15868_v14 = vld [vmem:[%s17141_s5 + $0x340] sm:$0xff] }
 0x3c7   :  { %10598 = vmatpush.bf16.msra.mxu2 %v15845_v5  ;;  %v15876_v5 = vld [vmem:[%s17141_s5 + $0x380] sm:$0xff] }
 0x3c8   :  { %v15884_v21 = vld [vmem:[%s17141_s5 + $0x3c0] sm:$0xff] }
 0x3c9   :  { %10573 = vmatpush.bf16.msra.mxu0 %v15828_v38  ;;  %10586 = vmatpush.bf16.msra.mxu1 %v15836_v17  ;;  %v8372_v61 = vpop.f32.mrf.mxu0  ;;  %v8385_v62 = vpop.f32.mrf.mxu1  ;;  %v15915_v38 = vld [vmem:[%s17141_s5 + $0x4b8] sm:$0xff]  ;;  %v9252_v17 = vunpack.c.l.b16 %v8833_v28 }
 0x3ca   :  { %10612 = vmatpush.bf16.msra.mxu3 %v15852_v41  ;;  %v8373_v0 = vadd.f32 %v16015_v60, %v8372_v61  ;;  %v15923_v41 = vld [vmem:[%s17141_s5 + $0x4f8] sm:$0xff]  ;;  %v16017_v60 = vld [vmem:[#allocation12 + $0x16] ss:$0 sm:$0xff]  ;;  %v15912_v61 = vld [vmem:[%s17141_s5 + $0x4a0] sm:$0xff] }
 0x3cb   :  { %10599 = vmatpush.bf16.msra.mxu2 %v15844_v10  ;;  %v16261_v10 = vmov 0   ;;  %v9276_v22 = vpack.c.b16 %v9252_v17, %v9252_v17  ;;  %v9257_v17 = vunpack.c.h.b16 %v8835_v57 }
 0x3cc   :  { %10574 = vmatmul.bf16.vlgmr.msra.gmra.mxu0 %v9270_v9  ;;  %10587 = vmatmul.bf16.vlgmr.msra.gmra.mxu1 %v9271_v54  ;;  %v8386_v44 = vadd.f32 %v8385_v62, %v8373_v0  ;;  %8825 = vst [vmem:[#allocation3 + $0x5c] sm:$0xf] %v16261_v10  ;;  %v15897_v54 = vld [vmem:[%s17141_s5 + $0x428] sm:$0xff] }
 0x3cd   :  { %10618 = vmatpush.bf16.msrb.mxu0 %v15867_v13  ;;  %10631 = vmatpush.bf16.msrb.mxu1 %v15875_v29  ;;  %v9253_v13 = vunpack.c.h.b16 %v8833_v28  ;;  %v15898_v29 = vld [vmem:[%s17141_s5 + $0x430] sm:$0xff]  ;;  %v15908_v28 = vld [vmem:[%s17141_s5 + $0x480] sm:$0xff] }
 0x3ce   :  { %10657 = vmatpush.bf16.msrb.mxu3 %v15891_v50  ;;  %10600 = vmatmul.bf16.vlgmr.msra.gmra.mxu2 %v9272_v39  ;;  %v15914_v50 = vld [vmem:[%s17141_s5 + $0x4b0] sm:$0xff]  ;;  %v15905_v39 = vld [vmem:[%s17141_s5 + $0x468] sm:$0xff] }
 0x3cf   :  { %10644 = vmatpush.bf16.msrb.mxu2 %v15883_v25  ;;  %10613 = vmatmul.bf16.vlgmr.msra.gmra.mxu3 %v9273_v49  ;;  %v9275_v25 = vpack.c.b16 %v9251_v43, %v9251_v43  ;;  %v9277_v9 = vpack.c.b16 %v9253_v13, %v9253_v13  ;;  %v15921_v49 = vld [vmem:[%s17141_s5 + $0x4e8] sm:$0xff]  ;;  %v15955_v43 = vld [vmem:[%s17141_s5 + $0x5f8] sm:$0xff] }
 0x3d1   :  { %10619 = vmatpush.bf16.msrb.mxu0 %v15866_v53  ;;  %10632 = vmatpush.bf16.msrb.mxu1 %v15874_v52  ;;  %v8398_v11 = vpop.f32.mrf.mxu2  ;;  %v8374_v15 = vpop.f32.mrf.mxu0  ;;  %v15922_v53 = vld [vmem:[%s17141_s5 + $0x4f0] sm:$0xff]  ;;  %v15913_v52 = vld [vmem:[%s17141_s5 + $0x4a8] sm:$0xff] }
 0x3d2   :  { %10658 = vmatpush.bf16.msrb.mxu3 %v15890_v37  ;;  %v8399_v12 = vadd.f32 %v8398_v11, %v8386_v44  ;;  %v16902_v36 = vpop.f32.mrf.mxu3  ;;  %v8387_v18 = vpop.f32.mrf.mxu1  ;;  %v15919_v44 = vld [vmem:[%s17141_s5 + $0x4d8] sm:$0xff] }
 0x3d3   :  { %10645 = vmatpush.bf16.msrb.mxu2 %v15882_v45  ;;  %v8555_v45 = vadd.f32 %v16016_v51, %v16902_v36  ;;  %v15894_v36 = vld [vmem:[%s17141_s5 + $0x410] sm:$0xff] }
 0x3d4   :  { %v8402_v46 = vmax.f32 %v8399_v12, 0.0  ;;  %v15902_v18 = vld [vmem:[%s17141_s5 + $0x450] sm:$0xff] }
 0x3d5   :  { %10620 = vmatpush.bf16.msrb.mxu0 %v15865_v34  ;;  %10633 = vmatpush.bf16.msrb.mxu1 %v15873_v58  ;;  %v16018_v51 = vld [vmem:[#allocation13] ss:$0 sm:$0xff] }
 0x3d6   :  { %10659 = vmatpush.bf16.msrb.mxu3 %v15889_v48  ;;  %v8403_v56 = vpack.c.bf16 %v8402_v46, %v8402_v46  ;;  %v15904_v48 = vld [vmem:[%s17141_s5 + $0x460] sm:$0xff]  ;;  %v15918_v46 = vld [vmem:[%s17141_s5 + $0x4d0] sm:$0xff] }
 0x3d7   :  { %10646 = vmatpush.bf16.msrb.mxu2 %v15881_v59  ;;  %v15896_v59 = vld [vmem:[%s17141_s5 + $0x420] sm:$0xff] }
 0x3d8   :  { %8404 = vst [vmem:[#allocation3 + $0x50] sm:$0xf] %v8403_v56  ;;  %v15901_v56 = vld [vmem:[%s17141_s5 + $0x448] sm:$0xff] }
 0x3d9   :  { %10621 = vmatpush.bf16.msrb.mxu0 %v15864_v32  ;;  %10634 = vmatpush.bf16.msrb.mxu1 %v15872_v7  ;;  %v8400_v2 = vpop.f32.mrf.mxu2  ;;  %v15920_v32 = vld [vmem:[%s17141_s5 + $0x4e0] sm:$0xff]  ;;  %v15895_v7 = vld [vmem:[%s17141_s5 + $0x418] sm:$0xff] }
 0x3da   :  { %10660 = vmatpush.bf16.msrb.mxu3 %v15888_v3  ;;  %v8556_v27 = vpop.f32.mrf.mxu3  ;;  %v15903_v3 = vld [vmem:[%s17141_s5 + $0x458] sm:$0xff]  ;;  %v8834_v2 = vld [vmem:[#allocation3 + $0x40] sm:$0xff] }
 0x3db   :  { %10647 = vmatpush.bf16.msrb.mxu2 %v15880_v55  ;;  %v15892_v27 = vld [vmem:[%s17141_s5 + $0x400] sm:$0xff] }
 0x3dd   :  { %10622 = vmatpush.bf16.msrb.mxu0 %v15863_v26  ;;  %10635 = vmatpush.bf16.msrb.mxu1 %v15871_v1  ;;  %v15911_v26 = vld [vmem:[%s17141_s5 + $0x498] sm:$0xff] }
 0x3de   :  { %10661 = vmatpush.bf16.msrb.mxu3 %v15887_v8 }
 0x3df   :  { %10648 = vmatpush.bf16.msrb.mxu2 %v15879_v40 }
 0x3e1   :  { %10623 = vmatpush.bf16.msrb.mxu0 %v15862_v30  ;;  %10636 = vmatpush.bf16.msrb.mxu1 %v15870_v6  ;;  %v15910_v30 = vld [vmem:[%s17141_s5 + $0x490] sm:$0xff] }
 0x3e2   :  { %10662 = vmatpush.bf16.msrb.mxu3 %v15886_v19 }
 0x3e3   :  { %10649 = vmatpush.bf16.msrb.mxu2 %v15878_v16  ;;  %v15893_v16 = vld [vmem:[%s17141_s5 + $0x408] sm:$0xff] }
 0x3e5   :  { %10624 = vmatpush.bf16.msrb.mxu0 %v15861_v63  ;;  %10637 = vmatpush.bf16.msrb.mxu1 %v15869_v4  ;;  %v15909_v63 = vld [vmem:[%s17141_s5 + $0x488] sm:$0xff] }
 0x3e6   :  { %10663 = vmatpush.bf16.msrb.mxu3 %v15885_v24  ;;  %v15917_v4 = vld [vmem:[%s17141_s5 + $0x4c8] sm:$0xff] }
 0x3e7   :  { %10650 = vmatpush.bf16.msrb.mxu2 %v15877_v23 }
 0x3e9   :  { %10625 = vmatpush.bf16.msrb.mxu0 %v15860_v20  ;;  %10638 = vmatpush.bf16.msrb.mxu1 %v15868_v14  ;;  %v8567_v37 = vpop.f32.mrf.mxu0  ;;  %v8792_v58 = vpop.f32.mrf.mxu1  ;;  %v15900_v20 = vld [vmem:[%s17141_s5 + $0x440] sm:$0xff] }
 0x3ea   :  { %10664 = vmatpush.bf16.msrb.mxu3 %v15884_v21  ;;  %v8568_v34 = vadd.f32 %v8567_v37, %v8555_v45  ;;  %v8793_v55 = vadd.f32 %v16017_v60, %v8792_v58  ;;  %v15916_v14 = vld [vmem:[%s17141_s5 + $0x4c0] sm:$0xff]  ;;  %v9254_v21 = vunpack.c.l.b16 %v8834_v2  ;;  %v15927_v60 = vld [vmem:[%s17141_s5 + $0x518] sm:$0xff] }
 0x3eb   :  { %10651 = vmatpush.bf16.msrb.mxu2 %v15876_v5  ;;  %v15931_v5 = vld [vmem:[%s17141_s5 + $0x538] sm:$0xff]  ;;  %v15936_v37 = vld [vmem:[%s17141_s5 + $0x560] sm:$0xff] }
 0x3ec   :  { %10626 = vmatmul.bf16.vlgmr.msrb.gmra.mxu0 %v9274_v42  ;;  %10639 = vmatmul.bf16.vlgmr.msrb.gmra.mxu1 %v9275_v25  ;;  %v8571_v62 = vmax.f32 %v8568_v34, 0.0  ;;  %v9278_v10 = vpack.c.b16 %v9254_v21, %v9254_v21  ;;  %v15946_v25 = vld [vmem:[%s17141_s5 + $0x5b0] sm:$0xff]  ;;  %v15944_v34 = vld [vmem:[%s17141_s5 + $0x5a0] sm:$0xff] }
 0x3ed   :  { %10670 = vmatpush.bf16.msra.mxu0 %v15899_v33  ;;  %10683 = vmatpush.bf16.msra.mxu1 %v15907_v35  ;;  %v15939_v33 = vld [vmem:[%s17141_s5 + $0x578] sm:$0xff]  ;;  %v9255_v35 = vunpack.c.h.b16 %v8834_v2 }
 0x3ee   :  { %10709 = vmatpush.bf16.msra.mxu3 %v15923_v41  ;;  %10652 = vmatmul.bf16.vlgmr.msrb.gmra.mxu2 %v9276_v22  ;;  %v8572_v0 = vpack.c.bf16 %v8571_v62, %v8571_v62  ;;  %v15930_v41 = vld [vmem:[%s17141_s5 + $0x530] sm:$0xff]  ;;  %v9281_v22 = vpack.c.b16 %v9257_v17, %v9257_v17  ;;  %v15951_v62 = vld [vmem:[%s17141_s5 + $0x5d8] sm:$0xff] }
 0x3ef   :  { %10696 = vmatpush.bf16.msra.mxu2 %v15915_v38  ;;  %10665 = vmatmul.bf16.vlgmr.msrb.gmra.mxu3 %v9277_v9  ;;  %v9256_v38 = vunpack.c.l.b16 %v8835_v57  ;;  %v9279_v13 = vpack.c.b16 %v9255_v35, %v9255_v35  ;;  %v15937_v9 = vld [vmem:[%s17141_s5 + $0x568] sm:$0xff] }
 0x3f0   :  { %8573 = vst [vmem:[#allocation3 + $0x54] sm:$0xf] %v8572_v0 }
 0x3f1   :  { %10671 = vmatpush.bf16.msra.mxu0 %v15898_v29  ;;  %10684 = vmatpush.bf16.msra.mxu1 %v15906_v47  ;;  %v8805_v1 = vpop.f32.mrf.mxu2  ;;  %v8569_v11 = vpop.f32.mrf.mxu0  ;;  %v9280_v42 = vpack.c.b16 %v9256_v38, %v9256_v38  ;;  %v15938_v29 = vld [vmem:[%s17141_s5 + $0x570] sm:$0xff] }
 0x3f2   :  { %10710 = vmatpush.bf16.msra.mxu3 %v15922_v53  ;;  %v8806_v40 = vadd.f32 %v8805_v1, %v8793_v55  ;;  %v8818_v8 = vpop.f32.mrf.mxu3  ;;  %v8794_v12 = vpop.f32.mrf.mxu1  ;;  %v15954_v47 = vld [vmem:[%s17141_s5 + $0x5f0] sm:$0xff]  ;;  %v15945_v53 = vld [vmem:[%s17141_s5 + $0x5a8] sm:$0xff] }
 0x3f3   :  { %10697 = vmatpush.bf16.msra.mxu2 %v15914_v50  ;;  %v15929_v50 = vld [vmem:[%s17141_s5 + $0x528] sm:$0xff]  ;;  %v15934_v1 = vld [vmem:[%s17141_s5 + $0x550] sm:$0xff] }
 0x3f4   :  { %v8819_v15 = vadd.f32 %v8818_v8, %v8806_v40  ;;  %v15942_v40 = vld [vmem:[%s17141_s5 + $0x590] sm:$0xff]  ;;  %v15925_v11 = vld [vmem:[%s17141_s5 + $0x508] sm:$0xff] }
 0x3f5   :  { %10672 = vmatpush.bf16.msra.mxu0 %v15897_v54  ;;  %10685 = vmatpush.bf16.msra.mxu1 %v15905_v39  ;;  %v15953_v54 = vld [vmem:[%s17141_s5 + $0x5e8] sm:$0xff]  ;;  %v15950_v8 = vld [vmem:[%s17141_s5 + $0x5d0] sm:$0xff] }
 0x3f6   :  { %10711 = vmatpush.bf16.msra.mxu3 %v15921_v49  ;;  %v8822_v6 = vmax.f32 %v8819_v15, 0.0  ;;  %v15928_v49 = vld [vmem:[%s17141_s5 + $0x520] sm:$0xff]  ;;  %v15933_v12 = vld [vmem:[%s17141_s5 + $0x548] sm:$0xff] }
 0x3f7   :  { %10698 = vmatpush.bf16.msra.mxu2 %v15913_v52  ;;  %v15949_v15 = vld [vmem:[%s17141_s5 + $0x5c8] sm:$0xff] }
 0x3f8   :  { %v8823_v19 = vpack.c.bf16 %v8822_v6, %v8822_v6 }
 0x3f9   :  { %10673 = vmatpush.bf16.msra.mxu0 %v15896_v59  ;;  %10686 = vmatpush.bf16.msra.mxu1 %v15904_v48  ;;  %v8807_v23 = vpop.f32.mrf.mxu2  ;;  %v15952_v59 = vld [vmem:[%s17141_s5 + $0x5e0] sm:$0xff]  ;;  %v15935_v48 = vld [vmem:[%s17141_s5 + $0x558] sm:$0xff] }
 0x3fa   :  { %10712 = vmatpush.bf16.msra.mxu3 %v15920_v32  ;;  %8824 = vst [vmem:[#allocation3 + $0x58] sm:$0xf] %v8823_v19  ;;  %v8820_v24 = vpop.f32.mrf.mxu3  ;;  %v15932_v19 = vld [vmem:[%s17141_s5 + $0x540] sm:$0xff] }
 0x3fb   :  { %10699 = vmatpush.bf16.msra.mxu2 %v15912_v61  ;;  %v15943_v61 = vld [vmem:[%s17141_s5 + $0x598] sm:$0xff] }
 0x3fd   :  { %10674 = vmatpush.bf16.msra.mxu0 %v15895_v7  ;;  %10687 = vmatpush.bf16.msra.mxu1 %v15903_v3 }
 0x3fe   :  { %10713 = vmatpush.bf16.msra.mxu3 %v15919_v44 }
 0x3ff   :  { %10700 = vmatpush.bf16.msra.mxu2 %v15911_v26  ;;  %v15926_v26 = vld [vmem:[%s17141_s5 + $0x510] sm:$0xff] }
 0x401   :  { %10675 = vmatpush.bf16.msra.mxu0 %v15894_v36  ;;  %10688 = vmatpush.bf16.msra.mxu1 %v15902_v18  ;;  %v15941_v36 = vld [vmem:[%s17141_s5 + $0x588] sm:$0xff]  ;;  %v8837_v6 = vld [vmem:[#allocation3 + $0x58] sm:$0xff] }
 0x402   :  { %10714 = vmatpush.bf16.msra.mxu3 %v15918_v46  ;;  %v9260_v24 = vunpack.c.l.b16 %v8837_v6  ;;  %v9261_v2 = vunpack.c.h.b16 %v8837_v6 }
 0x403   :  { %10701 = vmatpush.bf16.msra.mxu2 %v15910_v30  ;;  %v8836_v30 = vld [vmem:[#allocation3 + $0x50] sm:$0xff] }
 0x404   :  { %v9259_v23 = vunpack.c.h.b16 %v8836_v30 }
 0x405   :  { %10676 = vmatpush.bf16.msra.mxu0 %v15893_v16  ;;  %10689 = vmatpush.bf16.msra.mxu1 %v15901_v56  ;;  %v15924_v16 = vld [vmem:[%s17141_s5 + $0x500] sm:$0xff] }
 0x406   :  { %10715 = vmatpush.bf16.msra.mxu3 %v15917_v4  ;;  %v15940_v56 = vld [vmem:[%s17141_s5 + $0x580] sm:$0xff]  ;;  %v9283_v57 = vpack.c.b16 %v9259_v23, %v9259_v23 }
 0x407   :  { %10702 = vmatpush.bf16.msra.mxu2 %v15909_v63  ;;  %v9258_v63 = vunpack.c.l.b16 %v8836_v30  ;;  %v15948_v4 = vld [vmem:[%s17141_s5 + $0x5c0] sm:$0xff] }
 0x409   :  { %10677 = vmatpush.bf16.msra.mxu0 %v15892_v27  ;;  %10690 = vmatpush.bf16.msra.mxu1 %v15900_v20  ;;  %v10471_v39 = vpop.f32.mrf.mxu0  ;;  %v10484_v45 = vpop.f32.mrf.mxu1  ;;  %v9282_v27 = vpack.c.b16 %v9258_v63, %v9258_v63  ;;  %v9284_v20 = vpack.c.b16 %v9260_v24, %v9260_v24 }
 0x40a   :  { %10716 = vmatpush.bf16.msra.mxu3 %v15916_v14  ;;  %v10472_v52 = vadd.f32 %v16018_v51, %v10471_v39 }
 0x40b   :  { %10703 = vmatpush.bf16.msra.mxu2 %v15908_v28  ;;  %v9285_v28 = vpack.c.b16 %v9261_v2, %v9261_v2 }
 0x40c   :  { %10678 = vmatmul.bf16.vlgmr.msra.gmra.mxu0 %v9278_v10  ;;  %10691 = vmatmul.bf16.vlgmr.msra.gmra.mxu1 %v9279_v13  ;;  %v10485_v58 = vadd.f32 %v10484_v45, %v10472_v52 }
 0x40d   :  { %10722 = vmatpush.bf16.msrb.mxu0 %v15931_v5  ;;  %10735 = vmatpush.bf16.msrb.mxu1 %v15939_v33 }
 0x40e   :  { %10761 = vmatpush.bf16.msrb.mxu3 %v15955_v43  ;;  %10704 = vmatmul.bf16.vlgmr.msra.gmra.mxu2 %v9280_v42 }
 0x40f   :  { %10748 = vmatpush.bf16.msrb.mxu2 %v15947_v31  ;;  %10717 = vmatmul.bf16.vlgmr.msra.gmra.mxu3 %v9281_v22 }
 0x411   :  { %10723 = vmatpush.bf16.msrb.mxu0 %v15930_v41  ;;  %10736 = vmatpush.bf16.msrb.mxu1 %v15938_v29  ;;  %v10497_v32 = vpop.f32.mrf.mxu2  ;;  %v10473_v55 = vpop.f32.mrf.mxu0 }
 0x412   :  { %10762 = vmatpush.bf16.msrb.mxu3 %v15954_v47  ;;  %v10498_v0 = vadd.f32 %v10497_v32, %v10485_v58  ;;  %v10510_v7 = vpop.f32.mrf.mxu3  ;;  %v10486_v3 = vpop.f32.mrf.mxu1 }
 0x413   :  { %10749 = vmatpush.bf16.msrb.mxu2 %v15946_v25 }
 0x414   :  { %v10511_v44 = vadd.f32 %v10510_v7, %v10498_v0 }
 0x415   :  { %10724 = vmatpush.bf16.msrb.mxu0 %v15929_v50  ;;  %10737 = vmatpush.bf16.msrb.mxu1 %v15937_v9 }
 0x416   :  { %10763 = vmatpush.bf16.msrb.mxu3 %v15953_v54 }
 0x417   :  { %10750 = vmatpush.bf16.msrb.mxu2 %v15945_v53 }
 0x419   :  { %10725 = vmatpush.bf16.msrb.mxu0 %v15928_v49  ;;  %10738 = vmatpush.bf16.msrb.mxu1 %v15936_v37  ;;  %v10499_v18 = vpop.f32.mrf.mxu2 }
 0x41a   :  { %10764 = vmatpush.bf16.msrb.mxu3 %v15952_v59  ;;  %v10512_v46 = vpop.f32.mrf.mxu3 }
 0x41b   :  { %10751 = vmatpush.bf16.msrb.mxu2 %v15944_v34 }
 0x41d   :  { %10726 = vmatpush.bf16.msrb.mxu0 %v15927_v60  ;;  %10739 = vmatpush.bf16.msrb.mxu1 %v15935_v48  ;;  %v15956_v60 = vld [vmem:[#allocation15] sm:$0xff] }
 0x41e   :  { %10765 = vmatpush.bf16.msrb.mxu3 %v15951_v62 }
 0x41f   :  { %10752 = vmatpush.bf16.msrb.mxu2 %v15943_v61 }
 0x421   :  { %10727 = vmatpush.bf16.msrb.mxu0 %v15926_v26  ;;  %10740 = vmatpush.bf16.msrb.mxu1 %v15934_v1 }
 0x422   :  { %10766 = vmatpush.bf16.msrb.mxu3 %v15950_v8 }
 0x423   :  { %10753 = vmatpush.bf16.msrb.mxu2 %v15942_v40 }
 0x425   :  { %10728 = vmatpush.bf16.msrb.mxu0 %v15925_v11  ;;  %10741 = vmatpush.bf16.msrb.mxu1 %v15933_v12 }
 0x426   :  { %10767 = vmatpush.bf16.msrb.mxu3 %v15949_v15 }
 0x427   :  { %10754 = vmatpush.bf16.msrb.mxu2 %v15941_v36 }
 0x429   :  { %10729 = vmatpush.bf16.msrb.mxu0 %v15924_v16  ;;  %10742 = vmatpush.bf16.msrb.mxu1 %v15932_v19  ;;  %v10523_v14 = vpop.f32.mrf.mxu0  ;;  %v10536_v21 = vpop.f32.mrf.mxu1 }
 0x42a   :  { %10768 = vmatpush.bf16.msrb.mxu3 %v15948_v4  ;;  %v10524_v5 = vadd.f32 %v10523_v14, %v10511_v44 }
 0x42b   :  { %10755 = vmatpush.bf16.msrb.mxu2 %v15940_v56 }
 0x42c   :  { %10730 = vmatmul.bf16.vlgmr.msrb.gmra.mxu0 %v9282_v27  ;;  %10743 = vmatmul.bf16.vlgmr.msrb.gmra.mxu1 %v9283_v57  ;;  %v10537_v33 = vadd.f32 %v10536_v21, %v10524_v5  ;;  %v16020_v21 = vld [vmem:[#allocation18] ss:$0 sm:$0xff] }
 0x42d   :  { %10769 = vmatmul.bf16.vlgmr.msrb.gmra.mxu3 %v9285_v28  ;;  %10799 = vmatpush.bf16.msra.mxu0 %v15956_v60  ;;  %v16019_v28 = vld [vmem:[#allocation16] ss:$0 sm:$0xff] }
 0x42e   :  { %10756 = vmatmul.bf16.vlgmr.msrb.gmra.mxu2 %v9284_v20 }
 0x431   :  { %v10549_v31 = vpop.f32.mrf.mxu2  ;;  %v10525_v43 = vpop.f32.mrf.mxu0 }
 0x432   :  { %v10550_v35 = vadd.f32 %v10549_v31, %v10537_v33  ;;  %v10562_v38 = vpop.f32.mrf.mxu3  ;;  %v10538_v17 = vpop.f32.mrf.mxu1  ;;  %v16021_v43 = vld [vmem:[#allocation4] ss:$0 sm:$0xff] }
 0x434   :  { %v10563_v10 = vadd.f32 %v10562_v38, %v10550_v35 }
 0x439   :  { %v10551_v41 = vpop.f32.mrf.mxu2 }
 0x43a   :  { %v10564_v13 = vpop.f32.mrf.mxu3 }
 0x449   :  { %v10575_v42 = vpop.f32.mrf.mxu0  ;;  %v10588_v25 = vpop.f32.mrf.mxu1 }
 0x44a   :  { %v10576_v29 = vadd.f32 %v10575_v42, %v10563_v10 }
 0x44c   :  { %v10589_v22 = vadd.f32 %v10588_v25, %v10576_v29 }
 0x451   :  { %v10601_v47 = vpop.f32.mrf.mxu2  ;;  %v10577_v9 = vpop.f32.mrf.mxu0 }
 0x452   :  { %v10602_v50 = vadd.f32 %v10601_v47, %v10589_v22  ;;  %v10614_v51 = vpop.f32.mrf.mxu3  ;;  %v10590_v53 = vpop.f32.mrf.mxu1 }
 0x454   :  { %v10615_v54 = vadd.f32 %v10614_v51, %v10602_v50 }
 0x459   :  { %v10603_v39 = vpop.f32.mrf.mxu2 }
 0x45a   :  { %v10616_v52 = vpop.f32.mrf.mxu3 }
 0x469   :  { %v10627_v45 = vpop.f32.mrf.mxu0  ;;  %v10640_v49 = vpop.f32.mrf.mxu1 }
 0x46a   :  { %v10628_v0 = vadd.f32 %v10627_v45, %v10615_v54 }
 0x46c   :  { %v10641_v44 = vadd.f32 %v10640_v49, %v10628_v0 }
 0x471   :  { %v10653_v37 = vpop.f32.mrf.mxu2  ;;  %v10629_v58 = vpop.f32.mrf.mxu0 }
 0x472   :  { %v10666_v34 = vpop.f32.mrf.mxu3  ;;  %v10642_v59 = vpop.f32.mrf.mxu1  ;;  %v10654_v1 = vadd.f32 %v10653_v37, %v10641_v44 }
 0x474   :  { %v10667_v11 = vadd.f32 %v10666_v34, %v10654_v1 }
 0x479   :  { %v10655_v48 = vpop.f32.mrf.mxu2 }
 0x47a   :  { %v10668_v61 = vpop.f32.mrf.mxu3 }
 0x489   :  { %v10679_v62 = vpop.f32.mrf.mxu0  ;;  %v10692_v32 = vpop.f32.mrf.mxu1 }
 0x48a   :  { %v10680_v12 = vadd.f32 %v10679_v62, %v10667_v11 }
 0x48c   :  { %v10693_v36 = vadd.f32 %v10692_v32, %v10680_v12 }
 0x491   :  { %v10705_v7 = vpop.f32.mrf.mxu2  ;;  %v10681_v3 = vpop.f32.mrf.mxu0 }
 0x492   :  { %v10718_v55 = vpop.f32.mrf.mxu3  ;;  %v10694_v26 = vpop.f32.mrf.mxu1  ;;  %v10706_v15 = vadd.f32 %v10705_v7, %v10693_v36 }
 0x494   :  { %v10719_v18 = vadd.f32 %v10718_v55, %v10706_v15 }
 0x499   :  { %v10707_v40 = vpop.f32.mrf.mxu2 }
 0x49a   :  { %v10720_v8 = vpop.f32.mrf.mxu3 }
 0x4a9   :  { %v10731_v30 = vpop.f32.mrf.mxu0  ;;  %v10744_v46 = vpop.f32.mrf.mxu1 }
 0x4aa   :  { %v10732_v6 = vadd.f32 %v10731_v30, %v10719_v18 }
 0x4ac   :  { %v10745_v16 = vadd.f32 %v10744_v46, %v10732_v6 }
 0x4b0   :  { %v10770_v63 = vpop.f32.mrf.mxu3 }
 0x4b1   :  { %v10757_v19 = vpop.f32.mrf.mxu2  ;;  %v10733_v4 = vpop.f32.mrf.mxu0 }
 0x4b2   :  { %v10758_v56 = vadd.f32 %v10757_v19, %v10745_v16  ;;  %v10746_v23 = vpop.f32.mrf.mxu1 }
 0x4b4   :  { %v10771_v24 = vadd.f32 %v10770_v63, %v10758_v56 }
 0x4b6   :  { %v10774_v2 = vmax.f32 %v10771_v24, 0.0 }
 0x4b8   :  { %v10775_v27 = vpack.c.bf16 %v10774_v2, %v10774_v2  ;;  %v10772_v20 = vpop.f32.mrf.mxu3 }
 0x4b9   :  { %v10759_v57 = vpop.f32.mrf.mxu2 }
 0x4ba   :  { %14931 = vmatmul.msk.bf16.vlgmr.msra.gmra.mxu0 %vm10788_vm0, %v10775_v27 }
 0x537   :  { %v10801_v14 = vpop.f32.mrf.mxu0 }
 0x538   :  { %v10802_v5 = vadd.f32 %v16019_v28, %v10801_v14 }
 0x53a   :  { %v10805_v33 = vmax.f32 %v10802_v5, 0.0 }
 0x53c   :  { %v10810_v31 = vmul.f32 %v16020_v21, %v10805_v33 }
 0x53e   :  { %v10812_v35 = vsel %vm10811_vm1, %v10810_v31, 0.0 }
 0x53f   :  { %v10803_v38 = vpop.f32.mrf.mxu0  ;;  %10813 = vadd.xlane.f32.xlu0 %v10812_v35 }
 0x5b2   :  { %v10814_v17 = vpop.xlane.xlu0 %10813 }
 0x5b3   :  { %v10819_v10 = vadd.f32 %v16021_v43, %v10814_v17 }
 0x5b5   :  { %10821 = vst.msk [vmem:[%s17147_s11] sm:$0xff] %vm10820_vm2, %v10819_v10 }
 0x5b6   :  { %10826 = vsyncpa [#allocation6], 1 }
 0x5b7   :  { %10827 = vsyncpa [#allocation8], 1 }
 0x5b8   :  { %10828 = vsyncpa [#allocation11], 1 }
 0x5b9   :  { %10829 = vsyncpa [#allocation14], 1 }
 0x5ba   :  { %10830 = vsyncpa [#allocation17], 1 }

</bundles_post_ra>
